<compile_context>
chip_gen: v5e
topology: v5e:2x2
jax: 0.10.0
libtpu: 0.0.40
codegen_flags: <defaults>
</compile_context>

<pallas_src>
import jax
import jax.numpy as jnp
import numpy as np
from jax.experimental import pallas as pl
from jax.experimental.pallas import tpu as pltpu


# -----------------------------------------------------------------------------
# Kernels
# -----------------------------------------------------------------------------
def _matmul_bias_relu_kernel(x_ref, w_ref, b_ref, o_ref):
    """relu(x @ w + b): one big-K MXU matmul per conv layer.

    x_ref: (TILE_N, K) bf16 lane-dense im2col rows for this grid step
    w_ref: (K, Cout)   bf16
    b_ref: (1, Cout)   f32
    o_ref: (TILE_N, Cout) f32
    """
    o_ref[...] = jnp.maximum(
        jnp.dot(x_ref[...], w_ref[...], preferred_element_type=jnp.float32)
        + b_ref[...],
        0.0,
    )


def _fc_head_kernel(x_ref, w_ref, b_ref, o_ref):
    """One Linear head per grid step: out[h] = x @ W[h] + b[h].

    x_ref: (B, d_pad)      bf16 (whole reduction in one block)
    w_ref: (1, d_pad, L)   bf16
    b_ref: (1, 1, L)       f32
    o_ref: (1, B, L)       f32
    The head axis is "parallel": on v7x each TensorCore streams half the FC
    weight; on v5e/v6e it is just two cheap grid steps.
    """
    o_ref[0] = (
        jnp.dot(x_ref[...], w_ref[0], preferred_element_type=jnp.float32)
        + b_ref[0]
    )


# -----------------------------------------------------------------------------
# Wrappers
# -----------------------------------------------------------------------------
def _im2col(xpad, kh, kw, hout, wout):
    """Lane-dense im2col: (B*hout*wout, kh*kw*Cin), tap order (ky, kx, cin).

    Matches w_hwio.reshape(kh*kw*Cin, Cout) exactly.
    """
    cols = [xpad[:, ky:ky + hout, kx:kx + wout, :]
            for ky in range(kh) for kx in range(kw)]
    patches = jnp.concatenate(cols, axis=-1)
    B = xpad.shape[0]
    return patches.reshape(B * hout * wout, kh * kw * xpad.shape[-1])


def conv2d_relu(x_nhwc, w_hwio, b_row, pad, tile_n=512):
    """Stride-1 conv with symmetric padding, followed by ReLU."""
    B, H, W, Cin = x_nhwc.shape
    kh, kw, _, Cout = w_hwio.shape
    hout = H + 2 * pad - kh + 1
    wout = W + 2 * pad - kw + 1
    K = kh * kw * Cin
    N = B * hout * wout

    xpad = jnp.pad(x_nhwc, ((0, 0), (pad, pad), (pad, pad), (0, 0)))
    patches = _im2col(xpad, kh, kw, hout, wout)                  # (N, K) f32

    n_pad = pl.cdiv(N, tile_n) * tile_n
    if n_pad != N:
        patches = jnp.pad(patches, ((0, n_pad - N), (0, 0)))
    patches = patches.astype(w_hwio.dtype)                       # bf16 operands

    w2d = w_hwio.reshape(K, Cout)

    out = pl.pallas_call(
        _matmul_bias_relu_kernel,
        out_shape=jax.ShapeDtypeStruct((n_pad, Cout), jnp.float32),
        grid=(n_pad // tile_n,),
        in_specs=[
            pl.BlockSpec((tile_n, K), lambda i: (i, 0)),
            pl.BlockSpec((K, Cout), lambda i: (0, 0)),
            pl.BlockSpec((1, Cout), lambda i: (0, 0)),
        ],
        out_specs=pl.BlockSpec((tile_n, Cout), lambda i: (i, 0)),
        compiler_params=pltpu.CompilerParams(
            dimension_semantics=("parallel",),
            vmem_limit_bytes=32 * 1024 * 1024,
        ),
    )(patches, w2d, b_row)

    # Rows >= N are relu(bias) garbage from the zero-padded patch rows; drop.
    return out[:N].reshape(B, hout, wout, Cout)


def fc_heads(flat_bf16, w_fc, b_fc):
    """out[h] = flat @ w_fc[h] + b_fc[h] for h in {mean, logvar}.

    flat_bf16: (B, d_pad) bf16; w_fc: (2, d_pad, L) bf16; b_fc: (2, 1, L) f32.
    Returns (2, B, L) f32.
    """
    B, d_pad = flat_bf16.shape
    n_heads, _, L = w_fc.shape

    return pl.pallas_call(
        _fc_head_kernel,
        out_shape=jax.ShapeDtypeStruct((n_heads, B, L), jnp.float32),
        grid=(n_heads,),
        in_specs=[
            pl.BlockSpec((B, d_pad), lambda h: (0, 0)),
            pl.BlockSpec((1, d_pad, L), lambda h: (h, 0, 0)),
            pl.BlockSpec((1, 1, L), lambda h: (h, 0, 0)),
        ],
        out_specs=pl.BlockSpec((1, B, L), lambda h: (h, 0, 0)),
        compiler_params=pltpu.CompilerParams(
            dimension_semantics=("parallel",),
            vmem_limit_bytes=32 * 1024 * 1024,
        ),
    )(flat_bf16, w_fc, b_fc)


# -----------------------------------------------------------------------------
# Parameter prep (one-time, hoisted out of the forward pass)
# -----------------------------------------------------------------------------
_LANE = 128


def prepare_params(params, conv_h, conv_w, compute_dtype=jnp.bfloat16):
    """One-time weight prep: bf16 casts, fused + NHWC-permuted + padded FC weight."""
    Cc = params["w2"].shape[-1]                      # 64
    Hh, Ww = conv_h, conv_w
    d = Hh * Ww * Cc
    L = params["wm"].shape[1]
    assert params["wm"].shape[0] == d and params["wv"].shape[0] == d, (
        f"Linear in_features ({params['wm'].shape[0]}) != conv_h*conv_w*64 ({d})")

    def permute(w):
        # rows in torch NCHW-flatten order (c,h,w) -> NHWC order (h,w,c)
        return w.reshape(Cc, Hh, Ww, L).transpose(1, 2, 0, 3).reshape(d, L)

    d_pad = pl.cdiv(d, _LANE) * _LANE
    w_fc = jnp.stack([permute(params["wm"]), permute(params["wv"])], axis=0)
    w_fc = jnp.pad(w_fc, ((0, 0), (0, d_pad - d), (0, 0))).astype(compute_dtype)
    b_fc = jnp.stack([params["bm"], params["bv"]], axis=0).reshape(2, 1, L)

    return dict(
        w1=params["w1"].astype(compute_dtype),            # (3,3,Cin,32) HWIO
        b1=params["b1"].reshape(1, -1).astype(jnp.float32),
        w2=params["w2"].astype(compute_dtype),             # (4,4,32,64) HWIO
        b2=params["b2"].reshape(1, -1).astype(jnp.float32),
        w_fc=w_fc,                                         # (2, d_pad, L) bf16
        b_fc=b_fc.astype(jnp.float32),                     # (2, 1, L)
    )


def encoder_forward(prep, x_nchw):
    """Equivalent of Encoder.forward(x) -> (mean, logvar)."""
    x = jnp.transpose(x_nchw, (0, 2, 3, 1)).astype(jnp.float32)   # NCHW -> NHWC
    h1 = conv2d_relu(x, prep["w1"], prep["b1"], pad=1)            # 3x3, pad 1
    h2 = conv2d_relu(h1, prep["w2"], prep["b2"], pad=1)           # 4x4, pad 1

    B, Hh, Ww, Cc = h2.shape
    d = Hh * Ww * Cc
    d_pad = prep["w_fc"].shape[1]
    assert 0 <= d_pad - d < _LANE, (
        f"prepared FC weight (d_pad={d_pad}) does not match conv output (d={d})")

    flat = h2.reshape(B, d)                                       # NHWC flatten
    if d_pad != d:
        flat = jnp.pad(flat, ((0, 0), (0, d_pad - d)))            # zero K-pad
    flat = flat.astype(prep["w_fc"].dtype)

    out = fc_heads(flat, prep["w_fc"], prep["b_fc"])              # (2, B, L)
    return out[0], out[1]


# -----------------------------------------------------------------------------
# Parameters & reference
# -----------------------------------------------------------------------------
def init_params(key, input_channels, latent_dim, conv_h, conv_w):
    """Deterministic init mimicking PyTorch default uniform(-1/sqrt(fan_in), ...)."""
    ks = jax.random.split(key, 8)

    def conv_w_init(k, cout, cin, kh, kw):
        bound = 1.0 / np.sqrt(cin * kh * kw)
        w_oihw = jax.random.uniform(k, (cout, cin, kh, kw), jnp.float32,
                                    -bound, bound)
        return jnp.transpose(w_oihw, (2, 3, 1, 0))  # OIHW -> HWIO

    def vec_init(k, n, fan_in):
        bound = 1.0 / np.sqrt(fan_in)
        return jax.random.uniform(k, (n,), jnp.float32, -bound, bound)

    def lin_w_init(k, out_f, in_f):
        bound = 1.0 / np.sqrt(in_f)
        w = jax.random.uniform(k, (out_f, in_f), jnp.float32, -bound, bound)
        return jnp.transpose(w)  # (in, out) for x @ W

    d = conv_h * conv_w * 64  # matches nn.Linear(w*h*64, latent_dim)
    return dict(
        w1=conv_w_init(ks[0], 32, input_channels, 3, 3),
        b1=vec_init(ks[1], 32, input_channels * 3 * 3),
        w2=conv_w_init(ks[2], 64, 32, 4, 4),
        b2=vec_init(ks[3], 64, 32 * 4 * 4),
        wm=lin_w_init(ks[4], latent_dim, d),
        bm=vec_init(ks[5], latent_dim, d),
        wv=lin_w_init(ks[6], latent_dim, d),
        bv=vec_init(ks[7], latent_dim, d),
    )


def reference_forward(params, x_nchw):
    """Pure-JAX f32 reference of the same math (for correctness check)."""
    dn = ("NHWC", "HWIO", "NHWC")
    x = jnp.transpose(x_nchw, (0, 2, 3, 1)).astype(jnp.float32)
    h1 = jax.nn.relu(jax.lax.conv_general_dilated(
        x, params["w1"], (1, 1), [(1, 1), (1, 1)],
        dimension_numbers=dn) + params["b1"])
    h2 = jax.nn.relu(jax.lax.conv_general_dilated(
        h1, params["w2"], (1, 1), [(1, 1), (1, 1)],
        dimension_numbers=dn) + params["b2"])
    flat = jnp.transpose(h2, (0, 3, 1, 2)).reshape(h2.shape[0], -1)
    mean = flat @ params["wm"] + params["bm"]
    logvar = flat @ params["wv"] + params["bv"]
    return mean, logvar


if __name__ == "__main__":
    # Small shapes consistent with the module.
    B, C, H, W = 2, 4, 16, 16
    latent_dim = 32
    # Conv2 (kernel 4, pad 1) shrinks spatial by 1, so the PyTorch module must
    # be constructed with w = h = 15 for the Linear layers to match the
    # flattened conv output (w * h * 64 == 15 * 15 * 64 == 14400).
    conv_h, conv_w = H - 1, W - 1

    key = jax.random.PRNGKey(0)
    k_x, k_p = jax.random.split(key)
    x = jax.random.normal(k_x, (B, C, H, W), jnp.float32)
    params = init_params(k_p, C, latent_dim, conv_h, conv_w)

    # One-time weight prep (fused/permuted/padded FC weight, bf16 casts) —
    # deliberately outside the jitted forward.
    prep = prepare_params(params, conv_h, conv_w)

    fwd = jax.jit(encoder_forward)
    mean, logvar = jax.block_until_ready(fwd(prep, x))

    assert mean.shape == (B, latent_dim) and logvar.shape == (B, latent_dim)
    m_ref, lv_ref = reference_forward(params, x)
    # bf16 matmul operands (f32 accumulation): tolerance re-validated at 2e-2.
    np.testing.assert_allclose(np.asarray(mean), np.asarray(m_ref),
                               rtol=2e-2, atol=2e-2)
    np.testing.assert_allclose(np.asarray(logvar), np.asarray(lv_ref),
                               rtol=2e-2, atol=2e-2)
    print("KERNEL_OK")
</pallas_src>

<mosaic_0001>
module attributes {stable_mosaic.version = 11 : i64} {
  func.func @_matmul_bias_relu_kernel(%arg0: i32, %arg1: memref<512x36xbf16, #tpu.memory_space<vmem>>, %arg2: memref<36x32xbf16, #tpu.memory_space<vmem>>, %arg3: memref<1x32xf32, #tpu.memory_space<vmem>>, %arg4: memref<512x32xf32, #tpu.memory_space<vmem>>) attributes {dimension_semantics = [#tpu.dimension_semantics<parallel>], iteration_bounds = array<i64: 1>, scalar_prefetch = 0 : i64, scratch_operands = 0 : i64, tpu.core_type = #tpu.core_type<tc>, window_params = [{transform_indices = @transform_0, window_bounds = array<i64: 512, 36>}, {pipeline_mode = #tpu.pipeline_mode<synchronous>, transform_indices = @transform_1, window_bounds = array<i64: 36, 32>}, {pipeline_mode = #tpu.pipeline_mode<synchronous>, transform_indices = @transform_2, window_bounds = array<i64: 1, 32>}, {transform_indices = @transform_3, window_bounds = array<i64: 512, 32>}]} {
    %c0 = arith.constant 0 : index
    %c0_0 = arith.constant 0 : index
    %0 = vector.load %arg1[%c0, %c0_0] : memref<512x36xbf16, #tpu.memory_space<vmem>>, vector<512x36xbf16>
    %c0_1 = arith.constant 0 : index
    %c0_2 = arith.constant 0 : index
    %1 = vector.load %arg2[%c0_1, %c0_2] : memref<36x32xbf16, #tpu.memory_space<vmem>>, vector<36x32xbf16>
    %cst = arith.constant dense<0.000000e+00> : vector<512x32xf32>
    %2 = tpu.matmul %0, %1, %cst {dimension_numbers = #tpu.dot_dimension_numbers<[1], [0], [0], [1], [0, 0, 1, 1], [], []>} : vector<512x36xbf16>, vector<36x32xbf16>, vector<512x32xf32> -> vector<512x32xf32>
    %c0_3 = arith.constant 0 : index
    %c0_4 = arith.constant 0 : index
    %3 = vector.load %arg3[%c0_3, %c0_4] : memref<1x32xf32, #tpu.memory_space<vmem>>, vector<1x32xf32>
    %4 = vector.broadcast %3 : vector<1x32xf32> to vector<512x32xf32>
    %5 = arith.addf %2, %4 : vector<512x32xf32>
    %cst_5 = arith.constant 0.000000e+00 : f32
    %6 = vector.broadcast %cst_5 : f32 to vector<512x32xf32>
    %7 = arith.maximumf %5, %6 : vector<512x32xf32>
    %c0_6 = arith.constant 0 : index
    %c0_7 = arith.constant 0 : index
    %8 = vector.load %arg4[%c0_6, %c0_7] : memref<512x32xf32, #tpu.memory_space<vmem>>, vector<512x32xf32>
    tpu.vector_store %arg4[%c0_6, %c0_7], %7 {strides = array<i32>} : memref<512x32xf32, #tpu.memory_space<vmem>>, vector<512x32xf32>,
    return
  }
  func.func @transform_0(%arg0: i32) -> (i32, i32) {
    %c0_i32 = arith.constant 0 : i32
    %c0_i32_0 = arith.constant 0 : i32
    return %arg0, %c0_i32 : i32, i32
  }
  func.func @transform_1(%arg0: i32) -> (i32, i32) {
    %c0_i32 = arith.constant 0 : i32
    %c0_i32_0 = arith.constant 0 : i32
    %c0_i32_1 = arith.constant 0 : i32
    return %c0_i32, %c0_i32_0 : i32, i32
  }
  func.func @transform_2(%arg0: i32) -> (i32, i32) {
    %c0_i32 = arith.constant 0 : i32
    %c0_i32_0 = arith.constant 0 : i32
    %c0_i32_1 = arith.constant 0 : i32
    return %c0_i32, %c0_i32_0 : i32, i32
  }
  func.func @transform_3(%arg0: i32) -> (i32, i32) {
    %c0_i32 = arith.constant 0 : i32
    %c0_i32_0 = arith.constant 0 : i32
    return %arg0, %c0_i32 : i32, i32
  }
}

module attributes {stable_mosaic.version = 11 : i64} {
  func.func @_matmul_bias_relu_kernel(%arg0: i32, %arg1: memref<512x512xbf16, #tpu.memory_space<vmem>>, %arg2: memref<512x64xbf16, #tpu.memory_space<vmem>>, %arg3: memref<1x64xf32, #tpu.memory_space<vmem>>, %arg4: memref<512x64xf32, #tpu.memory_space<vmem>>) attributes {dimension_semantics = [#tpu.dimension_semantics<parallel>], iteration_bounds = array<i64: 1>, scalar_prefetch = 0 : i64, scratch_operands = 0 : i64, tpu.core_type = #tpu.core_type<tc>, window_params = [{transform_indices = @transform_0, window_bounds = array<i64: 512, 512>}, {pipeline_mode = #tpu.pipeline_mode<synchronous>, transform_indices = @transform_1, window_bounds = array<i64: 512, 64>}, {pipeline_mode = #tpu.pipeline_mode<synchronous>, transform_indices = @transform_2, window_bounds = array<i64: 1, 64>}, {transform_indices = @transform_3, window_bounds = array<i64: 512, 64>}]} {
    %c0 = arith.constant 0 : index
    %c0_0 = arith.constant 0 : index
    %0 = vector.load %arg1[%c0, %c0_0] : memref<512x512xbf16, #tpu.memory_space<vmem>>, vector<512x512xbf16>
    %c0_1 = arith.constant 0 : index
    %c0_2 = arith.constant 0 : index
    %1 = vector.load %arg2[%c0_1, %c0_2] : memref<512x64xbf16, #tpu.memory_space<vmem>>, vector<512x64xbf16>
    %cst = arith.constant dense<0.000000e+00> : vector<512x64xf32>
    %2 = tpu.matmul %0, %1, %cst {dimension_numbers = #tpu.dot_dimension_numbers<[1], [0], [0], [1], [0, 0, 1, 1], [], []>} : vector<512x512xbf16>, vector<512x64xbf16>, vector<512x64xf32> -> vector<512x64xf32>
    %c0_3 = arith.constant 0 : index
    %c0_4 = arith.constant 0 : index
    %3 = vector.load %arg3[%c0_3, %c0_4] : memref<1x64xf32, #tpu.memory_space<vmem>>, vector<1x64xf32>
    %4 = vector.broadcast %3 : vector<1x64xf32> to vector<512x64xf32>
    %5 = arith.addf %2, %4 : vector<512x64xf32>
    %cst_5 = arith.constant 0.000000e+00 : f32
    %6 = vector.broadcast %cst_5 : f32 to vector<512x64xf32>
    %7 = arith.maximumf %5, %6 : vector<512x64xf32>
    %c0_6 = arith.constant 0 : index
    %c0_7 = arith.constant 0 : index
    %8 = vector.load %arg4[%c0_6, %c0_7] : memref<512x64xf32, #tpu.memory_space<vmem>>, vector<512x64xf32>
    tpu.vector_store %arg4[%c0_6, %c0_7], %7 {strides = array<i32>} : memref<512x64xf32, #tpu.memory_space<vmem>>, vector<512x64xf32>,
    return
  }
  func.func @transform_0(%arg0: i32) -> (i32, i32) {
    %c0_i32 = arith.constant 0 : i32
    %c0_i32_0 = arith.constant 0 : i32
    return %arg0, %c0_i32 : i32, i32
  }
  func.func @transform_1(%arg0: i32) -> (i32, i32) {
    %c0_i32 = arith.constant 0 : i32
    %c0_i32_0 = arith.constant 0 : i32
    %c0_i32_1 = arith.constant 0 : i32
    return %c0_i32, %c0_i32_0 : i32, i32
  }
  func.func @transform_2(%arg0: i32) -> (i32, i32) {
    %c0_i32 = arith.constant 0 : i32
    %c0_i32_0 = arith.constant 0 : i32
    %c0_i32_1 = arith.constant 0 : i32
    return %c0_i32, %c0_i32_0 : i32, i32
  }
  func.func @transform_3(%arg0: i32) -> (i32, i32) {
    %c0_i32 = arith.constant 0 : i32
    %c0_i32_0 = arith.constant 0 : i32
    return %arg0, %c0_i32 : i32, i32
  }
}

module attributes {stable_mosaic.version = 11 : i64} {
  func.func @_fc_head_kernel(%arg0: i32, %arg1: memref<2x14464xbf16, #tpu.memory_space<vmem>>, %arg2: memref<1x14464x32xbf16, #tpu.memory_space<vmem>>, %arg3: memref<1x1x32xf32, #tpu.memory_space<vmem>>, %arg4: memref<1x2x32xf32, #tpu.memory_space<vmem>>) attributes {dimension_semantics = [#tpu.dimension_semantics<parallel>], iteration_bounds = array<i64: 2>, scalar_prefetch = 0 : i64, scratch_operands = 0 : i64, tpu.core_type = #tpu.core_type<tc>, window_params = [{pipeline_mode = #tpu.pipeline_mode<synchronous>, transform_indices = @transform_0, window_bounds = array<i64: 2, 14464>}, {transform_indices = @transform_1, window_bounds = array<i64: 1, 14464, 32>}, {transform_indices = @transform_2, window_bounds = array<i64: 1, 1, 32>}, {transform_indices = @transform_3, window_bounds = array<i64: 1, 2, 32>}]} {
    %c0 = arith.constant 0 : index
    %c0_0 = arith.constant 0 : index
    %0 = vector.load %arg1[%c0, %c0_0] : memref<2x14464xbf16, #tpu.memory_space<vmem>>, vector<2x14464xbf16>
    %c0_1 = arith.constant 0 : index
    %c0_2 = arith.constant 0 : index
    %c0_3 = arith.constant 0 : index
    %1 = vector.load %arg2[%c0_1, %c0_2, %c0_3] : memref<1x14464x32xbf16, #tpu.memory_space<vmem>>, vector<1x14464x32xbf16>
    %2 = vector.shape_cast %1 : vector<1x14464x32xbf16> to vector<14464x32xbf16>
    %cst = arith.constant dense<0.000000e+00> : vector<2x32xf32>
    %3 = tpu.matmul %0, %2, %cst {dimension_numbers = #tpu.dot_dimension_numbers<[1], [0], [0], [1], [0, 0, 1, 1], [], []>} : vector<2x14464xbf16>, vector<14464x32xbf16>, vector<2x32xf32> -> vector<2x32xf32>
    %c0_4 = arith.constant 0 : index
    %c0_5 = arith.constant 0 : index
    %c0_6 = arith.constant 0 : index
    %4 = vector.load %arg3[%c0_4, %c0_5, %c0_6] : memref<1x1x32xf32, #tpu.memory_space<vmem>>, vector<1x1x32xf32>
    %5 = vector.shape_cast %4 : vector<1x1x32xf32> to vector<1x32xf32>
    %6 = vector.broadcast %5 : vector<1x32xf32> to vector<2x32xf32>
    %7 = arith.addf %3, %6 : vector<2x32xf32>
    %c0_7 = arith.constant 0 : index
    %c0_8 = arith.constant 0 : index
    %c0_9 = arith.constant 0 : index
    %8 = vector.load %arg4[%c0_7, %c0_8, %c0_9] : memref<1x2x32xf32, #tpu.memory_space<vmem>>, vector<1x2x32xf32>
    %9 = vector.shape_cast %8 : vector<1x2x32xf32> to vector<2x32xf32>
    %10 = vector.shape_cast %7 : vector<2x32xf32> to vector<1x2x32xf32>
    tpu.vector_store %arg4[%c0_7, %c0_8, %c0_9], %10 {strides = array<i32>} : memref<1x2x32xf32, #tpu.memory_space<vmem>>, vector<1x2x32xf32>,
    return
  }
  func.func @transform_0(%arg0: i32) -> (i32, i32) {
    %c0_i32 = arith.constant 0 : i32
    %c0_i32_0 = arith.constant 0 : i32
    %c0_i32_1 = arith.constant 0 : i32
    return %c0_i32, %c0_i32_0 : i32, i32
  }
  func.func @transform_1(%arg0: i32) -> (i32, i32, i32) {
    %c0_i32 = arith.constant 0 : i32
    %c0_i32_0 = arith.constant 0 : i32
    %c0_i32_1 = arith.constant 0 : i32
    return %arg0, %c0_i32, %c0_i32_0 : i32, i32, i32
  }
  func.func @transform_2(%arg0: i32) -> (i32, i32, i32) {
    %c0_i32 = arith.constant 0 : i32
    %c0_i32_0 = arith.constant 0 : i32
    %c0_i32_1 = arith.constant 0 : i32
    return %arg0, %c0_i32, %c0_i32_0 : i32, i32, i32
  }
  func.func @transform_3(%arg0: i32) -> (i32, i32, i32) {
    %c0_i32 = arith.constant 0 : i32
    %c0_i32_0 = arith.constant 0 : i32
    %c0_i32_1 = arith.constant 0 : i32
    return %arg0, %c0_i32, %c0_i32_0 : i32, i32, i32
  }
}

</mosaic_0001>

<bundles_post_ra>
// kernel: encoder_forward.3
= control target key start
LH: loop header
LB: loop body
LE: loop exit
PB: predicated region body
PF: predicated region fallthrough
CT: control target
= control target key end

     0   :  { %8 = vsyncpa [#allocation3], 0  ;;  %s920_s15 = smov [#allocation2]   ;;  %s1403_s0 = inlined_call_operand.vmem [shape: bf16[512,36], index: 0, kind: input, shape index: {}]   ;;  %s1404_s1 = inlined_call_operand.vmem [shape: bf16[36,32], index: 1, kind: input, shape index: {}]   ;;  %s1405_s2 = inlined_call_operand.hbm [shape: f32[1,32], index: 2, kind: input, shape index: {}]   ;;  %s1406_s3 = inlined_call_operand.vmem [shape: f32[512,32], index: 3, kind: output, shape index: {}]  }
   0x1   :  { %s18_s14 = sshll.u32 %s1405_s2, 4  ;;  %s20_s16 = sshll.u32 %s920_s15, 4  ;;  %s19_s14 = int_to_ptr.hbm [resolvable:$true] %s18_s14  ;;  %s21_s16 = int_to_ptr.vmem [resolvable:$true] %s20_s16 }
   0x2   :  { %23 = dma.hbm_to_vmem [thread:$0]  %s19_s14, 16, %s21_s16, [#allocation3]  }
   0x3   :  { %918 = dma.done.wait [#allocation3], 16  }
   0x4   :  { %919 = vsyncadd [#allocation3], 4294967280  ;;  %v97_v0 = vld [vmem:[%s1404_s1 + $0x10] sm:$0x3]  ;;  %vm374_vm0 = vcmask 1041408   ;;  %v882_v4 = vld [vmem:[%s1404_s1 + $0x8] sm:$0xff] }
   0x5   :  { %v271_v1 = vunpack.c.l.b16 %v97_v0  ;;  %v881_v5 = vld [vmem:[%s1404_s1] sm:$0xff]  ;;  %vm277_vm1 = vcmask 293888   ;;  %v850_v10 = vld [vmem:[%s1403_s0 + $0x8] sm:$0xff]  ;;  %v851_v14 = vld [vmem:[%s1403_s0 + $0x10] sm:$0xff]  ;;  %vm611_vm2 = vcmask 261120  }
   0x6   :  { %v849_v6 = vld [vmem:[%s1403_s0] sm:$0xff]  ;;  %v858_v11 = vld [vmem:[%s1403_s0 + $0x48] sm:$0xff]  ;;  %v859_v15 = vld [vmem:[%s1403_s0 + $0x50] sm:$0xff] }
   0x7   :  { %v274_v2 = vpack.c.b16 %v271_v1, %v271_v1  ;;  %v857_v7 = vld [vmem:[%s1403_s0 + $0x40] sm:$0xff]  ;;  %v866_v12 = vld [vmem:[%s1403_s0 + $0x88] sm:$0xff]  ;;  %v867_v16 = vld [vmem:[%s1403_s0 + $0x90] sm:$0xff] }
   0x8   :  { %v865_v8 = vld [vmem:[%s1403_s0 + $0x80] sm:$0xff]  ;;  %v874_v13 = vld [vmem:[%s1403_s0 + $0xc8] sm:$0xff]  ;;  %v875_v17 = vld [vmem:[%s1403_s0 + $0xd0] sm:$0xff] }
   0x9   :  { %v376_v3 = vsel %vm374_vm0, %v274_v2, 0  ;;  %v873_v9 = vld [vmem:[%s1403_s0 + $0xc0] sm:$0xff]  ;;  %v852_v18 = vld [vmem:[%s1403_s0 + $0x18] sm:$0xff]  ;;  %v854_v26 = vld [vmem:[%s1403_s0 + $0x28] sm:$0xff] }
   0xa   :  { %383 = vmatpush.bf16.msra.mxu0 %v376_v3  ;;  %883 = vmatpush.bf16.msra.mxu1 %v376_v3  ;;  %v860_v19 = vld [vmem:[%s1403_s0 + $0x58] sm:$0xff]  ;;  %v853_v22 = vld [vmem:[%s1403_s0 + $0x20] sm:$0xff]  ;;  %v862_v27 = vld [vmem:[%s1403_s0 + $0x68] sm:$0xff] }
   0xb   :  { %884 = vmatpush.bf16.msra.mxu2 %v376_v3  ;;  %885 = vmatpush.bf16.msra.mxu3 %v376_v3  ;;  %v868_v20 = vld [vmem:[%s1403_s0 + $0x98] sm:$0xff]  ;;  %v861_v23 = vld [vmem:[%s1403_s0 + $0x60] sm:$0xff]  ;;  %v870_v28 = vld [vmem:[%s1403_s0 + $0xa8] sm:$0xff] }
   0xc   :  { %v876_v21 = vld [vmem:[%s1403_s0 + $0xd8] sm:$0xff]  ;;  %v869_v24 = vld [vmem:[%s1403_s0 + $0xa0] sm:$0xff]  ;;  %v878_v29 = vld [vmem:[%s1403_s0 + $0xe8] sm:$0xff] }
   0xd   :  { %v877_v25 = vld [vmem:[%s1403_s0 + $0xe0] sm:$0xff]  ;;  %v855_v30 = vld [vmem:[%s1403_s0 + $0x30] sm:$0xff]  ;;  %v856_v34 = vld [vmem:[%s1403_s0 + $0x38] sm:$0xff] }
   0xe   :  { %384 = vmatpush.bf16.msra.mxu0 %v882_v4  ;;  %886 = vmatpush.bf16.msra.mxu1 %v882_v4  ;;  %v863_v31 = vld [vmem:[%s1403_s0 + $0x70] sm:$0xff]  ;;  %v864_v35 = vld [vmem:[%s1403_s0 + $0x78] sm:$0xff]  ;;  %v1081_v38 = vld [vmem:[#allocation2] ss:$0 sm:$0xff] }
   0xf   :  { %887 = vmatpush.bf16.msra.mxu2 %v882_v4  ;;  %888 = vmatpush.bf16.msra.mxu3 %v882_v4  ;;  %v871_v32 = vld [vmem:[%s1403_s0 + $0xb0] sm:$0xff]  ;;  %v872_v36 = vld [vmem:[%s1403_s0 + $0xb8] sm:$0xff] }
  0x10   :  { %v879_v33 = vld [vmem:[%s1403_s0 + $0xf0] sm:$0xff]  ;;  %v880_v37 = vld [vmem:[%s1403_s0 + $0xf8] sm:$0xff] }
  0x12   :  { %385 = vmatpush.bf16.msra.mxu0 %v881_v5  ;;  %889 = vmatpush.bf16.msra.mxu1 %v881_v5 }
  0x13   :  { %890 = vmatpush.bf16.msra.mxu2 %v881_v5  ;;  %891 = vmatpush.bf16.msra.mxu3 %v881_v5 }
  0x15   :  { %817 = vmatmul.msk.bf16.vlgmr.msra.gmra.mxu0 %vm277_vm1, %v849_v6  ;;  %825 = vmatmul.msk.bf16.vlgmr.msra.gmra.mxu1 %vm277_vm1, %v857_v7 }
  0x16   :  { %833 = vmatmul.msk.bf16.vlgmr.msra.gmra.mxu2 %vm277_vm1, %v865_v8  ;;  %841 = vmatmul.msk.bf16.vlgmr.msra.gmra.mxu3 %vm277_vm1, %v873_v9 }
  0x25   :  { %818 = vmatmul.msk.bf16.gmra.mxu0 %vm277_vm1, %v850_v10  ;;  %826 = vmatmul.msk.bf16.gmra.mxu1 %vm277_vm1, %v858_v11 }
  0x26   :  { %834 = vmatmul.msk.bf16.gmra.mxu2 %vm277_vm1, %v866_v12  ;;  %842 = vmatmul.msk.bf16.gmra.mxu3 %vm277_vm1, %v874_v13 }
  0x35   :  { %819 = vmatmul.msk.bf16.gmra.mxu0 %vm277_vm1, %v851_v14  ;;  %827 = vmatmul.msk.bf16.gmra.mxu1 %vm277_vm1, %v859_v15 }
  0x36   :  { %835 = vmatmul.msk.bf16.gmra.mxu2 %vm277_vm1, %v867_v16  ;;  %843 = vmatmul.msk.bf16.gmra.mxu3 %vm277_vm1, %v875_v17 }
  0x45   :  { %820 = vmatmul.msk.bf16.gmra.mxu0 %vm277_vm1, %v852_v18  ;;  %828 = vmatmul.msk.bf16.gmra.mxu1 %vm277_vm1, %v860_v19 }
  0x46   :  { %836 = vmatmul.msk.bf16.gmra.mxu2 %vm277_vm1, %v868_v20  ;;  %844 = vmatmul.msk.bf16.gmra.mxu3 %vm277_vm1, %v876_v21 }
  0x55   :  { %821 = vmatmul.msk.bf16.gmra.mxu0 %vm277_vm1, %v853_v22  ;;  %829 = vmatmul.msk.bf16.gmra.mxu1 %vm277_vm1, %v861_v23 }
  0x56   :  { %837 = vmatmul.msk.bf16.gmra.mxu2 %vm277_vm1, %v869_v24  ;;  %845 = vmatmul.msk.bf16.gmra.mxu3 %vm277_vm1, %v877_v25 }
  0x65   :  { %822 = vmatmul.msk.bf16.gmra.mxu0 %vm277_vm1, %v854_v26  ;;  %830 = vmatmul.msk.bf16.gmra.mxu1 %vm277_vm1, %v862_v27 }
  0x66   :  { %838 = vmatmul.msk.bf16.gmra.mxu2 %vm277_vm1, %v870_v28  ;;  %846 = vmatmul.msk.bf16.gmra.mxu3 %vm277_vm1, %v878_v29 }
  0x75   :  { %823 = vmatmul.msk.bf16.gmra.mxu0 %vm277_vm1, %v855_v30  ;;  %831 = vmatmul.msk.bf16.gmra.mxu1 %vm277_vm1, %v863_v31 }
  0x76   :  { %839 = vmatmul.msk.bf16.gmra.mxu2 %vm277_vm1, %v871_v32  ;;  %847 = vmatmul.msk.bf16.gmra.mxu3 %vm277_vm1, %v879_v33 }
  0x85   :  { %824 = vmatmul.msk.bf16.gmra.mxu0 %vm277_vm1, %v856_v34  ;;  %832 = vmatmul.msk.bf16.gmra.mxu1 %vm277_vm1, %v864_v35 }
  0x86   :  { %840 = vmatmul.msk.bf16.gmra.mxu2 %vm277_vm1, %v872_v36  ;;  %848 = vmatmul.msk.bf16.gmra.mxu3 %vm277_vm1, %v880_v37 }
  0x92   :  { %v387_v39 = vpop.f32.mrf.mxu0  ;;  %v427_v40 = vpop.f32.mrf.mxu1 }
  0x93   :  { %v388_v41 = vadd.f32 %v1081_v38, %v387_v39  ;;  %v428_v42 = vadd.f32 %v1081_v38, %v427_v40 }
  0x95   :  { %v547_v43 = vmax.f32 %v388_v41, 0.0  ;;  %v563_v44 = vmax.f32 %v428_v42, 0.0 }
  0x97   :  { %612 = vst.msk [vmem:[%s1406_s3] sm:$0xff] %vm611_vm2, %v547_v43 }
  0x98   :  { %628 = vst.msk [vmem:[%s1406_s3 + $0x80] sm:$0xff] %vm611_vm2, %v563_v44 }
  0x99   :  { %v467_v45 = vpop.f32.mrf.mxu2  ;;  %v507_v46 = vpop.f32.mrf.mxu3 }
  0x9a   :  { %v468_v47 = vadd.f32 %v1081_v38, %v467_v45  ;;  %v508_v48 = vadd.f32 %v1081_v38, %v507_v46  ;;  %v389_v49 = vpop.f32.mrf.mxu0  ;;  %v429_v50 = vpop.f32.mrf.mxu1 }
  0x9b   :  { %v390_v51 = vadd.f32 %v1081_v38, %v389_v49  ;;  %v430_v52 = vadd.f32 %v1081_v38, %v429_v50 }
  0x9c   :  { %v579_v53 = vmax.f32 %v468_v47, 0.0  ;;  %v595_v54 = vmax.f32 %v508_v48, 0.0 }
  0x9d   :  { %v548_v55 = vmax.f32 %v390_v51, 0.0  ;;  %v564_v56 = vmax.f32 %v430_v52, 0.0 }
  0x9e   :  { %644 = vst.msk [vmem:[%s1406_s3 + $0x100] sm:$0xff] %vm611_vm2, %v579_v53 }
  0x9f   :  { %660 = vst.msk [vmem:[%s1406_s3 + $0x180] sm:$0xff] %vm611_vm2, %v595_v54 }
  0xa0   :  { %613 = vst.msk [vmem:[%s1406_s3 + $0x8] sm:$0xff] %vm611_vm2, %v548_v55 }
  0xa1   :  { %629 = vst.msk [vmem:[%s1406_s3 + $0x88] sm:$0xff] %vm611_vm2, %v564_v56  ;;  %v469_v57 = vpop.f32.mrf.mxu2  ;;  %v509_v58 = vpop.f32.mrf.mxu3 }
  0xa2   :  { %v470_v59 = vadd.f32 %v1081_v38, %v469_v57  ;;  %v510_v60 = vadd.f32 %v1081_v38, %v509_v58  ;;  %v392_v61 = vpop.f32.mrf.mxu0  ;;  %v432_v62 = vpop.f32.mrf.mxu1 }
  0xa3   :  { %v393_v63 = vadd.f32 %v1081_v38, %v392_v61  ;;  %v433_v0 = vadd.f32 %v1081_v38, %v432_v62 }
  0xa4   :  { %v580_v1 = vmax.f32 %v470_v59, 0.0  ;;  %v596_v2 = vmax.f32 %v510_v60, 0.0 }
  0xa5   :  { %v549_v3 = vmax.f32 %v393_v63, 0.0  ;;  %v565_v4 = vmax.f32 %v433_v0, 0.0 }
  0xa6   :  { %645 = vst.msk [vmem:[%s1406_s3 + $0x108] sm:$0xff] %vm611_vm2, %v580_v1 }
  0xa7   :  { %661 = vst.msk [vmem:[%s1406_s3 + $0x188] sm:$0xff] %vm611_vm2, %v596_v2 }
  0xa8   :  { %614 = vst.msk [vmem:[%s1406_s3 + $0x10] sm:$0xff] %vm611_vm2, %v549_v3 }
  0xa9   :  { %630 = vst.msk [vmem:[%s1406_s3 + $0x90] sm:$0xff] %vm611_vm2, %v565_v4  ;;  %v472_v5 = vpop.f32.mrf.mxu2  ;;  %v512_v6 = vpop.f32.mrf.mxu3 }
  0xaa   :  { %v473_v7 = vadd.f32 %v1081_v38, %v472_v5  ;;  %v513_v8 = vadd.f32 %v1081_v38, %v512_v6  ;;  %v394_v9 = vpop.f32.mrf.mxu0  ;;  %v434_v10 = vpop.f32.mrf.mxu1 }
  0xab   :  { %v395_v11 = vadd.f32 %v1081_v38, %v394_v9  ;;  %v435_v12 = vadd.f32 %v1081_v38, %v434_v10 }
  0xac   :  { %v581_v13 = vmax.f32 %v473_v7, 0.0  ;;  %v597_v14 = vmax.f32 %v513_v8, 0.0 }
  0xad   :  { %v550_v15 = vmax.f32 %v395_v11, 0.0  ;;  %v566_v16 = vmax.f32 %v435_v12, 0.0 }
  0xae   :  { %646 = vst.msk [vmem:[%s1406_s3 + $0x110] sm:$0xff] %vm611_vm2, %v581_v13 }
  0xaf   :  { %662 = vst.msk [vmem:[%s1406_s3 + $0x190] sm:$0xff] %vm611_vm2, %v597_v14 }
  0xb0   :  { %615 = vst.msk [vmem:[%s1406_s3 + $0x18] sm:$0xff] %vm611_vm2, %v550_v15 }
  0xb1   :  { %631 = vst.msk [vmem:[%s1406_s3 + $0x98] sm:$0xff] %vm611_vm2, %v566_v16  ;;  %v474_v17 = vpop.f32.mrf.mxu2  ;;  %v514_v18 = vpop.f32.mrf.mxu3 }
  0xb2   :  { %v475_v19 = vadd.f32 %v1081_v38, %v474_v17  ;;  %v515_v20 = vadd.f32 %v1081_v38, %v514_v18  ;;  %v397_v21 = vpop.f32.mrf.mxu0  ;;  %v437_v22 = vpop.f32.mrf.mxu1 }
  0xb3   :  { %v398_v23 = vadd.f32 %v1081_v38, %v397_v21  ;;  %v438_v24 = vadd.f32 %v1081_v38, %v437_v22 }
  0xb4   :  { %v582_v25 = vmax.f32 %v475_v19, 0.0  ;;  %v598_v26 = vmax.f32 %v515_v20, 0.0 }
  0xb5   :  { %v551_v27 = vmax.f32 %v398_v23, 0.0  ;;  %v567_v28 = vmax.f32 %v438_v24, 0.0 }
  0xb6   :  { %647 = vst.msk [vmem:[%s1406_s3 + $0x118] sm:$0xff] %vm611_vm2, %v582_v25 }
  0xb7   :  { %663 = vst.msk [vmem:[%s1406_s3 + $0x198] sm:$0xff] %vm611_vm2, %v598_v26 }
  0xb8   :  { %616 = vst.msk [vmem:[%s1406_s3 + $0x20] sm:$0xff] %vm611_vm2, %v551_v27 }
  0xb9   :  { %632 = vst.msk [vmem:[%s1406_s3 + $0xa0] sm:$0xff] %vm611_vm2, %v567_v28  ;;  %v477_v29 = vpop.f32.mrf.mxu2  ;;  %v517_v30 = vpop.f32.mrf.mxu3 }
  0xba   :  { %v478_v31 = vadd.f32 %v1081_v38, %v477_v29  ;;  %v518_v32 = vadd.f32 %v1081_v38, %v517_v30  ;;  %v399_v33 = vpop.f32.mrf.mxu0  ;;  %v439_v34 = vpop.f32.mrf.mxu1 }
  0xbb   :  { %v400_v35 = vadd.f32 %v1081_v38, %v399_v33  ;;  %v440_v36 = vadd.f32 %v1081_v38, %v439_v34 }
  0xbc   :  { %v583_v37 = vmax.f32 %v478_v31, 0.0  ;;  %v599_v39 = vmax.f32 %v518_v32, 0.0 }
  0xbd   :  { %v552_v40 = vmax.f32 %v400_v35, 0.0  ;;  %v568_v41 = vmax.f32 %v440_v36, 0.0 }
  0xbe   :  { %648 = vst.msk [vmem:[%s1406_s3 + $0x120] sm:$0xff] %vm611_vm2, %v583_v37 }
  0xbf   :  { %664 = vst.msk [vmem:[%s1406_s3 + $0x1a0] sm:$0xff] %vm611_vm2, %v599_v39 }
  0xc0   :  { %617 = vst.msk [vmem:[%s1406_s3 + $0x28] sm:$0xff] %vm611_vm2, %v552_v40 }
  0xc1   :  { %633 = vst.msk [vmem:[%s1406_s3 + $0xa8] sm:$0xff] %vm611_vm2, %v568_v41  ;;  %v479_v42 = vpop.f32.mrf.mxu2  ;;  %v519_v43 = vpop.f32.mrf.mxu3 }
  0xc2   :  { %v480_v44 = vadd.f32 %v1081_v38, %v479_v42  ;;  %v520_v45 = vadd.f32 %v1081_v38, %v519_v43  ;;  %v402_v46 = vpop.f32.mrf.mxu0  ;;  %v442_v47 = vpop.f32.mrf.mxu1 }
  0xc3   :  { %v403_v48 = vadd.f32 %v1081_v38, %v402_v46  ;;  %v443_v49 = vadd.f32 %v1081_v38, %v442_v47 }
  0xc4   :  { %v584_v50 = vmax.f32 %v480_v44, 0.0  ;;  %v600_v51 = vmax.f32 %v520_v45, 0.0 }
  0xc5   :  { %v553_v52 = vmax.f32 %v403_v48, 0.0  ;;  %v569_v53 = vmax.f32 %v443_v49, 0.0 }
  0xc6   :  { %649 = vst.msk [vmem:[%s1406_s3 + $0x128] sm:$0xff] %vm611_vm2, %v584_v50 }
  0xc7   :  { %665 = vst.msk [vmem:[%s1406_s3 + $0x1a8] sm:$0xff] %vm611_vm2, %v600_v51 }
  0xc8   :  { %618 = vst.msk [vmem:[%s1406_s3 + $0x30] sm:$0xff] %vm611_vm2, %v553_v52 }
  0xc9   :  { %634 = vst.msk [vmem:[%s1406_s3 + $0xb0] sm:$0xff] %vm611_vm2, %v569_v53  ;;  %v482_v54 = vpop.f32.mrf.mxu2  ;;  %v522_v55 = vpop.f32.mrf.mxu3 }
  0xca   :  { %v483_v56 = vadd.f32 %v1081_v38, %v482_v54  ;;  %v523_v57 = vadd.f32 %v1081_v38, %v522_v55  ;;  %v404_v58 = vpop.f32.mrf.mxu0  ;;  %v444_v59 = vpop.f32.mrf.mxu1 }
  0xcb   :  { %v405_v60 = vadd.f32 %v1081_v38, %v404_v58  ;;  %v445_v61 = vadd.f32 %v1081_v38, %v444_v59 }
  0xcc   :  { %v585_v62 = vmax.f32 %v483_v56, 0.0  ;;  %v601_v63 = vmax.f32 %v523_v57, 0.0 }
  0xcd   :  { %v554_v0 = vmax.f32 %v405_v60, 0.0  ;;  %v570_v1 = vmax.f32 %v445_v61, 0.0 }
  0xce   :  { %650 = vst.msk [vmem:[%s1406_s3 + $0x130] sm:$0xff] %vm611_vm2, %v585_v62 }
  0xcf   :  { %666 = vst.msk [vmem:[%s1406_s3 + $0x1b0] sm:$0xff] %vm611_vm2, %v601_v63 }
  0xd0   :  { %619 = vst.msk [vmem:[%s1406_s3 + $0x38] sm:$0xff] %vm611_vm2, %v554_v0 }
  0xd1   :  { %635 = vst.msk [vmem:[%s1406_s3 + $0xb8] sm:$0xff] %vm611_vm2, %v570_v1  ;;  %v484_v2 = vpop.f32.mrf.mxu2  ;;  %v524_v3 = vpop.f32.mrf.mxu3 }
  0xd2   :  { %v485_v4 = vadd.f32 %v1081_v38, %v484_v2  ;;  %v525_v5 = vadd.f32 %v1081_v38, %v524_v3  ;;  %v407_v6 = vpop.f32.mrf.mxu0  ;;  %v447_v7 = vpop.f32.mrf.mxu1 }
  0xd3   :  { %v408_v8 = vadd.f32 %v1081_v38, %v407_v6  ;;  %v448_v9 = vadd.f32 %v1081_v38, %v447_v7 }
  0xd4   :  { %v586_v10 = vmax.f32 %v485_v4, 0.0  ;;  %v602_v11 = vmax.f32 %v525_v5, 0.0 }
  0xd5   :  { %v555_v12 = vmax.f32 %v408_v8, 0.0  ;;  %v571_v13 = vmax.f32 %v448_v9, 0.0 }
  0xd6   :  { %651 = vst.msk [vmem:[%s1406_s3 + $0x138] sm:$0xff] %vm611_vm2, %v586_v10 }
  0xd7   :  { %667 = vst.msk [vmem:[%s1406_s3 + $0x1b8] sm:$0xff] %vm611_vm2, %v602_v11 }
  0xd8   :  { %620 = vst.msk [vmem:[%s1406_s3 + $0x40] sm:$0xff] %vm611_vm2, %v555_v12 }
  0xd9   :  { %636 = vst.msk [vmem:[%s1406_s3 + $0xc0] sm:$0xff] %vm611_vm2, %v571_v13  ;;  %v487_v14 = vpop.f32.mrf.mxu2  ;;  %v527_v15 = vpop.f32.mrf.mxu3 }
  0xda   :  { %v488_v16 = vadd.f32 %v1081_v38, %v487_v14  ;;  %v528_v17 = vadd.f32 %v1081_v38, %v527_v15  ;;  %v409_v18 = vpop.f32.mrf.mxu0  ;;  %v449_v19 = vpop.f32.mrf.mxu1 }
  0xdb   :  { %v410_v20 = vadd.f32 %v1081_v38, %v409_v18  ;;  %v450_v21 = vadd.f32 %v1081_v38, %v449_v19 }
  0xdc   :  { %v587_v22 = vmax.f32 %v488_v16, 0.0  ;;  %v603_v23 = vmax.f32 %v528_v17, 0.0 }
  0xdd   :  { %v556_v24 = vmax.f32 %v410_v20, 0.0  ;;  %v572_v25 = vmax.f32 %v450_v21, 0.0 }
  0xde   :  { %652 = vst.msk [vmem:[%s1406_s3 + $0x140] sm:$0xff] %vm611_vm2, %v587_v22 }
  0xdf   :  { %668 = vst.msk [vmem:[%s1406_s3 + $0x1c0] sm:$0xff] %vm611_vm2, %v603_v23 }
  0xe0   :  { %621 = vst.msk [vmem:[%s1406_s3 + $0x48] sm:$0xff] %vm611_vm2, %v556_v24 }
  0xe1   :  { %637 = vst.msk [vmem:[%s1406_s3 + $0xc8] sm:$0xff] %vm611_vm2, %v572_v25  ;;  %v489_v26 = vpop.f32.mrf.mxu2  ;;  %v529_v27 = vpop.f32.mrf.mxu3 }
  0xe2   :  { %v490_v28 = vadd.f32 %v1081_v38, %v489_v26  ;;  %v530_v29 = vadd.f32 %v1081_v38, %v529_v27  ;;  %v412_v30 = vpop.f32.mrf.mxu0  ;;  %v452_v31 = vpop.f32.mrf.mxu1 }
  0xe3   :  { %v413_v32 = vadd.f32 %v1081_v38, %v412_v30  ;;  %v453_v33 = vadd.f32 %v1081_v38, %v452_v31 }
  0xe4   :  { %v588_v34 = vmax.f32 %v490_v28, 0.0  ;;  %v604_v35 = vmax.f32 %v530_v29, 0.0 }
  0xe5   :  { %v557_v36 = vmax.f32 %v413_v32, 0.0  ;;  %v573_v37 = vmax.f32 %v453_v33, 0.0 }
  0xe6   :  { %653 = vst.msk [vmem:[%s1406_s3 + $0x148] sm:$0xff] %vm611_vm2, %v588_v34 }
  0xe7   :  { %669 = vst.msk [vmem:[%s1406_s3 + $0x1c8] sm:$0xff] %vm611_vm2, %v604_v35 }
  0xe8   :  { %622 = vst.msk [vmem:[%s1406_s3 + $0x50] sm:$0xff] %vm611_vm2, %v557_v36 }
  0xe9   :  { %638 = vst.msk [vmem:[%s1406_s3 + $0xd0] sm:$0xff] %vm611_vm2, %v573_v37  ;;  %v492_v39 = vpop.f32.mrf.mxu2  ;;  %v532_v40 = vpop.f32.mrf.mxu3 }
  0xea   :  { %v493_v41 = vadd.f32 %v1081_v38, %v492_v39  ;;  %v533_v42 = vadd.f32 %v1081_v38, %v532_v40  ;;  %v414_v43 = vpop.f32.mrf.mxu0  ;;  %v454_v44 = vpop.f32.mrf.mxu1 }
  0xeb   :  { %v415_v45 = vadd.f32 %v1081_v38, %v414_v43  ;;  %v455_v46 = vadd.f32 %v1081_v38, %v454_v44 }
  0xec   :  { %v589_v47 = vmax.f32 %v493_v41, 0.0  ;;  %v605_v48 = vmax.f32 %v533_v42, 0.0 }
  0xed   :  { %v558_v49 = vmax.f32 %v415_v45, 0.0  ;;  %v574_v50 = vmax.f32 %v455_v46, 0.0 }
  0xee   :  { %654 = vst.msk [vmem:[%s1406_s3 + $0x150] sm:$0xff] %vm611_vm2, %v589_v47 }
  0xef   :  { %670 = vst.msk [vmem:[%s1406_s3 + $0x1d0] sm:$0xff] %vm611_vm2, %v605_v48 }
  0xf0   :  { %623 = vst.msk [vmem:[%s1406_s3 + $0x58] sm:$0xff] %vm611_vm2, %v558_v49 }
  0xf1   :  { %639 = vst.msk [vmem:[%s1406_s3 + $0xd8] sm:$0xff] %vm611_vm2, %v574_v50  ;;  %v494_v51 = vpop.f32.mrf.mxu2  ;;  %v534_v52 = vpop.f32.mrf.mxu3 }
  0xf2   :  { %v495_v53 = vadd.f32 %v1081_v38, %v494_v51  ;;  %v535_v54 = vadd.f32 %v1081_v38, %v534_v52  ;;  %v417_v55 = vpop.f32.mrf.mxu0  ;;  %v457_v56 = vpop.f32.mrf.mxu1 }
  0xf3   :  { %v418_v57 = vadd.f32 %v1081_v38, %v417_v55  ;;  %v458_v58 = vadd.f32 %v1081_v38, %v457_v56 }
  0xf4   :  { %v590_v59 = vmax.f32 %v495_v53, 0.0  ;;  %v606_v60 = vmax.f32 %v535_v54, 0.0 }
  0xf5   :  { %v559_v61 = vmax.f32 %v418_v57, 0.0  ;;  %v575_v62 = vmax.f32 %v458_v58, 0.0 }
  0xf6   :  { %655 = vst.msk [vmem:[%s1406_s3 + $0x158] sm:$0xff] %vm611_vm2, %v590_v59 }
  0xf7   :  { %671 = vst.msk [vmem:[%s1406_s3 + $0x1d8] sm:$0xff] %vm611_vm2, %v606_v60 }
  0xf8   :  { %624 = vst.msk [vmem:[%s1406_s3 + $0x60] sm:$0xff] %vm611_vm2, %v559_v61 }
  0xf9   :  { %640 = vst.msk [vmem:[%s1406_s3 + $0xe0] sm:$0xff] %vm611_vm2, %v575_v62  ;;  %v497_v63 = vpop.f32.mrf.mxu2  ;;  %v537_v0 = vpop.f32.mrf.mxu3 }
  0xfa   :  { %v498_v1 = vadd.f32 %v1081_v38, %v497_v63  ;;  %v538_v2 = vadd.f32 %v1081_v38, %v537_v0  ;;  %v419_v3 = vpop.f32.mrf.mxu0  ;;  %v459_v4 = vpop.f32.mrf.mxu1 }
  0xfb   :  { %v420_v5 = vadd.f32 %v1081_v38, %v419_v3  ;;  %v460_v6 = vadd.f32 %v1081_v38, %v459_v4 }
  0xfc   :  { %v591_v7 = vmax.f32 %v498_v1, 0.0  ;;  %v607_v8 = vmax.f32 %v538_v2, 0.0 }
  0xfd   :  { %v560_v9 = vmax.f32 %v420_v5, 0.0  ;;  %v576_v10 = vmax.f32 %v460_v6, 0.0 }
  0xfe   :  { %656 = vst.msk [vmem:[%s1406_s3 + $0x160] sm:$0xff] %vm611_vm2, %v591_v7 }
  0xff   :  { %672 = vst.msk [vmem:[%s1406_s3 + $0x1e0] sm:$0xff] %vm611_vm2, %v607_v8 }
 0x100   :  { %625 = vst.msk [vmem:[%s1406_s3 + $0x68] sm:$0xff] %vm611_vm2, %v560_v9 }
 0x101   :  { %641 = vst.msk [vmem:[%s1406_s3 + $0xe8] sm:$0xff] %vm611_vm2, %v576_v10  ;;  %v499_v11 = vpop.f32.mrf.mxu2  ;;  %v539_v12 = vpop.f32.mrf.mxu3 }
 0x102   :  { %v500_v13 = vadd.f32 %v1081_v38, %v499_v11  ;;  %v540_v14 = vadd.f32 %v1081_v38, %v539_v12  ;;  %v422_v15 = vpop.f32.mrf.mxu0  ;;  %v462_v16 = vpop.f32.mrf.mxu1 }
 0x103   :  { %v423_v17 = vadd.f32 %v1081_v38, %v422_v15  ;;  %v463_v18 = vadd.f32 %v1081_v38, %v462_v16 }
 0x104   :  { %v592_v19 = vmax.f32 %v500_v13, 0.0  ;;  %v608_v20 = vmax.f32 %v540_v14, 0.0 }
 0x105   :  { %v561_v21 = vmax.f32 %v423_v17, 0.0  ;;  %v577_v22 = vmax.f32 %v463_v18, 0.0 }
 0x106   :  { %657 = vst.msk [vmem:[%s1406_s3 + $0x168] sm:$0xff] %vm611_vm2, %v592_v19 }
 0x107   :  { %673 = vst.msk [vmem:[%s1406_s3 + $0x1e8] sm:$0xff] %vm611_vm2, %v608_v20 }
 0x108   :  { %626 = vst.msk [vmem:[%s1406_s3 + $0x70] sm:$0xff] %vm611_vm2, %v561_v21 }
 0x109   :  { %642 = vst.msk [vmem:[%s1406_s3 + $0xf0] sm:$0xff] %vm611_vm2, %v577_v22  ;;  %v502_v23 = vpop.f32.mrf.mxu2  ;;  %v542_v24 = vpop.f32.mrf.mxu3 }
 0x10a   :  { %v503_v25 = vadd.f32 %v1081_v38, %v502_v23  ;;  %v543_v26 = vadd.f32 %v1081_v38, %v542_v24  ;;  %v424_v27 = vpop.f32.mrf.mxu0  ;;  %v464_v28 = vpop.f32.mrf.mxu1 }
 0x10b   :  { %v425_v29 = vadd.f32 %v1081_v38, %v424_v27  ;;  %v465_v30 = vadd.f32 %v1081_v38, %v464_v28 }
 0x10c   :  { %v593_v31 = vmax.f32 %v503_v25, 0.0  ;;  %v609_v32 = vmax.f32 %v543_v26, 0.0 }
 0x10d   :  { %v562_v33 = vmax.f32 %v425_v29, 0.0  ;;  %v578_v34 = vmax.f32 %v465_v30, 0.0 }
 0x10e   :  { %658 = vst.msk [vmem:[%s1406_s3 + $0x170] sm:$0xff] %vm611_vm2, %v593_v31 }
 0x10f   :  { %674 = vst.msk [vmem:[%s1406_s3 + $0x1f0] sm:$0xff] %vm611_vm2, %v609_v32 }
 0x110   :  { %627 = vst.msk [vmem:[%s1406_s3 + $0x78] sm:$0xff] %vm611_vm2, %v562_v33 }
 0x111   :  { %643 = vst.msk [vmem:[%s1406_s3 + $0xf8] sm:$0xff] %vm611_vm2, %v578_v34  ;;  %v504_v35 = vpop.f32.mrf.mxu2  ;;  %v544_v36 = vpop.f32.mrf.mxu3 }
 0x112   :  { %v505_v37 = vadd.f32 %v1081_v38, %v504_v35  ;;  %v545_v39 = vadd.f32 %v1081_v38, %v544_v36 }
 0x114   :  { %v594_v40 = vmax.f32 %v505_v37, 0.0  ;;  %v610_v41 = vmax.f32 %v545_v39, 0.0 }
 0x116   :  { %659 = vst.msk [vmem:[%s1406_s3 + $0x178] sm:$0xff] %vm611_vm2, %v594_v40 }
 0x117   :  { %675 = vst.msk [vmem:[%s1406_s3 + $0x1f8] sm:$0xff] %vm611_vm2, %v610_v41 }
 0x118   :  { %680 = vsyncpa [#allocation3], 1 }

// kernel: encoder_forward.4
= control target key start
LH: loop header
LB: loop body
LE: loop exit
PB: predicated region body
PF: predicated region fallthrough
CT: control target
= control target key end

     0   :  { %vm1782_vm0 = vcmask 523264   ;;  %s3867_s1 = inlined_call_operand.vmem [shape: bf16[512,64], index: 1, kind: input, shape index: {}]   ;;  %s3868_s2 = inlined_call_operand.vmem [shape: f32[1,64], index: 2, kind: input, shape index: {}]   ;;  %s3869_s0 = inlined_call_operand.vmem [shape: bf16[512,512], index: 0, kind: input, shape index: {}]   ;;  %s3870_s3 = inlined_call_operand.vmem [shape: f32[512,64], index: 3, kind: output, shape index: {}]  }
   0x1   :  { %v2626_v0 = vld [vmem:[%s3867_s1 + $0x38] sm:$0xff]  ;;  %v2625_v4 = vld [vmem:[%s3867_s1 + $0x30] sm:$0xff]  ;;  %v2624_v8 = vld [vmem:[%s3867_s1 + $0x28] sm:$0xff] }
   0x2   :  { %v2634_v1 = vld [vmem:[%s3867_s1 + $0x78] sm:$0xff]  ;;  %1042 = vmatpush.bf16.msra.mxu0 %v2626_v0  ;;  %v2633_v5 = vld [vmem:[%s3867_s1 + $0x70] sm:$0xff]  ;;  %v2632_v9 = vld [vmem:[%s3867_s1 + $0x68] sm:$0xff] }
   0x3   :  { %v2642_v2 = vld [vmem:[%s3867_s1 + $0xb8] sm:$0xff]  ;;  %1211 = vmatpush.bf16.msra.mxu1 %v2634_v1  ;;  %v2641_v6 = vld [vmem:[%s3867_s1 + $0xb0] sm:$0xff]  ;;  %v2640_v10 = vld [vmem:[%s3867_s1 + $0xa8] sm:$0xff] }
   0x4   :  { %v2650_v3 = vld [vmem:[%s3867_s1 + $0xf8] sm:$0xff]  ;;  %1380 = vmatpush.bf16.msra.mxu2 %v2642_v2  ;;  %v2649_v7 = vld [vmem:[%s3867_s1 + $0xf0] sm:$0xff]  ;;  %v2648_v11 = vld [vmem:[%s3867_s1 + $0xe8] sm:$0xff] }
   0x5   :  { %1549 = vmatpush.bf16.msra.mxu3 %v2650_v3  ;;  %v2623_v12 = vld [vmem:[%s3867_s1 + $0x20] sm:$0xff]  ;;  %v2622_v16 = vld [vmem:[%s3867_s1 + $0x18] sm:$0xff]  ;;  %v2621_v20 = vld [vmem:[%s3867_s1 + $0x10] sm:$0xff] }
   0x6   :  { %1043 = vmatpush.bf16.msra.mxu0 %v2625_v4  ;;  %v2631_v13 = vld [vmem:[%s3867_s1 + $0x60] sm:$0xff]  ;;  %v2630_v17 = vld [vmem:[%s3867_s1 + $0x58] sm:$0xff]  ;;  %v2629_v21 = vld [vmem:[%s3867_s1 + $0x50] sm:$0xff] }
   0x7   :  { %1212 = vmatpush.bf16.msra.mxu1 %v2633_v5  ;;  %v2639_v14 = vld [vmem:[%s3867_s1 + $0xa0] sm:$0xff]  ;;  %v2638_v18 = vld [vmem:[%s3867_s1 + $0x98] sm:$0xff]  ;;  %v2637_v22 = vld [vmem:[%s3867_s1 + $0x90] sm:$0xff] }
   0x8   :  { %1381 = vmatpush.bf16.msra.mxu2 %v2641_v6  ;;  %v2647_v15 = vld [vmem:[%s3867_s1 + $0xe0] sm:$0xff]  ;;  %v2646_v19 = vld [vmem:[%s3867_s1 + $0xd8] sm:$0xff]  ;;  %v2645_v23 = vld [vmem:[%s3867_s1 + $0xd0] sm:$0xff] }
   0x9   :  { %1550 = vmatpush.bf16.msra.mxu3 %v2649_v7  ;;  %v2620_v24 = vld [vmem:[%s3867_s1 + $0x8] sm:$0xff]  ;;  %v2619_v28 = vld [vmem:[%s3867_s1] sm:$0xff]  ;;  %v2493_v33 = vld [vmem:[%s3869_s0 + $0xc] sm:$0xf0] }
   0xa   :  { %1044 = vmatpush.bf16.msra.mxu0 %v2624_v8  ;;  %v2628_v25 = vld [vmem:[%s3867_s1 + $0x48] sm:$0xff]  ;;  %v2627_v29 = vld [vmem:[%s3867_s1 + $0x40] sm:$0xff]  ;;  %v1855_v35 = vld [vmem:[%s3869_s0 + $0x10] sm:$0xf0] }
   0xb   :  { %1213 = vmatpush.bf16.msra.mxu1 %v2632_v9  ;;  %v2636_v26 = vld [vmem:[%s3867_s1 + $0x88] sm:$0xff]  ;;  %v2635_v30 = vld [vmem:[%s3867_s1 + $0x80] sm:$0xff]  ;;  %v2494_v37 = vld [vmem:[%s3869_s0 + $0x14] sm:$0xf0] }
   0xc   :  { %1382 = vmatpush.bf16.msra.mxu2 %v2640_v10  ;;  %v2644_v27 = vld [vmem:[%s3867_s1 + $0xc8] sm:$0xff]  ;;  %v2643_v31 = vld [vmem:[%s3867_s1 + $0xc0] sm:$0xff]  ;;  %v1863_v39 = vld [vmem:[%s3869_s0 + $0x18] sm:$0xf0] }
   0xd   :  { %1551 = vmatpush.bf16.msra.mxu3 %v2648_v11  ;;  %v1853_v32 = vld [vmem:[%s3869_s0] sm:$0xf]  ;;  %v2491_v34 = vld [vmem:[%s3869_s0 + $0x4] sm:$0xf]  ;;  %v1861_v36 = vld [vmem:[%s3869_s0 + $0x8] sm:$0xf] }
   0xe   :  { %1045 = vmatpush.bf16.msra.mxu0 %v2623_v12  ;;  %v2492_v38 = vld [vmem:[%s3869_s0 + $0xc] sm:$0xf]  ;;  %v1854_v40 = vor.u32 %v2493_v33, %v1853_v32  ;;  %v1858_v41 = vor.u32 %v2491_v34, %v1855_v35  ;;  %v1862_v42 = vor.u32 %v2494_v37, %v1861_v36  ;;  %v1869_v44 = vld [vmem:[%s3869_s0 + $0x20] sm:$0xf]  ;;  %v2497_v45 = vld [vmem:[%s3869_s0 + $0x2c] sm:$0xf0] }
   0xf   :  { %1214 = vmatpush.bf16.msra.mxu1 %v2631_v13  ;;  %v1866_v43 = vor.u32 %v2492_v38, %v1863_v39  ;;  %v2495_v46 = vld [vmem:[%s3869_s0 + $0x24] sm:$0xf]  ;;  %v1871_v47 = vld [vmem:[%s3869_s0 + $0x30] sm:$0xf0]  ;;  %v1877_v48 = vld [vmem:[%s3869_s0 + $0x28] sm:$0xf]  ;;  %v1870_v52 = vor.u32 %v2497_v45, %v1869_v44 }
  0x10   :  { %1383 = vmatpush.bf16.msra.mxu2 %v2639_v14  ;;  %v2498_v49 = vld [vmem:[%s3869_s0 + $0x34] sm:$0xf0]  ;;  %v2496_v50 = vld [vmem:[%s3869_s0 + $0x2c] sm:$0xf]  ;;  %v1879_v51 = vld [vmem:[%s3869_s0 + $0x38] sm:$0xf0]  ;;  %v1874_v53 = vor.u32 %v2495_v46, %v1871_v47 }
  0x11   :  { %1552 = vmatpush.bf16.msra.mxu3 %v2647_v15  ;;  %v1878_v54 = vor.u32 %v2498_v49, %v1877_v48  ;;  %v1882_v55 = vor.u32 %v2496_v50, %v1879_v51  ;;  %v1885_v56 = vld [vmem:[%s3869_s0 + $0x40] sm:$0xf]  ;;  %v2501_v57 = vld [vmem:[%s3869_s0 + $0x4c] sm:$0xf0]  ;;  %v2499_v58 = vld [vmem:[%s3869_s0 + $0x44] sm:$0xf] }
  0x12   :  { %1046 = vmatpush.bf16.msra.mxu0 %v2622_v16  ;;  %v1887_v59 = vld [vmem:[%s3869_s0 + $0x50] sm:$0xf0]  ;;  %v1893_v60 = vld [vmem:[%s3869_s0 + $0x48] sm:$0xf]  ;;  %v2502_v61 = vld [vmem:[%s3869_s0 + $0x54] sm:$0xf0]  ;;  %v1886_v0 = vor.u32 %v2501_v57, %v1885_v56 }
  0x13   :  { %1215 = vmatpush.bf16.msra.mxu1 %v2630_v17  ;;  %v2500_v62 = vld [vmem:[%s3869_s0 + $0x4c] sm:$0xf]  ;;  %v1895_v63 = vld [vmem:[%s3869_s0 + $0x58] sm:$0xf0]  ;;  %v1890_v1 = vor.u32 %v2499_v58, %v1887_v59  ;;  %v1894_v2 = vor.u32 %v2502_v61, %v1893_v60  ;;  %v1901_v4 = vld [vmem:[%s3869_s0 + $0x60] sm:$0xf] }
  0x14   :  { %1384 = vmatpush.bf16.msra.mxu2 %v2638_v18  ;;  %v1898_v3 = vor.u32 %v2500_v62, %v1895_v63  ;;  %v2505_v5 = vld [vmem:[%s3869_s0 + $0x6c] sm:$0xf0]  ;;  %v2503_v6 = vld [vmem:[%s3869_s0 + $0x64] sm:$0xf]  ;;  %v1903_v7 = vld [vmem:[%s3869_s0 + $0x70] sm:$0xf0] }
  0x15   :  { %1553 = vmatpush.bf16.msra.mxu3 %v2646_v19  ;;  %v1909_v8 = vld [vmem:[%s3869_s0 + $0x68] sm:$0xf]  ;;  %v2506_v9 = vld [vmem:[%s3869_s0 + $0x74] sm:$0xf0]  ;;  %v2504_v10 = vld [vmem:[%s3869_s0 + $0x6c] sm:$0xf]  ;;  %v1902_v12 = vor.u32 %v2505_v5, %v1901_v4  ;;  %v1906_v13 = vor.u32 %v2503_v6, %v1903_v7 }
  0x16   :  { %1047 = vmatpush.bf16.msra.mxu0 %v2621_v20  ;;  %v1911_v11 = vld [vmem:[%s3869_s0 + $0x78] sm:$0xf0]  ;;  %v1910_v14 = vor.u32 %v2506_v9, %v1909_v8  ;;  %v1917_v16 = vld [vmem:[%s3869_s0 + $0x80] sm:$0xf]  ;;  %v2509_v17 = vld [vmem:[%s3869_s0 + $0x8c] sm:$0xf0] }
  0x17   :  { %1216 = vmatpush.bf16.msra.mxu1 %v2629_v21  ;;  %v1914_v15 = vor.u32 %v2504_v10, %v1911_v11  ;;  %v2507_v18 = vld [vmem:[%s3869_s0 + $0x84] sm:$0xf]  ;;  %v1919_v19 = vld [vmem:[%s3869_s0 + $0x90] sm:$0xf0]  ;;  %v1925_v20 = vld [vmem:[%s3869_s0 + $0x88] sm:$0xf] }
  0x18   :  { %1385 = vmatpush.bf16.msra.mxu2 %v2637_v22  ;;  %v2510_v21 = vld [vmem:[%s3869_s0 + $0x94] sm:$0xf0]  ;;  %v2508_v22 = vld [vmem:[%s3869_s0 + $0x8c] sm:$0xf]  ;;  %v1941_v32 = vld [vmem:[%s3869_s0 + $0xa8] sm:$0xf] }
  0x19   :  { %1554 = vmatpush.bf16.msra.mxu3 %v2645_v23  ;;  %v1927_v23 = vld [vmem:[%s3869_s0 + $0x98] sm:$0xf0]  ;;  %v2514_v33 = vld [vmem:[%s3869_s0 + $0xb4] sm:$0xf0]  ;;  %v2512_v34 = vld [vmem:[%s3869_s0 + $0xac] sm:$0xf] }
  0x1a   :  { %1048 = vmatpush.bf16.msra.mxu0 %v2620_v24  ;;  %v1918_v24 = vor.u32 %v2509_v17, %v1917_v16  ;;  %v1943_v35 = vld [vmem:[%s3869_s0 + $0xb8] sm:$0xf0]  ;;  %v1942_v38 = vor.u32 %v2514_v33, %v1941_v32  ;;  %v1957_v44 = vld [vmem:[%s3869_s0 + $0xc8] sm:$0xf]  ;;  %v2518_v45 = vld [vmem:[%s3869_s0 + $0xd4] sm:$0xf0] }
  0x1b   :  { %1217 = vmatpush.bf16.msra.mxu1 %v2628_v25  ;;  %v1922_v25 = vor.u32 %v2507_v18, %v1919_v19  ;;  %v1946_v39 = vor.u32 %v2512_v34, %v1943_v35  ;;  %v2516_v46 = vld [vmem:[%s3869_s0 + $0xcc] sm:$0xf]  ;;  %v1959_v47 = vld [vmem:[%s3869_s0 + $0xd8] sm:$0xf0]  ;;  %v1958_v50 = vor.u32 %v2518_v45, %v1957_v44  ;;  %v1973_v56 = vld [vmem:[%s3869_s0 + $0xe8] sm:$0xf] }
  0x1c   :  { %1386 = vmatpush.bf16.msra.mxu2 %v2636_v26  ;;  %v1926_v26 = vor.u32 %v2510_v21, %v1925_v20  ;;  %v1962_v51 = vor.u32 %v2516_v46, %v1959_v47  ;;  %v2522_v57 = vld [vmem:[%s3869_s0 + $0xf4] sm:$0xf0]  ;;  %v2520_v58 = vld [vmem:[%s3869_s0 + $0xec] sm:$0xf]  ;;  %v1975_v59 = vld [vmem:[%s3869_s0 + $0xf8] sm:$0xf0] }
  0x1d   :  { %1555 = vmatpush.bf16.msra.mxu3 %v2644_v27  ;;  %v1930_v27 = vor.u32 %v2508_v22, %v1927_v23  ;;  %v1974_v62 = vor.u32 %v2522_v57, %v1973_v56  ;;  %v1978_v63 = vor.u32 %v2520_v58, %v1975_v59  ;;  %v1983_v4 = vld [vmem:[%s3869_s0 + $0x110] sm:$0xf0]  ;;  %v1989_v5 = vld [vmem:[%s3869_s0 + $0x108] sm:$0xf]  ;;  %v2526_v6 = vld [vmem:[%s3869_s0 + $0x114] sm:$0xf0] }
  0x1e   :  { %1049 = vmatpush.bf16.msra.mxu0 %v2619_v28  ;;  %v1933_v28 = vld [vmem:[%s3869_s0 + $0xa0] sm:$0xf]  ;;  %v2524_v7 = vld [vmem:[%s3869_s0 + $0x10c] sm:$0xf]  ;;  %v1991_v8 = vld [vmem:[%s3869_s0 + $0x118] sm:$0xf0] }
  0x1f   :  { %1218 = vmatpush.bf16.msra.mxu1 %v2627_v29  ;;  %v2513_v29 = vld [vmem:[%s3869_s0 + $0xac] sm:$0xf0]  ;;  %v2007_v32 = vld [vmem:[%s3869_s0 + $0x138] sm:$0xf0]  ;;  %v2531_v56 = vld [vmem:[%s3869_s0 + $0x144] sm:$0xf] }
  0x20   :  { %1387 = vmatpush.bf16.msra.mxu2 %v2635_v30  ;;  %v2511_v30 = vld [vmem:[%s3869_s0 + $0xa4] sm:$0xf]  ;;  %v1934_v36 = vor.u32 %v2513_v29, %v1933_v28  ;;  %v1999_v28 = vld [vmem:[%s3869_s0 + $0x130] sm:$0xf0]  ;;  %v2005_v29 = vld [vmem:[%s3869_s0 + $0x128] sm:$0xf] }
  0x21   :  { %1556 = vmatpush.bf16.msra.mxu3 %v2643_v31  ;;  %1050 = vmatmul.bf16.vlgmr.msra.gmra.mxu0 %v1854_v40  ;;  %v1935_v31 = vld [vmem:[%s3869_s0 + $0xb0] sm:$0xf0]  ;;  %v1949_v40 = vld [vmem:[%s3869_s0 + $0xc0] sm:$0xf]  ;;  %v2021_v59 = vld [vmem:[%s3869_s0 + $0x148] sm:$0xf] }
  0x22   :  { %1219 = vmatmul.bf16.vlgmr.msra.gmra.mxu1 %v1858_v41  ;;  %v1938_v37 = vor.u32 %v2511_v30, %v1935_v31  ;;  %v2517_v41 = vld [vmem:[%s3869_s0 + $0xcc] sm:$0xf0]  ;;  %v2530_v30 = vld [vmem:[%s3869_s0 + $0x134] sm:$0xf0]  ;;  %v2528_v31 = vld [vmem:[%s3869_s0 + $0x12c] sm:$0xf] }
  0x23   :  { %1388 = vmatmul.bf16.vlgmr.msra.gmra.mxu2 %v1862_v42  ;;  %v2515_v42 = vld [vmem:[%s3869_s0 + $0xc4] sm:$0xf]  ;;  %v1950_v48 = vor.u32 %v2517_v41, %v1949_v40  ;;  %v2006_v41 = vor.u32 %v2530_v30, %v2005_v29  ;;  %v2015_v58 = vld [vmem:[%s3869_s0 + $0x150] sm:$0xf0]  ;;  %v2039_v29 = vld [vmem:[%s3869_s0 + $0x178] sm:$0xf0] }
  0x24   :  { %1557 = vmatmul.bf16.vlgmr.msra.gmra.mxu3 %v1866_v43  ;;  %v1951_v43 = vld [vmem:[%s3869_s0 + $0xd0] sm:$0xf0] }
  0x25   :  { %v1954_v49 = vor.u32 %v2515_v42, %v1951_v43  ;;  %v2010_v42 = vor.u32 %v2528_v31, %v2007_v32 }
  0x31   :  { %1055 = vmatmul.bf16.gmra.mxu0 %v1870_v52  ;;  %v1965_v52 = vld [vmem:[%s3869_s0 + $0xe0] sm:$0xf] }
  0x32   :  { %1224 = vmatmul.bf16.gmra.mxu1 %v1874_v53  ;;  %v2521_v53 = vld [vmem:[%s3869_s0 + $0xec] sm:$0xf0] }
  0x33   :  { %1393 = vmatmul.bf16.gmra.mxu2 %v1878_v54  ;;  %v2519_v54 = vld [vmem:[%s3869_s0 + $0xe4] sm:$0xf]  ;;  %v1966_v60 = vor.u32 %v2521_v53, %v1965_v52 }
  0x34   :  { %1562 = vmatmul.bf16.gmra.mxu3 %v1882_v55  ;;  %v1967_v55 = vld [vmem:[%s3869_s0 + $0xf0] sm:$0xf0] }
  0x35   :  { %v1970_v61 = vor.u32 %v2519_v54, %v1967_v55  ;;  %v2013_v54 = vld [vmem:[%s3869_s0 + $0x140] sm:$0xf]  ;;  %v2533_v55 = vld [vmem:[%s3869_s0 + $0x14c] sm:$0xf0] }
  0x41   :  { %1060 = vmatmul.bf16.gmra.mxu0 %v1886_v0  ;;  %v2964_v0 = vld [vmem:[%s3868_s2] ss:$0 sm:$0xff] }
  0x42   :  { %1229 = vmatmul.bf16.gmra.mxu1 %v1890_v1  ;;  %v1981_v1 = vld [vmem:[%s3869_s0 + $0x100] sm:$0xf] }
  0x43   :  { %1398 = vmatmul.bf16.gmra.mxu2 %v1894_v2  ;;  %v2525_v2 = vld [vmem:[%s3869_s0 + $0x10c] sm:$0xf0] }
  0x44   :  { %1567 = vmatmul.bf16.gmra.mxu3 %v1898_v3  ;;  %v2523_v3 = vld [vmem:[%s3869_s0 + $0x104] sm:$0xf]  ;;  %v1982_v9 = vor.u32 %v2525_v2, %v1981_v1 }
  0x45   :  { %v1986_v10 = vor.u32 %v2523_v3, %v1983_v4  ;;  %v2014_v3 = vor.u32 %v2533_v55, %v2013_v54  ;;  %v2018_v4 = vor.u32 %v2531_v56, %v2015_v58  ;;  %v2047_v55 = vld [vmem:[%s3869_s0 + $0x190] sm:$0xf0]  ;;  %v2053_v56 = vld [vmem:[%s3869_s0 + $0x188] sm:$0xf]  ;;  %v2540_v58 = vld [vmem:[%s3869_s0 + $0x18c] sm:$0xf] }
  0x51   :  { %1065 = vmatmul.bf16.gmra.mxu0 %v1902_v12 }
  0x52   :  { %1234 = vmatmul.bf16.gmra.mxu1 %v1906_v13  ;;  %v1990_v13 = vor.u32 %v2526_v6, %v1989_v5 }
  0x53   :  { %1403 = vmatmul.bf16.gmra.mxu2 %v1910_v14  ;;  %v1994_v14 = vor.u32 %v2524_v7, %v1991_v8 }
  0x54   :  { %1572 = vmatmul.bf16.gmra.mxu3 %v1914_v15 }
  0x61   :  { %1070 = vmatmul.bf16.gmra.mxu0 %v1918_v24  ;;  %v1997_v24 = vld [vmem:[%s3869_s0 + $0x120] sm:$0xf] }
  0x62   :  { %1239 = vmatmul.bf16.gmra.mxu1 %v1922_v25  ;;  %v2529_v25 = vld [vmem:[%s3869_s0 + $0x12c] sm:$0xf0] }
  0x63   :  { %1408 = vmatmul.bf16.gmra.mxu2 %v1926_v26  ;;  %v2527_v26 = vld [vmem:[%s3869_s0 + $0x124] sm:$0xf] }
  0x64   :  { %1577 = vmatmul.bf16.gmra.mxu3 %v1930_v27 }
  0x71   :  { %1075 = vmatmul.bf16.gmra.mxu0 %v1934_v36  ;;  %v1998_v36 = vor.u32 %v2529_v25, %v1997_v24  ;;  %v2031_v25 = vld [vmem:[%s3869_s0 + $0x170] sm:$0xf0] }
  0x72   :  { %1244 = vmatmul.bf16.gmra.mxu1 %v1938_v37  ;;  %v2002_v37 = vor.u32 %v2527_v26, %v1999_v28  ;;  %v2037_v26 = vld [vmem:[%s3869_s0 + $0x168] sm:$0xf]  ;;  %v2536_v28 = vld [vmem:[%s3869_s0 + $0x16c] sm:$0xf] }
  0x73   :  { %1413 = vmatmul.bf16.gmra.mxu2 %v1942_v38 }
  0x74   :  { %1582 = vmatmul.bf16.gmra.mxu3 %v1946_v39 }
  0x81   :  { %1080 = vmatmul.bf16.gmra.mxu0 %v1950_v48 }
  0x82   :  { %1249 = vmatmul.bf16.gmra.mxu1 %v1954_v49 }
  0x83   :  { %1418 = vmatmul.bf16.gmra.mxu2 %v1958_v50 }
  0x84   :  { %1587 = vmatmul.bf16.gmra.mxu3 %v1962_v51 }
  0x91   :  { %1085 = vmatmul.bf16.gmra.mxu0 %v1966_v60  ;;  %v2534_v60 = vld [vmem:[%s3869_s0 + $0x154] sm:$0xf0] }
  0x92   :  { %1254 = vmatmul.bf16.gmra.mxu1 %v1970_v61  ;;  %v2532_v61 = vld [vmem:[%s3869_s0 + $0x14c] sm:$0xf]  ;;  %v2022_v8 = vor.u32 %v2534_v60, %v2021_v59  ;;  %v2055_v59 = vld [vmem:[%s3869_s0 + $0x198] sm:$0xf0] }
  0x93   :  { %1423 = vmatmul.bf16.gmra.mxu2 %v1974_v62  ;;  %v2023_v62 = vld [vmem:[%s3869_s0 + $0x158] sm:$0xf0] }
  0x94   :  { %1592 = vmatmul.bf16.gmra.mxu3 %v1978_v63 }
  0x9e   :  { %v1051_v11 = vpop.f32.mrf.mxu0 }
  0x9f   :  { %v1220_v12 = vpop.f32.mrf.mxu1  ;;  %v1052_v15 = vadd.f32 %v2964_v0, %v1051_v11 }
  0xa1   :  { %1090 = vmatmul.bf16.gmra.mxu0 %v1982_v9  ;;  %v1221_v16 = vadd.f32 %v1220_v12, %v1052_v15  ;;  %v2026_v9 = vor.u32 %v2532_v61, %v2023_v62 }
  0xa2   :  { %1259 = vmatmul.bf16.gmra.mxu1 %v1986_v10 }
  0xa3   :  { %1428 = vmatmul.bf16.gmra.mxu2 %v1990_v13 }
  0xa4   :  { %1597 = vmatmul.bf16.gmra.mxu3 %v1994_v14 }
  0xa6   :  { %v1389_v17 = vpop.f32.mrf.mxu2  ;;  %v1053_v20 = vpop.f32.mrf.mxu0 }
  0xa7   :  { %v1558_v18 = vpop.f32.mrf.mxu3  ;;  %v1390_v19 = vadd.f32 %v1389_v17, %v1221_v16  ;;  %v1222_v21 = vpop.f32.mrf.mxu1  ;;  %v1054_v23 = vadd.f32 %v2964_v0, %v1053_v20 }
  0xa9   :  { %v1559_v22 = vadd.f32 %v1558_v18, %v1390_v19  ;;  %v1223_v33 = vadd.f32 %v1222_v21, %v1054_v23  ;;  %v2029_v21 = vld [vmem:[%s3869_s0 + $0x160] sm:$0xf]  ;;  %v2535_v23 = vld [vmem:[%s3869_s0 + $0x164] sm:$0xf] }
  0xab   :  { %v1718_v27 = vmax.f32 %v1559_v22, 0.0  ;;  %v2537_v22 = vld [vmem:[%s3869_s0 + $0x16c] sm:$0xf0] }
  0xad   :  { %1783 = vst.msk [vmem:[%s3870_s3] sm:$0xff] %vm1782_vm0, %v1718_v27  ;;  %v2538_v27 = vld [vmem:[%s3869_s0 + $0x174] sm:$0xf0] }
  0xae   :  { %v1391_v34 = vpop.f32.mrf.mxu2  ;;  %v1056_v39 = vpop.f32.mrf.mxu0 }
  0xaf   :  { %v1560_v35 = vpop.f32.mrf.mxu3  ;;  %v1392_v38 = vadd.f32 %v1391_v34, %v1223_v33  ;;  %v1225_v40 = vpop.f32.mrf.mxu1  ;;  %v1057_v43 = vadd.f32 %v2964_v0, %v1056_v39  ;;  %v2030_v33 = vor.u32 %v2537_v22, %v2029_v21  ;;  %v2034_v34 = vor.u32 %v2535_v23, %v2031_v25  ;;  %v2063_v22 = vld [vmem:[%s3869_s0 + $0x1b0] sm:$0xf0]  ;;  %v2069_v23 = vld [vmem:[%s3869_s0 + $0x1a8] sm:$0xf]  ;;  %v2544_v25 = vld [vmem:[%s3869_s0 + $0x1ac] sm:$0xf] }
  0xb0   :  { %v2042_v39 = vor.u32 %v2536_v28, %v2039_v29 }
  0xb1   :  { %v1561_v44 = vadd.f32 %v1560_v35, %v1392_v38  ;;  %1095 = vmatmul.bf16.gmra.mxu0 %v1998_v36  ;;  %v1226_v46 = vadd.f32 %v1225_v40, %v1057_v43  ;;  %v2038_v38 = vor.u32 %v2538_v27, %v2037_v26  ;;  %v2071_v26 = vld [vmem:[%s3869_s0 + $0x1b8] sm:$0xf0] }
  0xb2   :  { %1264 = vmatmul.bf16.gmra.mxu1 %v2002_v37 }
  0xb3   :  { %v1719_v45 = vmax.f32 %v1561_v44, 0.0  ;;  %1433 = vmatmul.bf16.gmra.mxu2 %v2006_v41 }
  0xb4   :  { %1602 = vmatmul.bf16.gmra.mxu3 %v2010_v42 }
  0xb5   :  { %1784 = vst.msk [vmem:[%s3870_s3 + $0x8] sm:$0xff] %vm1782_vm0, %v1719_v45 }
  0xb6   :  { %v1394_v47 = vpop.f32.mrf.mxu2  ;;  %v1058_v50 = vpop.f32.mrf.mxu0 }
  0xb7   :  { %v1563_v48 = vpop.f32.mrf.mxu3  ;;  %v1395_v49 = vadd.f32 %v1394_v47, %v1226_v46  ;;  %v1227_v51 = vpop.f32.mrf.mxu1  ;;  %v1059_v53 = vadd.f32 %v2964_v0, %v1058_v50 }
  0xb9   :  { %v1564_v52 = vadd.f32 %v1563_v48, %v1395_v49  ;;  %v1228_v63 = vadd.f32 %v1227_v51, %v1059_v53  ;;  %v2045_v51 = vld [vmem:[%s3869_s0 + $0x180] sm:$0xf]  ;;  %v2539_v53 = vld [vmem:[%s3869_s0 + $0x184] sm:$0xf] }
  0xbb   :  { %v1720_v57 = vmax.f32 %v1564_v52, 0.0  ;;  %v2541_v52 = vld [vmem:[%s3869_s0 + $0x18c] sm:$0xf0] }
  0xbd   :  { %1785 = vst.msk [vmem:[%s3870_s3 + $0x10] sm:$0xff] %vm1782_vm0, %v1720_v57  ;;  %v2542_v57 = vld [vmem:[%s3869_s0 + $0x194] sm:$0xf0] }
  0xbe   :  { %v1396_v1 = vpop.f32.mrf.mxu2  ;;  %v1061_v6 = vpop.f32.mrf.mxu0 }
  0xbf   :  { %v1565_v2 = vpop.f32.mrf.mxu3  ;;  %v1397_v5 = vadd.f32 %v1396_v1, %v1228_v63  ;;  %v1230_v7 = vpop.f32.mrf.mxu1  ;;  %v1062_v10 = vadd.f32 %v2964_v0, %v1061_v6  ;;  %v2046_v63 = vor.u32 %v2541_v52, %v2045_v51  ;;  %v2050_v1 = vor.u32 %v2539_v53, %v2047_v55  ;;  %v2079_v52 = vld [vmem:[%s3869_s0 + $0x1d0] sm:$0xf0]  ;;  %v2085_v53 = vld [vmem:[%s3869_s0 + $0x1c8] sm:$0xf]  ;;  %v2548_v55 = vld [vmem:[%s3869_s0 + $0x1cc] sm:$0xf] }
  0xc0   :  { %v2058_v6 = vor.u32 %v2540_v58, %v2055_v59 }
  0xc1   :  { %v1566_v11 = vadd.f32 %v1565_v2, %v1397_v5  ;;  %1100 = vmatmul.bf16.gmra.mxu0 %v2014_v3  ;;  %v1231_v13 = vadd.f32 %v1230_v7, %v1062_v10  ;;  %v2054_v5 = vor.u32 %v2542_v57, %v2053_v56  ;;  %v2087_v56 = vld [vmem:[%s3869_s0 + $0x1d8] sm:$0xf0] }
  0xc2   :  { %1269 = vmatmul.bf16.gmra.mxu1 %v2018_v4 }
  0xc3   :  { %v1721_v12 = vmax.f32 %v1566_v11, 0.0  ;;  %1438 = vmatmul.bf16.gmra.mxu2 %v2022_v8 }
  0xc4   :  { %1607 = vmatmul.bf16.gmra.mxu3 %v2026_v9 }
  0xc5   :  { %1786 = vst.msk [vmem:[%s3870_s3 + $0x18] sm:$0xff] %vm1782_vm0, %v1721_v12 }
  0xc6   :  { %v1399_v14 = vpop.f32.mrf.mxu2  ;;  %v1063_v17 = vpop.f32.mrf.mxu0 }
  0xc7   :  { %v1568_v15 = vpop.f32.mrf.mxu3  ;;  %v1400_v16 = vadd.f32 %v1399_v14, %v1231_v13  ;;  %v1232_v18 = vpop.f32.mrf.mxu1  ;;  %v1064_v20 = vadd.f32 %v2964_v0, %v1063_v17 }
  0xc9   :  { %v1569_v19 = vadd.f32 %v1568_v15, %v1400_v16  ;;  %v1233_v30 = vadd.f32 %v1232_v18, %v1064_v20  ;;  %v2061_v18 = vld [vmem:[%s3869_s0 + $0x1a0] sm:$0xf]  ;;  %v2543_v20 = vld [vmem:[%s3869_s0 + $0x1a4] sm:$0xf] }
  0xcb   :  { %v1722_v24 = vmax.f32 %v1569_v19, 0.0  ;;  %v2545_v19 = vld [vmem:[%s3869_s0 + $0x1ac] sm:$0xf0] }
  0xcd   :  { %1787 = vst.msk [vmem:[%s3870_s3 + $0x20] sm:$0xff] %vm1782_vm0, %v1722_v24  ;;  %v2546_v24 = vld [vmem:[%s3869_s0 + $0x1b4] sm:$0xf0] }
  0xce   :  { %v1401_v31 = vpop.f32.mrf.mxu2  ;;  %v1066_v36 = vpop.f32.mrf.mxu0 }
  0xcf   :  { %v1570_v32 = vpop.f32.mrf.mxu3  ;;  %v1402_v35 = vadd.f32 %v1401_v31, %v1233_v30  ;;  %v1235_v37 = vpop.f32.mrf.mxu1  ;;  %v1067_v40 = vadd.f32 %v2964_v0, %v1066_v36  ;;  %v2062_v30 = vor.u32 %v2545_v19, %v2061_v18  ;;  %v2066_v31 = vor.u32 %v2543_v20, %v2063_v22  ;;  %v2095_v19 = vld [vmem:[%s3869_s0 + $0x1f0] sm:$0xf0]  ;;  %v2101_v20 = vld [vmem:[%s3869_s0 + $0x1e8] sm:$0xf]  ;;  %v2552_v22 = vld [vmem:[%s3869_s0 + $0x1ec] sm:$0xf] }
  0xd0   :  { %v2074_v36 = vor.u32 %v2544_v25, %v2071_v26 }
  0xd1   :  { %v1571_v41 = vadd.f32 %v1570_v32, %v1402_v35  ;;  %1105 = vmatmul.bf16.gmra.mxu0 %v2030_v33  ;;  %v1236_v43 = vadd.f32 %v1235_v37, %v1067_v40  ;;  %v2070_v35 = vor.u32 %v2546_v24, %v2069_v23  ;;  %v2103_v23 = vld [vmem:[%s3869_s0 + $0x1f8] sm:$0xf0] }
  0xd2   :  { %1274 = vmatmul.bf16.gmra.mxu1 %v2034_v34 }
  0xd3   :  { %v1723_v42 = vmax.f32 %v1571_v41, 0.0  ;;  %1443 = vmatmul.bf16.gmra.mxu2 %v2038_v38 }
  0xd4   :  { %1612 = vmatmul.bf16.gmra.mxu3 %v2042_v39 }
  0xd5   :  { %1788 = vst.msk [vmem:[%s3870_s3 + $0x28] sm:$0xff] %vm1782_vm0, %v1723_v42 }
  0xd6   :  { %v1404_v44 = vpop.f32.mrf.mxu2  ;;  %v1068_v47 = vpop.f32.mrf.mxu0 }
  0xd7   :  { %v1573_v45 = vpop.f32.mrf.mxu3  ;;  %v1405_v46 = vadd.f32 %v1404_v44, %v1236_v43  ;;  %v1237_v48 = vpop.f32.mrf.mxu1  ;;  %v1069_v50 = vadd.f32 %v2964_v0, %v1068_v47 }
  0xd9   :  { %v1574_v49 = vadd.f32 %v1573_v45, %v1405_v46  ;;  %v1238_v60 = vadd.f32 %v1237_v48, %v1069_v50  ;;  %v2077_v48 = vld [vmem:[%s3869_s0 + $0x1c0] sm:$0xf]  ;;  %v2547_v50 = vld [vmem:[%s3869_s0 + $0x1c4] sm:$0xf] }
  0xdb   :  { %v1724_v54 = vmax.f32 %v1574_v49, 0.0  ;;  %v2549_v49 = vld [vmem:[%s3869_s0 + $0x1cc] sm:$0xf0] }
  0xdd   :  { %1789 = vst.msk [vmem:[%s3870_s3 + $0x30] sm:$0xff] %vm1782_vm0, %v1724_v54  ;;  %v2550_v54 = vld [vmem:[%s3869_s0 + $0x1d4] sm:$0xf0] }
  0xde   :  { %v1406_v61 = vpop.f32.mrf.mxu2  ;;  %v1071_v3 = vpop.f32.mrf.mxu0 }
  0xdf   :  { %v1575_v62 = vpop.f32.mrf.mxu3  ;;  %v1407_v2 = vadd.f32 %v1406_v61, %v1238_v60  ;;  %v1240_v4 = vpop.f32.mrf.mxu1  ;;  %v1072_v7 = vadd.f32 %v2964_v0, %v1071_v3  ;;  %v2078_v60 = vor.u32 %v2549_v49, %v2077_v48  ;;  %v2082_v61 = vor.u32 %v2547_v50, %v2079_v52  ;;  %v2111_v49 = vld [vmem:[%s3869_s0 + $0x210] sm:$0xf0]  ;;  %v2117_v50 = vld [vmem:[%s3869_s0 + $0x208] sm:$0xf]  ;;  %v2556_v52 = vld [vmem:[%s3869_s0 + $0x20c] sm:$0xf] }
  0xe0   :  { %v2090_v3 = vor.u32 %v2548_v55, %v2087_v56 }
  0xe1   :  { %v1576_v8 = vadd.f32 %v1575_v62, %v1407_v2  ;;  %1110 = vmatmul.bf16.gmra.mxu0 %v2046_v63  ;;  %v1241_v10 = vadd.f32 %v1240_v4, %v1072_v7  ;;  %v2086_v2 = vor.u32 %v2550_v54, %v2085_v53  ;;  %v2119_v53 = vld [vmem:[%s3869_s0 + $0x218] sm:$0xf0] }
  0xe2   :  { %1279 = vmatmul.bf16.gmra.mxu1 %v2050_v1 }
  0xe3   :  { %v1725_v9 = vmax.f32 %v1576_v8, 0.0  ;;  %1448 = vmatmul.bf16.gmra.mxu2 %v2054_v5 }
  0xe4   :  { %1617 = vmatmul.bf16.gmra.mxu3 %v2058_v6 }
  0xe5   :  { %1790 = vst.msk [vmem:[%s3870_s3 + $0x38] sm:$0xff] %vm1782_vm0, %v1725_v9 }
  0xe6   :  { %v1409_v11 = vpop.f32.mrf.mxu2  ;;  %v1073_v14 = vpop.f32.mrf.mxu0 }
  0xe7   :  { %v1578_v12 = vpop.f32.mrf.mxu3  ;;  %v1410_v13 = vadd.f32 %v1409_v11, %v1241_v10  ;;  %v1242_v15 = vpop.f32.mrf.mxu1  ;;  %v1074_v17 = vadd.f32 %v2964_v0, %v1073_v14 }
  0xe9   :  { %v1579_v16 = vadd.f32 %v1578_v12, %v1410_v13  ;;  %v1243_v27 = vadd.f32 %v1242_v15, %v1074_v17  ;;  %v2093_v15 = vld [vmem:[%s3869_s0 + $0x1e0] sm:$0xf]  ;;  %v2551_v17 = vld [vmem:[%s3869_s0 + $0x1e4] sm:$0xf] }
  0xeb   :  { %v1726_v21 = vmax.f32 %v1579_v16, 0.0  ;;  %v2553_v16 = vld [vmem:[%s3869_s0 + $0x1ec] sm:$0xf0] }
  0xed   :  { %1791 = vst.msk [vmem:[%s3870_s3 + $0x40] sm:$0xff] %vm1782_vm0, %v1726_v21  ;;  %v2554_v21 = vld [vmem:[%s3869_s0 + $0x1f4] sm:$0xf0] }
  0xee   :  { %v1411_v28 = vpop.f32.mrf.mxu2  ;;  %v1076_v33 = vpop.f32.mrf.mxu0 }
  0xef   :  { %v1580_v29 = vpop.f32.mrf.mxu3  ;;  %v1412_v32 = vadd.f32 %v1411_v28, %v1243_v27  ;;  %v1245_v34 = vpop.f32.mrf.mxu1  ;;  %v1077_v37 = vadd.f32 %v2964_v0, %v1076_v33  ;;  %v2094_v27 = vor.u32 %v2553_v16, %v2093_v15  ;;  %v2098_v28 = vor.u32 %v2551_v17, %v2095_v19  ;;  %v2127_v16 = vld [vmem:[%s3869_s0 + $0x230] sm:$0xf0]  ;;  %v2133_v17 = vld [vmem:[%s3869_s0 + $0x228] sm:$0xf]  ;;  %v2560_v19 = vld [vmem:[%s3869_s0 + $0x22c] sm:$0xf] }
  0xf0   :  { %v2106_v33 = vor.u32 %v2552_v22, %v2103_v23 }
  0xf1   :  { %v1581_v38 = vadd.f32 %v1580_v29, %v1412_v32  ;;  %1115 = vmatmul.bf16.gmra.mxu0 %v2062_v30  ;;  %v1246_v40 = vadd.f32 %v1245_v34, %v1077_v37  ;;  %v2102_v32 = vor.u32 %v2554_v21, %v2101_v20  ;;  %v2135_v20 = vld [vmem:[%s3869_s0 + $0x238] sm:$0xf0] }
  0xf2   :  { %1284 = vmatmul.bf16.gmra.mxu1 %v2066_v31 }
  0xf3   :  { %v1727_v39 = vmax.f32 %v1581_v38, 0.0  ;;  %1453 = vmatmul.bf16.gmra.mxu2 %v2070_v35 }
  0xf4   :  { %1622 = vmatmul.bf16.gmra.mxu3 %v2074_v36 }
  0xf5   :  { %1792 = vst.msk [vmem:[%s3870_s3 + $0x48] sm:$0xff] %vm1782_vm0, %v1727_v39 }
  0xf6   :  { %v1414_v41 = vpop.f32.mrf.mxu2  ;;  %v1078_v44 = vpop.f32.mrf.mxu0 }
  0xf7   :  { %v1583_v42 = vpop.f32.mrf.mxu3  ;;  %v1415_v43 = vadd.f32 %v1414_v41, %v1246_v40  ;;  %v1247_v45 = vpop.f32.mrf.mxu1  ;;  %v1079_v47 = vadd.f32 %v2964_v0, %v1078_v44 }
  0xf9   :  { %v1584_v46 = vadd.f32 %v1583_v42, %v1415_v43  ;;  %v1248_v57 = vadd.f32 %v1247_v45, %v1079_v47  ;;  %v2109_v45 = vld [vmem:[%s3869_s0 + $0x200] sm:$0xf]  ;;  %v2555_v47 = vld [vmem:[%s3869_s0 + $0x204] sm:$0xf] }
  0xfb   :  { %v1728_v51 = vmax.f32 %v1584_v46, 0.0  ;;  %v2557_v46 = vld [vmem:[%s3869_s0 + $0x20c] sm:$0xf0] }
  0xfd   :  { %1793 = vst.msk [vmem:[%s3870_s3 + $0x50] sm:$0xff] %vm1782_vm0, %v1728_v51  ;;  %v2558_v51 = vld [vmem:[%s3869_s0 + $0x214] sm:$0xf0] }
  0xfe   :  { %v1416_v58 = vpop.f32.mrf.mxu2  ;;  %v1081_v63 = vpop.f32.mrf.mxu0 }
  0xff   :  { %v1585_v59 = vpop.f32.mrf.mxu3  ;;  %v1417_v62 = vadd.f32 %v1416_v58, %v1248_v57  ;;  %v1250_v1 = vpop.f32.mrf.mxu1  ;;  %v1082_v4 = vadd.f32 %v2964_v0, %v1081_v63  ;;  %v2110_v57 = vor.u32 %v2557_v46, %v2109_v45  ;;  %v2114_v58 = vor.u32 %v2555_v47, %v2111_v49  ;;  %v2143_v46 = vld [vmem:[%s3869_s0 + $0x250] sm:$0xf0]  ;;  %v2149_v47 = vld [vmem:[%s3869_s0 + $0x248] sm:$0xf]  ;;  %v2564_v49 = vld [vmem:[%s3869_s0 + $0x24c] sm:$0xf] }
 0x100   :  { %v2122_v63 = vor.u32 %v2556_v52, %v2119_v53 }
 0x101   :  { %v1586_v5 = vadd.f32 %v1585_v59, %v1417_v62  ;;  %1120 = vmatmul.bf16.gmra.mxu0 %v2078_v60  ;;  %v1251_v7 = vadd.f32 %v1250_v1, %v1082_v4  ;;  %v2118_v62 = vor.u32 %v2558_v51, %v2117_v50  ;;  %v2151_v50 = vld [vmem:[%s3869_s0 + $0x258] sm:$0xf0] }
 0x102   :  { %1289 = vmatmul.bf16.gmra.mxu1 %v2082_v61 }
 0x103   :  { %v1729_v6 = vmax.f32 %v1586_v5, 0.0  ;;  %1458 = vmatmul.bf16.gmra.mxu2 %v2086_v2 }
 0x104   :  { %1627 = vmatmul.bf16.gmra.mxu3 %v2090_v3 }
 0x105   :  { %1794 = vst.msk [vmem:[%s3870_s3 + $0x58] sm:$0xff] %vm1782_vm0, %v1729_v6 }
 0x106   :  { %v1419_v8 = vpop.f32.mrf.mxu2  ;;  %v1083_v11 = vpop.f32.mrf.mxu0 }
 0x107   :  { %v1588_v9 = vpop.f32.mrf.mxu3  ;;  %v1420_v10 = vadd.f32 %v1419_v8, %v1251_v7  ;;  %v1252_v12 = vpop.f32.mrf.mxu1  ;;  %v1084_v14 = vadd.f32 %v2964_v0, %v1083_v11 }
 0x109   :  { %v1589_v13 = vadd.f32 %v1588_v9, %v1420_v10  ;;  %v1253_v24 = vadd.f32 %v1252_v12, %v1084_v14  ;;  %v2125_v12 = vld [vmem:[%s3869_s0 + $0x220] sm:$0xf]  ;;  %v2559_v14 = vld [vmem:[%s3869_s0 + $0x224] sm:$0xf] }
 0x10b   :  { %v1730_v18 = vmax.f32 %v1589_v13, 0.0  ;;  %v2561_v13 = vld [vmem:[%s3869_s0 + $0x22c] sm:$0xf0] }
 0x10d   :  { %1795 = vst.msk [vmem:[%s3870_s3 + $0x60] sm:$0xff] %vm1782_vm0, %v1730_v18  ;;  %v2562_v18 = vld [vmem:[%s3869_s0 + $0x234] sm:$0xf0] }
 0x10e   :  { %v1421_v25 = vpop.f32.mrf.mxu2  ;;  %v1086_v30 = vpop.f32.mrf.mxu0 }
 0x10f   :  { %v1590_v26 = vpop.f32.mrf.mxu3  ;;  %v1422_v29 = vadd.f32 %v1421_v25, %v1253_v24  ;;  %v1255_v31 = vpop.f32.mrf.mxu1  ;;  %v1087_v34 = vadd.f32 %v2964_v0, %v1086_v30  ;;  %v2126_v24 = vor.u32 %v2561_v13, %v2125_v12  ;;  %v2130_v25 = vor.u32 %v2559_v14, %v2127_v16  ;;  %v2159_v13 = vld [vmem:[%s3869_s0 + $0x270] sm:$0xf0]  ;;  %v2165_v14 = vld [vmem:[%s3869_s0 + $0x268] sm:$0xf]  ;;  %v2568_v16 = vld [vmem:[%s3869_s0 + $0x26c] sm:$0xf] }
 0x110   :  { %v2138_v30 = vor.u32 %v2560_v19, %v2135_v20 }
 0x111   :  { %v1591_v35 = vadd.f32 %v1590_v26, %v1422_v29  ;;  %1125 = vmatmul.bf16.gmra.mxu0 %v2094_v27  ;;  %v1256_v37 = vadd.f32 %v1255_v31, %v1087_v34  ;;  %v2134_v29 = vor.u32 %v2562_v18, %v2133_v17  ;;  %v2167_v17 = vld [vmem:[%s3869_s0 + $0x278] sm:$0xf0] }
 0x112   :  { %1294 = vmatmul.bf16.gmra.mxu1 %v2098_v28 }
 0x113   :  { %v1731_v36 = vmax.f32 %v1591_v35, 0.0  ;;  %1463 = vmatmul.bf16.gmra.mxu2 %v2102_v32 }
 0x114   :  { %1632 = vmatmul.bf16.gmra.mxu3 %v2106_v33 }
 0x115   :  { %1796 = vst.msk [vmem:[%s3870_s3 + $0x68] sm:$0xff] %vm1782_vm0, %v1731_v36 }
 0x116   :  { %v1424_v38 = vpop.f32.mrf.mxu2  ;;  %v1088_v41 = vpop.f32.mrf.mxu0 }
 0x117   :  { %v1593_v39 = vpop.f32.mrf.mxu3  ;;  %v1425_v40 = vadd.f32 %v1424_v38, %v1256_v37  ;;  %v1257_v42 = vpop.f32.mrf.mxu1  ;;  %v1089_v44 = vadd.f32 %v2964_v0, %v1088_v41 }
 0x119   :  { %v1594_v43 = vadd.f32 %v1593_v39, %v1425_v40  ;;  %v1258_v54 = vadd.f32 %v1257_v42, %v1089_v44  ;;  %v2141_v42 = vld [vmem:[%s3869_s0 + $0x240] sm:$0xf]  ;;  %v2563_v44 = vld [vmem:[%s3869_s0 + $0x244] sm:$0xf] }
 0x11b   :  { %v1732_v48 = vmax.f32 %v1594_v43, 0.0  ;;  %v2565_v43 = vld [vmem:[%s3869_s0 + $0x24c] sm:$0xf0] }
 0x11d   :  { %1797 = vst.msk [vmem:[%s3870_s3 + $0x70] sm:$0xff] %vm1782_vm0, %v1732_v48  ;;  %v2566_v48 = vld [vmem:[%s3869_s0 + $0x254] sm:$0xf0] }
 0x11e   :  { %v1426_v55 = vpop.f32.mrf.mxu2  ;;  %v1091_v60 = vpop.f32.mrf.mxu0 }
 0x11f   :  { %v1595_v56 = vpop.f32.mrf.mxu3  ;;  %v1427_v59 = vadd.f32 %v1426_v55, %v1258_v54  ;;  %v1260_v61 = vpop.f32.mrf.mxu1  ;;  %v1092_v1 = vadd.f32 %v2964_v0, %v1091_v60  ;;  %v2142_v54 = vor.u32 %v2565_v43, %v2141_v42  ;;  %v2146_v55 = vor.u32 %v2563_v44, %v2143_v46  ;;  %v2175_v43 = vld [vmem:[%s3869_s0 + $0x290] sm:$0xf0]  ;;  %v2181_v44 = vld [vmem:[%s3869_s0 + $0x288] sm:$0xf]  ;;  %v2572_v46 = vld [vmem:[%s3869_s0 + $0x28c] sm:$0xf] }
 0x120   :  { %v2154_v60 = vor.u32 %v2564_v49, %v2151_v50 }
 0x121   :  { %v1596_v2 = vadd.f32 %v1595_v56, %v1427_v59  ;;  %1130 = vmatmul.bf16.gmra.mxu0 %v2110_v57  ;;  %v1261_v4 = vadd.f32 %v1260_v61, %v1092_v1  ;;  %v2150_v59 = vor.u32 %v2566_v48, %v2149_v47  ;;  %v2183_v47 = vld [vmem:[%s3869_s0 + $0x298] sm:$0xf0] }
 0x122   :  { %1299 = vmatmul.bf16.gmra.mxu1 %v2114_v58 }
 0x123   :  { %v1733_v3 = vmax.f32 %v1596_v2, 0.0  ;;  %1468 = vmatmul.bf16.gmra.mxu2 %v2118_v62 }
 0x124   :  { %1637 = vmatmul.bf16.gmra.mxu3 %v2122_v63 }
 0x125   :  { %1798 = vst.msk [vmem:[%s3870_s3 + $0x78] sm:$0xff] %vm1782_vm0, %v1733_v3 }
 0x126   :  { %v1429_v5 = vpop.f32.mrf.mxu2  ;;  %v1093_v8 = vpop.f32.mrf.mxu0 }
 0x127   :  { %v1598_v6 = vpop.f32.mrf.mxu3  ;;  %v1430_v7 = vadd.f32 %v1429_v5, %v1261_v4  ;;  %v1262_v9 = vpop.f32.mrf.mxu1  ;;  %v1094_v11 = vadd.f32 %v2964_v0, %v1093_v8 }
 0x129   :  { %v1599_v10 = vadd.f32 %v1598_v6, %v1430_v7  ;;  %v1263_v21 = vadd.f32 %v1262_v9, %v1094_v11  ;;  %v2157_v9 = vld [vmem:[%s3869_s0 + $0x260] sm:$0xf]  ;;  %v2567_v11 = vld [vmem:[%s3869_s0 + $0x264] sm:$0xf] }
 0x12b   :  { %v1734_v15 = vmax.f32 %v1599_v10, 0.0  ;;  %v2569_v10 = vld [vmem:[%s3869_s0 + $0x26c] sm:$0xf0] }
 0x12d   :  { %1799 = vst.msk [vmem:[%s3870_s3 + $0x80] sm:$0xff] %vm1782_vm0, %v1734_v15  ;;  %v2570_v15 = vld [vmem:[%s3869_s0 + $0x274] sm:$0xf0] }
 0x12e   :  { %v1431_v22 = vpop.f32.mrf.mxu2  ;;  %v1096_v27 = vpop.f32.mrf.mxu0 }
 0x12f   :  { %v1600_v23 = vpop.f32.mrf.mxu3  ;;  %v1432_v26 = vadd.f32 %v1431_v22, %v1263_v21  ;;  %v1265_v28 = vpop.f32.mrf.mxu1  ;;  %v1097_v31 = vadd.f32 %v2964_v0, %v1096_v27  ;;  %v2158_v21 = vor.u32 %v2569_v10, %v2157_v9  ;;  %v2162_v22 = vor.u32 %v2567_v11, %v2159_v13  ;;  %v2191_v10 = vld [vmem:[%s3869_s0 + $0x2b0] sm:$0xf0]  ;;  %v2197_v11 = vld [vmem:[%s3869_s0 + $0x2a8] sm:$0xf]  ;;  %v2576_v13 = vld [vmem:[%s3869_s0 + $0x2ac] sm:$0xf] }
 0x130   :  { %v2170_v27 = vor.u32 %v2568_v16, %v2167_v17 }
 0x131   :  { %v1601_v32 = vadd.f32 %v1600_v23, %v1432_v26  ;;  %1135 = vmatmul.bf16.gmra.mxu0 %v2126_v24  ;;  %v1266_v34 = vadd.f32 %v1265_v28, %v1097_v31  ;;  %v2166_v26 = vor.u32 %v2570_v15, %v2165_v14  ;;  %v2199_v14 = vld [vmem:[%s3869_s0 + $0x2b8] sm:$0xf0] }
 0x132   :  { %1304 = vmatmul.bf16.gmra.mxu1 %v2130_v25 }
 0x133   :  { %v1735_v33 = vmax.f32 %v1601_v32, 0.0  ;;  %1473 = vmatmul.bf16.gmra.mxu2 %v2134_v29 }
 0x134   :  { %1642 = vmatmul.bf16.gmra.mxu3 %v2138_v30 }
 0x135   :  { %1800 = vst.msk [vmem:[%s3870_s3 + $0x88] sm:$0xff] %vm1782_vm0, %v1735_v33 }
 0x136   :  { %v1434_v35 = vpop.f32.mrf.mxu2  ;;  %v1098_v38 = vpop.f32.mrf.mxu0 }
 0x137   :  { %v1603_v36 = vpop.f32.mrf.mxu3  ;;  %v1435_v37 = vadd.f32 %v1434_v35, %v1266_v34  ;;  %v1267_v39 = vpop.f32.mrf.mxu1  ;;  %v1099_v41 = vadd.f32 %v2964_v0, %v1098_v38 }
 0x139   :  { %v1604_v40 = vadd.f32 %v1603_v36, %v1435_v37  ;;  %v1268_v51 = vadd.f32 %v1267_v39, %v1099_v41  ;;  %v2173_v39 = vld [vmem:[%s3869_s0 + $0x280] sm:$0xf]  ;;  %v2571_v41 = vld [vmem:[%s3869_s0 + $0x284] sm:$0xf] }
 0x13b   :  { %v1736_v45 = vmax.f32 %v1604_v40, 0.0  ;;  %v2573_v40 = vld [vmem:[%s3869_s0 + $0x28c] sm:$0xf0] }
 0x13d   :  { %1801 = vst.msk [vmem:[%s3870_s3 + $0x90] sm:$0xff] %vm1782_vm0, %v1736_v45  ;;  %v2574_v45 = vld [vmem:[%s3869_s0 + $0x294] sm:$0xf0] }
 0x13e   :  { %v1436_v52 = vpop.f32.mrf.mxu2  ;;  %v1101_v57 = vpop.f32.mrf.mxu0 }
 0x13f   :  { %v1605_v53 = vpop.f32.mrf.mxu3  ;;  %v1437_v56 = vadd.f32 %v1436_v52, %v1268_v51  ;;  %v1270_v58 = vpop.f32.mrf.mxu1  ;;  %v1102_v61 = vadd.f32 %v2964_v0, %v1101_v57  ;;  %v2174_v51 = vor.u32 %v2573_v40, %v2173_v39  ;;  %v2178_v52 = vor.u32 %v2571_v41, %v2175_v43  ;;  %v2207_v40 = vld [vmem:[%s3869_s0 + $0x2d0] sm:$0xf0]  ;;  %v2582_v41 = vld [vmem:[%s3869_s0 + $0x2d4] sm:$0xf0]  ;;  %v2215_v43 = vld [vmem:[%s3869_s0 + $0x2d8] sm:$0xf0] }
 0x140   :  { %v2186_v57 = vor.u32 %v2572_v46, %v2183_v47 }
 0x141   :  { %v1606_v62 = vadd.f32 %v1605_v53, %v1437_v56  ;;  %1140 = vmatmul.bf16.gmra.mxu0 %v2142_v54  ;;  %v1271_v1 = vadd.f32 %v1270_v58, %v1102_v61  ;;  %v2182_v56 = vor.u32 %v2574_v45, %v2181_v44 }
 0x142   :  { %1309 = vmatmul.bf16.gmra.mxu1 %v2146_v55 }
 0x143   :  { %v1737_v63 = vmax.f32 %v1606_v62, 0.0  ;;  %1478 = vmatmul.bf16.gmra.mxu2 %v2150_v59 }
 0x144   :  { %1647 = vmatmul.bf16.gmra.mxu3 %v2154_v60 }
 0x145   :  { %1802 = vst.msk [vmem:[%s3870_s3 + $0x98] sm:$0xff] %vm1782_vm0, %v1737_v63 }
 0x146   :  { %v1439_v2 = vpop.f32.mrf.mxu2  ;;  %v1103_v5 = vpop.f32.mrf.mxu0 }
 0x147   :  { %v1608_v3 = vpop.f32.mrf.mxu3  ;;  %v1440_v4 = vadd.f32 %v1439_v2, %v1271_v1  ;;  %v1272_v6 = vpop.f32.mrf.mxu1  ;;  %v1104_v8 = vadd.f32 %v2964_v0, %v1103_v5 }
 0x149   :  { %v1609_v7 = vadd.f32 %v1608_v3, %v1440_v4  ;;  %v1273_v18 = vadd.f32 %v1272_v6, %v1104_v8  ;;  %v2189_v6 = vld [vmem:[%s3869_s0 + $0x2a0] sm:$0xf]  ;;  %v2575_v8 = vld [vmem:[%s3869_s0 + $0x2a4] sm:$0xf] }
 0x14b   :  { %v1738_v12 = vmax.f32 %v1609_v7, 0.0  ;;  %v2577_v7 = vld [vmem:[%s3869_s0 + $0x2ac] sm:$0xf0] }
 0x14d   :  { %1803 = vst.msk [vmem:[%s3870_s3 + $0xa0] sm:$0xff] %vm1782_vm0, %v1738_v12  ;;  %v2578_v12 = vld [vmem:[%s3869_s0 + $0x2b4] sm:$0xf0] }
 0x14e   :  { %v1441_v19 = vpop.f32.mrf.mxu2  ;;  %v1106_v24 = vpop.f32.mrf.mxu0 }
 0x14f   :  { %v1610_v20 = vpop.f32.mrf.mxu3  ;;  %v1442_v23 = vadd.f32 %v1441_v19, %v1273_v18  ;;  %v1275_v25 = vpop.f32.mrf.mxu1  ;;  %v1107_v28 = vadd.f32 %v2964_v0, %v1106_v24  ;;  %v2190_v18 = vor.u32 %v2577_v7, %v2189_v6  ;;  %v2194_v19 = vor.u32 %v2575_v8, %v2191_v10  ;;  %v2223_v7 = vld [vmem:[%s3869_s0 + $0x2f0] sm:$0xf0]  ;;  %v2229_v8 = vld [vmem:[%s3869_s0 + $0x2e8] sm:$0xf]  ;;  %v2584_v10 = vld [vmem:[%s3869_s0 + $0x2ec] sm:$0xf] }
 0x150   :  { %v2202_v24 = vor.u32 %v2576_v13, %v2199_v14 }
 0x151   :  { %v1611_v29 = vadd.f32 %v1610_v20, %v1442_v23  ;;  %1145 = vmatmul.bf16.gmra.mxu0 %v2158_v21  ;;  %v1276_v31 = vadd.f32 %v1275_v25, %v1107_v28  ;;  %v2198_v23 = vor.u32 %v2578_v12, %v2197_v11  ;;  %v2231_v11 = vld [vmem:[%s3869_s0 + $0x2f8] sm:$0xf0] }
 0x152   :  { %1314 = vmatmul.bf16.gmra.mxu1 %v2162_v22 }
 0x153   :  { %v1739_v30 = vmax.f32 %v1611_v29, 0.0  ;;  %1483 = vmatmul.bf16.gmra.mxu2 %v2166_v26 }
 0x154   :  { %1652 = vmatmul.bf16.gmra.mxu3 %v2170_v27 }
 0x155   :  { %1804 = vst.msk [vmem:[%s3870_s3 + $0xa8] sm:$0xff] %vm1782_vm0, %v1739_v30 }
 0x156   :  { %v1444_v32 = vpop.f32.mrf.mxu2  ;;  %v1108_v35 = vpop.f32.mrf.mxu0 }
 0x157   :  { %v1613_v33 = vpop.f32.mrf.mxu3  ;;  %v1445_v34 = vadd.f32 %v1444_v32, %v1276_v31  ;;  %v1277_v36 = vpop.f32.mrf.mxu1  ;;  %v1109_v38 = vadd.f32 %v2964_v0, %v1108_v35 }
 0x159   :  { %v1614_v37 = vadd.f32 %v1613_v33, %v1445_v34  ;;  %v1278_v48 = vadd.f32 %v1277_v36, %v1109_v38  ;;  %v2205_v36 = vld [vmem:[%s3869_s0 + $0x2c0] sm:$0xf]  ;;  %v2579_v38 = vld [vmem:[%s3869_s0 + $0x2c4] sm:$0xf] }
 0x15b   :  { %v1740_v42 = vmax.f32 %v1614_v37, 0.0  ;;  %v2581_v37 = vld [vmem:[%s3869_s0 + $0x2cc] sm:$0xf0] }
 0x15c   :  { %v2206_v47 = vor.u32 %v2581_v37, %v2205_v36  ;;  %v2239_v37 = vld [vmem:[%s3869_s0 + $0x310] sm:$0xf0] }
 0x15d   :  { %1805 = vst.msk [vmem:[%s3870_s3 + $0xb0] sm:$0xff] %vm1782_vm0, %v1740_v42  ;;  %v2580_v42 = vld [vmem:[%s3869_s0 + $0x2cc] sm:$0xf] }
 0x15e   :  { %v1446_v49 = vpop.f32.mrf.mxu2  ;;  %v1111_v54 = vpop.f32.mrf.mxu0 }
 0x15f   :  { %v1615_v50 = vpop.f32.mrf.mxu3  ;;  %v1447_v53 = vadd.f32 %v1446_v49, %v1278_v48  ;;  %v1280_v55 = vpop.f32.mrf.mxu1  ;;  %v1112_v58 = vadd.f32 %v2964_v0, %v1111_v54  ;;  %v2210_v48 = vor.u32 %v2579_v38, %v2207_v40  ;;  %v3465_v54 = vld [vmem:[%s3868_s2] ss:$0 sm:$0xff]  ;;  %v2245_v38 = vld [vmem:[%s3869_s0 + $0x308] sm:$0xf]  ;;  %v2588_v40 = vld [vmem:[%s3869_s0 + $0x30c] sm:$0xf] }
 0x161   :  { %v1616_v59 = vadd.f32 %v1615_v50, %v1447_v53  ;;  %1150 = vmatmul.bf16.gmra.mxu0 %v2174_v51  ;;  %v1281_v61 = vadd.f32 %v1280_v55, %v1112_v58  ;;  %v2218_v53 = vor.u32 %v2580_v42, %v2215_v43 }
 0x162   :  { %1319 = vmatmul.bf16.gmra.mxu1 %v2178_v52 }
 0x163   :  { %v1741_v60 = vmax.f32 %v1616_v59, 0.0  ;;  %1488 = vmatmul.bf16.gmra.mxu2 %v2182_v56 }
 0x164   :  { %1657 = vmatmul.bf16.gmra.mxu3 %v2186_v57 }
 0x165   :  { %1806 = vst.msk [vmem:[%s3870_s3 + $0xb8] sm:$0xff] %vm1782_vm0, %v1741_v60 }
 0x166   :  { %v1449_v62 = vpop.f32.mrf.mxu2  ;;  %v1113_v2 = vpop.f32.mrf.mxu0 }
 0x167   :  { %v1618_v63 = vpop.f32.mrf.mxu3  ;;  %v1450_v1 = vadd.f32 %v1449_v62, %v1281_v61  ;;  %v1282_v3 = vpop.f32.mrf.mxu1  ;;  %v1114_v5 = vadd.f32 %v2964_v0, %v1113_v2 }
 0x169   :  { %v1619_v4 = vadd.f32 %v1618_v63, %v1450_v1  ;;  %v1283_v15 = vadd.f32 %v1282_v3, %v1114_v5  ;;  %v2221_v3 = vld [vmem:[%s3869_s0 + $0x2e0] sm:$0xf]  ;;  %v2583_v5 = vld [vmem:[%s3869_s0 + $0x2e4] sm:$0xf] }
 0x16b   :  { %v1742_v9 = vmax.f32 %v1619_v4, 0.0  ;;  %v2585_v4 = vld [vmem:[%s3869_s0 + $0x2ec] sm:$0xf0] }
 0x16d   :  { %1807 = vst.msk [vmem:[%s3870_s3 + $0xc0] sm:$0xff] %vm1782_vm0, %v1742_v9  ;;  %v2586_v9 = vld [vmem:[%s3869_s0 + $0x2f4] sm:$0xf0] }
 0x16e   :  { %v1451_v16 = vpop.f32.mrf.mxu2  ;;  %v1116_v21 = vpop.f32.mrf.mxu0 }
 0x16f   :  { %v1620_v17 = vpop.f32.mrf.mxu3  ;;  %v1452_v20 = vadd.f32 %v1451_v16, %v1283_v15  ;;  %v1285_v22 = vpop.f32.mrf.mxu1  ;;  %v1117_v25 = vadd.f32 %v2964_v0, %v1116_v21  ;;  %v2222_v15 = vor.u32 %v2585_v4, %v2221_v3  ;;  %v2226_v16 = vor.u32 %v2583_v5, %v2223_v7  ;;  %v2255_v4 = vld [vmem:[%s3869_s0 + $0x330] sm:$0xf0]  ;;  %v2261_v5 = vld [vmem:[%s3869_s0 + $0x328] sm:$0xf]  ;;  %v2592_v7 = vld [vmem:[%s3869_s0 + $0x32c] sm:$0xf] }
 0x170   :  { %v2234_v21 = vor.u32 %v2584_v10, %v2231_v11 }
 0x171   :  { %v1621_v26 = vadd.f32 %v1620_v17, %v1452_v20  ;;  %1155 = vmatmul.bf16.gmra.mxu0 %v2190_v18  ;;  %v1286_v28 = vadd.f32 %v1285_v22, %v1117_v25  ;;  %v2230_v20 = vor.u32 %v2586_v9, %v2229_v8  ;;  %v2263_v8 = vld [vmem:[%s3869_s0 + $0x338] sm:$0xf0] }
 0x172   :  { %1324 = vmatmul.bf16.gmra.mxu1 %v2194_v19 }
 0x173   :  { %v1743_v27 = vmax.f32 %v1621_v26, 0.0  ;;  %1493 = vmatmul.bf16.gmra.mxu2 %v2198_v23 }
 0x174   :  { %1662 = vmatmul.bf16.gmra.mxu3 %v2202_v24 }
 0x175   :  { %1808 = vst.msk [vmem:[%s3870_s3 + $0xc8] sm:$0xff] %vm1782_vm0, %v1743_v27 }
 0x176   :  { %v1454_v29 = vpop.f32.mrf.mxu2  ;;  %v1118_v32 = vpop.f32.mrf.mxu0 }
 0x177   :  { %v1623_v30 = vpop.f32.mrf.mxu3  ;;  %v1455_v31 = vadd.f32 %v1454_v29, %v1286_v28  ;;  %v1287_v33 = vpop.f32.mrf.mxu1  ;;  %v1119_v35 = vadd.f32 %v2964_v0, %v1118_v32  ;;  %v2213_v0 = vld [vmem:[%s3869_s0 + $0x2c8] sm:$0xf] }
 0x178   :  { %v2214_v52 = vor.u32 %v2582_v41, %v2213_v0  ;;  %v2247_v0 = vld [vmem:[%s3869_s0 + $0x318] sm:$0xf0] }
 0x179   :  { %v1624_v34 = vadd.f32 %v1623_v30, %v1455_v31  ;;  %v1288_v44 = vadd.f32 %v1287_v33, %v1119_v35  ;;  %v2237_v33 = vld [vmem:[%s3869_s0 + $0x300] sm:$0xf]  ;;  %v2587_v35 = vld [vmem:[%s3869_s0 + $0x304] sm:$0xf] }
 0x17b   :  { %v1744_v39 = vmax.f32 %v1624_v34, 0.0  ;;  %v2589_v34 = vld [vmem:[%s3869_s0 + $0x30c] sm:$0xf0] }
 0x17d   :  { %1809 = vst.msk [vmem:[%s3870_s3 + $0xd0] sm:$0xff] %vm1782_vm0, %v1744_v39  ;;  %v2590_v39 = vld [vmem:[%s3869_s0 + $0x314] sm:$0xf0] }
 0x17e   :  { %v1456_v45 = vpop.f32.mrf.mxu2  ;;  %v1121_v50 = vpop.f32.mrf.mxu0 }
 0x17f   :  { %v1625_v46 = vpop.f32.mrf.mxu3  ;;  %v1457_v49 = vadd.f32 %v1456_v45, %v1288_v44  ;;  %v1290_v51 = vpop.f32.mrf.mxu1  ;;  %v1122_v55 = vadd.f32 %v3465_v54, %v1121_v50  ;;  %v2238_v44 = vor.u32 %v2589_v34, %v2237_v33  ;;  %v2242_v45 = vor.u32 %v2587_v35, %v2239_v37  ;;  %v2271_v34 = vld [vmem:[%s3869_s0 + $0x350] sm:$0xf0]  ;;  %v2277_v35 = vld [vmem:[%s3869_s0 + $0x348] sm:$0xf]  ;;  %v2596_v37 = vld [vmem:[%s3869_s0 + $0x34c] sm:$0xf] }
 0x180   :  { %v2250_v50 = vor.u32 %v2588_v40, %v2247_v0 }
 0x181   :  { %v1626_v56 = vadd.f32 %v1625_v46, %v1457_v49  ;;  %1160 = vmatmul.bf16.gmra.mxu0 %v2206_v47  ;;  %v1291_v58 = vadd.f32 %v1290_v51, %v1122_v55  ;;  %v2246_v49 = vor.u32 %v2590_v39, %v2245_v38  ;;  %v2279_v38 = vld [vmem:[%s3869_s0 + $0x358] sm:$0xf0] }
 0x182   :  { %1329 = vmatmul.bf16.gmra.mxu1 %v2210_v48 }
 0x183   :  { %v1745_v57 = vmax.f32 %v1626_v56, 0.0  ;;  %1498 = vmatmul.bf16.gmra.mxu2 %v2214_v52 }
 0x184   :  { %1667 = vmatmul.bf16.gmra.mxu3 %v2218_v53 }
 0x185   :  { %1810 = vst.msk [vmem:[%s3870_s3 + $0xd8] sm:$0xff] %vm1782_vm0, %v1745_v57 }
 0x186   :  { %v1459_v59 = vpop.f32.mrf.mxu2  ;;  %v1123_v62 = vpop.f32.mrf.mxu0 }
 0x187   :  { %v1628_v60 = vpop.f32.mrf.mxu3  ;;  %v1460_v61 = vadd.f32 %v1459_v59, %v1291_v58  ;;  %v1292_v63 = vpop.f32.mrf.mxu1  ;;  %v1124_v2 = vadd.f32 %v3465_v54, %v1123_v62 }
 0x189   :  { %v1629_v1 = vadd.f32 %v1628_v60, %v1460_v61  ;;  %v1293_v12 = vadd.f32 %v1292_v63, %v1124_v2  ;;  %v2253_v63 = vld [vmem:[%s3869_s0 + $0x320] sm:$0xf]  ;;  %v2591_v2 = vld [vmem:[%s3869_s0 + $0x324] sm:$0xf] }
 0x18b   :  { %v1746_v6 = vmax.f32 %v1629_v1, 0.0  ;;  %v2593_v1 = vld [vmem:[%s3869_s0 + $0x32c] sm:$0xf0] }
 0x18d   :  { %1811 = vst.msk [vmem:[%s3870_s3 + $0xe0] sm:$0xff] %vm1782_vm0, %v1746_v6  ;;  %v2594_v6 = vld [vmem:[%s3869_s0 + $0x334] sm:$0xf0] }
 0x18e   :  { %v1461_v13 = vpop.f32.mrf.mxu2  ;;  %v1126_v18 = vpop.f32.mrf.mxu0 }
 0x18f   :  { %v1630_v14 = vpop.f32.mrf.mxu3  ;;  %v1462_v17 = vadd.f32 %v1461_v13, %v1293_v12  ;;  %v1295_v19 = vpop.f32.mrf.mxu1  ;;  %v1127_v22 = vadd.f32 %v3465_v54, %v1126_v18  ;;  %v2254_v12 = vor.u32 %v2593_v1, %v2253_v63  ;;  %v2258_v13 = vor.u32 %v2591_v2, %v2255_v4  ;;  %v2287_v1 = vld [vmem:[%s3869_s0 + $0x370] sm:$0xf0]  ;;  %v2293_v2 = vld [vmem:[%s3869_s0 + $0x368] sm:$0xf]  ;;  %v2600_v4 = vld [vmem:[%s3869_s0 + $0x36c] sm:$0xf] }
 0x190   :  { %v2266_v18 = vor.u32 %v2592_v7, %v2263_v8 }
 0x191   :  { %v1631_v23 = vadd.f32 %v1630_v14, %v1462_v17  ;;  %1165 = vmatmul.bf16.gmra.mxu0 %v2222_v15  ;;  %v1296_v25 = vadd.f32 %v1295_v19, %v1127_v22  ;;  %v2262_v17 = vor.u32 %v2594_v6, %v2261_v5  ;;  %v2295_v5 = vld [vmem:[%s3869_s0 + $0x378] sm:$0xf0] }
 0x192   :  { %1334 = vmatmul.bf16.gmra.mxu1 %v2226_v16 }
 0x193   :  { %v1747_v24 = vmax.f32 %v1631_v23, 0.0  ;;  %1503 = vmatmul.bf16.gmra.mxu2 %v2230_v20 }
 0x194   :  { %1672 = vmatmul.bf16.gmra.mxu3 %v2234_v21 }
 0x195   :  { %1812 = vst.msk [vmem:[%s3870_s3 + $0xe8] sm:$0xff] %vm1782_vm0, %v1747_v24 }
 0x196   :  { %v1464_v26 = vpop.f32.mrf.mxu2  ;;  %v1128_v29 = vpop.f32.mrf.mxu0 }
 0x197   :  { %v1633_v27 = vpop.f32.mrf.mxu3  ;;  %v1465_v28 = vadd.f32 %v1464_v26, %v1296_v25  ;;  %v1297_v30 = vpop.f32.mrf.mxu1  ;;  %v1129_v32 = vadd.f32 %v3465_v54, %v1128_v29 }
 0x199   :  { %v1634_v31 = vadd.f32 %v1633_v27, %v1465_v28  ;;  %v1298_v41 = vadd.f32 %v1297_v30, %v1129_v32  ;;  %v2269_v30 = vld [vmem:[%s3869_s0 + $0x340] sm:$0xf]  ;;  %v2595_v32 = vld [vmem:[%s3869_s0 + $0x344] sm:$0xf] }
 0x19b   :  { %v1748_v36 = vmax.f32 %v1634_v31, 0.0  ;;  %v2597_v31 = vld [vmem:[%s3869_s0 + $0x34c] sm:$0xf0] }
 0x19d   :  { %1813 = vst.msk [vmem:[%s3870_s3 + $0xf0] sm:$0xff] %vm1782_vm0, %v1748_v36  ;;  %v2598_v36 = vld [vmem:[%s3869_s0 + $0x354] sm:$0xf0] }
 0x19e   :  { %v1466_v42 = vpop.f32.mrf.mxu2  ;;  %v1131_v47 = vpop.f32.mrf.mxu0 }
 0x19f   :  { %v1635_v43 = vpop.f32.mrf.mxu3  ;;  %v1467_v46 = vadd.f32 %v1466_v42, %v1298_v41  ;;  %v1300_v48 = vpop.f32.mrf.mxu1  ;;  %v1132_v51 = vadd.f32 %v3465_v54, %v1131_v47  ;;  %v2270_v41 = vor.u32 %v2597_v31, %v2269_v30  ;;  %v2274_v42 = vor.u32 %v2595_v32, %v2271_v34  ;;  %v2303_v31 = vld [vmem:[%s3869_s0 + $0x390] sm:$0xf0]  ;;  %v2309_v32 = vld [vmem:[%s3869_s0 + $0x388] sm:$0xf]  ;;  %v2604_v34 = vld [vmem:[%s3869_s0 + $0x38c] sm:$0xf] }
 0x1a0   :  { %v2282_v47 = vor.u32 %v2596_v37, %v2279_v38 }
 0x1a1   :  { %v1636_v52 = vadd.f32 %v1635_v43, %v1467_v46  ;;  %1170 = vmatmul.bf16.gmra.mxu0 %v2238_v44  ;;  %v1301_v55 = vadd.f32 %v1300_v48, %v1132_v51  ;;  %v2278_v46 = vor.u32 %v2598_v36, %v2277_v35  ;;  %v2311_v35 = vld [vmem:[%s3869_s0 + $0x398] sm:$0xf0] }
 0x1a2   :  { %1339 = vmatmul.bf16.gmra.mxu1 %v2242_v45 }
 0x1a3   :  { %v1749_v53 = vmax.f32 %v1636_v52, 0.0  ;;  %1508 = vmatmul.bf16.gmra.mxu2 %v2246_v49 }
 0x1a4   :  { %1677 = vmatmul.bf16.gmra.mxu3 %v2250_v50 }
 0x1a5   :  { %1814 = vst.msk [vmem:[%s3870_s3 + $0xf8] sm:$0xff] %vm1782_vm0, %v1749_v53 }
 0x1a6   :  { %v1469_v56 = vpop.f32.mrf.mxu2  ;;  %v1133_v59 = vpop.f32.mrf.mxu0 }
 0x1a7   :  { %v1638_v57 = vpop.f32.mrf.mxu3  ;;  %v1470_v58 = vadd.f32 %v1469_v56, %v1301_v55  ;;  %v1302_v60 = vpop.f32.mrf.mxu1  ;;  %v1134_v62 = vadd.f32 %v3465_v54, %v1133_v59 }
 0x1a9   :  { %v1639_v61 = vadd.f32 %v1638_v57, %v1470_v58  ;;  %v1303_v9 = vadd.f32 %v1302_v60, %v1134_v62  ;;  %v2285_v60 = vld [vmem:[%s3869_s0 + $0x360] sm:$0xf]  ;;  %v2599_v62 = vld [vmem:[%s3869_s0 + $0x364] sm:$0xf] }
 0x1ab   :  { %v1750_v3 = vmax.f32 %v1639_v61, 0.0  ;;  %v2601_v61 = vld [vmem:[%s3869_s0 + $0x36c] sm:$0xf0] }
 0x1ad   :  { %1815 = vst.msk [vmem:[%s3870_s3 + $0x100] sm:$0xff] %vm1782_vm0, %v1750_v3  ;;  %v2602_v3 = vld [vmem:[%s3869_s0 + $0x374] sm:$0xf0] }
 0x1ae   :  { %v1471_v10 = vpop.f32.mrf.mxu2  ;;  %v1136_v15 = vpop.f32.mrf.mxu0 }
 0x1af   :  { %v1640_v11 = vpop.f32.mrf.mxu3  ;;  %v1472_v14 = vadd.f32 %v1471_v10, %v1303_v9  ;;  %v1305_v16 = vpop.f32.mrf.mxu1  ;;  %v1137_v19 = vadd.f32 %v3465_v54, %v1136_v15  ;;  %v2286_v9 = vor.u32 %v2601_v61, %v2285_v60  ;;  %v2290_v10 = vor.u32 %v2599_v62, %v2287_v1  ;;  %v2319_v61 = vld [vmem:[%s3869_s0 + $0x3b0] sm:$0xf0]  ;;  %v2325_v62 = vld [vmem:[%s3869_s0 + $0x3a8] sm:$0xf]  ;;  %v2608_v1 = vld [vmem:[%s3869_s0 + $0x3ac] sm:$0xf] }
 0x1b0   :  { %v2298_v15 = vor.u32 %v2600_v4, %v2295_v5 }
 0x1b1   :  { %v1641_v20 = vadd.f32 %v1640_v11, %v1472_v14  ;;  %1175 = vmatmul.bf16.gmra.mxu0 %v2254_v12  ;;  %v1306_v22 = vadd.f32 %v1305_v16, %v1137_v19  ;;  %v2294_v14 = vor.u32 %v2602_v3, %v2293_v2  ;;  %v2327_v2 = vld [vmem:[%s3869_s0 + $0x3b8] sm:$0xf0] }
 0x1b2   :  { %1344 = vmatmul.bf16.gmra.mxu1 %v2258_v13 }
 0x1b3   :  { %v1751_v21 = vmax.f32 %v1641_v20, 0.0  ;;  %1513 = vmatmul.bf16.gmra.mxu2 %v2262_v17 }
 0x1b4   :  { %1682 = vmatmul.bf16.gmra.mxu3 %v2266_v18 }
 0x1b5   :  { %1816 = vst.msk [vmem:[%s3870_s3 + $0x108] sm:$0xff] %vm1782_vm0, %v1751_v21 }
 0x1b6   :  { %v1474_v23 = vpop.f32.mrf.mxu2  ;;  %v1138_v26 = vpop.f32.mrf.mxu0 }
 0x1b7   :  { %v1643_v24 = vpop.f32.mrf.mxu3  ;;  %v1475_v25 = vadd.f32 %v1474_v23, %v1306_v22  ;;  %v1307_v27 = vpop.f32.mrf.mxu1  ;;  %v1139_v29 = vadd.f32 %v3465_v54, %v1138_v26 }
 0x1b9   :  { %v1644_v28 = vadd.f32 %v1643_v24, %v1475_v25  ;;  %v1308_v39 = vadd.f32 %v1307_v27, %v1139_v29  ;;  %v2301_v27 = vld [vmem:[%s3869_s0 + $0x380] sm:$0xf]  ;;  %v2603_v29 = vld [vmem:[%s3869_s0 + $0x384] sm:$0xf] }
 0x1bb   :  { %v1752_v33 = vmax.f32 %v1644_v28, 0.0  ;;  %v2605_v28 = vld [vmem:[%s3869_s0 + $0x38c] sm:$0xf0] }
 0x1bd   :  { %1817 = vst.msk [vmem:[%s3870_s3 + $0x110] sm:$0xff] %vm1782_vm0, %v1752_v33  ;;  %v2606_v33 = vld [vmem:[%s3869_s0 + $0x394] sm:$0xf0] }
 0x1be   :  { %v1476_v40 = vpop.f32.mrf.mxu2  ;;  %v1141_v44 = vpop.f32.mrf.mxu0 }
 0x1bf   :  { %v1645_v0 = vpop.f32.mrf.mxu3  ;;  %v1477_v43 = vadd.f32 %v1476_v40, %v1308_v39  ;;  %v1310_v45 = vpop.f32.mrf.mxu1  ;;  %v1142_v48 = vadd.f32 %v3465_v54, %v1141_v44  ;;  %v2302_v39 = vor.u32 %v2605_v28, %v2301_v27  ;;  %v2306_v40 = vor.u32 %v2603_v29, %v2303_v31  ;;  %v2335_v28 = vld [vmem:[%s3869_s0 + $0x3d0] sm:$0xf0]  ;;  %v2341_v29 = vld [vmem:[%s3869_s0 + $0x3c8] sm:$0xf]  ;;  %v2612_v31 = vld [vmem:[%s3869_s0 + $0x3cc] sm:$0xf] }
 0x1c0   :  { %v2314_v44 = vor.u32 %v2604_v34, %v2311_v35 }
 0x1c1   :  { %v1646_v49 = vadd.f32 %v1645_v0, %v1477_v43  ;;  %1180 = vmatmul.bf16.gmra.mxu0 %v2270_v41  ;;  %v1311_v51 = vadd.f32 %v1310_v45, %v1142_v48  ;;  %v2310_v43 = vor.u32 %v2606_v33, %v2309_v32  ;;  %v2343_v32 = vld [vmem:[%s3869_s0 + $0x3d8] sm:$0xf0] }
 0x1c2   :  { %1349 = vmatmul.bf16.gmra.mxu1 %v2274_v42 }
 0x1c3   :  { %v1753_v50 = vmax.f32 %v1646_v49, 0.0  ;;  %1518 = vmatmul.bf16.gmra.mxu2 %v2278_v46 }
 0x1c4   :  { %1687 = vmatmul.bf16.gmra.mxu3 %v2282_v47 }
 0x1c5   :  { %1818 = vst.msk [vmem:[%s3870_s3 + $0x118] sm:$0xff] %vm1782_vm0, %v1753_v50 }
 0x1c6   :  { %v1479_v52 = vpop.f32.mrf.mxu2  ;;  %v1143_v56 = vpop.f32.mrf.mxu0 }
 0x1c7   :  { %v1648_v53 = vpop.f32.mrf.mxu3  ;;  %v1480_v55 = vadd.f32 %v1479_v52, %v1311_v51  ;;  %v1312_v57 = vpop.f32.mrf.mxu1  ;;  %v1144_v59 = vadd.f32 %v3465_v54, %v1143_v56 }
 0x1c9   :  { %v1649_v58 = vadd.f32 %v1648_v53, %v1480_v55  ;;  %v1313_v6 = vadd.f32 %v1312_v57, %v1144_v59  ;;  %v2317_v57 = vld [vmem:[%s3869_s0 + $0x3a0] sm:$0xf]  ;;  %v2607_v59 = vld [vmem:[%s3869_s0 + $0x3a4] sm:$0xf] }
 0x1cb   :  { %v1754_v63 = vmax.f32 %v1649_v58, 0.0  ;;  %v2609_v58 = vld [vmem:[%s3869_s0 + $0x3ac] sm:$0xf0] }
 0x1cd   :  { %1819 = vst.msk [vmem:[%s3870_s3 + $0x120] sm:$0xff] %vm1782_vm0, %v1754_v63  ;;  %v2610_v63 = vld [vmem:[%s3869_s0 + $0x3b4] sm:$0xf0] }
 0x1ce   :  { %v1481_v7 = vpop.f32.mrf.mxu2  ;;  %v1146_v12 = vpop.f32.mrf.mxu0 }
 0x1cf   :  { %v1650_v8 = vpop.f32.mrf.mxu3  ;;  %v1482_v11 = vadd.f32 %v1481_v7, %v1313_v6  ;;  %v1315_v13 = vpop.f32.mrf.mxu1  ;;  %v1147_v16 = vadd.f32 %v3465_v54, %v1146_v12  ;;  %v2318_v6 = vor.u32 %v2609_v58, %v2317_v57  ;;  %v2322_v7 = vor.u32 %v2607_v59, %v2319_v61  ;;  %v2351_v58 = vld [vmem:[%s3869_s0 + $0x3f0] sm:$0xf0]  ;;  %v2357_v59 = vld [vmem:[%s3869_s0 + $0x3e8] sm:$0xf]  ;;  %v2616_v61 = vld [vmem:[%s3869_s0 + $0x3ec] sm:$0xf] }
 0x1d0   :  { %v2330_v12 = vor.u32 %v2608_v1, %v2327_v2 }
 0x1d1   :  { %v1651_v17 = vadd.f32 %v1650_v8, %v1482_v11  ;;  %1185 = vmatmul.bf16.gmra.mxu0 %v2286_v9  ;;  %v1316_v19 = vadd.f32 %v1315_v13, %v1147_v16  ;;  %v2326_v11 = vor.u32 %v2610_v63, %v2325_v62  ;;  %v2359_v62 = vld [vmem:[%s3869_s0 + $0x3f8] sm:$0xf0] }
 0x1d2   :  { %1354 = vmatmul.bf16.gmra.mxu1 %v2290_v10 }
 0x1d3   :  { %v1755_v18 = vmax.f32 %v1651_v17, 0.0  ;;  %1523 = vmatmul.bf16.gmra.mxu2 %v2294_v14 }
 0x1d4   :  { %1692 = vmatmul.bf16.gmra.mxu3 %v2298_v15 }
 0x1d5   :  { %1820 = vst.msk [vmem:[%s3870_s3 + $0x128] sm:$0xff] %vm1782_vm0, %v1755_v18 }
 0x1d6   :  { %v1484_v20 = vpop.f32.mrf.mxu2  ;;  %v1148_v23 = vpop.f32.mrf.mxu0 }
 0x1d7   :  { %v1653_v21 = vpop.f32.mrf.mxu3  ;;  %v1485_v22 = vadd.f32 %v1484_v20, %v1316_v19  ;;  %v1317_v24 = vpop.f32.mrf.mxu1  ;;  %v1149_v26 = vadd.f32 %v3465_v54, %v1148_v23 }
 0x1d9   :  { %v1654_v25 = vadd.f32 %v1653_v21, %v1485_v22  ;;  %v1318_v36 = vadd.f32 %v1317_v24, %v1149_v26  ;;  %v2333_v24 = vld [vmem:[%s3869_s0 + $0x3c0] sm:$0xf]  ;;  %v2611_v26 = vld [vmem:[%s3869_s0 + $0x3c4] sm:$0xf] }
 0x1db   :  { %v1756_v30 = vmax.f32 %v1654_v25, 0.0  ;;  %v2613_v25 = vld [vmem:[%s3869_s0 + $0x3cc] sm:$0xf0] }
 0x1dd   :  { %1821 = vst.msk [vmem:[%s3870_s3 + $0x130] sm:$0xff] %vm1782_vm0, %v1756_v30  ;;  %v2614_v30 = vld [vmem:[%s3869_s0 + $0x3d4] sm:$0xf0] }
 0x1de   :  { %v1486_v37 = vpop.f32.mrf.mxu2  ;;  %v1151_v41 = vpop.f32.mrf.mxu0 }
 0x1df   :  { %v1655_v38 = vpop.f32.mrf.mxu3  ;;  %v1487_v0 = vadd.f32 %v1486_v37, %v1318_v36  ;;  %v1320_v42 = vpop.f32.mrf.mxu1  ;;  %v1152_v45 = vadd.f32 %v3465_v54, %v1151_v41  ;;  %v2334_v36 = vor.u32 %v2613_v25, %v2333_v24  ;;  %v2338_v37 = vor.u32 %v2611_v26, %v2335_v28 }
 0x1e0   :  { %v2346_v41 = vor.u32 %v2612_v31, %v2343_v32 }
 0x1e1   :  { %v1656_v46 = vadd.f32 %v1655_v38, %v1487_v0  ;;  %1190 = vmatmul.bf16.gmra.mxu0 %v2302_v39  ;;  %v1321_v48 = vadd.f32 %v1320_v42, %v1152_v45  ;;  %v2342_v0 = vor.u32 %v2614_v30, %v2341_v29 }
 0x1e2   :  { %1359 = vmatmul.bf16.gmra.mxu1 %v2306_v40 }
 0x1e3   :  { %v1757_v47 = vmax.f32 %v1656_v46, 0.0  ;;  %1528 = vmatmul.bf16.gmra.mxu2 %v2310_v43 }
 0x1e4   :  { %1697 = vmatmul.bf16.gmra.mxu3 %v2314_v44 }
 0x1e5   :  { %1822 = vst.msk [vmem:[%s3870_s3 + $0x138] sm:$0xff] %vm1782_vm0, %v1757_v47 }
 0x1e6   :  { %v1489_v49 = vpop.f32.mrf.mxu2  ;;  %v1153_v52 = vpop.f32.mrf.mxu0 }
 0x1e7   :  { %v1658_v50 = vpop.f32.mrf.mxu3  ;;  %v1490_v51 = vadd.f32 %v1489_v49, %v1321_v48  ;;  %v1322_v53 = vpop.f32.mrf.mxu1  ;;  %v1154_v56 = vadd.f32 %v3465_v54, %v1153_v52 }
 0x1e9   :  { %v1659_v55 = vadd.f32 %v1658_v50, %v1490_v51  ;;  %v1323_v3 = vadd.f32 %v1322_v53, %v1154_v56  ;;  %v2349_v53 = vld [vmem:[%s3869_s0 + $0x3e0] sm:$0xf]  ;;  %v2615_v56 = vld [vmem:[%s3869_s0 + $0x3e4] sm:$0xf] }
 0x1eb   :  { %v1758_v60 = vmax.f32 %v1659_v55, 0.0  ;;  %v2617_v55 = vld [vmem:[%s3869_s0 + $0x3ec] sm:$0xf0] }
 0x1ed   :  { %1823 = vst.msk [vmem:[%s3870_s3 + $0x140] sm:$0xff] %vm1782_vm0, %v1758_v60  ;;  %v2618_v60 = vld [vmem:[%s3869_s0 + $0x3f4] sm:$0xf0] }
 0x1ee   :  { %v1491_v4 = vpop.f32.mrf.mxu2  ;;  %v1156_v9 = vpop.f32.mrf.mxu0 }
 0x1ef   :  { %v1660_v5 = vpop.f32.mrf.mxu3  ;;  %v1492_v8 = vadd.f32 %v1491_v4, %v1323_v3  ;;  %v1325_v10 = vpop.f32.mrf.mxu1  ;;  %v1157_v13 = vadd.f32 %v3465_v54, %v1156_v9  ;;  %v2350_v3 = vor.u32 %v2617_v55, %v2349_v53  ;;  %v2354_v4 = vor.u32 %v2615_v56, %v2351_v58 }
 0x1f0   :  { %v2362_v9 = vor.u32 %v2616_v61, %v2359_v62 }
 0x1f1   :  { %v1661_v14 = vadd.f32 %v1660_v5, %v1492_v8  ;;  %1195 = vmatmul.bf16.gmra.mxu0 %v2318_v6  ;;  %v1326_v16 = vadd.f32 %v1325_v10, %v1157_v13  ;;  %v2358_v8 = vor.u32 %v2618_v60, %v2357_v59 }
 0x1f2   :  { %1364 = vmatmul.bf16.gmra.mxu1 %v2322_v7 }
 0x1f3   :  { %v1759_v15 = vmax.f32 %v1661_v14, 0.0  ;;  %1533 = vmatmul.bf16.gmra.mxu2 %v2326_v11 }
 0x1f4   :  { %1702 = vmatmul.bf16.gmra.mxu3 %v2330_v12 }
 0x1f5   :  { %1824 = vst.msk [vmem:[%s3870_s3 + $0x148] sm:$0xff] %vm1782_vm0, %v1759_v15 }
 0x1f6   :  { %v1494_v17 = vpop.f32.mrf.mxu2  ;;  %v1158_v20 = vpop.f32.mrf.mxu0 }
 0x1f7   :  { %v1663_v18 = vpop.f32.mrf.mxu3  ;;  %v1495_v19 = vadd.f32 %v1494_v17, %v1326_v16  ;;  %v1327_v21 = vpop.f32.mrf.mxu1  ;;  %v1159_v23 = vadd.f32 %v3465_v54, %v1158_v20 }
 0x1f9   :  { %v1664_v22 = vadd.f32 %v1663_v18, %v1495_v19  ;;  %v1328_v33 = vadd.f32 %v1327_v21, %v1159_v23 }
 0x1fb   :  { %v1760_v27 = vmax.f32 %v1664_v22, 0.0 }
 0x1fd   :  { %1825 = vst.msk [vmem:[%s3870_s3 + $0x150] sm:$0xff] %vm1782_vm0, %v1760_v27 }
 0x1fe   :  { %v1496_v34 = vpop.f32.mrf.mxu2  ;;  %v1161_v39 = vpop.f32.mrf.mxu0 }
 0x1ff   :  { %v1665_v35 = vpop.f32.mrf.mxu3  ;;  %v1497_v38 = vadd.f32 %v1496_v34, %v1328_v33  ;;  %v1330_v40 = vpop.f32.mrf.mxu1  ;;  %v1162_v42 = vadd.f32 %v3465_v54, %v1161_v39 }
 0x201   :  { %v1666_v43 = vadd.f32 %v1665_v35, %v1497_v38  ;;  %1200 = vmatmul.bf16.gmra.mxu0 %v2334_v36  ;;  %v1331_v45 = vadd.f32 %v1330_v40, %v1162_v42 }
 0x202   :  { %1369 = vmatmul.bf16.gmra.mxu1 %v2338_v37 }
 0x203   :  { %v1761_v44 = vmax.f32 %v1666_v43, 0.0  ;;  %1538 = vmatmul.bf16.gmra.mxu2 %v2342_v0 }
 0x204   :  { %1707 = vmatmul.bf16.gmra.mxu3 %v2346_v41 }
 0x205   :  { %1826 = vst.msk [vmem:[%s3870_s3 + $0x158] sm:$0xff] %vm1782_vm0, %v1761_v44 }
 0x206   :  { %v1499_v46 = vpop.f32.mrf.mxu2  ;;  %v1163_v49 = vpop.f32.mrf.mxu0 }
 0x207   :  { %v1668_v47 = vpop.f32.mrf.mxu3  ;;  %v1500_v48 = vadd.f32 %v1499_v46, %v1331_v45  ;;  %v1332_v50 = vpop.f32.mrf.mxu1  ;;  %v1164_v52 = vadd.f32 %v3465_v54, %v1163_v49 }
 0x209   :  { %v1669_v51 = vadd.f32 %v1668_v47, %v1500_v48  ;;  %v1333_v63 = vadd.f32 %v1332_v50, %v1164_v52 }
 0x20b   :  { %v1762_v57 = vmax.f32 %v1669_v51, 0.0 }
 0x20d   :  { %1827 = vst.msk [vmem:[%s3870_s3 + $0x160] sm:$0xff] %vm1782_vm0, %v1762_v57 }
 0x20e   :  { %v1501_v1 = vpop.f32.mrf.mxu2  ;;  %v1166_v6 = vpop.f32.mrf.mxu0 }
 0x20f   :  { %v1670_v2 = vpop.f32.mrf.mxu3  ;;  %v1502_v5 = vadd.f32 %v1501_v1, %v1333_v63  ;;  %v1335_v7 = vpop.f32.mrf.mxu1  ;;  %v1167_v10 = vadd.f32 %v3465_v54, %v1166_v6 }
 0x211   :  { %v1671_v11 = vadd.f32 %v1670_v2, %v1502_v5  ;;  %1205 = vmatmul.bf16.gmra.mxu0 %v2350_v3  ;;  %v1336_v13 = vadd.f32 %v1335_v7, %v1167_v10 }
 0x212   :  { %1374 = vmatmul.bf16.gmra.mxu1 %v2354_v4 }
 0x213   :  { %v1763_v12 = vmax.f32 %v1671_v11, 0.0  ;;  %1543 = vmatmul.bf16.gmra.mxu2 %v2358_v8 }
 0x214   :  { %1712 = vmatmul.bf16.gmra.mxu3 %v2362_v9 }
 0x215   :  { %1828 = vst.msk [vmem:[%s3870_s3 + $0x168] sm:$0xff] %vm1782_vm0, %v1763_v12 }
 0x216   :  { %v1504_v14 = vpop.f32.mrf.mxu2  ;;  %v1168_v17 = vpop.f32.mrf.mxu0 }
 0x217   :  { %v1673_v15 = vpop.f32.mrf.mxu3  ;;  %v1505_v16 = vadd.f32 %v1504_v14, %v1336_v13  ;;  %v1337_v18 = vpop.f32.mrf.mxu1  ;;  %v1169_v20 = vadd.f32 %v3465_v54, %v1168_v17 }
 0x219   :  { %v1674_v19 = vadd.f32 %v1673_v15, %v1505_v16  ;;  %v1338_v22 = vadd.f32 %v1337_v18, %v1169_v20 }
 0x21b   :  { %v1764_v21 = vmax.f32 %v1674_v19, 0.0 }
 0x21d   :  { %1829 = vst.msk [vmem:[%s3870_s3 + $0x170] sm:$0xff] %vm1782_vm0, %v1764_v21 }
 0x21e   :  { %v1506_v23 = vpop.f32.mrf.mxu2  ;;  %v1171_v26 = vpop.f32.mrf.mxu0 }
 0x21f   :  { %v1675_v24 = vpop.f32.mrf.mxu3  ;;  %v1507_v25 = vadd.f32 %v1506_v23, %v1338_v22  ;;  %v1340_v27 = vpop.f32.mrf.mxu1  ;;  %v1172_v28 = vadd.f32 %v3465_v54, %v1171_v26 }
 0x221   :  { %v1676_v29 = vadd.f32 %v1675_v24, %v1507_v25  ;;  %v1341_v31 = vadd.f32 %v1340_v27, %v1172_v28 }
 0x223   :  { %v1765_v30 = vmax.f32 %v1676_v29, 0.0 }
 0x225   :  { %1830 = vst.msk [vmem:[%s3870_s3 + $0x178] sm:$0xff] %vm1782_vm0, %v1765_v30 }
 0x226   :  { %v1509_v32 = vpop.f32.mrf.mxu2  ;;  %v1173_v35 = vpop.f32.mrf.mxu0 }
 0x227   :  { %v1678_v33 = vpop.f32.mrf.mxu3  ;;  %v1510_v34 = vadd.f32 %v1509_v32, %v1341_v31  ;;  %v1342_v36 = vpop.f32.mrf.mxu1  ;;  %v1174_v38 = vadd.f32 %v3465_v54, %v1173_v35 }
 0x229   :  { %v1679_v37 = vadd.f32 %v1678_v33, %v1510_v34  ;;  %v1343_v40 = vadd.f32 %v1342_v36, %v1174_v38 }
 0x22b   :  { %v1766_v39 = vmax.f32 %v1679_v37, 0.0 }
 0x22d   :  { %1831 = vst.msk [vmem:[%s3870_s3 + $0x180] sm:$0xff] %vm1782_vm0, %v1766_v39 }
 0x22e   :  { %v1511_v0 = vpop.f32.mrf.mxu2  ;;  %v1176_v43 = vpop.f32.mrf.mxu0 }
 0x22f   :  { %v1680_v41 = vpop.f32.mrf.mxu3  ;;  %v1512_v42 = vadd.f32 %v1511_v0, %v1343_v40  ;;  %v1345_v44 = vpop.f32.mrf.mxu1  ;;  %v1177_v45 = vadd.f32 %v3465_v54, %v1176_v43 }
 0x231   :  { %v1681_v46 = vadd.f32 %v1680_v41, %v1512_v42  ;;  %v1346_v48 = vadd.f32 %v1345_v44, %v1177_v45 }
 0x233   :  { %v1767_v47 = vmax.f32 %v1681_v46, 0.0 }
 0x235   :  { %1832 = vst.msk [vmem:[%s3870_s3 + $0x188] sm:$0xff] %vm1782_vm0, %v1767_v47 }
 0x236   :  { %v1514_v49 = vpop.f32.mrf.mxu2  ;;  %v1178_v52 = vpop.f32.mrf.mxu0 }
 0x237   :  { %v1683_v50 = vpop.f32.mrf.mxu3  ;;  %v1515_v51 = vadd.f32 %v1514_v49, %v1346_v48  ;;  %v1347_v53 = vpop.f32.mrf.mxu1  ;;  %v1179_v56 = vadd.f32 %v3465_v54, %v1178_v52 }
 0x239   :  { %v1684_v55 = vadd.f32 %v1683_v50, %v1515_v51  ;;  %v1348_v58 = vadd.f32 %v1347_v53, %v1179_v56 }
 0x23b   :  { %v1768_v57 = vmax.f32 %v1684_v55, 0.0 }
 0x23d   :  { %1833 = vst.msk [vmem:[%s3870_s3 + $0x190] sm:$0xff] %vm1782_vm0, %v1768_v57 }
 0x23e   :  { %v1516_v59 = vpop.f32.mrf.mxu2  ;;  %v1181_v62 = vpop.f32.mrf.mxu0 }
 0x23f   :  { %v1685_v60 = vpop.f32.mrf.mxu3  ;;  %v1517_v61 = vadd.f32 %v1516_v59, %v1348_v58  ;;  %v1350_v63 = vpop.f32.mrf.mxu1  ;;  %v1182_v1 = vadd.f32 %v3465_v54, %v1181_v62 }
 0x241   :  { %v1686_v2 = vadd.f32 %v1685_v60, %v1517_v61  ;;  %v1351_v4 = vadd.f32 %v1350_v63, %v1182_v1 }
 0x243   :  { %v1769_v3 = vmax.f32 %v1686_v2, 0.0 }
 0x245   :  { %1834 = vst.msk [vmem:[%s3870_s3 + $0x198] sm:$0xff] %vm1782_vm0, %v1769_v3 }
 0x246   :  { %v1519_v5 = vpop.f32.mrf.mxu2  ;;  %v1183_v8 = vpop.f32.mrf.mxu0 }
 0x247   :  { %v1688_v6 = vpop.f32.mrf.mxu3  ;;  %v1520_v7 = vadd.f32 %v1519_v5, %v1351_v4  ;;  %v1352_v9 = vpop.f32.mrf.mxu1  ;;  %v1184_v11 = vadd.f32 %v3465_v54, %v1183_v8 }
 0x249   :  { %v1689_v10 = vadd.f32 %v1688_v6, %v1520_v7  ;;  %v1353_v13 = vadd.f32 %v1352_v9, %v1184_v11 }
 0x24b   :  { %v1770_v12 = vmax.f32 %v1689_v10, 0.0 }
 0x24d   :  { %1835 = vst.msk [vmem:[%s3870_s3 + $0x1a0] sm:$0xff] %vm1782_vm0, %v1770_v12 }
 0x24e   :  { %v1521_v14 = vpop.f32.mrf.mxu2  ;;  %v1186_v17 = vpop.f32.mrf.mxu0 }
 0x24f   :  { %v1690_v15 = vpop.f32.mrf.mxu3  ;;  %v1522_v16 = vadd.f32 %v1521_v14, %v1353_v13  ;;  %v1355_v18 = vpop.f32.mrf.mxu1  ;;  %v1187_v19 = vadd.f32 %v3465_v54, %v1186_v17 }
 0x251   :  { %v1691_v20 = vadd.f32 %v1690_v15, %v1522_v16  ;;  %v1356_v22 = vadd.f32 %v1355_v18, %v1187_v19 }
 0x253   :  { %v1771_v21 = vmax.f32 %v1691_v20, 0.0 }
 0x255   :  { %1836 = vst.msk [vmem:[%s3870_s3 + $0x1a8] sm:$0xff] %vm1782_vm0, %v1771_v21 }
 0x256   :  { %v1524_v23 = vpop.f32.mrf.mxu2  ;;  %v1188_v26 = vpop.f32.mrf.mxu0 }
 0x257   :  { %v1693_v24 = vpop.f32.mrf.mxu3  ;;  %v1525_v25 = vadd.f32 %v1524_v23, %v1356_v22  ;;  %v1357_v27 = vpop.f32.mrf.mxu1  ;;  %v1189_v29 = vadd.f32 %v3465_v54, %v1188_v26 }
 0x259   :  { %v1694_v28 = vadd.f32 %v1693_v24, %v1525_v25  ;;  %v1358_v31 = vadd.f32 %v1357_v27, %v1189_v29 }
 0x25b   :  { %v1772_v30 = vmax.f32 %v1694_v28, 0.0 }
 0x25d   :  { %1837 = vst.msk [vmem:[%s3870_s3 + $0x1b0] sm:$0xff] %vm1782_vm0, %v1772_v30 }
 0x25e   :  { %v1526_v32 = vpop.f32.mrf.mxu2  ;;  %v1191_v35 = vpop.f32.mrf.mxu0 }
 0x25f   :  { %v1695_v33 = vpop.f32.mrf.mxu3  ;;  %v1527_v34 = vadd.f32 %v1526_v32, %v1358_v31  ;;  %v1360_v36 = vpop.f32.mrf.mxu1  ;;  %v1192_v37 = vadd.f32 %v3465_v54, %v1191_v35 }
 0x261   :  { %v1696_v38 = vadd.f32 %v1695_v33, %v1527_v34  ;;  %v1361_v40 = vadd.f32 %v1360_v36, %v1192_v37 }
 0x263   :  { %v1773_v39 = vmax.f32 %v1696_v38, 0.0 }
 0x265   :  { %1838 = vst.msk [vmem:[%s3870_s3 + $0x1b8] sm:$0xff] %vm1782_vm0, %v1773_v39 }
 0x266   :  { %v1529_v0 = vpop.f32.mrf.mxu2  ;;  %v1193_v43 = vpop.f32.mrf.mxu0 }
 0x267   :  { %v1698_v41 = vpop.f32.mrf.mxu3  ;;  %v1530_v42 = vadd.f32 %v1529_v0, %v1361_v40  ;;  %v1362_v44 = vpop.f32.mrf.mxu1  ;;  %v1194_v46 = vadd.f32 %v3465_v54, %v1193_v43 }
 0x269   :  { %v1699_v45 = vadd.f32 %v1698_v41, %v1530_v42  ;;  %v1363_v48 = vadd.f32 %v1362_v44, %v1194_v46 }
 0x26b   :  { %v1774_v47 = vmax.f32 %v1699_v45, 0.0 }
 0x26d   :  { %1839 = vst.msk [vmem:[%s3870_s3 + $0x1c0] sm:$0xff] %vm1782_vm0, %v1774_v47 }
 0x26e   :  { %v1531_v49 = vpop.f32.mrf.mxu2  ;;  %v1196_v52 = vpop.f32.mrf.mxu0 }
 0x26f   :  { %v1700_v50 = vpop.f32.mrf.mxu3  ;;  %v1532_v51 = vadd.f32 %v1531_v49, %v1363_v48  ;;  %v1365_v53 = vpop.f32.mrf.mxu1  ;;  %v1197_v55 = vadd.f32 %v3465_v54, %v1196_v52 }
 0x271   :  { %v1701_v56 = vadd.f32 %v1700_v50, %v1532_v51  ;;  %v1366_v58 = vadd.f32 %v1365_v53, %v1197_v55 }
 0x273   :  { %v1775_v57 = vmax.f32 %v1701_v56, 0.0 }
 0x275   :  { %1840 = vst.msk [vmem:[%s3870_s3 + $0x1c8] sm:$0xff] %vm1782_vm0, %v1775_v57 }
 0x276   :  { %v1534_v59 = vpop.f32.mrf.mxu2  ;;  %v1198_v62 = vpop.f32.mrf.mxu0 }
 0x277   :  { %v1703_v60 = vpop.f32.mrf.mxu3  ;;  %v1535_v61 = vadd.f32 %v1534_v59, %v1366_v58  ;;  %v1367_v63 = vpop.f32.mrf.mxu1  ;;  %v1199_v2 = vadd.f32 %v3465_v54, %v1198_v62 }
 0x279   :  { %v1704_v1 = vadd.f32 %v1703_v60, %v1535_v61  ;;  %v1368_v4 = vadd.f32 %v1367_v63, %v1199_v2 }
 0x27b   :  { %v1776_v3 = vmax.f32 %v1704_v1, 0.0 }
 0x27d   :  { %1841 = vst.msk [vmem:[%s3870_s3 + $0x1d0] sm:$0xff] %vm1782_vm0, %v1776_v3 }
 0x27e   :  { %v1536_v5 = vpop.f32.mrf.mxu2  ;;  %v1201_v8 = vpop.f32.mrf.mxu0 }
 0x27f   :  { %v1705_v6 = vpop.f32.mrf.mxu3  ;;  %v1537_v7 = vadd.f32 %v1536_v5, %v1368_v4  ;;  %v1370_v9 = vpop.f32.mrf.mxu1  ;;  %v1202_v10 = vadd.f32 %v3465_v54, %v1201_v8 }
 0x281   :  { %v1706_v11 = vadd.f32 %v1705_v6, %v1537_v7  ;;  %v1371_v13 = vadd.f32 %v1370_v9, %v1202_v10 }
 0x283   :  { %v1777_v12 = vmax.f32 %v1706_v11, 0.0 }
 0x285   :  { %1842 = vst.msk [vmem:[%s3870_s3 + $0x1d8] sm:$0xff] %vm1782_vm0, %v1777_v12 }
 0x286   :  { %v1539_v14 = vpop.f32.mrf.mxu2  ;;  %v1203_v17 = vpop.f32.mrf.mxu0 }
 0x287   :  { %v1708_v15 = vpop.f32.mrf.mxu3  ;;  %v1540_v16 = vadd.f32 %v1539_v14, %v1371_v13  ;;  %v1372_v18 = vpop.f32.mrf.mxu1  ;;  %v1204_v20 = vadd.f32 %v3465_v54, %v1203_v17 }
 0x289   :  { %v1709_v19 = vadd.f32 %v1708_v15, %v1540_v16  ;;  %v1373_v22 = vadd.f32 %v1372_v18, %v1204_v20 }
 0x28b   :  { %v1778_v21 = vmax.f32 %v1709_v19, 0.0 }
 0x28d   :  { %1843 = vst.msk [vmem:[%s3870_s3 + $0x1e0] sm:$0xff] %vm1782_vm0, %v1778_v21 }
 0x28e   :  { %v1541_v23 = vpop.f32.mrf.mxu2  ;;  %v1206_v26 = vpop.f32.mrf.mxu0 }
 0x28f   :  { %v1710_v24 = vpop.f32.mrf.mxu3  ;;  %v1542_v25 = vadd.f32 %v1541_v23, %v1373_v22  ;;  %v1207_v27 = vadd.f32 %v3465_v54, %v1206_v26  ;;  %v1375_v29 = vpop.f32.mrf.mxu1 }
 0x291   :  { %v1711_v28 = vadd.f32 %v1710_v24, %v1542_v25  ;;  %v1376_v31 = vadd.f32 %v1375_v29, %v1207_v27 }
 0x293   :  { %v1779_v30 = vmax.f32 %v1711_v28, 0.0 }
 0x295   :  { %1844 = vst.msk [vmem:[%s3870_s3 + $0x1e8] sm:$0xff] %vm1782_vm0, %v1779_v30 }
 0x296   :  { %v1544_v32 = vpop.f32.mrf.mxu2  ;;  %v1208_v35 = vpop.f32.mrf.mxu0 }
 0x297   :  { %v1713_v33 = vpop.f32.mrf.mxu3  ;;  %v1545_v34 = vadd.f32 %v1544_v32, %v1376_v31  ;;  %v1209_v37 = vadd.f32 %v3465_v54, %v1208_v35  ;;  %v1377_v39 = vpop.f32.mrf.mxu1 }
 0x299   :  { %v1714_v36 = vadd.f32 %v1713_v33, %v1545_v34  ;;  %v1378_v40 = vadd.f32 %v1377_v39, %v1209_v37 }
 0x29b   :  { %v1780_v38 = vmax.f32 %v1714_v36, 0.0 }
 0x29d   :  { %1845 = vst.msk [vmem:[%s3870_s3 + $0x1f0] sm:$0xff] %vm1782_vm0, %v1780_v38 }
 0x29e   :  { %v1546_v0 = vpop.f32.mrf.mxu2 }
 0x29f   :  { %v1547_v41 = vadd.f32 %v1546_v0, %v1378_v40  ;;  %v1715_v42 = vpop.f32.mrf.mxu3 }
 0x2a1   :  { %v1716_v43 = vadd.f32 %v1715_v42, %v1547_v41 }
 0x2a3   :  { %v1781_v44 = vmax.f32 %v1716_v43, 0.0 }
 0x2a5   :  { %1846 = vst.msk [vmem:[%s3870_s3 + $0x1f8] sm:$0xff] %vm1782_vm0, %v1781_v44 }

// kernel: encoder_forward.5
= control target key start
LH: loop header
LB: loop body
LE: loop exit
PB: predicated region body
PF: predicated region fallthrough
CT: control target
= control target key end

     0   :  { %s13790_s12 = smov 0   ;;  %s14801_s0 = inlined_call_operand.vmem [shape: bf16[2,14464], index: 0, kind: input, shape index: {}]   ;;  %s14802_s1 = inlined_call_operand.vmem [shape: bf16[2,14464,32], index: 1, kind: input, shape index: {}]   ;;  %s14803_s2 = inlined_call_operand.vmem [shape: f32[2,1,32], index: 2, kind: input, shape index: {}]   ;;  %s14804_s3 = inlined_call_operand.vmem [shape: f32[2,2,32], index: 3, kind: output, shape index: {}]  }
   0x1 LB: > { %s9223_s13 = sadd.s32 4294967295, %s13768_s12   ;;  %p9227_p0 = scmp.ge.s32.totalorder %s13768_s12, 1  ;;  %s13768_s12 = sphi %s13790_s12, %s13_s12  }
   0x2   : > { %p145_p1 = scmp.lt.s32.totalorder %s13768_s12, 3 }
   0x4   : > { %p146_p2 = pnand %p9227_p0, %p145_p1 }
   0x5   : > { %p171_p3 = scmp.lt.s32.totalorder (!%p146_p2), %s9223_s13, 1 }
   0x6   : > { %149 = sbr.rel (%p146_p2) target bundleno = 1077 (0x435), region = 32 }
   0xb   : > { %s14806_s13 = smov (!%p171_p3, %s9223_s13), 1  ;;  %v183_v20 = vld [vmem:[%s14801_s0] sm:$0xff]  ;;  %vm9159_vm0 = vcmask 254976  }
   0xc   : > { %s13752_s14 = smul.u32 7232, %s14806_s13  ;;  %2011 = vst [vmem:[#allocation1] ss:$9 sm:$0xff] %v183_v20  ;;  %s178_s24 = scalar_lea.vmem %s14803_s2, %s14806_s13 }
   0xe   : > { %s13804_s17 = scalar_lea.vmem %s14802_s1, %s13752_s14 }
   0xf   : > { %v12855_v0 = vld [vmem:[%s13804_s17 + $0x38] sm:$0xff]  ;;  %v12854_v4 = vld [vmem:[%s13804_s17 + $0x30] sm:$0xff]  ;;  %v12853_v8 = vld [vmem:[%s13804_s17 + $0x28] sm:$0xff] }
  0x10   : > { %v12871_v1 = vld [vmem:[%s13804_s17 + $0xb8] sm:$0xff]  ;;  %7690 = vmatpush.bf16.msra.mxu0 %v12855_v0  ;;  %v12870_v5 = vld [vmem:[%s13804_s17 + $0xb0] sm:$0xff]  ;;  %v12869_v9 = vld [vmem:[%s13804_s17 + $0xa8] sm:$0xff] }
  0x11   : > { %v12863_v2 = vld [vmem:[%s13804_s17 + $0x78] sm:$0xff]  ;;  %7716 = vmatpush.bf16.msra.mxu2 %v12871_v1  ;;  %v12862_v6 = vld [vmem:[%s13804_s17 + $0x70] sm:$0xff]  ;;  %v12861_v10 = vld [vmem:[%s13804_s17 + $0x68] sm:$0xff] }
  0x12   : > { %v12879_v3 = vld [vmem:[%s13804_s17 + $0xf8] sm:$0xff]  ;;  %7703 = vmatpush.bf16.msra.mxu1 %v12863_v2  ;;  %v12878_v7 = vld [vmem:[%s13804_s17 + $0xf0] sm:$0xff]  ;;  %v12877_v11 = vld [vmem:[%s13804_s17 + $0xe8] sm:$0xff] }
  0x13   : > { %7729 = vmatpush.bf16.msra.mxu3 %v12879_v3  ;;  %v12852_v12 = vld [vmem:[%s13804_s17 + $0x20] sm:$0xff]  ;;  %v12851_v16 = vld [vmem:[%s13804_s17 + $0x18] sm:$0xff]  ;;  %v12850_v21 = vld [vmem:[%s13804_s17 + $0x10] sm:$0xff] }
  0x14   : > { %7691 = vmatpush.bf16.msra.mxu0 %v12854_v4  ;;  %v12868_v13 = vld [vmem:[%s13804_s17 + $0xa0] sm:$0xff]  ;;  %v12867_v17 = vld [vmem:[%s13804_s17 + $0x98] sm:$0xff]  ;;  %v12866_v22 = vld [vmem:[%s13804_s17 + $0x90] sm:$0xff] }
  0x15   : > { %7717 = vmatpush.bf16.msra.mxu2 %v12870_v5  ;;  %v12860_v14 = vld [vmem:[%s13804_s17 + $0x60] sm:$0xff]  ;;  %v12859_v18 = vld [vmem:[%s13804_s17 + $0x58] sm:$0xff]  ;;  %v12858_v23 = vld [vmem:[%s13804_s17 + $0x50] sm:$0xff] }
  0x16   : > { %7704 = vmatpush.bf16.msra.mxu1 %v12862_v6  ;;  %v12876_v15 = vld [vmem:[%s13804_s17 + $0xe0] sm:$0xff]  ;;  %v12875_v19 = vld [vmem:[%s13804_s17 + $0xd8] sm:$0xff]  ;;  %v12874_v24 = vld [vmem:[%s13804_s17 + $0xd0] sm:$0xff] }
  0x17   : > { %7730 = vmatpush.bf16.msra.mxu3 %v12878_v7  ;;  %v12849_v25 = vld [vmem:[%s13804_s17 + $0x8] sm:$0xff]  ;;  %v12848_v29 = vld [vmem:[%s13804_s17] sm:$0xff]  ;;  %v12887_v31 = vld [vmem:[%s13804_s17 + $0x138] sm:$0xff] }
  0x18   : > { %7692 = vmatpush.bf16.msra.mxu0 %v12853_v8  ;;  %v12865_v26 = vld [vmem:[%s13804_s17 + $0x88] sm:$0xff]  ;;  %v12864_v30 = vld [vmem:[%s13804_s17 + $0x80] sm:$0xff]  ;;  %v12903_v32 = vld [vmem:[%s13804_s17 + $0x1b8] sm:$0xff] }
  0x19   : > { %7718 = vmatpush.bf16.msra.mxu2 %v12869_v9  ;;  %v12857_v27 = vld [vmem:[%s13804_s17 + $0x48] sm:$0xff]  ;;  %v12856_v33 = vld [vmem:[%s13804_s17 + $0x40] sm:$0xff]  ;;  %v12895_v35 = vld [vmem:[%s13804_s17 + $0x178] sm:$0xff] }
  0x1a   : > { %7705 = vmatpush.bf16.msra.mxu1 %v12861_v10  ;;  %v12873_v28 = vld [vmem:[%s13804_s17 + $0xc8] sm:$0xff]  ;;  %v12872_v34 = vld [vmem:[%s13804_s17 + $0xc0] sm:$0xff]  ;;  %v12911_v36 = vld [vmem:[%s13804_s17 + $0x1f8] sm:$0xff] }
  0x1b   : > { %7731 = vmatpush.bf16.msra.mxu3 %v12877_v11  ;;  %v12886_v37 = vld [vmem:[%s13804_s17 + $0x130] sm:$0xff]  ;;  %v2012_v40 = vld [vmem:[#allocation1] sm:$0xff]  ;;  %v12885_v45 = vld [vmem:[%s13804_s17 + $0x128] sm:$0xff] }
  0x1c   : > { %7693 = vmatpush.bf16.msra.mxu0 %v12852_v12  ;;  %v12902_v38 = vld [vmem:[%s13804_s17 + $0x1b0] sm:$0xff]  ;;  %v2015_v43 = vld [vmem:[#allocation1 + $0x1b] sm:$0xff]  ;;  %v12901_v46 = vld [vmem:[%s13804_s17 + $0x1a8] sm:$0xff] }
  0x1d   : > { %7719 = vmatpush.bf16.msra.mxu2 %v12868_v13  ;;  %v2014_v39 = vld [vmem:[#allocation1 + $0x12] sm:$0xff]  ;;  %v2013_v44 = vld [vmem:[#allocation1 + $0x9] sm:$0xff]  ;;  %v12884_v49 = vld [vmem:[%s13804_s17 + $0x120] sm:$0xff] }
  0x1e   : > { %7706 = vmatpush.bf16.msra.mxu1 %v12860_v14  ;;  %v12894_v41 = vld [vmem:[%s13804_s17 + $0x170] sm:$0xff]  ;;  %v12893_v47 = vld [vmem:[%s13804_s17 + $0x168] sm:$0xff]  ;;  %v12900_v50 = vld [vmem:[%s13804_s17 + $0x1a0] sm:$0xff] }
  0x1f   : > { %7732 = vmatpush.bf16.msra.mxu3 %v12876_v15  ;;  %v12910_v42 = vld [vmem:[%s13804_s17 + $0x1f0] sm:$0xff]  ;;  %v12909_v48 = vld [vmem:[%s13804_s17 + $0x1e8] sm:$0xff]  ;;  %v12892_v51 = vld [vmem:[%s13804_s17 + $0x160] sm:$0xff] }
  0x20   : > { %7694 = vmatpush.bf16.msra.mxu0 %v12851_v16  ;;  %v12908_v52 = vld [vmem:[%s13804_s17 + $0x1e0] sm:$0xff]  ;;  %v12883_v53 = vld [vmem:[%s13804_s17 + $0x118] sm:$0xff]  ;;  %v12882_v57 = vld [vmem:[%s13804_s17 + $0x110] sm:$0xff] }
  0x21   : > { %7720 = vmatpush.bf16.msra.mxu2 %v12867_v17  ;;  %v12899_v54 = vld [vmem:[%s13804_s17 + $0x198] sm:$0xff]  ;;  %v12898_v58 = vld [vmem:[%s13804_s17 + $0x190] sm:$0xff]  ;;  %v2016_v62 = vld [vmem:[#allocation1 + $0x24] sm:$0xff] }
  0x22   : > { %7707 = vmatpush.bf16.msra.mxu1 %v12859_v18  ;;  %v12891_v55 = vld [vmem:[%s13804_s17 + $0x158] sm:$0xff]  ;;  %v12890_v59 = vld [vmem:[%s13804_s17 + $0x150] sm:$0xff]  ;;  %v184_v1 = vld [vmem:[%s14801_s0 + $0x8] sm:$0xff] }
  0x23   : > { %7733 = vmatpush.bf16.msra.mxu3 %v12875_v19  ;;  %v12907_v56 = vld [vmem:[%s13804_s17 + $0x1d8] sm:$0xff]  ;;  %v12906_v60 = vld [vmem:[%s13804_s17 + $0x1d0] sm:$0xff]  ;;  %v12881_v2 = vld [vmem:[%s13804_s17 + $0x108] sm:$0xff] }
  0x24   : > { %7695 = vmatpush.bf16.msra.mxu0 %v12850_v21  ;;  %v2018_v61 = vld [vmem:[#allocation1 + $0x36] sm:$0xff]  ;;  %v2019_v63 = vld [vmem:[#allocation1 + $0x3f] sm:$0xff]  ;;  %v2017_v0 = vld [vmem:[#allocation1 + $0x2d] sm:$0xff] }
  0x25   : > { %7721 = vmatpush.bf16.msra.mxu2 %v12866_v22  ;;  %v12897_v3 = vld [vmem:[%s13804_s17 + $0x188] sm:$0xff]  ;;  %2021 = vst [vmem:[#allocation1] ss:$9 sm:$0xff] %v184_v1  ;;  %v12880_v6 = vld [vmem:[%s13804_s17 + $0x100] sm:$0xff]  ;;  %v12919_v8 = vld [vmem:[%s13804_s17 + $0x238] sm:$0xff] }
  0x26   : > { %7708 = vmatpush.bf16.msra.mxu1 %v12858_v23  ;;  %v12889_v4 = vld [vmem:[%s13804_s17 + $0x148] sm:$0xff]  ;;  %v12896_v7 = vld [vmem:[%s13804_s17 + $0x180] sm:$0xff]  ;;  %v12935_v9 = vld [vmem:[%s13804_s17 + $0x2b8] sm:$0xff] }
  0x27   : > { %7734 = vmatpush.bf16.msra.mxu3 %v12874_v24  ;;  %v12905_v5 = vld [vmem:[%s13804_s17 + $0x1c8] sm:$0xff]  ;;  %v12888_v10 = vld [vmem:[%s13804_s17 + $0x140] sm:$0xff]  ;;  %v12927_v12 = vld [vmem:[%s13804_s17 + $0x278] sm:$0xff] }
  0x28   : > { %7696 = vmatpush.bf16.msra.mxu0 %v12849_v25  ;;  %v12904_v11 = vld [vmem:[%s13804_s17 + $0x1c0] sm:$0xff]  ;;  %v12943_v13 = vld [vmem:[%s13804_s17 + $0x2f8] sm:$0xff]  ;;  %v12918_v14 = vld [vmem:[%s13804_s17 + $0x230] sm:$0xff] }
  0x29   : > { %7722 = vmatpush.bf16.msra.mxu2 %v12865_v26  ;;  %v12934_v15 = vld [vmem:[%s13804_s17 + $0x2b0] sm:$0xff]  ;;  %v12917_v18 = vld [vmem:[%s13804_s17 + $0x228] sm:$0xff]  ;;  %v12916_v22 = vld [vmem:[%s13804_s17 + $0x220] sm:$0xff] }
  0x2a   : > { %7709 = vmatpush.bf16.msra.mxu1 %v12857_v27  ;;  %v12926_v16 = vld [vmem:[%s13804_s17 + $0x270] sm:$0xff]  ;;  %v12933_v19 = vld [vmem:[%s13804_s17 + $0x2a8] sm:$0xff]  ;;  %v12932_v23 = vld [vmem:[%s13804_s17 + $0x2a0] sm:$0xff] }
  0x2b   : > { %7735 = vmatpush.bf16.msra.mxu3 %v12873_v28  ;;  %v12942_v17 = vld [vmem:[%s13804_s17 + $0x2f0] sm:$0xff]  ;;  %v12925_v20 = vld [vmem:[%s13804_s17 + $0x268] sm:$0xff]  ;;  %v12924_v24 = vld [vmem:[%s13804_s17 + $0x260] sm:$0xff] }
  0x2c   : > { %7697 = vmatpush.bf16.msra.mxu0 %v12848_v29  ;;  %v12941_v21 = vld [vmem:[%s13804_s17 + $0x2e8] sm:$0xff]  ;;  %v12940_v25 = vld [vmem:[%s13804_s17 + $0x2e0] sm:$0xff]  ;;  %v12915_v26 = vld [vmem:[%s13804_s17 + $0x218] sm:$0xff] }
  0x2d   : > { %7723 = vmatpush.bf16.msra.mxu2 %v12864_v30  ;;  %v12931_v27 = vld [vmem:[%s13804_s17 + $0x298] sm:$0xff]  ;;  %v12914_v30 = vld [vmem:[%s13804_s17 + $0x210] sm:$0xff] }
  0x2e   : > { %7710 = vmatpush.bf16.msra.mxu1 %v12856_v33  ;;  %v12923_v28 = vld [vmem:[%s13804_s17 + $0x258] sm:$0xff]  ;;  %v12938_v33 = vld [vmem:[%s13804_s17 + $0x2d0] sm:$0xff] }
  0x2f   : > { %7736 = vmatpush.bf16.msra.mxu3 %v12872_v34  ;;  %7698 = vmatmul.bf16.vlgmr.msra.gmra.mxu0 %v2012_v40  ;;  %v12939_v29 = vld [vmem:[%s13804_s17 + $0x2d8] sm:$0xff]  ;;  %v12913_v34 = vld [vmem:[%s13804_s17 + $0x208] sm:$0xff] }
  0x30   : > { %7742 = vmatpush.bf16.msrb.mxu0 %v12887_v31  ;;  %7724 = vmatmul.bf16.vlgmr.msra.gmra.mxu2 %v2014_v39  ;;  %v12930_v31 = vld [vmem:[%s13804_s17 + $0x290] sm:$0xff]  ;;  %v12928_v39 = vld [vmem:[%s13804_s17 + $0x280] sm:$0xff]  ;;  %v12951_v40 = vld [vmem:[%s13804_s17 + $0x338] sm:$0xff] }
  0x31   : > { %7768 = vmatpush.bf16.msrb.mxu2 %v12903_v32  ;;  %7711 = vmatmul.bf16.vlgmr.msra.gmra.mxu1 %v2013_v44  ;;  %v12922_v32 = vld [vmem:[%s13804_s17 + $0x250] sm:$0xff]  ;;  %v12959_v44 = vld [vmem:[%s13804_s17 + $0x378] sm:$0xff] }
  0x32   : > { %7755 = vmatpush.bf16.msrb.mxu1 %v12895_v35  ;;  %7737 = vmatmul.bf16.vlgmr.msra.gmra.mxu3 %v2015_v43  ;;  %v12929_v35 = vld [vmem:[%s13804_s17 + $0x288] sm:$0xff]  ;;  %v12936_v43 = vld [vmem:[%s13804_s17 + $0x2c0] sm:$0xff]  ;;  %v12971_v1 = vld [vmem:[%s13804_s17 + $0x3d8] sm:$0xff] }
  0x33   : > { %7781 = vmatpush.bf16.msrb.mxu3 %v12911_v36  ;;  %v12921_v36 = vld [vmem:[%s13804_s17 + $0x248] sm:$0xff] }
  0x34   : > { %7743 = vmatpush.bf16.msrb.mxu0 %v12886_v37  ;;  %v12937_v37 = vld [vmem:[%s13804_s17 + $0x2c8] sm:$0xff] }
  0x35   : > { %7769 = vmatpush.bf16.msrb.mxu2 %v12902_v38  ;;  %v12912_v38 = vld [vmem:[%s13804_s17 + $0x200] sm:$0xff] }
  0x36   : > { %7756 = vmatpush.bf16.msrb.mxu1 %v12894_v41  ;;  %v12967_v41 = vld [vmem:[%s13804_s17 + $0x3b8] sm:$0xff] }
  0x37   : > { %7782 = vmatpush.bf16.msrb.mxu3 %v12910_v42  ;;  %v12920_v42 = vld [vmem:[%s13804_s17 + $0x240] sm:$0xff] }
  0x38   : > { %7744 = vmatpush.bf16.msrb.mxu0 %v12885_v45  ;;  %v2022_v45 = vld [vmem:[#allocation1] sm:$0xff] }
  0x39   : > { %7770 = vmatpush.bf16.msrb.mxu2 %v12901_v46  ;;  %v2024_v46 = vld [vmem:[#allocation1 + $0x12] sm:$0xff] }
  0x3a   : > { %7757 = vmatpush.bf16.msrb.mxu1 %v12893_v47  ;;  %v12975_v47 = vld [vmem:[%s13804_s17 + $0x3f8] sm:$0xff] }
  0x3b   : > { %7783 = vmatpush.bf16.msrb.mxu3 %v12909_v48  ;;  %v2023_v48 = vld [vmem:[#allocation1 + $0x9] sm:$0xff] }
  0x3c   : > { %7745 = vmatpush.bf16.msrb.mxu0 %v12884_v49  ;;  %v2025_v49 = vld [vmem:[#allocation1 + $0x1b] sm:$0xff] }
  0x3d   : > { %7771 = vmatpush.bf16.msrb.mxu2 %v12900_v50  ;;  %v12950_v50 = vld [vmem:[%s13804_s17 + $0x330] sm:$0xff] }
  0x3e   : > { %7758 = vmatpush.bf16.msrb.mxu1 %v12892_v51  ;;  %v12966_v51 = vld [vmem:[%s13804_s17 + $0x3b0] sm:$0xff] }
  0x3f   : > { %7784 = vmatpush.bf16.msrb.mxu3 %v12908_v52  ;;  %v12958_v52 = vld [vmem:[%s13804_s17 + $0x370] sm:$0xff] }
  0x40   : > { %7746 = vmatpush.bf16.msrb.mxu0 %v12883_v53  ;;  %v12974_v53 = vld [vmem:[%s13804_s17 + $0x3f0] sm:$0xff] }
  0x41   : > { %7772 = vmatpush.bf16.msrb.mxu2 %v12899_v54  ;;  %v12949_v54 = vld [vmem:[%s13804_s17 + $0x328] sm:$0xff] }
  0x42   : > { %7759 = vmatpush.bf16.msrb.mxu1 %v12891_v55  ;;  %v12965_v55 = vld [vmem:[%s13804_s17 + $0x3a8] sm:$0xff] }
  0x43   : > { %7785 = vmatpush.bf16.msrb.mxu3 %v12907_v56  ;;  %v12957_v56 = vld [vmem:[%s13804_s17 + $0x368] sm:$0xff] }
  0x44   : > { %7747 = vmatpush.bf16.msrb.mxu0 %v12882_v57  ;;  %v12973_v57 = vld [vmem:[%s13804_s17 + $0x3e8] sm:$0xff] }
  0x45   : > { %7773 = vmatpush.bf16.msrb.mxu2 %v12898_v58  ;;  %v12948_v58 = vld [vmem:[%s13804_s17 + $0x320] sm:$0xff] }
  0x46   : > { %7760 = vmatpush.bf16.msrb.mxu1 %v12890_v59  ;;  %v12964_v59 = vld [vmem:[%s13804_s17 + $0x3a0] sm:$0xff] }
  0x47   : > { %7786 = vmatpush.bf16.msrb.mxu3 %v12906_v60  ;;  %v12956_v60 = vld [vmem:[%s13804_s17 + $0x360] sm:$0xff] }
  0x48   : > { %7748 = vmatpush.bf16.msrb.mxu0 %v12881_v2  ;;  %v12946_v2 = vld [vmem:[%s13804_s17 + $0x310] sm:$0xff] }
  0x49   : > { %7774 = vmatpush.bf16.msrb.mxu2 %v12897_v3  ;;  %v12962_v3 = vld [vmem:[%s13804_s17 + $0x390] sm:$0xff] }
  0x4a   : > { %7761 = vmatpush.bf16.msrb.mxu1 %v12889_v4  ;;  %v12954_v4 = vld [vmem:[%s13804_s17 + $0x350] sm:$0xff] }
  0x4b   : > { %7787 = vmatpush.bf16.msrb.mxu3 %v12905_v5  ;;  %v12970_v5 = vld [vmem:[%s13804_s17 + $0x3d0] sm:$0xff] }
  0x4c   : > { %7749 = vmatpush.bf16.msrb.mxu0 %v12880_v6  ;;  %v12945_v6 = vld [vmem:[%s13804_s17 + $0x308] sm:$0xff] }
  0x4d   : > { %7775 = vmatpush.bf16.msrb.mxu2 %v12896_v7  ;;  %v12961_v7 = vld [vmem:[%s13804_s17 + $0x388] sm:$0xff] }
  0x4e   : > { %7762 = vmatpush.bf16.msrb.mxu1 %v12888_v10  ;;  %v2027_v10 = vld [vmem:[#allocation1 + $0x2d] sm:$0xff] }
  0x4f   : > { %7788 = vmatpush.bf16.msrb.mxu3 %v12904_v11  ;;  %7750 = vmatmul.bf16.vlgmr.msrb.gmra.mxu0 %v2016_v62  ;;  %v12947_v62 = vld [vmem:[%s13804_s17 + $0x318] sm:$0xff] }
  0x50   : > { %7794 = vmatpush.bf16.msra.mxu0 %v12919_v8  ;;  %7776 = vmatmul.bf16.vlgmr.msrb.gmra.mxu2 %v2018_v61  ;;  %v12972_v61 = vld [vmem:[%s13804_s17 + $0x3e0] sm:$0xff] }
  0x51   : > { %7820 = vmatpush.bf16.msra.mxu2 %v12935_v9  ;;  %7763 = vmatmul.bf16.vlgmr.msrb.gmra.mxu1 %v2017_v0  ;;  %v12955_v0 = vld [vmem:[%s13804_s17 + $0x358] sm:$0xff]  ;;  %v2026_v8 = vld [vmem:[#allocation1 + $0x24] sm:$0xff] }
  0x52   : > { %7807 = vmatpush.bf16.msra.mxu1 %v12927_v12  ;;  %7789 = vmatmul.bf16.vlgmr.msrb.gmra.mxu3 %v2019_v63  ;;  %v12963_v63 = vld [vmem:[%s13804_s17 + $0x398] sm:$0xff]  ;;  %v185_v12 = vld [vmem:[%s14801_s0 + $0x10] sm:$0xff] }
  0x53   : > { %7833 = vmatpush.bf16.msra.mxu3 %v12943_v13  ;;  %v2028_v9 = vld [vmem:[#allocation1 + $0x36] sm:$0xff]  ;;  %v2029_v11 = vld [vmem:[#allocation1 + $0x3f] sm:$0xff]  ;;  %v12953_v13 = vld [vmem:[%s13804_s17 + $0x348] sm:$0xff] }
  0x54   : > { %7795 = vmatpush.bf16.msra.mxu0 %v12918_v14  ;;  %2031 = vst [vmem:[#allocation1] ss:$9 sm:$0xff] %v185_v12  ;;  %v12969_v14 = vld [vmem:[%s13804_s17 + $0x3c8] sm:$0xff]  ;;  %v13027_v12 = vld [vmem:[%s13804_s17 + $0x598] sm:$0xff] }
  0x55   : > { %7821 = vmatpush.bf16.msra.mxu2 %v12934_v15  ;;  %v12944_v15 = vld [vmem:[%s13804_s17 + $0x300] sm:$0xff] }
  0x56   : > { %7808 = vmatpush.bf16.msra.mxu1 %v12926_v16  ;;  %v12960_v16 = vld [vmem:[%s13804_s17 + $0x380] sm:$0xff] }
  0x57   : > { %7834 = vmatpush.bf16.msra.mxu3 %v12942_v17  ;;  %v12983_v17 = vld [vmem:[%s13804_s17 + $0x438] sm:$0xff] }
  0x58   : > { %7796 = vmatpush.bf16.msra.mxu0 %v12917_v18  ;;  %v12999_v18 = vld [vmem:[%s13804_s17 + $0x4b8] sm:$0xff] }
  0x59   : > { %7822 = vmatpush.bf16.msra.mxu2 %v12933_v19  ;;  %v12952_v19 = vld [vmem:[%s13804_s17 + $0x340] sm:$0xff] }
  0x5a   : > { %7809 = vmatpush.bf16.msra.mxu1 %v12925_v20  ;;  %v12968_v20 = vld [vmem:[%s13804_s17 + $0x3c0] sm:$0xff] }
  0x5b   : > { %7835 = vmatpush.bf16.msra.mxu3 %v12941_v21  ;;  %v12991_v21 = vld [vmem:[%s13804_s17 + $0x478] sm:$0xff] }
  0x5c   : > { %7797 = vmatpush.bf16.msra.mxu0 %v12916_v22  ;;  %v13007_v22 = vld [vmem:[%s13804_s17 + $0x4f8] sm:$0xff] }
  0x5d   : > { %7823 = vmatpush.bf16.msra.mxu2 %v12932_v23  ;;  %v12982_v23 = vld [vmem:[%s13804_s17 + $0x430] sm:$0xff] }
  0x5e   : > { %7810 = vmatpush.bf16.msra.mxu1 %v12924_v24  ;;  %v12998_v24 = vld [vmem:[%s13804_s17 + $0x4b0] sm:$0xff] }
  0x5f   : > { %7836 = vmatpush.bf16.msra.mxu3 %v12940_v25  ;;  %v12990_v25 = vld [vmem:[%s13804_s17 + $0x470] sm:$0xff] }
  0x60   : > { %7798 = vmatpush.bf16.msra.mxu0 %v12915_v26  ;;  %v13006_v26 = vld [vmem:[%s13804_s17 + $0x4f0] sm:$0xff] }
  0x61   : > { %7824 = vmatpush.bf16.msra.mxu2 %v12931_v27  ;;  %v12981_v27 = vld [vmem:[%s13804_s17 + $0x428] sm:$0xff] }
  0x62   : > { %7811 = vmatpush.bf16.msra.mxu1 %v12923_v28  ;;  %v12997_v28 = vld [vmem:[%s13804_s17 + $0x4a8] sm:$0xff] }
  0x63   : > { %7837 = vmatpush.bf16.msra.mxu3 %v12939_v29  ;;  %v12989_v29 = vld [vmem:[%s13804_s17 + $0x468] sm:$0xff] }
  0x64   : > { %7799 = vmatpush.bf16.msra.mxu0 %v12914_v30  ;;  %v13005_v30 = vld [vmem:[%s13804_s17 + $0x4e8] sm:$0xff] }
  0x65   : > { %7825 = vmatpush.bf16.msra.mxu2 %v12930_v31  ;;  %v12980_v31 = vld [vmem:[%s13804_s17 + $0x420] sm:$0xff] }
  0x66   : > { %7812 = vmatpush.bf16.msra.mxu1 %v12922_v32  ;;  %v12996_v32 = vld [vmem:[%s13804_s17 + $0x4a0] sm:$0xff] }
  0x67   : > { %7838 = vmatpush.bf16.msra.mxu3 %v12938_v33  ;;  %v12988_v33 = vld [vmem:[%s13804_s17 + $0x460] sm:$0xff] }
  0x68   : > { %7800 = vmatpush.bf16.msra.mxu0 %v12913_v34  ;;  %v13004_v34 = vld [vmem:[%s13804_s17 + $0x4e0] sm:$0xff] }
  0x69   : > { %7826 = vmatpush.bf16.msra.mxu2 %v12929_v35  ;;  %v12979_v35 = vld [vmem:[%s13804_s17 + $0x418] sm:$0xff] }
  0x6a   : > { %7813 = vmatpush.bf16.msra.mxu1 %v12921_v36  ;;  %v12995_v36 = vld [vmem:[%s13804_s17 + $0x498] sm:$0xff] }
  0x6b   : > { %7839 = vmatpush.bf16.msra.mxu3 %v12937_v37  ;;  %v12987_v37 = vld [vmem:[%s13804_s17 + $0x458] sm:$0xff] }
  0x6c   : > { %7801 = vmatpush.bf16.msra.mxu0 %v12912_v38  ;;  %v13003_v38 = vld [vmem:[%s13804_s17 + $0x4d8] sm:$0xff] }
  0x6d   : > { %7827 = vmatpush.bf16.msra.mxu2 %v12928_v39  ;;  %v12978_v39 = vld [vmem:[%s13804_s17 + $0x410] sm:$0xff] }
  0x6e   : > { %7814 = vmatpush.bf16.msra.mxu1 %v12920_v42  ;;  %v13002_v42 = vld [vmem:[%s13804_s17 + $0x4d0] sm:$0xff] }
  0x6f   : > { %7840 = vmatpush.bf16.msra.mxu3 %v12936_v43  ;;  %7802 = vmatmul.bf16.vlgmr.msra.gmra.mxu0 %v2022_v45  ;;  %v12977_v43 = vld [vmem:[%s13804_s17 + $0x408] sm:$0xff] }
  0x70   : > { %7846 = vmatpush.bf16.msrb.mxu0 %v12951_v40  ;;  %7828 = vmatmul.bf16.vlgmr.msra.gmra.mxu2 %v2024_v46  ;;  %v12994_v40 = vld [vmem:[%s13804_s17 + $0x490] sm:$0xff]  ;;  %v12985_v45 = vld [vmem:[%s13804_s17 + $0x448] sm:$0xff] }
  0x71   : > { %7872 = vmatpush.bf16.msrb.mxu2 %v12967_v41  ;;  %7815 = vmatmul.bf16.vlgmr.msra.gmra.mxu1 %v2023_v48  ;;  %v12986_v41 = vld [vmem:[%s13804_s17 + $0x450] sm:$0xff]  ;;  %v13001_v46 = vld [vmem:[%s13804_s17 + $0x4c8] sm:$0xff]  ;;  %v12992_v48 = vld [vmem:[%s13804_s17 + $0x480] sm:$0xff] }
  0x72   : > { %7859 = vmatpush.bf16.msrb.mxu1 %v12959_v44  ;;  %7841 = vmatmul.bf16.vlgmr.msra.gmra.mxu3 %v2025_v49  ;;  %v12993_v44 = vld [vmem:[%s13804_s17 + $0x488] sm:$0xff]  ;;  %v13015_v49 = vld [vmem:[%s13804_s17 + $0x538] sm:$0xff] }
  0x73   : > { %7885 = vmatpush.bf16.msrb.mxu3 %v12975_v47  ;;  %v12976_v47 = vld [vmem:[%s13804_s17 + $0x400] sm:$0xff] }
  0x74   : > { %7847 = vmatpush.bf16.msrb.mxu0 %v12950_v50  ;;  %v13031_v50 = vld [vmem:[%s13804_s17 + $0x5b8] sm:$0xff] }
  0x75   : > { %7873 = vmatpush.bf16.msrb.mxu2 %v12966_v51  ;;  %v12984_v51 = vld [vmem:[%s13804_s17 + $0x440] sm:$0xff] }
  0x76   : > { %7860 = vmatpush.bf16.msrb.mxu1 %v12958_v52  ;;  %v13000_v52 = vld [vmem:[%s13804_s17 + $0x4c0] sm:$0xff] }
  0x77   : > { %7886 = vmatpush.bf16.msrb.mxu3 %v12974_v53  ;;  %v13023_v53 = vld [vmem:[%s13804_s17 + $0x578] sm:$0xff] }
  0x78   : > { %7848 = vmatpush.bf16.msrb.mxu0 %v12949_v54  ;;  %v2032_v54 = vld [vmem:[#allocation1] sm:$0xff] }
  0x79   : > { %7874 = vmatpush.bf16.msrb.mxu2 %v12965_v55  ;;  %v2034_v55 = vld [vmem:[#allocation1 + $0x12] sm:$0xff] }
  0x7a   : > { %7861 = vmatpush.bf16.msrb.mxu1 %v12957_v56  ;;  %v13039_v56 = vld [vmem:[%s13804_s17 + $0x5f8] sm:$0xff] }
  0x7b   : > { %7887 = vmatpush.bf16.msrb.mxu3 %v12973_v57  ;;  %v2033_v57 = vld [vmem:[#allocation1 + $0x9] sm:$0xff] }
  0x7c   : > { %7849 = vmatpush.bf16.msrb.mxu0 %v12948_v58  ;;  %v2035_v58 = vld [vmem:[#allocation1 + $0x1b] sm:$0xff] }
  0x7d   : > { %7875 = vmatpush.bf16.msrb.mxu2 %v12964_v59  ;;  %v13014_v59 = vld [vmem:[%s13804_s17 + $0x530] sm:$0xff] }
  0x7e   : > { %7862 = vmatpush.bf16.msrb.mxu1 %v12956_v60  ;;  %v13030_v60 = vld [vmem:[%s13804_s17 + $0x5b0] sm:$0xff] }
  0x7f   : > { %7888 = vmatpush.bf16.msrb.mxu3 %v12972_v61  ;;  %v13022_v61 = vld [vmem:[%s13804_s17 + $0x570] sm:$0xff] }
  0x80   : > { %7850 = vmatpush.bf16.msrb.mxu0 %v12947_v62  ;;  %v13038_v62 = vld [vmem:[%s13804_s17 + $0x5f0] sm:$0xff] }
  0x81   : > { %7876 = vmatpush.bf16.msrb.mxu2 %v12963_v63  ;;  %v13013_v63 = vld [vmem:[%s13804_s17 + $0x528] sm:$0xff] }
  0x82   : > { %7863 = vmatpush.bf16.msrb.mxu1 %v12955_v0  ;;  %v13029_v0 = vld [vmem:[%s13804_s17 + $0x5a8] sm:$0xff] }
  0x83   : > { %7889 = vmatpush.bf16.msrb.mxu3 %v12971_v1  ;;  %v13021_v1 = vld [vmem:[%s13804_s17 + $0x568] sm:$0xff] }
  0x84   : > { %7851 = vmatpush.bf16.msrb.mxu0 %v12946_v2  ;;  %v13037_v2 = vld [vmem:[%s13804_s17 + $0x5e8] sm:$0xff] }
  0x85   : > { %7877 = vmatpush.bf16.msrb.mxu2 %v12962_v3  ;;  %v13761_v3 = vld [vmem:[%s178_s24] ss:$0 sm:$0xff] }
  0x86   : > { %7864 = vmatpush.bf16.msrb.mxu1 %v12954_v4  ;;  %v13012_v4 = vld [vmem:[%s13804_s17 + $0x520] sm:$0xff] }
  0x87   : > { %7890 = vmatpush.bf16.msrb.mxu3 %v12970_v5  ;;  %v13028_v5 = vld [vmem:[%s13804_s17 + $0x5a0] sm:$0xff] }
  0x88   : > { %7852 = vmatpush.bf16.msrb.mxu0 %v12945_v6 }
  0x89   : > { %7878 = vmatpush.bf16.msrb.mxu2 %v12961_v7  ;;  %v13020_v7 = vld [vmem:[%s13804_s17 + $0x560] sm:$0xff] }
  0x8a   : > { %7865 = vmatpush.bf16.msrb.mxu1 %v12953_v13 }
  0x8b   : > { %7891 = vmatpush.bf16.msrb.mxu3 %v12969_v14  ;;  %v13019_v14 = vld [vmem:[%s13804_s17 + $0x558] sm:$0xff] }
  0x8c   : > { %7853 = vmatpush.bf16.msrb.mxu0 %v12944_v15  ;;  %v13035_v15 = vld [vmem:[%s13804_s17 + $0x5d8] sm:$0xff] }
  0x8d   : > { %7879 = vmatpush.bf16.msrb.mxu2 %v12960_v16 }
  0x8e   : > { %7866 = vmatpush.bf16.msrb.mxu1 %v12952_v19 }
  0x8f   : > { %7892 = vmatpush.bf16.msrb.mxu3 %v12968_v20  ;;  %7854 = vmatmul.bf16.vlgmr.msrb.gmra.mxu0 %v2026_v8  ;;  %v13036_v8 = vld [vmem:[%s13804_s17 + $0x5e0] sm:$0xff] }
  0x90   : > { %7898 = vmatpush.bf16.msra.mxu0 %v12983_v17  ;;  %7880 = vmatmul.bf16.vlgmr.msrb.gmra.mxu2 %v2028_v9  ;;  %v13010_v17 = vld [vmem:[%s13804_s17 + $0x510] sm:$0xff] }
  0x91   : > { %7924 = vmatpush.bf16.msra.mxu2 %v12999_v18  ;;  %7867 = vmatmul.bf16.vlgmr.msrb.gmra.mxu1 %v2027_v10  ;;  %v13026_v18 = vld [vmem:[%s13804_s17 + $0x590] sm:$0xff] }
  0x92   : > { %7911 = vmatpush.bf16.msra.mxu1 %v12991_v21  ;;  %7893 = vmatmul.bf16.vlgmr.msrb.gmra.mxu3 %v2029_v11  ;;  %v13011_v11 = vld [vmem:[%s13804_s17 + $0x518] sm:$0xff] }
  0x93   : > { %7937 = vmatpush.bf16.msra.mxu3 %v13007_v22  ;;  %v13018_v22 = vld [vmem:[%s13804_s17 + $0x550] sm:$0xff] }
  0x94   : > { %7899 = vmatpush.bf16.msra.mxu0 %v12982_v23  ;;  %v13034_v23 = vld [vmem:[%s13804_s17 + $0x5d0] sm:$0xff] }
  0x95   : > { %7925 = vmatpush.bf16.msra.mxu2 %v12998_v24  ;;  %v13009_v24 = vld [vmem:[%s13804_s17 + $0x508] sm:$0xff] }
  0x96   : > { %7912 = vmatpush.bf16.msra.mxu1 %v12990_v25 }
  0x97   : > { %7938 = vmatpush.bf16.msra.mxu3 %v13006_v26  ;;  %v13025_v26 = vld [vmem:[%s13804_s17 + $0x588] sm:$0xff] }
  0x98   : > { %7900 = vmatpush.bf16.msra.mxu0 %v12981_v27  ;;  %v2036_v27 = vld [vmem:[#allocation1 + $0x24] sm:$0xff] }
  0x99   : > { %7926 = vmatpush.bf16.msra.mxu2 %v12997_v28  ;;  %v2038_v28 = vld [vmem:[#allocation1 + $0x36] sm:$0xff] }
  0x9a   : > { %7913 = vmatpush.bf16.msra.mxu1 %v12989_v29 }
  0x9b   : > { %7939 = vmatpush.bf16.msra.mxu3 %v13005_v30  ;;  %v2037_v30 = vld [vmem:[#allocation1 + $0x2d] sm:$0xff] }
  0x9c   : > { %7901 = vmatpush.bf16.msra.mxu0 %v12980_v31  ;;  %v2039_v31 = vld [vmem:[#allocation1 + $0x3f] sm:$0xff] }
  0x9d   : > { %7927 = vmatpush.bf16.msra.mxu2 %v12996_v32  ;;  %v186_v32 = vld [vmem:[%s14801_s0 + $0x18] sm:$0xff] }
  0x9e   : > { %7914 = vmatpush.bf16.msra.mxu1 %v12988_v33  ;;  %2041 = vst [vmem:[#allocation1] ss:$9 sm:$0xff] %v186_v32  ;;  %v13017_v33 = vld [vmem:[%s13804_s17 + $0x548] sm:$0xff]  ;;  %v13102_v32 = vld [vmem:[%s13804_s17 + $0x7f0] sm:$0xff] }
  0x9f   : > { %7940 = vmatpush.bf16.msra.mxu3 %v13004_v34  ;;  %v13033_v34 = vld [vmem:[%s13804_s17 + $0x5c8] sm:$0xff] }
  0xa0   : > { %7902 = vmatpush.bf16.msra.mxu0 %v12979_v35 }
  0xa1   : > { %7928 = vmatpush.bf16.msra.mxu2 %v12995_v36  ;;  %v13008_v36 = vld [vmem:[%s13804_s17 + $0x500] sm:$0xff] }
  0xa2   : > { %7915 = vmatpush.bf16.msra.mxu1 %v12987_v37  ;;  %v13024_v37 = vld [vmem:[%s13804_s17 + $0x580] sm:$0xff] }
  0xa3   : > { %7941 = vmatpush.bf16.msra.mxu3 %v13003_v38  ;;  %v13047_v38 = vld [vmem:[%s13804_s17 + $0x638] sm:$0xff] }
  0xa4   : > { %7903 = vmatpush.bf16.msra.mxu0 %v12978_v39  ;;  %v13063_v39 = vld [vmem:[%s13804_s17 + $0x6b8] sm:$0xff] }
  0xa5   : > { %7929 = vmatpush.bf16.msra.mxu2 %v12994_v40 }
  0xa6   : > { %7916 = vmatpush.bf16.msra.mxu1 %v12986_v41  ;;  %v13016_v41 = vld [vmem:[%s13804_s17 + $0x540] sm:$0xff] }
  0xa7   : > { %7942 = vmatpush.bf16.msra.mxu3 %v13002_v42  ;;  %v13032_v42 = vld [vmem:[%s13804_s17 + $0x5c0] sm:$0xff] }
  0xa8   : > { %7904 = vmatpush.bf16.msra.mxu0 %v12977_v43  ;;  %v13055_v43 = vld [vmem:[%s13804_s17 + $0x678] sm:$0xff] }
  0xa9   : > { %7930 = vmatpush.bf16.msra.mxu2 %v12993_v44  ;;  %v13071_v44 = vld [vmem:[%s13804_s17 + $0x6f8] sm:$0xff] }
  0xaa   : > { %7917 = vmatpush.bf16.msra.mxu1 %v12985_v45  ;;  %v13046_v45 = vld [vmem:[%s13804_s17 + $0x630] sm:$0xff] }
  0xab   : > { %7943 = vmatpush.bf16.msra.mxu3 %v13001_v46  ;;  %v13062_v46 = vld [vmem:[%s13804_s17 + $0x6b0] sm:$0xff] }
  0xac   : > { %7905 = vmatpush.bf16.msra.mxu0 %v12976_v47  ;;  %v7699_v6 = vpop.f32.mrf.mxu0  ;;  %v13054_v47 = vld [vmem:[%s13804_s17 + $0x670] sm:$0xff] }
  0xad   : > { %7931 = vmatpush.bf16.msra.mxu2 %v12992_v48  ;;  %v7700_v9 = vadd.f32 %v13761_v3, %v7699_v6  ;;  %v13070_v48 = vld [vmem:[%s13804_s17 + $0x6f0] sm:$0xff] }
  0xae   : > { %7918 = vmatpush.bf16.msra.mxu1 %v12984_v51  ;;  %v7712_v10 = vpop.f32.mrf.mxu1  ;;  %v13053_v51 = vld [vmem:[%s13804_s17 + $0x668] sm:$0xff]  ;;  %v13042_v3 = vld [vmem:[%s13804_s17 + $0x610] sm:$0xff] }
  0xaf   : > { %7944 = vmatpush.bf16.msra.mxu3 %v13000_v52  ;;  %7906 = vmatmul.bf16.vlgmr.msra.gmra.mxu0 %v2032_v54  ;;  %v7713_v13 = vadd.f32 %v7712_v10, %v7700_v9  ;;  %v13069_v52 = vld [vmem:[%s13804_s17 + $0x6e8] sm:$0xff]  ;;  %v13060_v54 = vld [vmem:[%s13804_s17 + $0x6a0] sm:$0xff]  ;;  %v13066_v9 = vld [vmem:[%s13804_s17 + $0x6d0] sm:$0xff] }
  0xb0   : > { %7950 = vmatpush.bf16.msrb.mxu0 %v13015_v49  ;;  %7932 = vmatmul.bf16.vlgmr.msra.gmra.mxu2 %v2034_v55  ;;  %v13045_v49 = vld [vmem:[%s13804_s17 + $0x628] sm:$0xff] }
  0xb1   : > { %7976 = vmatpush.bf16.msrb.mxu2 %v13031_v50  ;;  %7919 = vmatmul.bf16.vlgmr.msra.gmra.mxu1 %v2033_v57  ;;  %v13061_v50 = vld [vmem:[%s13804_s17 + $0x6a8] sm:$0xff]  ;;  %v13052_v57 = vld [vmem:[%s13804_s17 + $0x660] sm:$0xff] }
  0xb2   : > { %7963 = vmatpush.bf16.msrb.mxu1 %v13023_v53  ;;  %7945 = vmatmul.bf16.vlgmr.msra.gmra.mxu3 %v2035_v58  ;;  %v13044_v53 = vld [vmem:[%s13804_s17 + $0x620] sm:$0xff] }
  0xb3   : > { %7989 = vmatpush.bf16.msrb.mxu3 %v13039_v56  ;;  %v7725_v16 = vpop.f32.mrf.mxu2  ;;  %v13068_v58 = vld [vmem:[%s13804_s17 + $0x6e0] sm:$0xff] }
  0xb4   : > { %7951 = vmatpush.bf16.msrb.mxu0 %v13014_v59  ;;  %v7726_v19 = vadd.f32 %v7725_v16, %v7713_v13  ;;  %v7701_v21 = vpop.f32.mrf.mxu0  ;;  %v13049_v13 = vld [vmem:[%s13804_s17 + $0x648] sm:$0xff]  ;;  %v13040_v16 = vld [vmem:[%s13804_s17 + $0x600] sm:$0xff] }
  0xb5   : > { %7977 = vmatpush.bf16.msrb.mxu2 %v13030_v60  ;;  %v7738_v20 = vpop.f32.mrf.mxu3  ;;  %v13048_v21 = vld [vmem:[%s13804_s17 + $0x640] sm:$0xff] }
  0xb6   : > { %7964 = vmatpush.bf16.msrb.mxu1 %v13022_v61  ;;  %v7739_v25 = vadd.f32 %v7738_v20, %v7726_v19  ;;  %v7714_v29 = vpop.f32.mrf.mxu1  ;;  %v13043_v61 = vld [vmem:[%s13804_s17 + $0x618] sm:$0xff] }
  0xb7   : > { %7990 = vmatpush.bf16.msrb.mxu3 %v13038_v62  ;;  %v13059_v62 = vld [vmem:[%s13804_s17 + $0x698] sm:$0xff]  ;;  %v13078_v29 = vld [vmem:[%s13804_s17 + $0x730] sm:$0xff] }
  0xb8   : > { %7952 = vmatpush.bf16.msrb.mxu0 %v13013_v63  ;;  %v13051_v63 = vld [vmem:[%s13804_s17 + $0x658] sm:$0xff] }
  0xb9   : > { %7978 = vmatpush.bf16.msrb.mxu2 %v13029_v0  ;;  %v13067_v0 = vld [vmem:[%s13804_s17 + $0x6d8] sm:$0xff] }
  0xba   : > { %7965 = vmatpush.bf16.msrb.mxu1 %v13021_v1  ;;  %v13079_v19 = vld [vmem:[%s13804_s17 + $0x738] sm:$0xff] }
  0xbb   : > { %7991 = vmatpush.bf16.msrb.mxu3 %v13037_v2  ;;  %v7727_v35 = vpop.f32.mrf.mxu2  ;;  %v13095_v20 = vld [vmem:[%s13804_s17 + $0x7b8] sm:$0xff] }
  0xbc   : > { %7953 = vmatpush.bf16.msrb.mxu0 %v13012_v4  ;;  %v13058_v4 = vld [vmem:[%s13804_s17 + $0x690] sm:$0xff]  ;;  %v13085_v35 = vld [vmem:[%s13804_s17 + $0x768] sm:$0xff] }
  0xbd   : > { %7979 = vmatpush.bf16.msrb.mxu2 %v13028_v5  ;;  %v7740_v40 = vpop.f32.mrf.mxu3 }
  0xbe   : > { %7966 = vmatpush.bf16.msrb.mxu1 %v13020_v7  ;;  %v13092_v40 = vld [vmem:[%s13804_s17 + $0x7a0] sm:$0xff] }
  0xbf   : > { %7992 = vmatpush.bf16.msrb.mxu3 %v13036_v8  ;;  %v13050_v8 = vld [vmem:[%s13804_s17 + $0x650] sm:$0xff] }
  0xc0   : > { %7954 = vmatpush.bf16.msrb.mxu0 %v13011_v11  ;;  %v13041_v11 = vld [vmem:[%s13804_s17 + $0x608] sm:$0xff] }
  0xc1   : > { %7980 = vmatpush.bf16.msrb.mxu2 %v13027_v12  ;;  %v13057_v12 = vld [vmem:[%s13804_s17 + $0x688] sm:$0xff] }
  0xc2   : > { %7967 = vmatpush.bf16.msrb.mxu1 %v13019_v14  ;;  %v13065_v14 = vld [vmem:[%s13804_s17 + $0x6c8] sm:$0xff] }
  0xc3   : > { %7993 = vmatpush.bf16.msrb.mxu3 %v13035_v15 }
  0xc4   : > { %7955 = vmatpush.bf16.msrb.mxu0 %v13010_v17  ;;  %v13056_v17 = vld [vmem:[%s13804_s17 + $0x680] sm:$0xff] }
  0xc5   : > { %7981 = vmatpush.bf16.msrb.mxu2 %v13026_v18 }
  0xc6   : > { %7968 = vmatpush.bf16.msrb.mxu1 %v13018_v22  ;;  %v13064_v22 = vld [vmem:[%s13804_s17 + $0x6c0] sm:$0xff] }
  0xc7   : > { %7994 = vmatpush.bf16.msrb.mxu3 %v13034_v23  ;;  %v13087_v23 = vld [vmem:[%s13804_s17 + $0x778] sm:$0xff] }
  0xc8   : > { %7956 = vmatpush.bf16.msrb.mxu0 %v13009_v24  ;;  %v2042_v24 = vld [vmem:[#allocation1] sm:$0xff] }
  0xc9   : > { %7982 = vmatpush.bf16.msrb.mxu2 %v13025_v26  ;;  %v13103_v26 = vld [vmem:[%s13804_s17 + $0x7f8] sm:$0xff] }
  0xca   : > { %7969 = vmatpush.bf16.msrb.mxu1 %v13017_v33  ;;  %v13077_v33 = vld [vmem:[%s13804_s17 + $0x728] sm:$0xff] }
  0xcb   : > { %7995 = vmatpush.bf16.msrb.mxu3 %v13033_v34  ;;  %v13093_v34 = vld [vmem:[%s13804_s17 + $0x7a8] sm:$0xff] }
  0xcc   : > { %7957 = vmatpush.bf16.msrb.mxu0 %v13008_v36  ;;  %v7751_v55 = vpop.f32.mrf.mxu0  ;;  %v13101_v36 = vld [vmem:[%s13804_s17 + $0x7e8] sm:$0xff] }
  0xcd   : > { %7983 = vmatpush.bf16.msrb.mxu2 %v13024_v37  ;;  %v7752_v56 = vadd.f32 %v7751_v55, %v7739_v25  ;;  %v2044_v25 = vld [vmem:[#allocation1 + $0x12] sm:$0xff] }
  0xce   : > { %7970 = vmatpush.bf16.msrb.mxu1 %v13016_v41  ;;  %v7764_v59 = vpop.f32.mrf.mxu1  ;;  %v13090_v55 = vld [vmem:[%s13804_s17 + $0x790] sm:$0xff] }
  0xcf   : > { %7996 = vmatpush.bf16.msrb.mxu3 %v13032_v42  ;;  %7958 = vmatmul.bf16.vlgmr.msrb.gmra.mxu0 %v2036_v27  ;;  %v7765_v60 = vadd.f32 %v7764_v59, %v7752_v56  ;;  %v2043_v27 = vld [vmem:[#allocation1 + $0x9] sm:$0xff] }
  0xd0   : > { %8002 = vmatpush.bf16.msra.mxu0 %v13047_v38  ;;  %7984 = vmatmul.bf16.vlgmr.msrb.gmra.mxu2 %v2038_v28  ;;  %v2045_v28 = vld [vmem:[#allocation1 + $0x1b] sm:$0xff]  ;;  %v13073_v59 = vld [vmem:[%s13804_s17 + $0x708] sm:$0xff] }
  0xd1   : > { %8028 = vmatpush.bf16.msra.mxu2 %v13063_v39  ;;  %7971 = vmatmul.bf16.vlgmr.msrb.gmra.mxu1 %v2037_v30  ;;  %v13094_v30 = vld [vmem:[%s13804_s17 + $0x7b0] sm:$0xff]  ;;  %v13076_v39 = vld [vmem:[%s13804_s17 + $0x720] sm:$0xff] }
  0xd2   : > { %8015 = vmatpush.bf16.msra.mxu1 %v13055_v43  ;;  %7997 = vmatmul.bf16.vlgmr.msrb.gmra.mxu3 %v2039_v31  ;;  %v13086_v31 = vld [vmem:[%s13804_s17 + $0x770] sm:$0xff]  ;;  %v13084_v43 = vld [vmem:[%s13804_s17 + $0x760] sm:$0xff] }
  0xd3   : > { %8041 = vmatpush.bf16.msra.mxu3 %v13071_v44  ;;  %v7777_v1 = vpop.f32.mrf.mxu2  ;;  %v13100_v44 = vld [vmem:[%s13804_s17 + $0x7e0] sm:$0xff] }
  0xd4   : > { %8003 = vmatpush.bf16.msra.mxu0 %v13046_v45  ;;  %v7778_v2 = vadd.f32 %v7777_v1, %v7765_v60  ;;  %v7753_v6 = vpop.f32.mrf.mxu0  ;;  %v13075_v45 = vld [vmem:[%s13804_s17 + $0x718] sm:$0xff]  ;;  %v13089_v60 = vld [vmem:[%s13804_s17 + $0x788] sm:$0xff] }
  0xd5   : > { %8029 = vmatpush.bf16.msra.mxu2 %v13062_v46  ;;  %v7790_v5 = vpop.f32.mrf.mxu3  ;;  %v13091_v46 = vld [vmem:[%s13804_s17 + $0x798] sm:$0xff]  ;;  %v13072_v6 = vld [vmem:[%s13804_s17 + $0x700] sm:$0xff] }
  0xd6   : > { %8016 = vmatpush.bf16.msra.mxu1 %v13054_v47  ;;  %v7791_v7 = vadd.f32 %v7790_v5, %v7778_v2  ;;  %v7766_v10 = vpop.f32.mrf.mxu1  ;;  %v187_v2 = vld [vmem:[%s14801_s0 + $0x20] sm:$0xff] }
  0xd7   : > { %8042 = vmatpush.bf16.msra.mxu3 %v13070_v48  ;;  %v13080_v10 = vld [vmem:[%s13804_s17 + $0x740] sm:$0xff] }
  0xd8   : > { %8004 = vmatpush.bf16.msra.mxu0 %v13045_v49  ;;  %v13083_v49 = vld [vmem:[%s13804_s17 + $0x758] sm:$0xff] }
  0xd9   : > { %8030 = vmatpush.bf16.msra.mxu2 %v13061_v50  ;;  %v13099_v50 = vld [vmem:[%s13804_s17 + $0x7d8] sm:$0xff] }
  0xda   : > { %8017 = vmatpush.bf16.msra.mxu1 %v13053_v51 }
  0xdb   : > { %8043 = vmatpush.bf16.msra.mxu3 %v13069_v52  ;;  %v7779_v15 = vpop.f32.mrf.mxu2 }
  0xdc   : > { %8005 = vmatpush.bf16.msra.mxu0 %v13044_v53  ;;  %v13126_v15 = vld [vmem:[%s13804_s17 + $0x8b0] sm:$0xff] }
  0xdd   : > { %8031 = vmatpush.bf16.msra.mxu2 %v13060_v54  ;;  %v7792_v18 = vpop.f32.mrf.mxu3  ;;  %v13074_v54 = vld [vmem:[%s13804_s17 + $0x710] sm:$0xff] }
  0xde   : > { %8018 = vmatpush.bf16.msra.mxu1 %v13052_v57  ;;  %v13082_v57 = vld [vmem:[%s13804_s17 + $0x750] sm:$0xff]  ;;  %v13109_v18 = vld [vmem:[%s13804_s17 + $0x828] sm:$0xff] }
  0xdf   : > { %8044 = vmatpush.bf16.msra.mxu3 %v13068_v58  ;;  %v13098_v58 = vld [vmem:[%s13804_s17 + $0x7d0] sm:$0xff] }
  0xe0   : > { %8006 = vmatpush.bf16.msra.mxu0 %v13043_v61  ;;  %v2046_v61 = vld [vmem:[#allocation1 + $0x24] sm:$0xff] }
  0xe1   : > { %8032 = vmatpush.bf16.msra.mxu2 %v13059_v62  ;;  %v2048_v62 = vld [vmem:[#allocation1 + $0x36] sm:$0xff] }
  0xe2   : > { %8019 = vmatpush.bf16.msra.mxu1 %v13051_v63  ;;  %v2047_v63 = vld [vmem:[#allocation1 + $0x2d] sm:$0xff] }
  0xe3   : > { %8045 = vmatpush.bf16.msra.mxu3 %v13067_v0  ;;  %v2049_v0 = vld [vmem:[#allocation1 + $0x3f] sm:$0xff] }
  0xe4   : > { %8007 = vmatpush.bf16.msra.mxu0 %v13042_v3  ;;  %2051 = vst [vmem:[#allocation1] ss:$9 sm:$0xff] %v187_v2  ;;  %v13081_v3 = vld [vmem:[%s13804_s17 + $0x748] sm:$0xff] }
  0xe5   : > { %8033 = vmatpush.bf16.msra.mxu2 %v13058_v4  ;;  %v13097_v4 = vld [vmem:[%s13804_s17 + $0x7c8] sm:$0xff] }
  0xe6   : > { %8020 = vmatpush.bf16.msra.mxu1 %v13050_v8  ;;  %v13111_v8 = vld [vmem:[%s13804_s17 + $0x838] sm:$0xff]  ;;  %v13141_v2 = vld [vmem:[%s13804_s17 + $0x928] sm:$0xff] }
  0xe7   : > { %8046 = vmatpush.bf16.msra.mxu3 %v13066_v9  ;;  %v13127_v9 = vld [vmem:[%s13804_s17 + $0x8b8] sm:$0xff] }
  0xe8   : > { %8008 = vmatpush.bf16.msra.mxu0 %v13041_v11  ;;  %v13096_v11 = vld [vmem:[%s13804_s17 + $0x7c0] sm:$0xff] }
  0xe9   : > { %8034 = vmatpush.bf16.msra.mxu2 %v13057_v12  ;;  %v13119_v12 = vld [vmem:[%s13804_s17 + $0x878] sm:$0xff] }
  0xea   : > { %8021 = vmatpush.bf16.msra.mxu1 %v13049_v13  ;;  %v13135_v13 = vld [vmem:[%s13804_s17 + $0x8f8] sm:$0xff] }
  0xeb   : > { %8047 = vmatpush.bf16.msra.mxu3 %v13065_v14  ;;  %v13110_v14 = vld [vmem:[%s13804_s17 + $0x830] sm:$0xff] }
  0xec   : > { %8009 = vmatpush.bf16.msra.mxu0 %v13040_v16  ;;  %v7803_v37 = vpop.f32.mrf.mxu0  ;;  %v13118_v16 = vld [vmem:[%s13804_s17 + $0x870] sm:$0xff] }
  0xed   : > { %8035 = vmatpush.bf16.msra.mxu2 %v13056_v17  ;;  %v7804_v38 = vadd.f32 %v7803_v37, %v7791_v7  ;;  %v13088_v7 = vld [vmem:[%s13804_s17 + $0x780] sm:$0xff]  ;;  %v13134_v17 = vld [vmem:[%s13804_s17 + $0x8f0] sm:$0xff] }
  0xee   : > { %8022 = vmatpush.bf16.msra.mxu1 %v13048_v21  ;;  %v7816_v41 = vpop.f32.mrf.mxu1  ;;  %v13133_v21 = vld [vmem:[%s13804_s17 + $0x8e8] sm:$0xff] }
  0xef   : > { %8048 = vmatpush.bf16.msra.mxu3 %v13064_v22  ;;  %8010 = vmatmul.bf16.vlgmr.msra.gmra.mxu0 %v2042_v24  ;;  %v7817_v42 = vadd.f32 %v7816_v41, %v7804_v38  ;;  %v13108_v24 = vld [vmem:[%s13804_s17 + $0x820] sm:$0xff] }
  0xf0   : > { %8054 = vmatpush.bf16.msrb.mxu0 %v13079_v19  ;;  %8036 = vmatmul.bf16.vlgmr.msra.gmra.mxu2 %v2044_v25  ;;  %v13125_v19 = vld [vmem:[%s13804_s17 + $0x8a8] sm:$0xff]  ;;  %v13124_v25 = vld [vmem:[%s13804_s17 + $0x8a0] sm:$0xff] }
  0xf1   : > { %8080 = vmatpush.bf16.msrb.mxu2 %v13095_v20  ;;  %8023 = vmatmul.bf16.vlgmr.msra.gmra.mxu1 %v2043_v27  ;;  %v13117_v20 = vld [vmem:[%s13804_s17 + $0x868] sm:$0xff] }
  0xf2   : > { %8067 = vmatpush.bf16.msrb.mxu1 %v13087_v23  ;;  %8049 = vmatmul.bf16.vlgmr.msra.gmra.mxu3 %v2045_v28  ;;  %v13116_v28 = vld [vmem:[%s13804_s17 + $0x860] sm:$0xff] }
  0xf3   : > { %8093 = vmatpush.bf16.msrb.mxu3 %v13103_v26  ;;  %v7829_v47 = vpop.f32.mrf.mxu2 }
  0xf4   : > { %8055 = vmatpush.bf16.msrb.mxu0 %v13078_v29  ;;  %v7830_v48 = vadd.f32 %v7829_v47, %v7817_v42  ;;  %v7805_v52 = vpop.f32.mrf.mxu0  ;;  %v13132_v29 = vld [vmem:[%s13804_s17 + $0x8e0] sm:$0xff]  ;;  %v13114_v42 = vld [vmem:[%s13804_s17 + $0x850] sm:$0xff]  ;;  %v13113_v47 = vld [vmem:[%s13804_s17 + $0x848] sm:$0xff] }
  0xf5   : > { %8081 = vmatpush.bf16.msrb.mxu2 %v13094_v30  ;;  %v7842_v51 = vpop.f32.mrf.mxu3  ;;  %v13107_v30 = vld [vmem:[%s13804_s17 + $0x818] sm:$0xff] }
  0xf6   : > { %8068 = vmatpush.bf16.msrb.mxu1 %v13086_v31  ;;  %v14071_v53 = vadd.f32 %v7842_v51, %v7830_v48  ;;  %v7818_v56 = vpop.f32.mrf.mxu1  ;;  %v13123_v31 = vld [vmem:[%s13804_s17 + $0x898] sm:$0xff]  ;;  %v13129_v48 = vld [vmem:[%s13804_s17 + $0x8c8] sm:$0xff]  ;;  %v13120_v51 = vld [vmem:[%s13804_s17 + $0x880] sm:$0xff] }
  0xf7   : > { %8094 = vmatpush.bf16.msrb.mxu3 %v13102_v32  ;;  %v13143_v52 = vld [vmem:[%s13804_s17 + $0x938] sm:$0xff] }
  0xf8   : > { %8056 = vmatpush.bf16.msrb.mxu0 %v13077_v33  ;;  %v13151_v56 = vld [vmem:[%s13804_s17 + $0x978] sm:$0xff] }
  0xf9   : > { %8082 = vmatpush.bf16.msrb.mxu2 %v13093_v34  ;;  %v13115_v34 = vld [vmem:[%s13804_s17 + $0x858] sm:$0xff] }
  0xfa   : > { %8069 = vmatpush.bf16.msrb.mxu1 %v13085_v35  ;;  %v13131_v35 = vld [vmem:[%s13804_s17 + $0x8d8] sm:$0xff] }
  0xfb   : > { %8095 = vmatpush.bf16.msrb.mxu3 %v13101_v36  ;;  %v7831_v1 = vpop.f32.mrf.mxu2 }
  0xfc   : > { %8057 = vmatpush.bf16.msrb.mxu0 %v13076_v39  ;;  %v13106_v39 = vld [vmem:[%s13804_s17 + $0x810] sm:$0xff] }
  0xfd   : > { %8083 = vmatpush.bf16.msrb.mxu2 %v13092_v40  ;;  %v7844_v5 = vpop.f32.mrf.mxu3  ;;  %v13122_v40 = vld [vmem:[%s13804_s17 + $0x890] sm:$0xff] }
  0xfe   : > { %8070 = vmatpush.bf16.msrb.mxu1 %v13084_v43  ;;  %v13130_v43 = vld [vmem:[%s13804_s17 + $0x8d0] sm:$0xff]  ;;  %v13165_v5 = vld [vmem:[%s13804_s17 + $0x9e8] sm:$0xff] }
  0xff   : > { %8096 = vmatpush.bf16.msrb.mxu3 %v13100_v44  ;;  %v13105_v44 = vld [vmem:[%s13804_s17 + $0x808] sm:$0xff]  ;;  %v13166_v1 = vld [vmem:[%s13804_s17 + $0x9f0] sm:$0xff] }
 0x100   : > { %8058 = vmatpush.bf16.msrb.mxu0 %v13075_v45  ;;  %v13121_v45 = vld [vmem:[%s13804_s17 + $0x888] sm:$0xff] }
 0x101   : > { %8084 = vmatpush.bf16.msrb.mxu2 %v13091_v46 }
 0x102   : > { %8071 = vmatpush.bf16.msrb.mxu1 %v13083_v49 }
 0x103   : > { %8097 = vmatpush.bf16.msrb.mxu3 %v13099_v50  ;;  %v13104_v50 = vld [vmem:[%s13804_s17 + $0x800] sm:$0xff] }
 0x104   : > { %8059 = vmatpush.bf16.msrb.mxu0 %v13074_v54  ;;  %v13112_v54 = vld [vmem:[%s13804_s17 + $0x840] sm:$0xff] }
 0x105   : > { %8085 = vmatpush.bf16.msrb.mxu2 %v13090_v55  ;;  %v13128_v55 = vld [vmem:[%s13804_s17 + $0x8c0] sm:$0xff] }
 0x106   : > { %8072 = vmatpush.bf16.msrb.mxu1 %v13082_v57  ;;  %v2052_v57 = vld [vmem:[#allocation1] sm:$0xff] }
 0x107   : > { %8098 = vmatpush.bf16.msrb.mxu3 %v13098_v58  ;;  %v2054_v58 = vld [vmem:[#allocation1 + $0x12] sm:$0xff] }
 0x108   : > { %8060 = vmatpush.bf16.msrb.mxu0 %v13073_v59  ;;  %v13167_v59 = vld [vmem:[%s13804_s17 + $0x9f8] sm:$0xff] }
 0x109   : > { %8086 = vmatpush.bf16.msrb.mxu2 %v13089_v60  ;;  %v2053_v60 = vld [vmem:[#allocation1 + $0x9] sm:$0xff] }
 0x10a   : > { %8073 = vmatpush.bf16.msrb.mxu1 %v13081_v3  ;;  %v13157_v3 = vld [vmem:[%s13804_s17 + $0x9a8] sm:$0xff] }
 0x10b   : > { %8099 = vmatpush.bf16.msrb.mxu3 %v13097_v4  ;;  %v13149_v4 = vld [vmem:[%s13804_s17 + $0x968] sm:$0xff] }
 0x10c   : > { %8061 = vmatpush.bf16.msrb.mxu0 %v13072_v6  ;;  %v7855_v22 = vpop.f32.mrf.mxu0 }
 0x10d   : > { %8087 = vmatpush.bf16.msrb.mxu2 %v13088_v7  ;;  %v7856_v23 = vadd.f32 %v7855_v22, %v14071_v53  ;;  %v13159_v53 = vld [vmem:[%s13804_s17 + $0x9b8] sm:$0xff] }
 0x10e   : > { %8074 = vmatpush.bf16.msrb.mxu1 %v13080_v10  ;;  %v7868_v26 = vpop.f32.mrf.mxu1 }
 0x10f   : > { %8100 = vmatpush.bf16.msrb.mxu3 %v13096_v11  ;;  %8062 = vmatmul.bf16.vlgmr.msrb.gmra.mxu0 %v2046_v61  ;;  %v7869_v27 = vadd.f32 %v7868_v26, %v7856_v23  ;;  %v2055_v61 = vld [vmem:[#allocation1 + $0x1b] sm:$0xff]  ;;  %v13138_v23 = vld [vmem:[%s13804_s17 + $0x910] sm:$0xff] }
 0x110   : > { %8106 = vmatpush.bf16.msra.mxu0 %v13111_v8  ;;  %8088 = vmatmul.bf16.vlgmr.msrb.gmra.mxu2 %v2048_v62  ;;  %v13142_v62 = vld [vmem:[%s13804_s17 + $0x930] sm:$0xff]  ;;  %v13140_v8 = vld [vmem:[%s13804_s17 + $0x920] sm:$0xff] }
 0x111   : > { %8132 = vmatpush.bf16.msra.mxu2 %v13127_v9  ;;  %8075 = vmatmul.bf16.vlgmr.msrb.gmra.mxu1 %v2047_v63  ;;  %v13158_v63 = vld [vmem:[%s13804_s17 + $0x9b0] sm:$0xff]  ;;  %v13156_v9 = vld [vmem:[%s13804_s17 + $0x9a0] sm:$0xff] }
 0x112   : > { %8119 = vmatpush.bf16.msra.mxu1 %v13119_v12  ;;  %8101 = vmatmul.bf16.vlgmr.msrb.gmra.mxu3 %v2049_v0  ;;  %v13150_v0 = vld [vmem:[%s13804_s17 + $0x970] sm:$0xff]  ;;  %v13148_v12 = vld [vmem:[%s13804_s17 + $0x960] sm:$0xff] }
 0x113   : > { %8145 = vmatpush.bf16.msra.mxu3 %v13135_v13  ;;  %v7881_v32 = vpop.f32.mrf.mxu2  ;;  %v13164_v13 = vld [vmem:[%s13804_s17 + $0x9e0] sm:$0xff]  ;;  %v13146_v26 = vld [vmem:[%s13804_s17 + $0x950] sm:$0xff] }
 0x114   : > { %8107 = vmatpush.bf16.msra.mxu0 %v13110_v14  ;;  %v7882_v33 = vadd.f32 %v7881_v32, %v7869_v27  ;;  %v7857_v37 = vpop.f32.mrf.mxu0  ;;  %v13139_v14 = vld [vmem:[%s13804_s17 + $0x918] sm:$0xff]  ;;  %v13162_v27 = vld [vmem:[%s13804_s17 + $0x9d0] sm:$0xff] }
 0x115   : > { %8133 = vmatpush.bf16.msra.mxu2 %v13126_v15  ;;  %v7894_v36 = vpop.f32.mrf.mxu3  ;;  %v13155_v15 = vld [vmem:[%s13804_s17 + $0x998] sm:$0xff]  ;;  %v2057_v32 = vld [vmem:[#allocation1 + $0x2d] sm:$0xff] }
 0x116   : > { %8120 = vmatpush.bf16.msra.mxu1 %v13118_v16  ;;  %v7895_v38 = vadd.f32 %v7894_v36, %v7882_v33  ;;  %v7870_v41 = vpop.f32.mrf.mxu1  ;;  %v2059_v33 = vld [vmem:[#allocation1 + $0x3f] sm:$0xff]  ;;  %v13145_v36 = vld [vmem:[%s13804_s17 + $0x948] sm:$0xff] }
 0x117   : > { %8146 = vmatpush.bf16.msra.mxu3 %v13134_v17  ;;  %v13161_v37 = vld [vmem:[%s13804_s17 + $0x9c8] sm:$0xff]  ;;  %v13175_v41 = vld [vmem:[%s13804_s17 + $0xa38] sm:$0xff] }
 0x118   : > { %8108 = vmatpush.bf16.msra.mxu0 %v13109_v18  ;;  %v13147_v18 = vld [vmem:[%s13804_s17 + $0x958] sm:$0xff] }
 0x119   : > { %8134 = vmatpush.bf16.msra.mxu2 %v13125_v19  ;;  %v13163_v19 = vld [vmem:[%s13804_s17 + $0x9d8] sm:$0xff] }
 0x11a   : > { %8121 = vmatpush.bf16.msra.mxu1 %v13117_v20 }
 0x11b   : > { %8147 = vmatpush.bf16.msra.mxu3 %v13133_v21  ;;  %v7883_v46 = vpop.f32.mrf.mxu2 }
 0x11c   : > { %8109 = vmatpush.bf16.msra.mxu0 %v13108_v24  ;;  %v13154_v24 = vld [vmem:[%s13804_s17 + $0x990] sm:$0xff]  ;;  %v13199_v46 = vld [vmem:[%s13804_s17 + $0xaf8] sm:$0xff] }
 0x11d   : > { %8135 = vmatpush.bf16.msra.mxu2 %v13124_v25  ;;  %v7896_v49 = vpop.f32.mrf.mxu3 }
 0x11e   : > { %8122 = vmatpush.bf16.msra.mxu1 %v13116_v28  ;;  %v13137_v28 = vld [vmem:[%s13804_s17 + $0x908] sm:$0xff]  ;;  %v13182_v49 = vld [vmem:[%s13804_s17 + $0xa70] sm:$0xff] }
 0x11f   : > { %8148 = vmatpush.bf16.msra.mxu3 %v13132_v29  ;;  %v13153_v29 = vld [vmem:[%s13804_s17 + $0x988] sm:$0xff] }
 0x120   : > { %8110 = vmatpush.bf16.msra.mxu0 %v13107_v30  ;;  %v2056_v30 = vld [vmem:[#allocation1 + $0x24] sm:$0xff] }
 0x121   : > { %8136 = vmatpush.bf16.msra.mxu2 %v13123_v31  ;;  %v2058_v31 = vld [vmem:[#allocation1 + $0x36] sm:$0xff] }
 0x122   : > { %8123 = vmatpush.bf16.msra.mxu1 %v13115_v34 }
 0x123   : > { %8149 = vmatpush.bf16.msra.mxu3 %v13131_v35  ;;  %v188_v35 = vld [vmem:[%s14801_s0 + $0x28] sm:$0xff] }
 0x124   : > { %8111 = vmatpush.bf16.msra.mxu0 %v13106_v39  ;;  %2061 = vst [vmem:[#allocation1] ss:$9 sm:$0xff] %v188_v35  ;;  %v13136_v39 = vld [vmem:[%s13804_s17 + $0x900] sm:$0xff]  ;;  %v13205_v35 = vld [vmem:[%s13804_s17 + $0xb28] sm:$0xff] }
 0x125   : > { %8137 = vmatpush.bf16.msra.mxu2 %v13122_v40  ;;  %v13152_v40 = vld [vmem:[%s13804_s17 + $0x980] sm:$0xff] }
 0x126   : > { %8124 = vmatpush.bf16.msra.mxu1 %v13114_v42  ;;  %v13191_v42 = vld [vmem:[%s13804_s17 + $0xab8] sm:$0xff] }
 0x127   : > { %8150 = vmatpush.bf16.msra.mxu3 %v13130_v43  ;;  %v13144_v43 = vld [vmem:[%s13804_s17 + $0x940] sm:$0xff] }
 0x128   : > { %8112 = vmatpush.bf16.msra.mxu0 %v13105_v44  ;;  %v13160_v44 = vld [vmem:[%s13804_s17 + $0x9c0] sm:$0xff] }
 0x129   : > { %8138 = vmatpush.bf16.msra.mxu2 %v13121_v45  ;;  %v13183_v45 = vld [vmem:[%s13804_s17 + $0xa78] sm:$0xff] }
 0x12a   : > { %8125 = vmatpush.bf16.msra.mxu1 %v13113_v47  ;;  %v13174_v47 = vld [vmem:[%s13804_s17 + $0xa30] sm:$0xff] }
 0x12b   : > { %8151 = vmatpush.bf16.msra.mxu3 %v13129_v48  ;;  %v13190_v48 = vld [vmem:[%s13804_s17 + $0xab0] sm:$0xff] }
 0x12c   : > { %8113 = vmatpush.bf16.msra.mxu0 %v13104_v50  ;;  %v7907_v6 = vpop.f32.mrf.mxu0  ;;  %v13198_v50 = vld [vmem:[%s13804_s17 + $0xaf0] sm:$0xff] }
 0x12d   : > { %8139 = vmatpush.bf16.msra.mxu2 %v13120_v51  ;;  %v7908_v7 = vadd.f32 %v7907_v6, %v7895_v38  ;;  %v13173_v51 = vld [vmem:[%s13804_s17 + $0xa28] sm:$0xff] }
 0x12e   : > { %8126 = vmatpush.bf16.msra.mxu1 %v13112_v54  ;;  %v7920_v10 = vpop.f32.mrf.mxu1  ;;  %v13197_v54 = vld [vmem:[%s13804_s17 + $0xae8] sm:$0xff] }
 0x12f   : > { %8152 = vmatpush.bf16.msra.mxu3 %v13128_v55  ;;  %8114 = vmatmul.bf16.vlgmr.msra.gmra.mxu0 %v2052_v57  ;;  %v7921_v11 = vadd.f32 %v7920_v10, %v7908_v7  ;;  %v13172_v57 = vld [vmem:[%s13804_s17 + $0xa20] sm:$0xff] }
 0x130   : > { %8158 = vmatpush.bf16.msrb.mxu0 %v13143_v52  ;;  %8140 = vmatmul.bf16.vlgmr.msra.gmra.mxu2 %v2054_v58  ;;  %v13189_v52 = vld [vmem:[%s13804_s17 + $0xaa8] sm:$0xff]  ;;  %v13188_v58 = vld [vmem:[%s13804_s17 + $0xaa0] sm:$0xff] }
 0x131   : > { %8184 = vmatpush.bf16.msrb.mxu2 %v13159_v53  ;;  %8127 = vmatmul.bf16.vlgmr.msra.gmra.mxu1 %v2053_v60  ;;  %v13181_v53 = vld [vmem:[%s13804_s17 + $0xa68] sm:$0xff] }
 0x132   : > { %8171 = vmatpush.bf16.msrb.mxu1 %v13151_v56  ;;  %8153 = vmatmul.bf16.vlgmr.msra.gmra.mxu3 %v2055_v61  ;;  %v13180_v61 = vld [vmem:[%s13804_s17 + $0xa60] sm:$0xff] }
 0x133   : > { %8197 = vmatpush.bf16.msrb.mxu3 %v13167_v59  ;;  %v7933_v16 = vpop.f32.mrf.mxu2 }
 0x134   : > { %8159 = vmatpush.bf16.msrb.mxu0 %v13142_v62  ;;  %v7934_v17 = vadd.f32 %v7933_v16, %v7921_v11  ;;  %v7909_v21 = vpop.f32.mrf.mxu0  ;;  %v13196_v62 = vld [vmem:[%s13804_s17 + $0xae0] sm:$0xff]  ;;  %v13178_v11 = vld [vmem:[%s13804_s17 + $0xa50] sm:$0xff]  ;;  %v13177_v16 = vld [vmem:[%s13804_s17 + $0xa48] sm:$0xff] }
 0x135   : > { %8185 = vmatpush.bf16.msrb.mxu2 %v13158_v63  ;;  %v7946_v20 = vpop.f32.mrf.mxu3  ;;  %v13171_v63 = vld [vmem:[%s13804_s17 + $0xa18] sm:$0xff] }
 0x136   : > { %8172 = vmatpush.bf16.msrb.mxu1 %v13150_v0  ;;  %v14141_v22 = vadd.f32 %v7946_v20, %v7934_v17  ;;  %v7922_v25 = vpop.f32.mrf.mxu1  ;;  %v13187_v0 = vld [vmem:[%s13804_s17 + $0xa98] sm:$0xff]  ;;  %v13193_v17 = vld [vmem:[%s13804_s17 + $0xac8] sm:$0xff]  ;;  %v13184_v20 = vld [vmem:[%s13804_s17 + $0xa80] sm:$0xff] }
 0x137   : > { %8198 = vmatpush.bf16.msrb.mxu3 %v13166_v1  ;;  %v13207_v21 = vld [vmem:[%s13804_s17 + $0xb38] sm:$0xff] }
 0x138   : > { %8160 = vmatpush.bf16.msrb.mxu0 %v13141_v2  ;;  %v13215_v25 = vld [vmem:[%s13804_s17 + $0xb78] sm:$0xff] }
 0x139   : > { %8186 = vmatpush.bf16.msrb.mxu2 %v13157_v3  ;;  %v13179_v3 = vld [vmem:[%s13804_s17 + $0xa58] sm:$0xff] }
 0x13a   : > { %8173 = vmatpush.bf16.msrb.mxu1 %v13149_v4  ;;  %v13195_v4 = vld [vmem:[%s13804_s17 + $0xad8] sm:$0xff] }
 0x13b   : > { %8199 = vmatpush.bf16.msrb.mxu3 %v13165_v5  ;;  %v7935_v34 = vpop.f32.mrf.mxu2 }
 0x13c   : > { %8161 = vmatpush.bf16.msrb.mxu0 %v13140_v8  ;;  %v13170_v8 = vld [vmem:[%s13804_s17 + $0xa10] sm:$0xff] }
 0x13d   : > { %8187 = vmatpush.bf16.msrb.mxu2 %v13156_v9  ;;  %v7948_v38 = vpop.f32.mrf.mxu3  ;;  %v13186_v9 = vld [vmem:[%s13804_s17 + $0xa90] sm:$0xff] }
 0x13e   : > { %8174 = vmatpush.bf16.msrb.mxu1 %v13148_v12  ;;  %v13194_v12 = vld [vmem:[%s13804_s17 + $0xad0] sm:$0xff]  ;;  %v13229_v38 = vld [vmem:[%s13804_s17 + $0xbe8] sm:$0xff] }
 0x13f   : > { %8200 = vmatpush.bf16.msrb.mxu3 %v13164_v13  ;;  %v13169_v13 = vld [vmem:[%s13804_s17 + $0xa08] sm:$0xff]  ;;  %v13230_v34 = vld [vmem:[%s13804_s17 + $0xbf0] sm:$0xff] }
 0x140   : > { %8162 = vmatpush.bf16.msrb.mxu0 %v13139_v14  ;;  %v13185_v14 = vld [vmem:[%s13804_s17 + $0xa88] sm:$0xff] }
 0x141   : > { %8188 = vmatpush.bf16.msrb.mxu2 %v13155_v15 }
 0x142   : > { %8175 = vmatpush.bf16.msrb.mxu1 %v13147_v18 }
 0x143   : > { %8201 = vmatpush.bf16.msrb.mxu3 %v13163_v19  ;;  %v13168_v19 = vld [vmem:[%s13804_s17 + $0xa00] sm:$0xff] }
 0x144   : > { %8163 = vmatpush.bf16.msrb.mxu0 %v13138_v23  ;;  %v13176_v23 = vld [vmem:[%s13804_s17 + $0xa40] sm:$0xff] }
 0x145   : > { %8189 = vmatpush.bf16.msrb.mxu2 %v13154_v24  ;;  %v13192_v24 = vld [vmem:[%s13804_s17 + $0xac0] sm:$0xff] }
 0x146   : > { %8176 = vmatpush.bf16.msrb.mxu1 %v13146_v26  ;;  %v2062_v26 = vld [vmem:[#allocation1] sm:$0xff] }
 0x147   : > { %8202 = vmatpush.bf16.msrb.mxu3 %v13162_v27  ;;  %v2064_v27 = vld [vmem:[#allocation1 + $0x12] sm:$0xff] }
 0x148   : > { %8164 = vmatpush.bf16.msrb.mxu0 %v13137_v28  ;;  %v13231_v28 = vld [vmem:[%s13804_s17 + $0xbf8] sm:$0xff] }
 0x149   : > { %8190 = vmatpush.bf16.msrb.mxu2 %v13153_v29  ;;  %v2063_v29 = vld [vmem:[#allocation1 + $0x9] sm:$0xff] }
 0x14a   : > { %8177 = vmatpush.bf16.msrb.mxu1 %v13145_v36  ;;  %v13221_v36 = vld [vmem:[%s13804_s17 + $0xba8] sm:$0xff] }
 0x14b   : > { %8203 = vmatpush.bf16.msrb.mxu3 %v13161_v37  ;;  %v13213_v37 = vld [vmem:[%s13804_s17 + $0xb68] sm:$0xff] }
 0x14c   : > { %8165 = vmatpush.bf16.msrb.mxu0 %v13136_v39  ;;  %v7959_v55 = vpop.f32.mrf.mxu0 }
 0x14d   : > { %8191 = vmatpush.bf16.msrb.mxu2 %v13152_v40  ;;  %v7960_v56 = vadd.f32 %v7959_v55, %v14141_v22  ;;  %v13223_v22 = vld [vmem:[%s13804_s17 + $0xbb8] sm:$0xff] }
 0x14e   : > { %8178 = vmatpush.bf16.msrb.mxu1 %v13144_v43  ;;  %v7972_v59 = vpop.f32.mrf.mxu1 }
 0x14f   : > { %8204 = vmatpush.bf16.msrb.mxu3 %v13160_v44  ;;  %8166 = vmatmul.bf16.vlgmr.msrb.gmra.mxu0 %v2056_v30  ;;  %v7973_v60 = vadd.f32 %v7972_v59, %v7960_v56  ;;  %v2065_v30 = vld [vmem:[#allocation1 + $0x1b] sm:$0xff]  ;;  %v13202_v56 = vld [vmem:[%s13804_s17 + $0xb10] sm:$0xff] }
 0x150   : > { %8210 = vmatpush.bf16.msra.mxu0 %v13175_v41  ;;  %8192 = vmatmul.bf16.vlgmr.msrb.gmra.mxu2 %v2058_v31  ;;  %v13206_v31 = vld [vmem:[%s13804_s17 + $0xb30] sm:$0xff]  ;;  %v13204_v41 = vld [vmem:[%s13804_s17 + $0xb20] sm:$0xff] }
 0x151   : > { %8236 = vmatpush.bf16.msra.mxu2 %v13191_v42  ;;  %8179 = vmatmul.bf16.vlgmr.msrb.gmra.mxu1 %v2057_v32  ;;  %v13222_v32 = vld [vmem:[%s13804_s17 + $0xbb0] sm:$0xff]  ;;  %v13220_v42 = vld [vmem:[%s13804_s17 + $0xba0] sm:$0xff] }
 0x152   : > { %8223 = vmatpush.bf16.msra.mxu1 %v13183_v45  ;;  %8205 = vmatmul.bf16.vlgmr.msrb.gmra.mxu3 %v2059_v33  ;;  %v13214_v33 = vld [vmem:[%s13804_s17 + $0xb70] sm:$0xff]  ;;  %v13212_v45 = vld [vmem:[%s13804_s17 + $0xb60] sm:$0xff] }
 0x153   : > { %8249 = vmatpush.bf16.msra.mxu3 %v13199_v46  ;;  %v7985_v1 = vpop.f32.mrf.mxu2  ;;  %v13228_v46 = vld [vmem:[%s13804_s17 + $0xbe0] sm:$0xff]  ;;  %v13210_v59 = vld [vmem:[%s13804_s17 + $0xb50] sm:$0xff] }
 0x154   : > { %8211 = vmatpush.bf16.msra.mxu0 %v13174_v47  ;;  %v7986_v2 = vadd.f32 %v7985_v1, %v7973_v60  ;;  %v7961_v6 = vpop.f32.mrf.mxu0  ;;  %v13203_v47 = vld [vmem:[%s13804_s17 + $0xb18] sm:$0xff]  ;;  %v13226_v60 = vld [vmem:[%s13804_s17 + $0xbd0] sm:$0xff] }
 0x155   : > { %8237 = vmatpush.bf16.msra.mxu2 %v13190_v48  ;;  %v7998_v5 = vpop.f32.mrf.mxu3  ;;  %v13219_v48 = vld [vmem:[%s13804_s17 + $0xb98] sm:$0xff]  ;;  %v2067_v1 = vld [vmem:[#allocation1 + $0x2d] sm:$0xff] }
 0x156   : > { %8224 = vmatpush.bf16.msra.mxu1 %v13182_v49  ;;  %v7999_v7 = vadd.f32 %v7998_v5, %v7986_v2  ;;  %v7974_v10 = vpop.f32.mrf.mxu1  ;;  %v2069_v2 = vld [vmem:[#allocation1 + $0x3f] sm:$0xff]  ;;  %v13209_v5 = vld [vmem:[%s13804_s17 + $0xb48] sm:$0xff] }
 0x157   : > { %8250 = vmatpush.bf16.msra.mxu3 %v13198_v50  ;;  %v13225_v6 = vld [vmem:[%s13804_s17 + $0xbc8] sm:$0xff]  ;;  %v13239_v10 = vld [vmem:[%s13804_s17 + $0xc38] sm:$0xff] }
 0x158   : > { %8212 = vmatpush.bf16.msra.mxu0 %v13173_v51  ;;  %v13211_v51 = vld [vmem:[%s13804_s17 + $0xb58] sm:$0xff] }
 0x159   : > { %8238 = vmatpush.bf16.msra.mxu2 %v13189_v52  ;;  %v13227_v52 = vld [vmem:[%s13804_s17 + $0xbd8] sm:$0xff] }
 0x15a   : > { %8225 = vmatpush.bf16.msra.mxu1 %v13181_v53 }
 0x15b   : > { %8251 = vmatpush.bf16.msra.mxu3 %v13197_v54  ;;  %v7987_v15 = vpop.f32.mrf.mxu2 }
 0x15c   : > { %8213 = vmatpush.bf16.msra.mxu0 %v13172_v57  ;;  %v13218_v57 = vld [vmem:[%s13804_s17 + $0xb90] sm:$0xff]  ;;  %v13263_v15 = vld [vmem:[%s13804_s17 + $0xcf8] sm:$0xff] }
 0x15d   : > { %8239 = vmatpush.bf16.msra.mxu2 %v13188_v58  ;;  %v8000_v18 = vpop.f32.mrf.mxu3 }
 0x15e   : > { %8226 = vmatpush.bf16.msra.mxu1 %v13180_v61  ;;  %v13201_v61 = vld [vmem:[%s13804_s17 + $0xb08] sm:$0xff]  ;;  %v13246_v18 = vld [vmem:[%s13804_s17 + $0xc70] sm:$0xff] }
 0x15f   : > { %8252 = vmatpush.bf16.msra.mxu3 %v13196_v62  ;;  %v13217_v62 = vld [vmem:[%s13804_s17 + $0xb88] sm:$0xff] }
 0x160   : > { %8214 = vmatpush.bf16.msra.mxu0 %v13171_v63  ;;  %v2066_v63 = vld [vmem:[#allocation1 + $0x24] sm:$0xff] }
 0x161   : > { %8240 = vmatpush.bf16.msra.mxu2 %v13187_v0  ;;  %v2068_v0 = vld [vmem:[#allocation1 + $0x36] sm:$0xff] }
 0x162   : > { %8227 = vmatpush.bf16.msra.mxu1 %v13179_v3 }
 0x163   : > { %8253 = vmatpush.bf16.msra.mxu3 %v13195_v4  ;;  %v189_v4 = vld [vmem:[%s14801_s0 + $0x30] sm:$0xff] }
 0x164   : > { %8215 = vmatpush.bf16.msra.mxu0 %v13170_v8  ;;  %2071 = vst [vmem:[#allocation1] ss:$9 sm:$0xff] %v189_v4  ;;  %v13200_v8 = vld [vmem:[%s13804_s17 + $0xb00] sm:$0xff]  ;;  %v13269_v4 = vld [vmem:[%s13804_s17 + $0xd28] sm:$0xff] }
 0x165   : > { %8241 = vmatpush.bf16.msra.mxu2 %v13186_v9  ;;  %v13216_v9 = vld [vmem:[%s13804_s17 + $0xb80] sm:$0xff] }
 0x166   : > { %8228 = vmatpush.bf16.msra.mxu1 %v13178_v11  ;;  %v13255_v11 = vld [vmem:[%s13804_s17 + $0xcb8] sm:$0xff] }
 0x167   : > { %8254 = vmatpush.bf16.msra.mxu3 %v13194_v12  ;;  %v13208_v12 = vld [vmem:[%s13804_s17 + $0xb40] sm:$0xff] }
 0x168   : > { %8216 = vmatpush.bf16.msra.mxu0 %v13169_v13  ;;  %v13224_v13 = vld [vmem:[%s13804_s17 + $0xbc0] sm:$0xff] }
 0x169   : > { %8242 = vmatpush.bf16.msra.mxu2 %v13185_v14  ;;  %v13247_v14 = vld [vmem:[%s13804_s17 + $0xc78] sm:$0xff] }
 0x16a   : > { %8229 = vmatpush.bf16.msra.mxu1 %v13177_v16  ;;  %v13238_v16 = vld [vmem:[%s13804_s17 + $0xc30] sm:$0xff] }
 0x16b   : > { %8255 = vmatpush.bf16.msra.mxu3 %v13193_v17  ;;  %v13254_v17 = vld [vmem:[%s13804_s17 + $0xcb0] sm:$0xff] }
 0x16c   : > { %8217 = vmatpush.bf16.msra.mxu0 %v13168_v19  ;;  %v8011_v39 = vpop.f32.mrf.mxu0  ;;  %v13262_v19 = vld [vmem:[%s13804_s17 + $0xcf0] sm:$0xff] }
 0x16d   : > { %8243 = vmatpush.bf16.msra.mxu2 %v13184_v20  ;;  %v8012_v40 = vadd.f32 %v8011_v39, %v7999_v7  ;;  %v13237_v20 = vld [vmem:[%s13804_s17 + $0xc28] sm:$0xff] }
 0x16e   : > { %8230 = vmatpush.bf16.msra.mxu1 %v13176_v23  ;;  %v8024_v43 = vpop.f32.mrf.mxu1  ;;  %v13261_v23 = vld [vmem:[%s13804_s17 + $0xce8] sm:$0xff] }
 0x16f   : > { %8256 = vmatpush.bf16.msra.mxu3 %v13192_v24  ;;  %8218 = vmatmul.bf16.vlgmr.msra.gmra.mxu0 %v2062_v26  ;;  %v8025_v44 = vadd.f32 %v8024_v43, %v8012_v40  ;;  %v13236_v26 = vld [vmem:[%s13804_s17 + $0xc20] sm:$0xff] }
 0x170   : > { %8262 = vmatpush.bf16.msrb.mxu0 %v13207_v21  ;;  %8244 = vmatmul.bf16.vlgmr.msra.gmra.mxu2 %v2064_v27  ;;  %v13253_v21 = vld [vmem:[%s13804_s17 + $0xca8] sm:$0xff]  ;;  %v13252_v27 = vld [vmem:[%s13804_s17 + $0xca0] sm:$0xff] }
 0x171   : > { %8288 = vmatpush.bf16.msrb.mxu2 %v13223_v22  ;;  %8231 = vmatmul.bf16.vlgmr.msra.gmra.mxu1 %v2063_v29  ;;  %v13245_v22 = vld [vmem:[%s13804_s17 + $0xc68] sm:$0xff] }
 0x172   : > { %8275 = vmatpush.bf16.msrb.mxu1 %v13215_v25  ;;  %8257 = vmatmul.bf16.vlgmr.msra.gmra.mxu3 %v2065_v30  ;;  %v13244_v30 = vld [vmem:[%s13804_s17 + $0xc60] sm:$0xff] }
 0x173   : > { %8301 = vmatpush.bf16.msrb.mxu3 %v13231_v28  ;;  %v8037_v49 = vpop.f32.mrf.mxu2 }
 0x174   : > { %8263 = vmatpush.bf16.msrb.mxu0 %v13206_v31  ;;  %v8038_v50 = vadd.f32 %v8037_v49, %v8025_v44  ;;  %v8013_v54 = vpop.f32.mrf.mxu0  ;;  %v13260_v31 = vld [vmem:[%s13804_s17 + $0xce0] sm:$0xff]  ;;  %v13242_v44 = vld [vmem:[%s13804_s17 + $0xc50] sm:$0xff]  ;;  %v13241_v49 = vld [vmem:[%s13804_s17 + $0xc48] sm:$0xff] }
 0x175   : > { %8289 = vmatpush.bf16.msrb.mxu2 %v13222_v32  ;;  %v8050_v53 = vpop.f32.mrf.mxu3  ;;  %v13235_v32 = vld [vmem:[%s13804_s17 + $0xc18] sm:$0xff] }
 0x176   : > { %8276 = vmatpush.bf16.msrb.mxu1 %v13214_v33  ;;  %v14211_v55 = vadd.f32 %v8050_v53, %v8038_v50  ;;  %v8026_v58 = vpop.f32.mrf.mxu1  ;;  %v13251_v33 = vld [vmem:[%s13804_s17 + $0xc98] sm:$0xff]  ;;  %v13257_v50 = vld [vmem:[%s13804_s17 + $0xcc8] sm:$0xff]  ;;  %v13248_v53 = vld [vmem:[%s13804_s17 + $0xc80] sm:$0xff] }
 0x177   : > { %8302 = vmatpush.bf16.msrb.mxu3 %v13230_v34  ;;  %v13271_v54 = vld [vmem:[%s13804_s17 + $0xd38] sm:$0xff] }
 0x178   : > { %8264 = vmatpush.bf16.msrb.mxu0 %v13205_v35  ;;  %v13279_v58 = vld [vmem:[%s13804_s17 + $0xd78] sm:$0xff] }
 0x179   : > { %8290 = vmatpush.bf16.msrb.mxu2 %v13221_v36  ;;  %v13243_v36 = vld [vmem:[%s13804_s17 + $0xc58] sm:$0xff] }
 0x17a   : > { %8277 = vmatpush.bf16.msrb.mxu1 %v13213_v37  ;;  %v13259_v37 = vld [vmem:[%s13804_s17 + $0xcd8] sm:$0xff] }
 0x17b   : > { %8303 = vmatpush.bf16.msrb.mxu3 %v13229_v38  ;;  %v8039_v3 = vpop.f32.mrf.mxu2 }
 0x17c   : > { %8265 = vmatpush.bf16.msrb.mxu0 %v13204_v41  ;;  %v13234_v41 = vld [vmem:[%s13804_s17 + $0xc10] sm:$0xff] }
 0x17d   : > { %8291 = vmatpush.bf16.msrb.mxu2 %v13220_v42  ;;  %v8052_v7 = vpop.f32.mrf.mxu3  ;;  %v13250_v42 = vld [vmem:[%s13804_s17 + $0xc90] sm:$0xff] }
 0x17e   : > { %8278 = vmatpush.bf16.msrb.mxu1 %v13212_v45  ;;  %v13258_v45 = vld [vmem:[%s13804_s17 + $0xcd0] sm:$0xff]  ;;  %v13293_v7 = vld [vmem:[%s13804_s17 + $0xde8] sm:$0xff] }
 0x17f   : > { %8304 = vmatpush.bf16.msrb.mxu3 %v13228_v46  ;;  %v13233_v46 = vld [vmem:[%s13804_s17 + $0xc08] sm:$0xff]  ;;  %v13294_v3 = vld [vmem:[%s13804_s17 + $0xdf0] sm:$0xff] }
 0x180   : > { %8266 = vmatpush.bf16.msrb.mxu0 %v13203_v47  ;;  %v13249_v47 = vld [vmem:[%s13804_s17 + $0xc88] sm:$0xff] }
 0x181   : > { %8292 = vmatpush.bf16.msrb.mxu2 %v13219_v48 }
 0x182   : > { %8279 = vmatpush.bf16.msrb.mxu1 %v13211_v51 }
 0x183   : > { %8305 = vmatpush.bf16.msrb.mxu3 %v13227_v52  ;;  %v13232_v52 = vld [vmem:[%s13804_s17 + $0xc00] sm:$0xff] }
 0x184   : > { %8267 = vmatpush.bf16.msrb.mxu0 %v13202_v56  ;;  %v13240_v56 = vld [vmem:[%s13804_s17 + $0xc40] sm:$0xff] }
 0x185   : > { %8293 = vmatpush.bf16.msrb.mxu2 %v13218_v57  ;;  %v13256_v57 = vld [vmem:[%s13804_s17 + $0xcc0] sm:$0xff] }
 0x186   : > { %8280 = vmatpush.bf16.msrb.mxu1 %v13210_v59  ;;  %v2072_v59 = vld [vmem:[#allocation1] sm:$0xff] }
 0x187   : > { %8306 = vmatpush.bf16.msrb.mxu3 %v13226_v60  ;;  %v2074_v60 = vld [vmem:[#allocation1 + $0x12] sm:$0xff] }
 0x188   : > { %8268 = vmatpush.bf16.msrb.mxu0 %v13201_v61  ;;  %v13295_v61 = vld [vmem:[%s13804_s17 + $0xdf8] sm:$0xff] }
 0x189   : > { %8294 = vmatpush.bf16.msrb.mxu2 %v13217_v62  ;;  %v2073_v62 = vld [vmem:[#allocation1 + $0x9] sm:$0xff] }
 0x18a   : > { %8281 = vmatpush.bf16.msrb.mxu1 %v13209_v5  ;;  %v13285_v5 = vld [vmem:[%s13804_s17 + $0xda8] sm:$0xff] }
 0x18b   : > { %8307 = vmatpush.bf16.msrb.mxu3 %v13225_v6  ;;  %v13277_v6 = vld [vmem:[%s13804_s17 + $0xd68] sm:$0xff] }
 0x18c   : > { %8269 = vmatpush.bf16.msrb.mxu0 %v13200_v8  ;;  %v8063_v24 = vpop.f32.mrf.mxu0 }
 0x18d   : > { %8295 = vmatpush.bf16.msrb.mxu2 %v13216_v9  ;;  %v8064_v25 = vadd.f32 %v8063_v24, %v14211_v55  ;;  %v13287_v55 = vld [vmem:[%s13804_s17 + $0xdb8] sm:$0xff] }
 0x18e   : > { %8282 = vmatpush.bf16.msrb.mxu1 %v13208_v12  ;;  %v8076_v28 = vpop.f32.mrf.mxu1 }
 0x18f   : > { %8308 = vmatpush.bf16.msrb.mxu3 %v13224_v13  ;;  %8270 = vmatmul.bf16.vlgmr.msrb.gmra.mxu0 %v2066_v63  ;;  %v8077_v29 = vadd.f32 %v8076_v28, %v8064_v25  ;;  %v2075_v63 = vld [vmem:[#allocation1 + $0x1b] sm:$0xff]  ;;  %v13266_v25 = vld [vmem:[%s13804_s17 + $0xd10] sm:$0xff] }
 0x190   : > { %8314 = vmatpush.bf16.msra.mxu0 %v13239_v10  ;;  %8296 = vmatmul.bf16.vlgmr.msrb.gmra.mxu2 %v2068_v0  ;;  %v13270_v0 = vld [vmem:[%s13804_s17 + $0xd30] sm:$0xff]  ;;  %v13268_v10 = vld [vmem:[%s13804_s17 + $0xd20] sm:$0xff] }
 0x191   : > { %8340 = vmatpush.bf16.msra.mxu2 %v13255_v11  ;;  %8283 = vmatmul.bf16.vlgmr.msrb.gmra.mxu1 %v2067_v1  ;;  %v13286_v1 = vld [vmem:[%s13804_s17 + $0xdb0] sm:$0xff]  ;;  %v13284_v11 = vld [vmem:[%s13804_s17 + $0xda0] sm:$0xff] }
 0x192   : > { %8327 = vmatpush.bf16.msra.mxu1 %v13247_v14  ;;  %8309 = vmatmul.bf16.vlgmr.msrb.gmra.mxu3 %v2069_v2  ;;  %v13278_v2 = vld [vmem:[%s13804_s17 + $0xd70] sm:$0xff]  ;;  %v13276_v14 = vld [vmem:[%s13804_s17 + $0xd60] sm:$0xff] }
 0x193   : > { %8353 = vmatpush.bf16.msra.mxu3 %v13263_v15  ;;  %v8089_v34 = vpop.f32.mrf.mxu2  ;;  %v13292_v15 = vld [vmem:[%s13804_s17 + $0xde0] sm:$0xff]  ;;  %v13274_v28 = vld [vmem:[%s13804_s17 + $0xd50] sm:$0xff] }
 0x194   : > { %8315 = vmatpush.bf16.msra.mxu0 %v13238_v16  ;;  %v8090_v35 = vadd.f32 %v8089_v34, %v8077_v29  ;;  %v8065_v39 = vpop.f32.mrf.mxu0  ;;  %v13267_v16 = vld [vmem:[%s13804_s17 + $0xd18] sm:$0xff]  ;;  %v13290_v29 = vld [vmem:[%s13804_s17 + $0xdd0] sm:$0xff] }
 0x195   : > { %8341 = vmatpush.bf16.msra.mxu2 %v13254_v17  ;;  %v8102_v38 = vpop.f32.mrf.mxu3  ;;  %v13283_v17 = vld [vmem:[%s13804_s17 + $0xd98] sm:$0xff]  ;;  %v2077_v34 = vld [vmem:[#allocation1 + $0x2d] sm:$0xff] }
 0x196   : > { %8328 = vmatpush.bf16.msra.mxu1 %v13246_v18  ;;  %v8103_v40 = vadd.f32 %v8102_v38, %v8090_v35  ;;  %v8078_v43 = vpop.f32.mrf.mxu1  ;;  %v2079_v35 = vld [vmem:[#allocation1 + $0x3f] sm:$0xff]  ;;  %v13273_v38 = vld [vmem:[%s13804_s17 + $0xd48] sm:$0xff] }
 0x197   : > { %8354 = vmatpush.bf16.msra.mxu3 %v13262_v19  ;;  %v13289_v39 = vld [vmem:[%s13804_s17 + $0xdc8] sm:$0xff]  ;;  %v13303_v43 = vld [vmem:[%s13804_s17 + $0xe38] sm:$0xff] }
 0x198   : > { %8316 = vmatpush.bf16.msra.mxu0 %v13237_v20  ;;  %v13275_v20 = vld [vmem:[%s13804_s17 + $0xd58] sm:$0xff] }
 0x199   : > { %8342 = vmatpush.bf16.msra.mxu2 %v13253_v21  ;;  %v13291_v21 = vld [vmem:[%s13804_s17 + $0xdd8] sm:$0xff] }
 0x19a   : > { %8329 = vmatpush.bf16.msra.mxu1 %v13245_v22 }
 0x19b   : > { %8355 = vmatpush.bf16.msra.mxu3 %v13261_v23  ;;  %v8091_v48 = vpop.f32.mrf.mxu2 }
 0x19c   : > { %8317 = vmatpush.bf16.msra.mxu0 %v13236_v26  ;;  %v13282_v26 = vld [vmem:[%s13804_s17 + $0xd90] sm:$0xff]  ;;  %v13327_v48 = vld [vmem:[%s13804_s17 + $0xef8] sm:$0xff] }
 0x19d   : > { %8343 = vmatpush.bf16.msra.mxu2 %v13252_v27  ;;  %v8104_v51 = vpop.f32.mrf.mxu3 }
 0x19e   : > { %8330 = vmatpush.bf16.msra.mxu1 %v13244_v30  ;;  %v13265_v30 = vld [vmem:[%s13804_s17 + $0xd08] sm:$0xff]  ;;  %v13310_v51 = vld [vmem:[%s13804_s17 + $0xe70] sm:$0xff] }
 0x19f   : > { %8356 = vmatpush.bf16.msra.mxu3 %v13260_v31  ;;  %v13281_v31 = vld [vmem:[%s13804_s17 + $0xd88] sm:$0xff] }
 0x1a0   : > { %8318 = vmatpush.bf16.msra.mxu0 %v13235_v32  ;;  %v2076_v32 = vld [vmem:[#allocation1 + $0x24] sm:$0xff] }
 0x1a1   : > { %8344 = vmatpush.bf16.msra.mxu2 %v13251_v33  ;;  %v2078_v33 = vld [vmem:[#allocation1 + $0x36] sm:$0xff] }
 0x1a2   : > { %8331 = vmatpush.bf16.msra.mxu1 %v13243_v36 }
 0x1a3   : > { %8357 = vmatpush.bf16.msra.mxu3 %v13259_v37  ;;  %v190_v37 = vld [vmem:[%s14801_s0 + $0x38] sm:$0xff] }
 0x1a4   : > { %8319 = vmatpush.bf16.msra.mxu0 %v13234_v41  ;;  %2081 = vst [vmem:[#allocation1] ss:$9 sm:$0xff] %v190_v37  ;;  %v13264_v41 = vld [vmem:[%s13804_s17 + $0xd00] sm:$0xff]  ;;  %v13333_v37 = vld [vmem:[%s13804_s17 + $0xf28] sm:$0xff] }
 0x1a5   : > { %8345 = vmatpush.bf16.msra.mxu2 %v13250_v42  ;;  %v13280_v42 = vld [vmem:[%s13804_s17 + $0xd80] sm:$0xff] }
 0x1a6   : > { %8332 = vmatpush.bf16.msra.mxu1 %v13242_v44  ;;  %v13319_v44 = vld [vmem:[%s13804_s17 + $0xeb8] sm:$0xff] }
 0x1a7   : > { %8358 = vmatpush.bf16.msra.mxu3 %v13258_v45  ;;  %v13272_v45 = vld [vmem:[%s13804_s17 + $0xd40] sm:$0xff] }
 0x1a8   : > { %8320 = vmatpush.bf16.msra.mxu0 %v13233_v46  ;;  %v13288_v46 = vld [vmem:[%s13804_s17 + $0xdc0] sm:$0xff] }
 0x1a9   : > { %8346 = vmatpush.bf16.msra.mxu2 %v13249_v47  ;;  %v13311_v47 = vld [vmem:[%s13804_s17 + $0xe78] sm:$0xff] }
 0x1aa   : > { %8333 = vmatpush.bf16.msra.mxu1 %v13241_v49  ;;  %v13302_v49 = vld [vmem:[%s13804_s17 + $0xe30] sm:$0xff] }
 0x1ab   : > { %8359 = vmatpush.bf16.msra.mxu3 %v13257_v50  ;;  %v13318_v50 = vld [vmem:[%s13804_s17 + $0xeb0] sm:$0xff] }
 0x1ac   : > { %8321 = vmatpush.bf16.msra.mxu0 %v13232_v52  ;;  %v8115_v8 = vpop.f32.mrf.mxu0  ;;  %v13326_v52 = vld [vmem:[%s13804_s17 + $0xef0] sm:$0xff] }
 0x1ad   : > { %8347 = vmatpush.bf16.msra.mxu2 %v13248_v53  ;;  %v8116_v9 = vadd.f32 %v8115_v8, %v8103_v40  ;;  %v13301_v53 = vld [vmem:[%s13804_s17 + $0xe28] sm:$0xff] }
 0x1ae   : > { %8334 = vmatpush.bf16.msra.mxu1 %v13240_v56  ;;  %v8128_v12 = vpop.f32.mrf.mxu1  ;;  %v13325_v56 = vld [vmem:[%s13804_s17 + $0xee8] sm:$0xff] }
 0x1af   : > { %8360 = vmatpush.bf16.msra.mxu3 %v13256_v57  ;;  %8322 = vmatmul.bf16.vlgmr.msra.gmra.mxu0 %v2072_v59  ;;  %v8129_v13 = vadd.f32 %v8128_v12, %v8116_v9  ;;  %v13300_v59 = vld [vmem:[%s13804_s17 + $0xe20] sm:$0xff] }
 0x1b0   : > { %8366 = vmatpush.bf16.msrb.mxu0 %v13271_v54  ;;  %8348 = vmatmul.bf16.vlgmr.msra.gmra.mxu2 %v2074_v60  ;;  %v13317_v54 = vld [vmem:[%s13804_s17 + $0xea8] sm:$0xff]  ;;  %v13316_v60 = vld [vmem:[%s13804_s17 + $0xea0] sm:$0xff] }
 0x1b1   : > { %8392 = vmatpush.bf16.msrb.mxu2 %v13287_v55  ;;  %8335 = vmatmul.bf16.vlgmr.msra.gmra.mxu1 %v2073_v62  ;;  %v13309_v55 = vld [vmem:[%s13804_s17 + $0xe68] sm:$0xff] }
 0x1b2   : > { %8379 = vmatpush.bf16.msrb.mxu1 %v13279_v58  ;;  %8361 = vmatmul.bf16.vlgmr.msra.gmra.mxu3 %v2075_v63  ;;  %v13308_v63 = vld [vmem:[%s13804_s17 + $0xe60] sm:$0xff] }
 0x1b3   : > { %8405 = vmatpush.bf16.msrb.mxu3 %v13295_v61  ;;  %v8141_v18 = vpop.f32.mrf.mxu2 }
 0x1b4   : > { %8367 = vmatpush.bf16.msrb.mxu0 %v13270_v0  ;;  %v8142_v19 = vadd.f32 %v8141_v18, %v8129_v13  ;;  %v8117_v23 = vpop.f32.mrf.mxu0  ;;  %v13324_v0 = vld [vmem:[%s13804_s17 + $0xee0] sm:$0xff]  ;;  %v13306_v13 = vld [vmem:[%s13804_s17 + $0xe50] sm:$0xff]  ;;  %v13305_v18 = vld [vmem:[%s13804_s17 + $0xe48] sm:$0xff] }
 0x1b5   : > { %8393 = vmatpush.bf16.msrb.mxu2 %v13286_v1  ;;  %v8154_v22 = vpop.f32.mrf.mxu3  ;;  %v13299_v1 = vld [vmem:[%s13804_s17 + $0xe18] sm:$0xff] }
 0x1b6   : > { %8380 = vmatpush.bf16.msrb.mxu1 %v13278_v2  ;;  %v14281_v24 = vadd.f32 %v8154_v22, %v8142_v19  ;;  %v8130_v27 = vpop.f32.mrf.mxu1  ;;  %v13315_v2 = vld [vmem:[%s13804_s17 + $0xe98] sm:$0xff]  ;;  %v13321_v19 = vld [vmem:[%s13804_s17 + $0xec8] sm:$0xff]  ;;  %v13312_v22 = vld [vmem:[%s13804_s17 + $0xe80] sm:$0xff] }
 0x1b7   : > { %8406 = vmatpush.bf16.msrb.mxu3 %v13294_v3  ;;  %v13335_v23 = vld [vmem:[%s13804_s17 + $0xf38] sm:$0xff] }
 0x1b8   : > { %8368 = vmatpush.bf16.msrb.mxu0 %v13269_v4  ;;  %v13343_v27 = vld [vmem:[%s13804_s17 + $0xf78] sm:$0xff] }
 0x1b9   : > { %8394 = vmatpush.bf16.msrb.mxu2 %v13285_v5  ;;  %v13307_v5 = vld [vmem:[%s13804_s17 + $0xe58] sm:$0xff] }
 0x1ba   : > { %8381 = vmatpush.bf16.msrb.mxu1 %v13277_v6  ;;  %v13323_v6 = vld [vmem:[%s13804_s17 + $0xed8] sm:$0xff] }
 0x1bb   : > { %8407 = vmatpush.bf16.msrb.mxu3 %v13293_v7  ;;  %v8143_v36 = vpop.f32.mrf.mxu2 }
 0x1bc   : > { %8369 = vmatpush.bf16.msrb.mxu0 %v13268_v10  ;;  %v13298_v10 = vld [vmem:[%s13804_s17 + $0xe10] sm:$0xff] }
 0x1bd   : > { %8395 = vmatpush.bf16.msrb.mxu2 %v13284_v11  ;;  %v8156_v40 = vpop.f32.mrf.mxu3  ;;  %v13314_v11 = vld [vmem:[%s13804_s17 + $0xe90] sm:$0xff] }
 0x1be   : > { %8382 = vmatpush.bf16.msrb.mxu1 %v13276_v14  ;;  %v13322_v14 = vld [vmem:[%s13804_s17 + $0xed0] sm:$0xff]  ;;  %v13357_v40 = vld [vmem:[%s13804_s17 + $0xfe8] sm:$0xff] }
 0x1bf   : > { %8408 = vmatpush.bf16.msrb.mxu3 %v13292_v15  ;;  %v13297_v15 = vld [vmem:[%s13804_s17 + $0xe08] sm:$0xff]  ;;  %v13358_v36 = vld [vmem:[%s13804_s17 + $0xff0] sm:$0xff] }
 0x1c0   : > { %8370 = vmatpush.bf16.msrb.mxu0 %v13267_v16  ;;  %v13313_v16 = vld [vmem:[%s13804_s17 + $0xe88] sm:$0xff] }
 0x1c1   : > { %8396 = vmatpush.bf16.msrb.mxu2 %v13283_v17 }
 0x1c2   : > { %8383 = vmatpush.bf16.msrb.mxu1 %v13275_v20 }
 0x1c3   : > { %8409 = vmatpush.bf16.msrb.mxu3 %v13291_v21  ;;  %v13296_v21 = vld [vmem:[%s13804_s17 + $0xe00] sm:$0xff] }
 0x1c4   : > { %8371 = vmatpush.bf16.msrb.mxu0 %v13266_v25  ;;  %v13304_v25 = vld [vmem:[%s13804_s17 + $0xe40] sm:$0xff] }
 0x1c5   : > { %8397 = vmatpush.bf16.msrb.mxu2 %v13282_v26  ;;  %v13320_v26 = vld [vmem:[%s13804_s17 + $0xec0] sm:$0xff] }
 0x1c6   : > { %8384 = vmatpush.bf16.msrb.mxu1 %v13274_v28  ;;  %v2082_v28 = vld [vmem:[#allocation1] sm:$0xff] }
 0x1c7   : > { %8410 = vmatpush.bf16.msrb.mxu3 %v13290_v29  ;;  %v2084_v29 = vld [vmem:[#allocation1 + $0x12] sm:$0xff] }
 0x1c8   : > { %8372 = vmatpush.bf16.msrb.mxu0 %v13265_v30  ;;  %v13359_v30 = vld [vmem:[%s13804_s17 + $0xff8] sm:$0xff] }
 0x1c9   : > { %8398 = vmatpush.bf16.msrb.mxu2 %v13281_v31  ;;  %v2083_v31 = vld [vmem:[#allocation1 + $0x9] sm:$0xff] }
 0x1ca   : > { %8385 = vmatpush.bf16.msrb.mxu1 %v13273_v38  ;;  %v13349_v38 = vld [vmem:[%s13804_s17 + $0xfa8] sm:$0xff] }
 0x1cb   : > { %8411 = vmatpush.bf16.msrb.mxu3 %v13289_v39  ;;  %v13341_v39 = vld [vmem:[%s13804_s17 + $0xf68] sm:$0xff] }
 0x1cc   : > { %8373 = vmatpush.bf16.msrb.mxu0 %v13264_v41  ;;  %v8167_v57 = vpop.f32.mrf.mxu0 }
 0x1cd   : > { %8399 = vmatpush.bf16.msrb.mxu2 %v13280_v42  ;;  %v8168_v58 = vadd.f32 %v8167_v57, %v14281_v24  ;;  %v13351_v24 = vld [vmem:[%s13804_s17 + $0xfb8] sm:$0xff] }
 0x1ce   : > { %8386 = vmatpush.bf16.msrb.mxu1 %v13272_v45  ;;  %v8180_v61 = vpop.f32.mrf.mxu1 }
 0x1cf   : > { %8412 = vmatpush.bf16.msrb.mxu3 %v13288_v46  ;;  %8374 = vmatmul.bf16.vlgmr.msrb.gmra.mxu0 %v2076_v32  ;;  %v8181_v62 = vadd.f32 %v8180_v61, %v8168_v58  ;;  %v2085_v32 = vld [vmem:[#allocation1 + $0x1b] sm:$0xff]  ;;  %v13330_v58 = vld [vmem:[%s13804_s17 + $0xf10] sm:$0xff] }
 0x1d0   : > { %8418 = vmatpush.bf16.msra.mxu0 %v13303_v43  ;;  %8400 = vmatmul.bf16.vlgmr.msrb.gmra.mxu2 %v2078_v33  ;;  %v13334_v33 = vld [vmem:[%s13804_s17 + $0xf30] sm:$0xff]  ;;  %v13332_v43 = vld [vmem:[%s13804_s17 + $0xf20] sm:$0xff] }
 0x1d1   : > { %8444 = vmatpush.bf16.msra.mxu2 %v13319_v44  ;;  %8387 = vmatmul.bf16.vlgmr.msrb.gmra.mxu1 %v2077_v34  ;;  %v13350_v34 = vld [vmem:[%s13804_s17 + $0xfb0] sm:$0xff]  ;;  %v13348_v44 = vld [vmem:[%s13804_s17 + $0xfa0] sm:$0xff] }
 0x1d2   : > { %8431 = vmatpush.bf16.msra.mxu1 %v13311_v47  ;;  %8413 = vmatmul.bf16.vlgmr.msrb.gmra.mxu3 %v2079_v35  ;;  %v13342_v35 = vld [vmem:[%s13804_s17 + $0xf70] sm:$0xff]  ;;  %v13340_v47 = vld [vmem:[%s13804_s17 + $0xf60] sm:$0xff] }
 0x1d3   : > { %8457 = vmatpush.bf16.msra.mxu3 %v13327_v48  ;;  %v8193_v3 = vpop.f32.mrf.mxu2  ;;  %v13356_v48 = vld [vmem:[%s13804_s17 + $0xfe0] sm:$0xff]  ;;  %v13338_v61 = vld [vmem:[%s13804_s17 + $0xf50] sm:$0xff] }
 0x1d4   : > { %8419 = vmatpush.bf16.msra.mxu0 %v13302_v49  ;;  %v8194_v4 = vadd.f32 %v8193_v3, %v8181_v62  ;;  %v8169_v8 = vpop.f32.mrf.mxu0  ;;  %v13331_v49 = vld [vmem:[%s13804_s17 + $0xf18] sm:$0xff]  ;;  %v13354_v62 = vld [vmem:[%s13804_s17 + $0xfd0] sm:$0xff] }
 0x1d5   : > { %8445 = vmatpush.bf16.msra.mxu2 %v13318_v50  ;;  %v8206_v7 = vpop.f32.mrf.mxu3  ;;  %v13347_v50 = vld [vmem:[%s13804_s17 + $0xf98] sm:$0xff]  ;;  %v2087_v3 = vld [vmem:[#allocation1 + $0x2d] sm:$0xff] }
 0x1d6   : > { %8432 = vmatpush.bf16.msra.mxu1 %v13310_v51  ;;  %v8207_v9 = vadd.f32 %v8206_v7, %v8194_v4  ;;  %v8182_v12 = vpop.f32.mrf.mxu1  ;;  %v2089_v4 = vld [vmem:[#allocation1 + $0x3f] sm:$0xff]  ;;  %v13337_v7 = vld [vmem:[%s13804_s17 + $0xf48] sm:$0xff] }
 0x1d7   : > { %8458 = vmatpush.bf16.msra.mxu3 %v13326_v52  ;;  %v13353_v8 = vld [vmem:[%s13804_s17 + $0xfc8] sm:$0xff]  ;;  %v13367_v12 = vld [vmem:[%s13804_s17 + $0x1038] sm:$0xff] }
 0x1d8   : > { %8420 = vmatpush.bf16.msra.mxu0 %v13301_v53  ;;  %v13339_v53 = vld [vmem:[%s13804_s17 + $0xf58] sm:$0xff] }
 0x1d9   : > { %8446 = vmatpush.bf16.msra.mxu2 %v13317_v54  ;;  %v13355_v54 = vld [vmem:[%s13804_s17 + $0xfd8] sm:$0xff] }
 0x1da   : > { %8433 = vmatpush.bf16.msra.mxu1 %v13309_v55 }
 0x1db   : > { %8459 = vmatpush.bf16.msra.mxu3 %v13325_v56  ;;  %v8195_v17 = vpop.f32.mrf.mxu2 }
 0x1dc   : > { %8421 = vmatpush.bf16.msra.mxu0 %v13300_v59  ;;  %v13346_v59 = vld [vmem:[%s13804_s17 + $0xf90] sm:$0xff]  ;;  %v13391_v17 = vld [vmem:[%s13804_s17 + $0x10f8] sm:$0xff] }
 0x1dd   : > { %8447 = vmatpush.bf16.msra.mxu2 %v13316_v60  ;;  %v8208_v20 = vpop.f32.mrf.mxu3 }
 0x1de   : > { %8434 = vmatpush.bf16.msra.mxu1 %v13308_v63  ;;  %v13329_v63 = vld [vmem:[%s13804_s17 + $0xf08] sm:$0xff]  ;;  %v13374_v20 = vld [vmem:[%s13804_s17 + $0x1070] sm:$0xff] }
 0x1df   : > { %8460 = vmatpush.bf16.msra.mxu3 %v13324_v0  ;;  %v13345_v0 = vld [vmem:[%s13804_s17 + $0xf88] sm:$0xff] }
 0x1e0   : > { %8422 = vmatpush.bf16.msra.mxu0 %v13299_v1  ;;  %v2086_v1 = vld [vmem:[#allocation1 + $0x24] sm:$0xff] }
 0x1e1   : > { %8448 = vmatpush.bf16.msra.mxu2 %v13315_v2  ;;  %v2088_v2 = vld [vmem:[#allocation1 + $0x36] sm:$0xff] }
 0x1e2   : > { %8435 = vmatpush.bf16.msra.mxu1 %v13307_v5 }
 0x1e3   : > { %8461 = vmatpush.bf16.msra.mxu3 %v13323_v6  ;;  %v191_v6 = vld [vmem:[%s14801_s0 + $0x40] sm:$0xff] }
 0x1e4   : > { %8423 = vmatpush.bf16.msra.mxu0 %v13298_v10  ;;  %2091 = vst [vmem:[#allocation1] ss:$9 sm:$0xff] %v191_v6  ;;  %v13328_v10 = vld [vmem:[%s13804_s17 + $0xf00] sm:$0xff]  ;;  %v13397_v6 = vld [vmem:[%s13804_s17 + $0x1128] sm:$0xff] }
 0x1e5   : > { %8449 = vmatpush.bf16.msra.mxu2 %v13314_v11  ;;  %v13344_v11 = vld [vmem:[%s13804_s17 + $0xf80] sm:$0xff] }
 0x1e6   : > { %8436 = vmatpush.bf16.msra.mxu1 %v13306_v13  ;;  %v13383_v13 = vld [vmem:[%s13804_s17 + $0x10b8] sm:$0xff] }
 0x1e7   : > { %8462 = vmatpush.bf16.msra.mxu3 %v13322_v14  ;;  %v13336_v14 = vld [vmem:[%s13804_s17 + $0xf40] sm:$0xff] }
 0x1e8   : > { %8424 = vmatpush.bf16.msra.mxu0 %v13297_v15  ;;  %v13352_v15 = vld [vmem:[%s13804_s17 + $0xfc0] sm:$0xff] }
 0x1e9   : > { %8450 = vmatpush.bf16.msra.mxu2 %v13313_v16  ;;  %v13375_v16 = vld [vmem:[%s13804_s17 + $0x1078] sm:$0xff] }
 0x1ea   : > { %8437 = vmatpush.bf16.msra.mxu1 %v13305_v18  ;;  %v13366_v18 = vld [vmem:[%s13804_s17 + $0x1030] sm:$0xff] }
 0x1eb   : > { %8463 = vmatpush.bf16.msra.mxu3 %v13321_v19  ;;  %v13382_v19 = vld [vmem:[%s13804_s17 + $0x10b0] sm:$0xff] }
 0x1ec   : > { %8425 = vmatpush.bf16.msra.mxu0 %v13296_v21  ;;  %v8219_v41 = vpop.f32.mrf.mxu0  ;;  %v13390_v21 = vld [vmem:[%s13804_s17 + $0x10f0] sm:$0xff] }
 0x1ed   : > { %8451 = vmatpush.bf16.msra.mxu2 %v13312_v22  ;;  %v8220_v42 = vadd.f32 %v8219_v41, %v8207_v9  ;;  %v13365_v22 = vld [vmem:[%s13804_s17 + $0x1028] sm:$0xff] }
 0x1ee   : > { %8438 = vmatpush.bf16.msra.mxu1 %v13304_v25  ;;  %v8232_v45 = vpop.f32.mrf.mxu1  ;;  %v13389_v25 = vld [vmem:[%s13804_s17 + $0x10e8] sm:$0xff] }
 0x1ef   : > { %8464 = vmatpush.bf16.msra.mxu3 %v13320_v26  ;;  %8426 = vmatmul.bf16.vlgmr.msra.gmra.mxu0 %v2082_v28  ;;  %v8233_v46 = vadd.f32 %v8232_v45, %v8220_v42  ;;  %v13364_v28 = vld [vmem:[%s13804_s17 + $0x1020] sm:$0xff] }
 0x1f0   : > { %8470 = vmatpush.bf16.msrb.mxu0 %v13335_v23  ;;  %8452 = vmatmul.bf16.vlgmr.msra.gmra.mxu2 %v2084_v29  ;;  %v13381_v23 = vld [vmem:[%s13804_s17 + $0x10a8] sm:$0xff]  ;;  %v13380_v29 = vld [vmem:[%s13804_s17 + $0x10a0] sm:$0xff] }
 0x1f1   : > { %8496 = vmatpush.bf16.msrb.mxu2 %v13351_v24  ;;  %8439 = vmatmul.bf16.vlgmr.msra.gmra.mxu1 %v2083_v31  ;;  %v13373_v24 = vld [vmem:[%s13804_s17 + $0x1068] sm:$0xff] }
 0x1f2   : > { %8483 = vmatpush.bf16.msrb.mxu1 %v13343_v27  ;;  %8465 = vmatmul.bf16.vlgmr.msra.gmra.mxu3 %v2085_v32  ;;  %v13372_v32 = vld [vmem:[%s13804_s17 + $0x1060] sm:$0xff] }
 0x1f3   : > { %8509 = vmatpush.bf16.msrb.mxu3 %v13359_v30  ;;  %v8245_v51 = vpop.f32.mrf.mxu2 }
 0x1f4   : > { %8471 = vmatpush.bf16.msrb.mxu0 %v13334_v33  ;;  %v8246_v52 = vadd.f32 %v8245_v51, %v8233_v46  ;;  %v8221_v56 = vpop.f32.mrf.mxu0  ;;  %v13388_v33 = vld [vmem:[%s13804_s17 + $0x10e0] sm:$0xff]  ;;  %v13370_v46 = vld [vmem:[%s13804_s17 + $0x1050] sm:$0xff]  ;;  %v13369_v51 = vld [vmem:[%s13804_s17 + $0x1048] sm:$0xff] }
 0x1f5   : > { %8497 = vmatpush.bf16.msrb.mxu2 %v13350_v34  ;;  %v8258_v55 = vpop.f32.mrf.mxu3  ;;  %v13363_v34 = vld [vmem:[%s13804_s17 + $0x1018] sm:$0xff] }
 0x1f6   : > { %8484 = vmatpush.bf16.msrb.mxu1 %v13342_v35  ;;  %v14351_v57 = vadd.f32 %v8258_v55, %v8246_v52  ;;  %v8234_v60 = vpop.f32.mrf.mxu1  ;;  %v13379_v35 = vld [vmem:[%s13804_s17 + $0x1098] sm:$0xff]  ;;  %v13385_v52 = vld [vmem:[%s13804_s17 + $0x10c8] sm:$0xff]  ;;  %v13376_v55 = vld [vmem:[%s13804_s17 + $0x1080] sm:$0xff] }
 0x1f7   : > { %8510 = vmatpush.bf16.msrb.mxu3 %v13358_v36  ;;  %v13399_v56 = vld [vmem:[%s13804_s17 + $0x1138] sm:$0xff] }
 0x1f8   : > { %8472 = vmatpush.bf16.msrb.mxu0 %v13333_v37  ;;  %v13407_v60 = vld [vmem:[%s13804_s17 + $0x1178] sm:$0xff] }
 0x1f9   : > { %8498 = vmatpush.bf16.msrb.mxu2 %v13349_v38  ;;  %v13371_v38 = vld [vmem:[%s13804_s17 + $0x1058] sm:$0xff] }
 0x1fa   : > { %8485 = vmatpush.bf16.msrb.mxu1 %v13341_v39  ;;  %v13387_v39 = vld [vmem:[%s13804_s17 + $0x10d8] sm:$0xff] }
 0x1fb   : > { %8511 = vmatpush.bf16.msrb.mxu3 %v13357_v40  ;;  %v8247_v5 = vpop.f32.mrf.mxu2 }
 0x1fc   : > { %8473 = vmatpush.bf16.msrb.mxu0 %v13332_v43  ;;  %v13362_v43 = vld [vmem:[%s13804_s17 + $0x1010] sm:$0xff] }
 0x1fd   : > { %8499 = vmatpush.bf16.msrb.mxu2 %v13348_v44  ;;  %v8260_v9 = vpop.f32.mrf.mxu3  ;;  %v13378_v44 = vld [vmem:[%s13804_s17 + $0x1090] sm:$0xff] }
 0x1fe   : > { %8486 = vmatpush.bf16.msrb.mxu1 %v13340_v47  ;;  %v13386_v47 = vld [vmem:[%s13804_s17 + $0x10d0] sm:$0xff]  ;;  %v13421_v9 = vld [vmem:[%s13804_s17 + $0x11e8] sm:$0xff] }
 0x1ff   : > { %8512 = vmatpush.bf16.msrb.mxu3 %v13356_v48  ;;  %v13361_v48 = vld [vmem:[%s13804_s17 + $0x1008] sm:$0xff]  ;;  %v13422_v5 = vld [vmem:[%s13804_s17 + $0x11f0] sm:$0xff] }
 0x200   : > { %8474 = vmatpush.bf16.msrb.mxu0 %v13331_v49  ;;  %v13377_v49 = vld [vmem:[%s13804_s17 + $0x1088] sm:$0xff] }
 0x201   : > { %8500 = vmatpush.bf16.msrb.mxu2 %v13347_v50 }
 0x202   : > { %8487 = vmatpush.bf16.msrb.mxu1 %v13339_v53 }
 0x203   : > { %8513 = vmatpush.bf16.msrb.mxu3 %v13355_v54  ;;  %v13360_v54 = vld [vmem:[%s13804_s17 + $0x1000] sm:$0xff] }
 0x204   : > { %8475 = vmatpush.bf16.msrb.mxu0 %v13330_v58  ;;  %v13368_v58 = vld [vmem:[%s13804_s17 + $0x1040] sm:$0xff] }
 0x205   : > { %8501 = vmatpush.bf16.msrb.mxu2 %v13346_v59  ;;  %v13384_v59 = vld [vmem:[%s13804_s17 + $0x10c0] sm:$0xff] }
 0x206   : > { %8488 = vmatpush.bf16.msrb.mxu1 %v13338_v61  ;;  %v2092_v61 = vld [vmem:[#allocation1] sm:$0xff] }
 0x207   : > { %8514 = vmatpush.bf16.msrb.mxu3 %v13354_v62  ;;  %v2094_v62 = vld [vmem:[#allocation1 + $0x12] sm:$0xff] }
 0x208   : > { %8476 = vmatpush.bf16.msrb.mxu0 %v13329_v63  ;;  %v13423_v63 = vld [vmem:[%s13804_s17 + $0x11f8] sm:$0xff] }
 0x209   : > { %8502 = vmatpush.bf16.msrb.mxu2 %v13345_v0  ;;  %v2093_v0 = vld [vmem:[#allocation1 + $0x9] sm:$0xff] }
 0x20a   : > { %8489 = vmatpush.bf16.msrb.mxu1 %v13337_v7  ;;  %v13413_v7 = vld [vmem:[%s13804_s17 + $0x11a8] sm:$0xff] }
 0x20b   : > { %8515 = vmatpush.bf16.msrb.mxu3 %v13353_v8  ;;  %v13405_v8 = vld [vmem:[%s13804_s17 + $0x1168] sm:$0xff] }
 0x20c   : > { %8477 = vmatpush.bf16.msrb.mxu0 %v13328_v10  ;;  %v8271_v26 = vpop.f32.mrf.mxu0 }
 0x20d   : > { %8503 = vmatpush.bf16.msrb.mxu2 %v13344_v11  ;;  %v8272_v27 = vadd.f32 %v8271_v26, %v14351_v57  ;;  %v13415_v57 = vld [vmem:[%s13804_s17 + $0x11b8] sm:$0xff] }
 0x20e   : > { %8490 = vmatpush.bf16.msrb.mxu1 %v13336_v14  ;;  %v8284_v30 = vpop.f32.mrf.mxu1 }
 0x20f   : > { %8516 = vmatpush.bf16.msrb.mxu3 %v13352_v15  ;;  %8478 = vmatmul.bf16.vlgmr.msrb.gmra.mxu0 %v2086_v1  ;;  %v8285_v31 = vadd.f32 %v8284_v30, %v8272_v27  ;;  %v2095_v1 = vld [vmem:[#allocation1 + $0x1b] sm:$0xff]  ;;  %v13394_v27 = vld [vmem:[%s13804_s17 + $0x1110] sm:$0xff] }
 0x210   : > { %8522 = vmatpush.bf16.msra.mxu0 %v13367_v12  ;;  %8504 = vmatmul.bf16.vlgmr.msrb.gmra.mxu2 %v2088_v2  ;;  %v13398_v2 = vld [vmem:[%s13804_s17 + $0x1130] sm:$0xff]  ;;  %v13396_v12 = vld [vmem:[%s13804_s17 + $0x1120] sm:$0xff] }
 0x211   : > { %8548 = vmatpush.bf16.msra.mxu2 %v13383_v13  ;;  %8491 = vmatmul.bf16.vlgmr.msrb.gmra.mxu1 %v2087_v3  ;;  %v13414_v3 = vld [vmem:[%s13804_s17 + $0x11b0] sm:$0xff]  ;;  %v13412_v13 = vld [vmem:[%s13804_s17 + $0x11a0] sm:$0xff] }
 0x212   : > { %8535 = vmatpush.bf16.msra.mxu1 %v13375_v16  ;;  %8517 = vmatmul.bf16.vlgmr.msrb.gmra.mxu3 %v2089_v4  ;;  %v13406_v4 = vld [vmem:[%s13804_s17 + $0x1170] sm:$0xff]  ;;  %v13404_v16 = vld [vmem:[%s13804_s17 + $0x1160] sm:$0xff] }
 0x213   : > { %8561 = vmatpush.bf16.msra.mxu3 %v13391_v17  ;;  %v8297_v36 = vpop.f32.mrf.mxu2  ;;  %v13420_v17 = vld [vmem:[%s13804_s17 + $0x11e0] sm:$0xff]  ;;  %v13402_v30 = vld [vmem:[%s13804_s17 + $0x1150] sm:$0xff] }
 0x214   : > { %8523 = vmatpush.bf16.msra.mxu0 %v13366_v18  ;;  %v8298_v37 = vadd.f32 %v8297_v36, %v8285_v31  ;;  %v8273_v41 = vpop.f32.mrf.mxu0  ;;  %v13395_v18 = vld [vmem:[%s13804_s17 + $0x1118] sm:$0xff]  ;;  %v13418_v31 = vld [vmem:[%s13804_s17 + $0x11d0] sm:$0xff] }
 0x215   : > { %8549 = vmatpush.bf16.msra.mxu2 %v13382_v19  ;;  %v8310_v40 = vpop.f32.mrf.mxu3  ;;  %v13411_v19 = vld [vmem:[%s13804_s17 + $0x1198] sm:$0xff]  ;;  %v2097_v36 = vld [vmem:[#allocation1 + $0x2d] sm:$0xff] }
 0x216   : > { %8536 = vmatpush.bf16.msra.mxu1 %v13374_v20  ;;  %v8311_v42 = vadd.f32 %v8310_v40, %v8298_v37  ;;  %v8286_v45 = vpop.f32.mrf.mxu1  ;;  %v2099_v37 = vld [vmem:[#allocation1 + $0x3f] sm:$0xff]  ;;  %v13401_v40 = vld [vmem:[%s13804_s17 + $0x1148] sm:$0xff] }
 0x217   : > { %8562 = vmatpush.bf16.msra.mxu3 %v13390_v21  ;;  %v13417_v41 = vld [vmem:[%s13804_s17 + $0x11c8] sm:$0xff]  ;;  %v13431_v45 = vld [vmem:[%s13804_s17 + $0x1238] sm:$0xff] }
 0x218   : > { %8524 = vmatpush.bf16.msra.mxu0 %v13365_v22  ;;  %v13403_v22 = vld [vmem:[%s13804_s17 + $0x1158] sm:$0xff] }
 0x219   : > { %8550 = vmatpush.bf16.msra.mxu2 %v13381_v23  ;;  %v13419_v23 = vld [vmem:[%s13804_s17 + $0x11d8] sm:$0xff] }
 0x21a   : > { %8537 = vmatpush.bf16.msra.mxu1 %v13373_v24 }
 0x21b   : > { %8563 = vmatpush.bf16.msra.mxu3 %v13389_v25  ;;  %v8299_v50 = vpop.f32.mrf.mxu2 }
 0x21c   : > { %8525 = vmatpush.bf16.msra.mxu0 %v13364_v28  ;;  %v13410_v28 = vld [vmem:[%s13804_s17 + $0x1190] sm:$0xff]  ;;  %v13455_v50 = vld [vmem:[%s13804_s17 + $0x12f8] sm:$0xff] }
 0x21d   : > { %8551 = vmatpush.bf16.msra.mxu2 %v13380_v29  ;;  %v8312_v53 = vpop.f32.mrf.mxu3 }
 0x21e   : > { %8538 = vmatpush.bf16.msra.mxu1 %v13372_v32  ;;  %v13393_v32 = vld [vmem:[%s13804_s17 + $0x1108] sm:$0xff]  ;;  %v13438_v53 = vld [vmem:[%s13804_s17 + $0x1270] sm:$0xff] }
 0x21f   : > { %8564 = vmatpush.bf16.msra.mxu3 %v13388_v33  ;;  %v13409_v33 = vld [vmem:[%s13804_s17 + $0x1188] sm:$0xff] }
 0x220   : > { %8526 = vmatpush.bf16.msra.mxu0 %v13363_v34  ;;  %v2096_v34 = vld [vmem:[#allocation1 + $0x24] sm:$0xff] }
 0x221   : > { %8552 = vmatpush.bf16.msra.mxu2 %v13379_v35  ;;  %v2098_v35 = vld [vmem:[#allocation1 + $0x36] sm:$0xff] }
 0x222   : > { %8539 = vmatpush.bf16.msra.mxu1 %v13371_v38 }
 0x223   : > { %8565 = vmatpush.bf16.msra.mxu3 %v13387_v39  ;;  %v192_v39 = vld [vmem:[%s14801_s0 + $0x48] sm:$0xff] }
 0x224   : > { %8527 = vmatpush.bf16.msra.mxu0 %v13362_v43  ;;  %2101 = vst [vmem:[#allocation1] ss:$9 sm:$0xff] %v192_v39  ;;  %v13392_v43 = vld [vmem:[%s13804_s17 + $0x1100] sm:$0xff]  ;;  %v13461_v39 = vld [vmem:[%s13804_s17 + $0x1328] sm:$0xff] }
 0x225   : > { %8553 = vmatpush.bf16.msra.mxu2 %v13378_v44  ;;  %v13408_v44 = vld [vmem:[%s13804_s17 + $0x1180] sm:$0xff] }
 0x226   : > { %8540 = vmatpush.bf16.msra.mxu1 %v13370_v46  ;;  %v13447_v46 = vld [vmem:[%s13804_s17 + $0x12b8] sm:$0xff] }
 0x227   : > { %8566 = vmatpush.bf16.msra.mxu3 %v13386_v47  ;;  %v13400_v47 = vld [vmem:[%s13804_s17 + $0x1140] sm:$0xff] }
 0x228   : > { %8528 = vmatpush.bf16.msra.mxu0 %v13361_v48  ;;  %v13416_v48 = vld [vmem:[%s13804_s17 + $0x11c0] sm:$0xff] }
 0x229   : > { %8554 = vmatpush.bf16.msra.mxu2 %v13377_v49  ;;  %v13439_v49 = vld [vmem:[%s13804_s17 + $0x1278] sm:$0xff] }
 0x22a   : > { %8541 = vmatpush.bf16.msra.mxu1 %v13369_v51  ;;  %v13430_v51 = vld [vmem:[%s13804_s17 + $0x1230] sm:$0xff] }
 0x22b   : > { %8567 = vmatpush.bf16.msra.mxu3 %v13385_v52  ;;  %v13446_v52 = vld [vmem:[%s13804_s17 + $0x12b0] sm:$0xff] }
 0x22c   : > { %8529 = vmatpush.bf16.msra.mxu0 %v13360_v54  ;;  %v8323_v10 = vpop.f32.mrf.mxu0  ;;  %v13454_v54 = vld [vmem:[%s13804_s17 + $0x12f0] sm:$0xff] }
 0x22d   : > { %8555 = vmatpush.bf16.msra.mxu2 %v13376_v55  ;;  %v8324_v11 = vadd.f32 %v8323_v10, %v8311_v42  ;;  %v13429_v55 = vld [vmem:[%s13804_s17 + $0x1228] sm:$0xff] }
 0x22e   : > { %8542 = vmatpush.bf16.msra.mxu1 %v13368_v58  ;;  %v8336_v14 = vpop.f32.mrf.mxu1  ;;  %v13453_v58 = vld [vmem:[%s13804_s17 + $0x12e8] sm:$0xff] }
 0x22f   : > { %8568 = vmatpush.bf16.msra.mxu3 %v13384_v59  ;;  %8530 = vmatmul.bf16.vlgmr.msra.gmra.mxu0 %v2092_v61  ;;  %v8337_v15 = vadd.f32 %v8336_v14, %v8324_v11  ;;  %v13428_v61 = vld [vmem:[%s13804_s17 + $0x1220] sm:$0xff] }
 0x230   : > { %8574 = vmatpush.bf16.msrb.mxu0 %v13399_v56  ;;  %8556 = vmatmul.bf16.vlgmr.msra.gmra.mxu2 %v2094_v62  ;;  %v13445_v56 = vld [vmem:[%s13804_s17 + $0x12a8] sm:$0xff]  ;;  %v13444_v62 = vld [vmem:[%s13804_s17 + $0x12a0] sm:$0xff] }
 0x231   : > { %8600 = vmatpush.bf16.msrb.mxu2 %v13415_v57  ;;  %8543 = vmatmul.bf16.vlgmr.msra.gmra.mxu1 %v2093_v0  ;;  %v13437_v57 = vld [vmem:[%s13804_s17 + $0x1268] sm:$0xff] }
 0x232   : > { %8587 = vmatpush.bf16.msrb.mxu1 %v13407_v60  ;;  %8569 = vmatmul.bf16.vlgmr.msra.gmra.mxu3 %v2095_v1  ;;  %v13436_v1 = vld [vmem:[%s13804_s17 + $0x1260] sm:$0xff] }
 0x233   : > { %8613 = vmatpush.bf16.msrb.mxu3 %v13423_v63  ;;  %v8349_v20 = vpop.f32.mrf.mxu2 }
 0x234   : > { %8575 = vmatpush.bf16.msrb.mxu0 %v13398_v2  ;;  %v8350_v21 = vadd.f32 %v8349_v20, %v8337_v15  ;;  %v8325_v25 = vpop.f32.mrf.mxu0  ;;  %v13452_v2 = vld [vmem:[%s13804_s17 + $0x12e0] sm:$0xff]  ;;  %v13434_v15 = vld [vmem:[%s13804_s17 + $0x1250] sm:$0xff]  ;;  %v13433_v20 = vld [vmem:[%s13804_s17 + $0x1248] sm:$0xff] }
 0x235   : > { %8601 = vmatpush.bf16.msrb.mxu2 %v13414_v3  ;;  %v8362_v24 = vpop.f32.mrf.mxu3  ;;  %v13427_v3 = vld [vmem:[%s13804_s17 + $0x1218] sm:$0xff] }
 0x236   : > { %8588 = vmatpush.bf16.msrb.mxu1 %v13406_v4  ;;  %v14421_v26 = vadd.f32 %v8362_v24, %v8350_v21  ;;  %v8338_v29 = vpop.f32.mrf.mxu1  ;;  %v13443_v4 = vld [vmem:[%s13804_s17 + $0x1298] sm:$0xff]  ;;  %v13449_v21 = vld [vmem:[%s13804_s17 + $0x12c8] sm:$0xff]  ;;  %v13440_v24 = vld [vmem:[%s13804_s17 + $0x1280] sm:$0xff] }
 0x237   : > { %8614 = vmatpush.bf16.msrb.mxu3 %v13422_v5  ;;  %v13463_v25 = vld [vmem:[%s13804_s17 + $0x1338] sm:$0xff] }
 0x238   : > { %8576 = vmatpush.bf16.msrb.mxu0 %v13397_v6  ;;  %v13471_v29 = vld [vmem:[%s13804_s17 + $0x1378] sm:$0xff] }
 0x239   : > { %8602 = vmatpush.bf16.msrb.mxu2 %v13413_v7  ;;  %v13435_v7 = vld [vmem:[%s13804_s17 + $0x1258] sm:$0xff] }
 0x23a   : > { %8589 = vmatpush.bf16.msrb.mxu1 %v13405_v8  ;;  %v13451_v8 = vld [vmem:[%s13804_s17 + $0x12d8] sm:$0xff] }
 0x23b   : > { %8615 = vmatpush.bf16.msrb.mxu3 %v13421_v9  ;;  %v8351_v38 = vpop.f32.mrf.mxu2 }
 0x23c   : > { %8577 = vmatpush.bf16.msrb.mxu0 %v13396_v12  ;;  %v13426_v12 = vld [vmem:[%s13804_s17 + $0x1210] sm:$0xff] }
 0x23d   : > { %8603 = vmatpush.bf16.msrb.mxu2 %v13412_v13  ;;  %v8364_v42 = vpop.f32.mrf.mxu3  ;;  %v13442_v13 = vld [vmem:[%s13804_s17 + $0x1290] sm:$0xff] }
 0x23e   : > { %8590 = vmatpush.bf16.msrb.mxu1 %v13404_v16  ;;  %v13450_v16 = vld [vmem:[%s13804_s17 + $0x12d0] sm:$0xff]  ;;  %v13485_v42 = vld [vmem:[%s13804_s17 + $0x13e8] sm:$0xff] }
 0x23f   : > { %8616 = vmatpush.bf16.msrb.mxu3 %v13420_v17  ;;  %v13425_v17 = vld [vmem:[%s13804_s17 + $0x1208] sm:$0xff]  ;;  %v13486_v38 = vld [vmem:[%s13804_s17 + $0x13f0] sm:$0xff] }
 0x240   : > { %8578 = vmatpush.bf16.msrb.mxu0 %v13395_v18  ;;  %v13441_v18 = vld [vmem:[%s13804_s17 + $0x1288] sm:$0xff] }
 0x241   : > { %8604 = vmatpush.bf16.msrb.mxu2 %v13411_v19 }
 0x242   : > { %8591 = vmatpush.bf16.msrb.mxu1 %v13403_v22 }
 0x243   : > { %8617 = vmatpush.bf16.msrb.mxu3 %v13419_v23  ;;  %v13424_v23 = vld [vmem:[%s13804_s17 + $0x1200] sm:$0xff] }
 0x244   : > { %8579 = vmatpush.bf16.msrb.mxu0 %v13394_v27  ;;  %v13432_v27 = vld [vmem:[%s13804_s17 + $0x1240] sm:$0xff] }
 0x245   : > { %8605 = vmatpush.bf16.msrb.mxu2 %v13410_v28  ;;  %v13448_v28 = vld [vmem:[%s13804_s17 + $0x12c0] sm:$0xff] }
 0x246   : > { %8592 = vmatpush.bf16.msrb.mxu1 %v13402_v30  ;;  %v2102_v30 = vld [vmem:[#allocation1] sm:$0xff] }
 0x247   : > { %8618 = vmatpush.bf16.msrb.mxu3 %v13418_v31  ;;  %v2104_v31 = vld [vmem:[#allocation1 + $0x12] sm:$0xff] }
 0x248   : > { %8580 = vmatpush.bf16.msrb.mxu0 %v13393_v32  ;;  %v13487_v32 = vld [vmem:[%s13804_s17 + $0x13f8] sm:$0xff] }
 0x249   : > { %8606 = vmatpush.bf16.msrb.mxu2 %v13409_v33  ;;  %v2103_v33 = vld [vmem:[#allocation1 + $0x9] sm:$0xff] }
 0x24a   : > { %8593 = vmatpush.bf16.msrb.mxu1 %v13401_v40  ;;  %v13477_v40 = vld [vmem:[%s13804_s17 + $0x13a8] sm:$0xff] }
 0x24b   : > { %8619 = vmatpush.bf16.msrb.mxu3 %v13417_v41  ;;  %v13469_v41 = vld [vmem:[%s13804_s17 + $0x1368] sm:$0xff] }
 0x24c   : > { %8581 = vmatpush.bf16.msrb.mxu0 %v13392_v43  ;;  %v8375_v59 = vpop.f32.mrf.mxu0 }
 0x24d   : > { %8607 = vmatpush.bf16.msrb.mxu2 %v13408_v44  ;;  %v8376_v60 = vadd.f32 %v8375_v59, %v14421_v26  ;;  %v13479_v26 = vld [vmem:[%s13804_s17 + $0x13b8] sm:$0xff] }
 0x24e   : > { %8594 = vmatpush.bf16.msrb.mxu1 %v13400_v47  ;;  %v8388_v63 = vpop.f32.mrf.mxu1 }
 0x24f   : > { %8620 = vmatpush.bf16.msrb.mxu3 %v13416_v48  ;;  %8582 = vmatmul.bf16.vlgmr.msrb.gmra.mxu0 %v2096_v34  ;;  %v8389_v0 = vadd.f32 %v8388_v63, %v8376_v60  ;;  %v2105_v34 = vld [vmem:[#allocation1 + $0x1b] sm:$0xff]  ;;  %v13458_v60 = vld [vmem:[%s13804_s17 + $0x1310] sm:$0xff] }
 0x250   : > { %8626 = vmatpush.bf16.msra.mxu0 %v13431_v45  ;;  %8608 = vmatmul.bf16.vlgmr.msrb.gmra.mxu2 %v2098_v35  ;;  %v13462_v35 = vld [vmem:[%s13804_s17 + $0x1330] sm:$0xff]  ;;  %v13460_v45 = vld [vmem:[%s13804_s17 + $0x1320] sm:$0xff] }
 0x251   : > { %8652 = vmatpush.bf16.msra.mxu2 %v13447_v46  ;;  %8595 = vmatmul.bf16.vlgmr.msrb.gmra.mxu1 %v2097_v36  ;;  %v13478_v36 = vld [vmem:[%s13804_s17 + $0x13b0] sm:$0xff]  ;;  %v13476_v46 = vld [vmem:[%s13804_s17 + $0x13a0] sm:$0xff] }
 0x252   : > { %8639 = vmatpush.bf16.msra.mxu1 %v13439_v49  ;;  %8621 = vmatmul.bf16.vlgmr.msrb.gmra.mxu3 %v2099_v37  ;;  %v13470_v37 = vld [vmem:[%s13804_s17 + $0x1370] sm:$0xff]  ;;  %v13468_v49 = vld [vmem:[%s13804_s17 + $0x1360] sm:$0xff] }
 0x253   : > { %8665 = vmatpush.bf16.msra.mxu3 %v13455_v50  ;;  %v8401_v5 = vpop.f32.mrf.mxu2  ;;  %v13484_v50 = vld [vmem:[%s13804_s17 + $0x13e0] sm:$0xff]  ;;  %v13466_v63 = vld [vmem:[%s13804_s17 + $0x1350] sm:$0xff] }
 0x254   : > { %8627 = vmatpush.bf16.msra.mxu0 %v13430_v51  ;;  %v8402_v6 = vadd.f32 %v8401_v5, %v8389_v0  ;;  %v8377_v10 = vpop.f32.mrf.mxu0  ;;  %v13459_v51 = vld [vmem:[%s13804_s17 + $0x1318] sm:$0xff]  ;;  %v13482_v0 = vld [vmem:[%s13804_s17 + $0x13d0] sm:$0xff] }
 0x255   : > { %8653 = vmatpush.bf16.msra.mxu2 %v13446_v52  ;;  %v8414_v9 = vpop.f32.mrf.mxu3  ;;  %v13475_v52 = vld [vmem:[%s13804_s17 + $0x1398] sm:$0xff]  ;;  %v2107_v5 = vld [vmem:[#allocation1 + $0x2d] sm:$0xff] }
 0x256   : > { %8640 = vmatpush.bf16.msra.mxu1 %v13438_v53  ;;  %v8415_v11 = vadd.f32 %v8414_v9, %v8402_v6  ;;  %v8390_v14 = vpop.f32.mrf.mxu1  ;;  %v2109_v6 = vld [vmem:[#allocation1 + $0x3f] sm:$0xff]  ;;  %v13465_v9 = vld [vmem:[%s13804_s17 + $0x1348] sm:$0xff] }
 0x257   : > { %8666 = vmatpush.bf16.msra.mxu3 %v13454_v54  ;;  %v13481_v10 = vld [vmem:[%s13804_s17 + $0x13c8] sm:$0xff]  ;;  %v13495_v14 = vld [vmem:[%s13804_s17 + $0x1438] sm:$0xff] }
 0x258   : > { %8628 = vmatpush.bf16.msra.mxu0 %v13429_v55  ;;  %v13467_v55 = vld [vmem:[%s13804_s17 + $0x1358] sm:$0xff] }
 0x259   : > { %8654 = vmatpush.bf16.msra.mxu2 %v13445_v56  ;;  %v13483_v56 = vld [vmem:[%s13804_s17 + $0x13d8] sm:$0xff] }
 0x25a   : > { %8641 = vmatpush.bf16.msra.mxu1 %v13437_v57 }
 0x25b   : > { %8667 = vmatpush.bf16.msra.mxu3 %v13453_v58  ;;  %v8403_v19 = vpop.f32.mrf.mxu2 }
 0x25c   : > { %8629 = vmatpush.bf16.msra.mxu0 %v13428_v61  ;;  %v13474_v61 = vld [vmem:[%s13804_s17 + $0x1390] sm:$0xff]  ;;  %v13519_v19 = vld [vmem:[%s13804_s17 + $0x14f8] sm:$0xff] }
 0x25d   : > { %8655 = vmatpush.bf16.msra.mxu2 %v13444_v62  ;;  %v8416_v22 = vpop.f32.mrf.mxu3 }
 0x25e   : > { %8642 = vmatpush.bf16.msra.mxu1 %v13436_v1  ;;  %v13457_v1 = vld [vmem:[%s13804_s17 + $0x1308] sm:$0xff]  ;;  %v13502_v22 = vld [vmem:[%s13804_s17 + $0x1470] sm:$0xff] }
 0x25f   : > { %8668 = vmatpush.bf16.msra.mxu3 %v13452_v2  ;;  %v13473_v2 = vld [vmem:[%s13804_s17 + $0x1388] sm:$0xff] }
 0x260   : > { %8630 = vmatpush.bf16.msra.mxu0 %v13427_v3  ;;  %v2106_v3 = vld [vmem:[#allocation1 + $0x24] sm:$0xff] }
 0x261   : > { %8656 = vmatpush.bf16.msra.mxu2 %v13443_v4  ;;  %v2108_v4 = vld [vmem:[#allocation1 + $0x36] sm:$0xff] }
 0x262   : > { %8643 = vmatpush.bf16.msra.mxu1 %v13435_v7 }
 0x263   : > { %8669 = vmatpush.bf16.msra.mxu3 %v13451_v8  ;;  %v193_v8 = vld [vmem:[%s14801_s0 + $0x50] sm:$0xff] }
 0x264   : > { %8631 = vmatpush.bf16.msra.mxu0 %v13426_v12  ;;  %2111 = vst [vmem:[#allocation1] ss:$9 sm:$0xff] %v193_v8  ;;  %v13456_v12 = vld [vmem:[%s13804_s17 + $0x1300] sm:$0xff]  ;;  %v13525_v8 = vld [vmem:[%s13804_s17 + $0x1528] sm:$0xff] }
 0x265   : > { %8657 = vmatpush.bf16.msra.mxu2 %v13442_v13  ;;  %v13472_v13 = vld [vmem:[%s13804_s17 + $0x1380] sm:$0xff] }
 0x266   : > { %8644 = vmatpush.bf16.msra.mxu1 %v13434_v15  ;;  %v13511_v15 = vld [vmem:[%s13804_s17 + $0x14b8] sm:$0xff] }
 0x267   : > { %8670 = vmatpush.bf16.msra.mxu3 %v13450_v16  ;;  %v13464_v16 = vld [vmem:[%s13804_s17 + $0x1340] sm:$0xff] }
 0x268   : > { %8632 = vmatpush.bf16.msra.mxu0 %v13425_v17  ;;  %v13480_v17 = vld [vmem:[%s13804_s17 + $0x13c0] sm:$0xff] }
 0x269   : > { %8658 = vmatpush.bf16.msra.mxu2 %v13441_v18  ;;  %v13503_v18 = vld [vmem:[%s13804_s17 + $0x1478] sm:$0xff] }
 0x26a   : > { %8645 = vmatpush.bf16.msra.mxu1 %v13433_v20  ;;  %v13494_v20 = vld [vmem:[%s13804_s17 + $0x1430] sm:$0xff] }
 0x26b   : > { %8671 = vmatpush.bf16.msra.mxu3 %v13449_v21  ;;  %v13510_v21 = vld [vmem:[%s13804_s17 + $0x14b0] sm:$0xff] }
 0x26c   : > { %8633 = vmatpush.bf16.msra.mxu0 %v13424_v23  ;;  %v8427_v43 = vpop.f32.mrf.mxu0  ;;  %v13518_v23 = vld [vmem:[%s13804_s17 + $0x14f0] sm:$0xff] }
 0x26d   : > { %8659 = vmatpush.bf16.msra.mxu2 %v13440_v24  ;;  %v8428_v44 = vadd.f32 %v8427_v43, %v8415_v11  ;;  %v13493_v24 = vld [vmem:[%s13804_s17 + $0x1428] sm:$0xff] }
 0x26e   : > { %8646 = vmatpush.bf16.msra.mxu1 %v13432_v27  ;;  %v8440_v47 = vpop.f32.mrf.mxu1  ;;  %v13517_v27 = vld [vmem:[%s13804_s17 + $0x14e8] sm:$0xff] }
 0x26f   : > { %8672 = vmatpush.bf16.msra.mxu3 %v13448_v28  ;;  %8634 = vmatmul.bf16.vlgmr.msra.gmra.mxu0 %v2102_v30  ;;  %v8441_v48 = vadd.f32 %v8440_v47, %v8428_v44  ;;  %v13492_v30 = vld [vmem:[%s13804_s17 + $0x1420] sm:$0xff] }
 0x270   : > { %8678 = vmatpush.bf16.msrb.mxu0 %v13463_v25  ;;  %8660 = vmatmul.bf16.vlgmr.msra.gmra.mxu2 %v2104_v31  ;;  %v13509_v25 = vld [vmem:[%s13804_s17 + $0x14a8] sm:$0xff]  ;;  %v13508_v31 = vld [vmem:[%s13804_s17 + $0x14a0] sm:$0xff] }
 0x271   : > { %8704 = vmatpush.bf16.msrb.mxu2 %v13479_v26  ;;  %8647 = vmatmul.bf16.vlgmr.msra.gmra.mxu1 %v2103_v33  ;;  %v13501_v26 = vld [vmem:[%s13804_s17 + $0x1468] sm:$0xff] }
 0x272   : > { %8691 = vmatpush.bf16.msrb.mxu1 %v13471_v29  ;;  %8673 = vmatmul.bf16.vlgmr.msra.gmra.mxu3 %v2105_v34  ;;  %v13500_v34 = vld [vmem:[%s13804_s17 + $0x1460] sm:$0xff] }
 0x273   : > { %8717 = vmatpush.bf16.msrb.mxu3 %v13487_v32  ;;  %v8453_v53 = vpop.f32.mrf.mxu2 }
 0x274   : > { %8679 = vmatpush.bf16.msrb.mxu0 %v13462_v35  ;;  %v8454_v54 = vadd.f32 %v8453_v53, %v8441_v48  ;;  %v8429_v58 = vpop.f32.mrf.mxu0  ;;  %v13516_v35 = vld [vmem:[%s13804_s17 + $0x14e0] sm:$0xff]  ;;  %v13498_v48 = vld [vmem:[%s13804_s17 + $0x1450] sm:$0xff]  ;;  %v13497_v53 = vld [vmem:[%s13804_s17 + $0x1448] sm:$0xff] }
 0x275   : > { %8705 = vmatpush.bf16.msrb.mxu2 %v13478_v36  ;;  %v8466_v57 = vpop.f32.mrf.mxu3  ;;  %v13491_v36 = vld [vmem:[%s13804_s17 + $0x1418] sm:$0xff] }
 0x276   : > { %8692 = vmatpush.bf16.msrb.mxu1 %v13470_v37  ;;  %v14491_v59 = vadd.f32 %v8466_v57, %v8454_v54  ;;  %v8442_v62 = vpop.f32.mrf.mxu1  ;;  %v13507_v37 = vld [vmem:[%s13804_s17 + $0x1498] sm:$0xff]  ;;  %v13513_v54 = vld [vmem:[%s13804_s17 + $0x14c8] sm:$0xff]  ;;  %v13504_v57 = vld [vmem:[%s13804_s17 + $0x1480] sm:$0xff] }
 0x277   : > { %8718 = vmatpush.bf16.msrb.mxu3 %v13486_v38  ;;  %v13527_v58 = vld [vmem:[%s13804_s17 + $0x1538] sm:$0xff] }
 0x278   : > { %8680 = vmatpush.bf16.msrb.mxu0 %v13461_v39  ;;  %v13535_v62 = vld [vmem:[%s13804_s17 + $0x1578] sm:$0xff] }
 0x279   : > { %8706 = vmatpush.bf16.msrb.mxu2 %v13477_v40  ;;  %v13499_v40 = vld [vmem:[%s13804_s17 + $0x1458] sm:$0xff] }
 0x27a   : > { %8693 = vmatpush.bf16.msrb.mxu1 %v13469_v41  ;;  %v13515_v41 = vld [vmem:[%s13804_s17 + $0x14d8] sm:$0xff] }
 0x27b   : > { %8719 = vmatpush.bf16.msrb.mxu3 %v13485_v42  ;;  %v8455_v7 = vpop.f32.mrf.mxu2 }
 0x27c   : > { %8681 = vmatpush.bf16.msrb.mxu0 %v13460_v45  ;;  %v13490_v45 = vld [vmem:[%s13804_s17 + $0x1410] sm:$0xff] }
 0x27d   : > { %8707 = vmatpush.bf16.msrb.mxu2 %v13476_v46  ;;  %v8468_v11 = vpop.f32.mrf.mxu3  ;;  %v13506_v46 = vld [vmem:[%s13804_s17 + $0x1490] sm:$0xff] }
 0x27e   : > { %8694 = vmatpush.bf16.msrb.mxu1 %v13468_v49  ;;  %v13514_v49 = vld [vmem:[%s13804_s17 + $0x14d0] sm:$0xff]  ;;  %v13549_v11 = vld [vmem:[%s13804_s17 + $0x15e8] sm:$0xff] }
 0x27f   : > { %8720 = vmatpush.bf16.msrb.mxu3 %v13484_v50  ;;  %v13489_v50 = vld [vmem:[%s13804_s17 + $0x1408] sm:$0xff]  ;;  %v13550_v7 = vld [vmem:[%s13804_s17 + $0x15f0] sm:$0xff] }
 0x280   : > { %8682 = vmatpush.bf16.msrb.mxu0 %v13459_v51  ;;  %v13505_v51 = vld [vmem:[%s13804_s17 + $0x1488] sm:$0xff] }
 0x281   : > { %8708 = vmatpush.bf16.msrb.mxu2 %v13475_v52 }
 0x282   : > { %8695 = vmatpush.bf16.msrb.mxu1 %v13467_v55 }
 0x283   : > { %8721 = vmatpush.bf16.msrb.mxu3 %v13483_v56  ;;  %v13488_v56 = vld [vmem:[%s13804_s17 + $0x1400] sm:$0xff] }
 0x284   : > { %8683 = vmatpush.bf16.msrb.mxu0 %v13458_v60  ;;  %v13496_v60 = vld [vmem:[%s13804_s17 + $0x1440] sm:$0xff] }
 0x285   : > { %8709 = vmatpush.bf16.msrb.mxu2 %v13474_v61  ;;  %v13512_v61 = vld [vmem:[%s13804_s17 + $0x14c0] sm:$0xff] }
 0x286   : > { %8696 = vmatpush.bf16.msrb.mxu1 %v13466_v63  ;;  %v2112_v63 = vld [vmem:[#allocation1] sm:$0xff] }
 0x287   : > { %8722 = vmatpush.bf16.msrb.mxu3 %v13482_v0  ;;  %v2114_v0 = vld [vmem:[#allocation1 + $0x12] sm:$0xff] }
 0x288   : > { %8684 = vmatpush.bf16.msrb.mxu0 %v13457_v1  ;;  %v13551_v1 = vld [vmem:[%s13804_s17 + $0x15f8] sm:$0xff] }
 0x289   : > { %8710 = vmatpush.bf16.msrb.mxu2 %v13473_v2  ;;  %v2113_v2 = vld [vmem:[#allocation1 + $0x9] sm:$0xff] }
 0x28a   : > { %8697 = vmatpush.bf16.msrb.mxu1 %v13465_v9  ;;  %v13541_v9 = vld [vmem:[%s13804_s17 + $0x15a8] sm:$0xff] }
 0x28b   : > { %8723 = vmatpush.bf16.msrb.mxu3 %v13481_v10  ;;  %v13533_v10 = vld [vmem:[%s13804_s17 + $0x1568] sm:$0xff] }
 0x28c   : > { %8685 = vmatpush.bf16.msrb.mxu0 %v13456_v12  ;;  %v8479_v28 = vpop.f32.mrf.mxu0 }
 0x28d   : > { %8711 = vmatpush.bf16.msrb.mxu2 %v13472_v13  ;;  %v8480_v29 = vadd.f32 %v8479_v28, %v14491_v59  ;;  %v13543_v59 = vld [vmem:[%s13804_s17 + $0x15b8] sm:$0xff] }
 0x28e   : > { %8698 = vmatpush.bf16.msrb.mxu1 %v13464_v16  ;;  %v8492_v32 = vpop.f32.mrf.mxu1 }
 0x28f   : > { %8724 = vmatpush.bf16.msrb.mxu3 %v13480_v17  ;;  %8686 = vmatmul.bf16.vlgmr.msrb.gmra.mxu0 %v2106_v3  ;;  %v8493_v33 = vadd.f32 %v8492_v32, %v8480_v29  ;;  %v2115_v3 = vld [vmem:[#allocation1 + $0x1b] sm:$0xff]  ;;  %v13522_v29 = vld [vmem:[%s13804_s17 + $0x1510] sm:$0xff] }
 0x290   : > { %8730 = vmatpush.bf16.msra.mxu0 %v13495_v14  ;;  %8712 = vmatmul.bf16.vlgmr.msrb.gmra.mxu2 %v2108_v4  ;;  %v13526_v4 = vld [vmem:[%s13804_s17 + $0x1530] sm:$0xff]  ;;  %v13524_v14 = vld [vmem:[%s13804_s17 + $0x1520] sm:$0xff] }
 0x291   : > { %8756 = vmatpush.bf16.msra.mxu2 %v13511_v15  ;;  %8699 = vmatmul.bf16.vlgmr.msrb.gmra.mxu1 %v2107_v5  ;;  %v13542_v5 = vld [vmem:[%s13804_s17 + $0x15b0] sm:$0xff]  ;;  %v13540_v15 = vld [vmem:[%s13804_s17 + $0x15a0] sm:$0xff] }
 0x292   : > { %8743 = vmatpush.bf16.msra.mxu1 %v13503_v18  ;;  %8725 = vmatmul.bf16.vlgmr.msrb.gmra.mxu3 %v2109_v6  ;;  %v13534_v6 = vld [vmem:[%s13804_s17 + $0x1570] sm:$0xff]  ;;  %v13532_v18 = vld [vmem:[%s13804_s17 + $0x1560] sm:$0xff] }
 0x293   : > { %8769 = vmatpush.bf16.msra.mxu3 %v13519_v19  ;;  %v8505_v38 = vpop.f32.mrf.mxu2  ;;  %v13548_v19 = vld [vmem:[%s13804_s17 + $0x15e0] sm:$0xff]  ;;  %v13530_v32 = vld [vmem:[%s13804_s17 + $0x1550] sm:$0xff] }
 0x294   : > { %8731 = vmatpush.bf16.msra.mxu0 %v13494_v20  ;;  %v8506_v39 = vadd.f32 %v8505_v38, %v8493_v33  ;;  %v8481_v43 = vpop.f32.mrf.mxu0  ;;  %v13523_v20 = vld [vmem:[%s13804_s17 + $0x1518] sm:$0xff]  ;;  %v13546_v33 = vld [vmem:[%s13804_s17 + $0x15d0] sm:$0xff] }
 0x295   : > { %8757 = vmatpush.bf16.msra.mxu2 %v13510_v21  ;;  %v8518_v42 = vpop.f32.mrf.mxu3  ;;  %v13539_v21 = vld [vmem:[%s13804_s17 + $0x1598] sm:$0xff]  ;;  %v2117_v38 = vld [vmem:[#allocation1 + $0x2d] sm:$0xff] }
 0x296   : > { %8744 = vmatpush.bf16.msra.mxu1 %v13502_v22  ;;  %v8519_v44 = vadd.f32 %v8518_v42, %v8506_v39  ;;  %v8494_v47 = vpop.f32.mrf.mxu1  ;;  %v2119_v39 = vld [vmem:[#allocation1 + $0x3f] sm:$0xff]  ;;  %v13529_v42 = vld [vmem:[%s13804_s17 + $0x1548] sm:$0xff] }
 0x297   : > { %8770 = vmatpush.bf16.msra.mxu3 %v13518_v23  ;;  %v13545_v43 = vld [vmem:[%s13804_s17 + $0x15c8] sm:$0xff]  ;;  %v13559_v47 = vld [vmem:[%s13804_s17 + $0x1638] sm:$0xff] }
 0x298   : > { %8732 = vmatpush.bf16.msra.mxu0 %v13493_v24  ;;  %v13531_v24 = vld [vmem:[%s13804_s17 + $0x1558] sm:$0xff] }
 0x299   : > { %8758 = vmatpush.bf16.msra.mxu2 %v13509_v25  ;;  %v13547_v25 = vld [vmem:[%s13804_s17 + $0x15d8] sm:$0xff] }
 0x29a   : > { %8745 = vmatpush.bf16.msra.mxu1 %v13501_v26 }
 0x29b   : > { %8771 = vmatpush.bf16.msra.mxu3 %v13517_v27  ;;  %v8507_v52 = vpop.f32.mrf.mxu2 }
 0x29c   : > { %8733 = vmatpush.bf16.msra.mxu0 %v13492_v30  ;;  %v13538_v30 = vld [vmem:[%s13804_s17 + $0x1590] sm:$0xff]  ;;  %v13583_v52 = vld [vmem:[%s13804_s17 + $0x16f8] sm:$0xff] }
 0x29d   : > { %8759 = vmatpush.bf16.msra.mxu2 %v13508_v31  ;;  %v8520_v55 = vpop.f32.mrf.mxu3 }
 0x29e   : > { %8746 = vmatpush.bf16.msra.mxu1 %v13500_v34  ;;  %v13521_v34 = vld [vmem:[%s13804_s17 + $0x1508] sm:$0xff]  ;;  %v13566_v55 = vld [vmem:[%s13804_s17 + $0x1670] sm:$0xff] }
 0x29f   : > { %8772 = vmatpush.bf16.msra.mxu3 %v13516_v35  ;;  %v13537_v35 = vld [vmem:[%s13804_s17 + $0x1588] sm:$0xff] }
 0x2a0   : > { %8734 = vmatpush.bf16.msra.mxu0 %v13491_v36  ;;  %v2116_v36 = vld [vmem:[#allocation1 + $0x24] sm:$0xff] }
 0x2a1   : > { %8760 = vmatpush.bf16.msra.mxu2 %v13507_v37  ;;  %v2118_v37 = vld [vmem:[#allocation1 + $0x36] sm:$0xff] }
 0x2a2   : > { %8747 = vmatpush.bf16.msra.mxu1 %v13499_v40 }
 0x2a3   : > { %8773 = vmatpush.bf16.msra.mxu3 %v13515_v41  ;;  %v194_v41 = vld [vmem:[%s14801_s0 + $0x58] sm:$0xff] }
 0x2a4   : > { %8735 = vmatpush.bf16.msra.mxu0 %v13490_v45  ;;  %2121 = vst [vmem:[#allocation1] ss:$9 sm:$0xff] %v194_v41  ;;  %v13520_v45 = vld [vmem:[%s13804_s17 + $0x1500] sm:$0xff]  ;;  %v13589_v41 = vld [vmem:[%s13804_s17 + $0x1728] sm:$0xff] }
 0x2a5   : > { %8761 = vmatpush.bf16.msra.mxu2 %v13506_v46  ;;  %v13536_v46 = vld [vmem:[%s13804_s17 + $0x1580] sm:$0xff] }
 0x2a6   : > { %8748 = vmatpush.bf16.msra.mxu1 %v13498_v48  ;;  %v13575_v48 = vld [vmem:[%s13804_s17 + $0x16b8] sm:$0xff] }
 0x2a7   : > { %8774 = vmatpush.bf16.msra.mxu3 %v13514_v49  ;;  %v13528_v49 = vld [vmem:[%s13804_s17 + $0x1540] sm:$0xff] }
 0x2a8   : > { %8736 = vmatpush.bf16.msra.mxu0 %v13489_v50  ;;  %v13544_v50 = vld [vmem:[%s13804_s17 + $0x15c0] sm:$0xff] }
 0x2a9   : > { %8762 = vmatpush.bf16.msra.mxu2 %v13505_v51  ;;  %v13567_v51 = vld [vmem:[%s13804_s17 + $0x1678] sm:$0xff] }
 0x2aa   : > { %8749 = vmatpush.bf16.msra.mxu1 %v13497_v53  ;;  %v13558_v53 = vld [vmem:[%s13804_s17 + $0x1630] sm:$0xff] }
 0x2ab   : > { %8775 = vmatpush.bf16.msra.mxu3 %v13513_v54  ;;  %v13574_v54 = vld [vmem:[%s13804_s17 + $0x16b0] sm:$0xff] }
 0x2ac   : > { %8737 = vmatpush.bf16.msra.mxu0 %v13488_v56  ;;  %v8531_v12 = vpop.f32.mrf.mxu0  ;;  %v13582_v56 = vld [vmem:[%s13804_s17 + $0x16f0] sm:$0xff] }
 0x2ad   : > { %8763 = vmatpush.bf16.msra.mxu2 %v13504_v57  ;;  %v8532_v13 = vadd.f32 %v8531_v12, %v8519_v44  ;;  %v13557_v57 = vld [vmem:[%s13804_s17 + $0x1628] sm:$0xff] }
 0x2ae   : > { %8750 = vmatpush.bf16.msra.mxu1 %v13496_v60  ;;  %v8544_v16 = vpop.f32.mrf.mxu1  ;;  %v13581_v60 = vld [vmem:[%s13804_s17 + $0x16e8] sm:$0xff] }
 0x2af   : > { %8776 = vmatpush.bf16.msra.mxu3 %v13512_v61  ;;  %8738 = vmatmul.bf16.vlgmr.msra.gmra.mxu0 %v2112_v63  ;;  %v8545_v17 = vadd.f32 %v8544_v16, %v8532_v13  ;;  %v13556_v63 = vld [vmem:[%s13804_s17 + $0x1620] sm:$0xff] }
 0x2b0   : > { %8782 = vmatpush.bf16.msrb.mxu0 %v13527_v58  ;;  %8764 = vmatmul.bf16.vlgmr.msra.gmra.mxu2 %v2114_v0  ;;  %v13573_v58 = vld [vmem:[%s13804_s17 + $0x16a8] sm:$0xff]  ;;  %v13572_v0 = vld [vmem:[%s13804_s17 + $0x16a0] sm:$0xff] }
 0x2b1   : > { %8808 = vmatpush.bf16.msrb.mxu2 %v13543_v59  ;;  %8751 = vmatmul.bf16.vlgmr.msra.gmra.mxu1 %v2113_v2  ;;  %v13565_v59 = vld [vmem:[%s13804_s17 + $0x1668] sm:$0xff] }
 0x2b2   : > { %8795 = vmatpush.bf16.msrb.mxu1 %v13535_v62  ;;  %8777 = vmatmul.bf16.vlgmr.msra.gmra.mxu3 %v2115_v3  ;;  %v13564_v3 = vld [vmem:[%s13804_s17 + $0x1660] sm:$0xff] }
 0x2b3   : > { %8821 = vmatpush.bf16.msrb.mxu3 %v13551_v1  ;;  %v8557_v22 = vpop.f32.mrf.mxu2 }
 0x2b4   : > { %8783 = vmatpush.bf16.msrb.mxu0 %v13526_v4  ;;  %v8558_v23 = vadd.f32 %v8557_v22, %v8545_v17  ;;  %v8533_v27 = vpop.f32.mrf.mxu0  ;;  %v13580_v4 = vld [vmem:[%s13804_s17 + $0x16e0] sm:$0xff]  ;;  %v13562_v17 = vld [vmem:[%s13804_s17 + $0x1650] sm:$0xff]  ;;  %v13561_v22 = vld [vmem:[%s13804_s17 + $0x1648] sm:$0xff] }
 0x2b5   : > { %8809 = vmatpush.bf16.msrb.mxu2 %v13542_v5  ;;  %v8570_v26 = vpop.f32.mrf.mxu3  ;;  %v13555_v5 = vld [vmem:[%s13804_s17 + $0x1618] sm:$0xff] }
 0x2b6   : > { %8796 = vmatpush.bf16.msrb.mxu1 %v13534_v6  ;;  %v14561_v28 = vadd.f32 %v8570_v26, %v8558_v23  ;;  %v8546_v31 = vpop.f32.mrf.mxu1  ;;  %v13571_v6 = vld [vmem:[%s13804_s17 + $0x1698] sm:$0xff]  ;;  %v13577_v23 = vld [vmem:[%s13804_s17 + $0x16c8] sm:$0xff]  ;;  %v13568_v26 = vld [vmem:[%s13804_s17 + $0x1680] sm:$0xff] }
 0x2b7   : > { %8822 = vmatpush.bf16.msrb.mxu3 %v13550_v7  ;;  %v13591_v27 = vld [vmem:[%s13804_s17 + $0x1738] sm:$0xff] }
 0x2b8   : > { %8784 = vmatpush.bf16.msrb.mxu0 %v13525_v8  ;;  %v13599_v31 = vld [vmem:[%s13804_s17 + $0x1778] sm:$0xff] }
 0x2b9   : > { %8810 = vmatpush.bf16.msrb.mxu2 %v13541_v9  ;;  %v13563_v9 = vld [vmem:[%s13804_s17 + $0x1658] sm:$0xff] }
 0x2ba   : > { %8797 = vmatpush.bf16.msrb.mxu1 %v13533_v10  ;;  %v13579_v10 = vld [vmem:[%s13804_s17 + $0x16d8] sm:$0xff] }
 0x2bb   : > { %8823 = vmatpush.bf16.msrb.mxu3 %v13549_v11  ;;  %v8559_v40 = vpop.f32.mrf.mxu2 }
 0x2bc   : > { %8785 = vmatpush.bf16.msrb.mxu0 %v13524_v14  ;;  %v13554_v14 = vld [vmem:[%s13804_s17 + $0x1610] sm:$0xff] }
 0x2bd   : > { %8811 = vmatpush.bf16.msrb.mxu2 %v13540_v15  ;;  %v8572_v44 = vpop.f32.mrf.mxu3  ;;  %v13570_v15 = vld [vmem:[%s13804_s17 + $0x1690] sm:$0xff] }
 0x2be   : > { %8798 = vmatpush.bf16.msrb.mxu1 %v13532_v18  ;;  %v13578_v18 = vld [vmem:[%s13804_s17 + $0x16d0] sm:$0xff]  ;;  %v13613_v44 = vld [vmem:[%s13804_s17 + $0x17e8] sm:$0xff] }
 0x2bf   : > { %8824 = vmatpush.bf16.msrb.mxu3 %v13548_v19  ;;  %v13553_v19 = vld [vmem:[%s13804_s17 + $0x1608] sm:$0xff]  ;;  %v13614_v40 = vld [vmem:[%s13804_s17 + $0x17f0] sm:$0xff] }
 0x2c0   : > { %8786 = vmatpush.bf16.msrb.mxu0 %v13523_v20  ;;  %v13569_v20 = vld [vmem:[%s13804_s17 + $0x1688] sm:$0xff] }
 0x2c1   : > { %8812 = vmatpush.bf16.msrb.mxu2 %v13539_v21 }
 0x2c2   : > { %8799 = vmatpush.bf16.msrb.mxu1 %v13531_v24 }
 0x2c3   : > { %8825 = vmatpush.bf16.msrb.mxu3 %v13547_v25  ;;  %v13552_v25 = vld [vmem:[%s13804_s17 + $0x1600] sm:$0xff] }
 0x2c4   : > { %8787 = vmatpush.bf16.msrb.mxu0 %v13522_v29  ;;  %v13560_v29 = vld [vmem:[%s13804_s17 + $0x1640] sm:$0xff] }
 0x2c5   : > { %8813 = vmatpush.bf16.msrb.mxu2 %v13538_v30  ;;  %v13576_v30 = vld [vmem:[%s13804_s17 + $0x16c0] sm:$0xff] }
 0x2c6   : > { %8800 = vmatpush.bf16.msrb.mxu1 %v13530_v32  ;;  %v2122_v32 = vld [vmem:[#allocation1] sm:$0xff] }
 0x2c7   : > { %8826 = vmatpush.bf16.msrb.mxu3 %v13546_v33  ;;  %v2124_v33 = vld [vmem:[#allocation1 + $0x12] sm:$0xff] }
 0x2c8   : > { %8788 = vmatpush.bf16.msrb.mxu0 %v13521_v34  ;;  %v13615_v34 = vld [vmem:[%s13804_s17 + $0x17f8] sm:$0xff] }
 0x2c9   : > { %8814 = vmatpush.bf16.msrb.mxu2 %v13537_v35  ;;  %v2123_v35 = vld [vmem:[#allocation1 + $0x9] sm:$0xff] }
 0x2ca   : > { %8801 = vmatpush.bf16.msrb.mxu1 %v13529_v42  ;;  %v13605_v42 = vld [vmem:[%s13804_s17 + $0x17a8] sm:$0xff] }
 0x2cb   : > { %8827 = vmatpush.bf16.msrb.mxu3 %v13545_v43  ;;  %v13597_v43 = vld [vmem:[%s13804_s17 + $0x1768] sm:$0xff] }
 0x2cc   : > { %8789 = vmatpush.bf16.msrb.mxu0 %v13520_v45  ;;  %v8583_v61 = vpop.f32.mrf.mxu0 }
 0x2cd   : > { %8815 = vmatpush.bf16.msrb.mxu2 %v13536_v46  ;;  %v8584_v62 = vadd.f32 %v8583_v61, %v14561_v28  ;;  %v13607_v28 = vld [vmem:[%s13804_s17 + $0x17b8] sm:$0xff] }
 0x2ce   : > { %8802 = vmatpush.bf16.msrb.mxu1 %v13528_v49  ;;  %v8596_v1 = vpop.f32.mrf.mxu1 }
 0x2cf   : > { %8828 = vmatpush.bf16.msrb.mxu3 %v13544_v50  ;;  %8790 = vmatmul.bf16.vlgmr.msrb.gmra.mxu0 %v2116_v36  ;;  %v8597_v2 = vadd.f32 %v8596_v1, %v8584_v62  ;;  %v2125_v36 = vld [vmem:[#allocation1 + $0x1b] sm:$0xff]  ;;  %v13586_v62 = vld [vmem:[%s13804_s17 + $0x1710] sm:$0xff] }
 0x2d0   : > { %8834 = vmatpush.bf16.msra.mxu0 %v13559_v47  ;;  %8816 = vmatmul.bf16.vlgmr.msrb.gmra.mxu2 %v2118_v37  ;;  %v13590_v37 = vld [vmem:[%s13804_s17 + $0x1730] sm:$0xff]  ;;  %v13588_v47 = vld [vmem:[%s13804_s17 + $0x1720] sm:$0xff] }
 0x2d1   : > { %8860 = vmatpush.bf16.msra.mxu2 %v13575_v48  ;;  %8803 = vmatmul.bf16.vlgmr.msrb.gmra.mxu1 %v2117_v38  ;;  %v13606_v38 = vld [vmem:[%s13804_s17 + $0x17b0] sm:$0xff]  ;;  %v13604_v48 = vld [vmem:[%s13804_s17 + $0x17a0] sm:$0xff] }
 0x2d2   : > { %8847 = vmatpush.bf16.msra.mxu1 %v13567_v51  ;;  %8829 = vmatmul.bf16.vlgmr.msrb.gmra.mxu3 %v2119_v39  ;;  %v13598_v39 = vld [vmem:[%s13804_s17 + $0x1770] sm:$0xff]  ;;  %v13596_v51 = vld [vmem:[%s13804_s17 + $0x1760] sm:$0xff] }
 0x2d3   : > { %8873 = vmatpush.bf16.msra.mxu3 %v13583_v52  ;;  %v8609_v7 = vpop.f32.mrf.mxu2  ;;  %v13612_v52 = vld [vmem:[%s13804_s17 + $0x17e0] sm:$0xff]  ;;  %v13594_v1 = vld [vmem:[%s13804_s17 + $0x1750] sm:$0xff] }
 0x2d4   : > { %8835 = vmatpush.bf16.msra.mxu0 %v13558_v53  ;;  %v8610_v8 = vadd.f32 %v8609_v7, %v8597_v2  ;;  %v8585_v12 = vpop.f32.mrf.mxu0  ;;  %v13587_v53 = vld [vmem:[%s13804_s17 + $0x1718] sm:$0xff]  ;;  %v13610_v2 = vld [vmem:[%s13804_s17 + $0x17d0] sm:$0xff] }
 0x2d5   : > { %8861 = vmatpush.bf16.msra.mxu2 %v13574_v54  ;;  %v8622_v11 = vpop.f32.mrf.mxu3  ;;  %v13603_v54 = vld [vmem:[%s13804_s17 + $0x1798] sm:$0xff]  ;;  %v2127_v7 = vld [vmem:[#allocation1 + $0x2d] sm:$0xff] }
 0x2d6   : > { %8848 = vmatpush.bf16.msra.mxu1 %v13566_v55  ;;  %v8623_v13 = vadd.f32 %v8622_v11, %v8610_v8  ;;  %v8598_v16 = vpop.f32.mrf.mxu1  ;;  %v2129_v8 = vld [vmem:[#allocation1 + $0x3f] sm:$0xff]  ;;  %v13593_v11 = vld [vmem:[%s13804_s17 + $0x1748] sm:$0xff] }
 0x2d7   : > { %8874 = vmatpush.bf16.msra.mxu3 %v13582_v56  ;;  %v13609_v12 = vld [vmem:[%s13804_s17 + $0x17c8] sm:$0xff]  ;;  %v13623_v16 = vld [vmem:[%s13804_s17 + $0x1838] sm:$0xff] }
 0x2d8   : > { %8836 = vmatpush.bf16.msra.mxu0 %v13557_v57  ;;  %v13595_v57 = vld [vmem:[%s13804_s17 + $0x1758] sm:$0xff] }
 0x2d9   : > { %8862 = vmatpush.bf16.msra.mxu2 %v13573_v58  ;;  %v13611_v58 = vld [vmem:[%s13804_s17 + $0x17d8] sm:$0xff] }
 0x2da   : > { %8849 = vmatpush.bf16.msra.mxu1 %v13565_v59 }
 0x2db   : > { %8875 = vmatpush.bf16.msra.mxu3 %v13581_v60  ;;  %v8611_v21 = vpop.f32.mrf.mxu2 }
 0x2dc   : > { %8837 = vmatpush.bf16.msra.mxu0 %v13556_v63  ;;  %v13602_v63 = vld [vmem:[%s13804_s17 + $0x1790] sm:$0xff]  ;;  %v13647_v21 = vld [vmem:[%s13804_s17 + $0x18f8] sm:$0xff] }
 0x2dd   : > { %8863 = vmatpush.bf16.msra.mxu2 %v13572_v0  ;;  %v8624_v24 = vpop.f32.mrf.mxu3 }
 0x2de   : > { %8850 = vmatpush.bf16.msra.mxu1 %v13564_v3  ;;  %v13585_v3 = vld [vmem:[%s13804_s17 + $0x1708] sm:$0xff]  ;;  %v13630_v24 = vld [vmem:[%s13804_s17 + $0x1870] sm:$0xff] }
 0x2df   : > { %8876 = vmatpush.bf16.msra.mxu3 %v13580_v4  ;;  %v13601_v4 = vld [vmem:[%s13804_s17 + $0x1788] sm:$0xff] }
 0x2e0   : > { %8838 = vmatpush.bf16.msra.mxu0 %v13555_v5  ;;  %v2126_v5 = vld [vmem:[#allocation1 + $0x24] sm:$0xff] }
 0x2e1   : > { %8864 = vmatpush.bf16.msra.mxu2 %v13571_v6  ;;  %v2128_v6 = vld [vmem:[#allocation1 + $0x36] sm:$0xff] }
 0x2e2   : > { %8851 = vmatpush.bf16.msra.mxu1 %v13563_v9 }
 0x2e3   : > { %8877 = vmatpush.bf16.msra.mxu3 %v13579_v10  ;;  %v195_v10 = vld [vmem:[%s14801_s0 + $0x60] sm:$0xff] }
 0x2e4   : > { %8839 = vmatpush.bf16.msra.mxu0 %v13554_v14  ;;  %2131 = vst [vmem:[#allocation1] ss:$9 sm:$0xff] %v195_v10  ;;  %v13584_v14 = vld [vmem:[%s13804_s17 + $0x1700] sm:$0xff]  ;;  %v13653_v10 = vld [vmem:[%s13804_s17 + $0x1928] sm:$0xff] }
 0x2e5   : > { %8865 = vmatpush.bf16.msra.mxu2 %v13570_v15  ;;  %v13600_v15 = vld [vmem:[%s13804_s17 + $0x1780] sm:$0xff] }
 0x2e6   : > { %8852 = vmatpush.bf16.msra.mxu1 %v13562_v17  ;;  %v13639_v17 = vld [vmem:[%s13804_s17 + $0x18b8] sm:$0xff] }
 0x2e7   : > { %8878 = vmatpush.bf16.msra.mxu3 %v13578_v18  ;;  %v13592_v18 = vld [vmem:[%s13804_s17 + $0x1740] sm:$0xff] }
 0x2e8   : > { %8840 = vmatpush.bf16.msra.mxu0 %v13553_v19  ;;  %v13608_v19 = vld [vmem:[%s13804_s17 + $0x17c0] sm:$0xff] }
 0x2e9   : > { %8866 = vmatpush.bf16.msra.mxu2 %v13569_v20  ;;  %v13631_v20 = vld [vmem:[%s13804_s17 + $0x1878] sm:$0xff] }
 0x2ea   : > { %8853 = vmatpush.bf16.msra.mxu1 %v13561_v22  ;;  %v13622_v22 = vld [vmem:[%s13804_s17 + $0x1830] sm:$0xff] }
 0x2eb   : > { %8879 = vmatpush.bf16.msra.mxu3 %v13577_v23  ;;  %v13638_v23 = vld [vmem:[%s13804_s17 + $0x18b0] sm:$0xff] }
 0x2ec   : > { %8841 = vmatpush.bf16.msra.mxu0 %v13552_v25  ;;  %v8635_v45 = vpop.f32.mrf.mxu0  ;;  %v13646_v25 = vld [vmem:[%s13804_s17 + $0x18f0] sm:$0xff] }
 0x2ed   : > { %8867 = vmatpush.bf16.msra.mxu2 %v13568_v26  ;;  %v8636_v46 = vadd.f32 %v8635_v45, %v8623_v13  ;;  %v13621_v26 = vld [vmem:[%s13804_s17 + $0x1828] sm:$0xff] }
 0x2ee   : > { %8854 = vmatpush.bf16.msra.mxu1 %v13560_v29  ;;  %v8648_v49 = vpop.f32.mrf.mxu1  ;;  %v13645_v29 = vld [vmem:[%s13804_s17 + $0x18e8] sm:$0xff] }
 0x2ef   : > { %8880 = vmatpush.bf16.msra.mxu3 %v13576_v30  ;;  %8842 = vmatmul.bf16.vlgmr.msra.gmra.mxu0 %v2122_v32  ;;  %v8649_v50 = vadd.f32 %v8648_v49, %v8636_v46  ;;  %v13620_v32 = vld [vmem:[%s13804_s17 + $0x1820] sm:$0xff] }
 0x2f0   : > { %8886 = vmatpush.bf16.msrb.mxu0 %v13591_v27  ;;  %8868 = vmatmul.bf16.vlgmr.msra.gmra.mxu2 %v2124_v33  ;;  %v13637_v27 = vld [vmem:[%s13804_s17 + $0x18a8] sm:$0xff]  ;;  %v13636_v33 = vld [vmem:[%s13804_s17 + $0x18a0] sm:$0xff] }
 0x2f1   : > { %8912 = vmatpush.bf16.msrb.mxu2 %v13607_v28  ;;  %8855 = vmatmul.bf16.vlgmr.msra.gmra.mxu1 %v2123_v35  ;;  %v13629_v28 = vld [vmem:[%s13804_s17 + $0x1868] sm:$0xff] }
 0x2f2   : > { %8899 = vmatpush.bf16.msrb.mxu1 %v13599_v31  ;;  %8881 = vmatmul.bf16.vlgmr.msra.gmra.mxu3 %v2125_v36  ;;  %v13628_v36 = vld [vmem:[%s13804_s17 + $0x1860] sm:$0xff] }
 0x2f3   : > { %8925 = vmatpush.bf16.msrb.mxu3 %v13615_v34  ;;  %v8661_v55 = vpop.f32.mrf.mxu2 }
 0x2f4   : > { %8887 = vmatpush.bf16.msrb.mxu0 %v13590_v37  ;;  %v8662_v56 = vadd.f32 %v8661_v55, %v8649_v50  ;;  %v8637_v60 = vpop.f32.mrf.mxu0  ;;  %v13644_v37 = vld [vmem:[%s13804_s17 + $0x18e0] sm:$0xff]  ;;  %v13626_v50 = vld [vmem:[%s13804_s17 + $0x1850] sm:$0xff]  ;;  %v13625_v55 = vld [vmem:[%s13804_s17 + $0x1848] sm:$0xff] }
 0x2f5   : > { %8913 = vmatpush.bf16.msrb.mxu2 %v13606_v38  ;;  %v8674_v59 = vpop.f32.mrf.mxu3  ;;  %v13619_v38 = vld [vmem:[%s13804_s17 + $0x1818] sm:$0xff] }
 0x2f6   : > { %8900 = vmatpush.bf16.msrb.mxu1 %v13598_v39  ;;  %v14631_v61 = vadd.f32 %v8674_v59, %v8662_v56  ;;  %v8650_v0 = vpop.f32.mrf.mxu1  ;;  %v13635_v39 = vld [vmem:[%s13804_s17 + $0x1898] sm:$0xff]  ;;  %v13641_v56 = vld [vmem:[%s13804_s17 + $0x18c8] sm:$0xff]  ;;  %v13632_v59 = vld [vmem:[%s13804_s17 + $0x1880] sm:$0xff] }
 0x2f7   : > { %8926 = vmatpush.bf16.msrb.mxu3 %v13614_v40  ;;  %v13655_v60 = vld [vmem:[%s13804_s17 + $0x1938] sm:$0xff] }
 0x2f8   : > { %8888 = vmatpush.bf16.msrb.mxu0 %v13589_v41  ;;  %v13663_v0 = vld [vmem:[%s13804_s17 + $0x1978] sm:$0xff] }
 0x2f9   : > { %8914 = vmatpush.bf16.msrb.mxu2 %v13605_v42  ;;  %v13627_v42 = vld [vmem:[%s13804_s17 + $0x1858] sm:$0xff] }
 0x2fa   : > { %8901 = vmatpush.bf16.msrb.mxu1 %v13597_v43  ;;  %v13643_v43 = vld [vmem:[%s13804_s17 + $0x18d8] sm:$0xff] }
 0x2fb   : > { %8927 = vmatpush.bf16.msrb.mxu3 %v13613_v44  ;;  %v8663_v9 = vpop.f32.mrf.mxu2 }
 0x2fc   : > { %8889 = vmatpush.bf16.msrb.mxu0 %v13588_v47  ;;  %v13618_v47 = vld [vmem:[%s13804_s17 + $0x1810] sm:$0xff] }
 0x2fd   : > { %8915 = vmatpush.bf16.msrb.mxu2 %v13604_v48  ;;  %v8676_v13 = vpop.f32.mrf.mxu3  ;;  %v13634_v48 = vld [vmem:[%s13804_s17 + $0x1890] sm:$0xff] }
 0x2fe   : > { %8902 = vmatpush.bf16.msrb.mxu1 %v13596_v51  ;;  %v13642_v51 = vld [vmem:[%s13804_s17 + $0x18d0] sm:$0xff]  ;;  %v13677_v13 = vld [vmem:[%s13804_s17 + $0x19e8] sm:$0xff] }
 0x2ff   : > { %8928 = vmatpush.bf16.msrb.mxu3 %v13612_v52  ;;  %v13617_v52 = vld [vmem:[%s13804_s17 + $0x1808] sm:$0xff]  ;;  %v13678_v9 = vld [vmem:[%s13804_s17 + $0x19f0] sm:$0xff] }
 0x300   : > { %8890 = vmatpush.bf16.msrb.mxu0 %v13587_v53  ;;  %v13633_v53 = vld [vmem:[%s13804_s17 + $0x1888] sm:$0xff] }
 0x301   : > { %8916 = vmatpush.bf16.msrb.mxu2 %v13603_v54 }
 0x302   : > { %8903 = vmatpush.bf16.msrb.mxu1 %v13595_v57 }
 0x303   : > { %8929 = vmatpush.bf16.msrb.mxu3 %v13611_v58  ;;  %v13616_v58 = vld [vmem:[%s13804_s17 + $0x1800] sm:$0xff] }
 0x304   : > { %8891 = vmatpush.bf16.msrb.mxu0 %v13586_v62  ;;  %v13624_v62 = vld [vmem:[%s13804_s17 + $0x1840] sm:$0xff] }
 0x305   : > { %8917 = vmatpush.bf16.msrb.mxu2 %v13602_v63  ;;  %v13640_v63 = vld [vmem:[%s13804_s17 + $0x18c0] sm:$0xff] }
 0x306   : > { %8904 = vmatpush.bf16.msrb.mxu1 %v13594_v1  ;;  %v2132_v1 = vld [vmem:[#allocation1] sm:$0xff] }
 0x307   : > { %8930 = vmatpush.bf16.msrb.mxu3 %v13610_v2  ;;  %v2134_v2 = vld [vmem:[#allocation1 + $0x12] sm:$0xff] }
 0x308   : > { %8892 = vmatpush.bf16.msrb.mxu0 %v13585_v3  ;;  %v13679_v3 = vld [vmem:[%s13804_s17 + $0x19f8] sm:$0xff] }
 0x309   : > { %8918 = vmatpush.bf16.msrb.mxu2 %v13601_v4  ;;  %v2133_v4 = vld [vmem:[#allocation1 + $0x9] sm:$0xff] }
 0x30a   : > { %8905 = vmatpush.bf16.msrb.mxu1 %v13593_v11  ;;  %v13669_v11 = vld [vmem:[%s13804_s17 + $0x19a8] sm:$0xff] }
 0x30b   : > { %8931 = vmatpush.bf16.msrb.mxu3 %v13609_v12  ;;  %v13661_v12 = vld [vmem:[%s13804_s17 + $0x1968] sm:$0xff] }
 0x30c   : > { %8893 = vmatpush.bf16.msrb.mxu0 %v13584_v14  ;;  %v8687_v30 = vpop.f32.mrf.mxu0 }
 0x30d   : > { %8919 = vmatpush.bf16.msrb.mxu2 %v13600_v15  ;;  %v8688_v31 = vadd.f32 %v8687_v30, %v14631_v61  ;;  %v13671_v61 = vld [vmem:[%s13804_s17 + $0x19b8] sm:$0xff] }
 0x30e   : > { %8906 = vmatpush.bf16.msrb.mxu1 %v13592_v18  ;;  %v8700_v34 = vpop.f32.mrf.mxu1 }
 0x30f   : > { %8932 = vmatpush.bf16.msrb.mxu3 %v13608_v19  ;;  %8894 = vmatmul.bf16.vlgmr.msrb.gmra.mxu0 %v2126_v5  ;;  %v8701_v35 = vadd.f32 %v8700_v34, %v8688_v31  ;;  %v2135_v5 = vld [vmem:[#allocation1 + $0x1b] sm:$0xff]  ;;  %v13650_v31 = vld [vmem:[%s13804_s17 + $0x1910] sm:$0xff] }
 0x310   : > { %8938 = vmatpush.bf16.msra.mxu0 %v13623_v16  ;;  %8920 = vmatmul.bf16.vlgmr.msrb.gmra.mxu2 %v2128_v6  ;;  %v13654_v6 = vld [vmem:[%s13804_s17 + $0x1930] sm:$0xff]  ;;  %v13652_v16 = vld [vmem:[%s13804_s17 + $0x1920] sm:$0xff] }
 0x311   : > { %8964 = vmatpush.bf16.msra.mxu2 %v13639_v17  ;;  %8907 = vmatmul.bf16.vlgmr.msrb.gmra.mxu1 %v2127_v7  ;;  %v13670_v7 = vld [vmem:[%s13804_s17 + $0x19b0] sm:$0xff]  ;;  %v13668_v17 = vld [vmem:[%s13804_s17 + $0x19a0] sm:$0xff] }
 0x312   : > { %8951 = vmatpush.bf16.msra.mxu1 %v13631_v20  ;;  %8933 = vmatmul.bf16.vlgmr.msrb.gmra.mxu3 %v2129_v8  ;;  %v13662_v8 = vld [vmem:[%s13804_s17 + $0x1970] sm:$0xff]  ;;  %v13660_v20 = vld [vmem:[%s13804_s17 + $0x1960] sm:$0xff] }
 0x313   : > { %8977 = vmatpush.bf16.msra.mxu3 %v13647_v21  ;;  %v8713_v40 = vpop.f32.mrf.mxu2  ;;  %v13676_v21 = vld [vmem:[%s13804_s17 + $0x19e0] sm:$0xff]  ;;  %v13658_v34 = vld [vmem:[%s13804_s17 + $0x1950] sm:$0xff] }
 0x314   : > { %8939 = vmatpush.bf16.msra.mxu0 %v13622_v22  ;;  %v8714_v41 = vadd.f32 %v8713_v40, %v8701_v35  ;;  %v8689_v45 = vpop.f32.mrf.mxu0  ;;  %v13651_v22 = vld [vmem:[%s13804_s17 + $0x1918] sm:$0xff]  ;;  %v13674_v35 = vld [vmem:[%s13804_s17 + $0x19d0] sm:$0xff] }
 0x315   : > { %8965 = vmatpush.bf16.msra.mxu2 %v13638_v23  ;;  %v8726_v44 = vpop.f32.mrf.mxu3  ;;  %v13667_v23 = vld [vmem:[%s13804_s17 + $0x1998] sm:$0xff]  ;;  %v2137_v40 = vld [vmem:[#allocation1 + $0x2d] sm:$0xff] }
 0x316   : > { %8952 = vmatpush.bf16.msra.mxu1 %v13630_v24  ;;  %v8727_v46 = vadd.f32 %v8726_v44, %v8714_v41  ;;  %v8702_v49 = vpop.f32.mrf.mxu1  ;;  %v2139_v41 = vld [vmem:[#allocation1 + $0x3f] sm:$0xff]  ;;  %v13657_v44 = vld [vmem:[%s13804_s17 + $0x1948] sm:$0xff] }
 0x317   : > { %8978 = vmatpush.bf16.msra.mxu3 %v13646_v25  ;;  %v13673_v45 = vld [vmem:[%s13804_s17 + $0x19c8] sm:$0xff]  ;;  %v13687_v49 = vld [vmem:[%s13804_s17 + $0x1a38] sm:$0xff] }
 0x318   : > { %8940 = vmatpush.bf16.msra.mxu0 %v13621_v26  ;;  %v13659_v26 = vld [vmem:[%s13804_s17 + $0x1958] sm:$0xff] }
 0x319   : > { %8966 = vmatpush.bf16.msra.mxu2 %v13637_v27  ;;  %v13675_v27 = vld [vmem:[%s13804_s17 + $0x19d8] sm:$0xff] }
 0x31a   : > { %8953 = vmatpush.bf16.msra.mxu1 %v13629_v28 }
 0x31b   : > { %8979 = vmatpush.bf16.msra.mxu3 %v13645_v29  ;;  %v8715_v54 = vpop.f32.mrf.mxu2 }
 0x31c   : > { %8941 = vmatpush.bf16.msra.mxu0 %v13620_v32  ;;  %v13666_v32 = vld [vmem:[%s13804_s17 + $0x1990] sm:$0xff]  ;;  %v13711_v54 = vld [vmem:[%s13804_s17 + $0x1af8] sm:$0xff] }
 0x31d   : > { %8967 = vmatpush.bf16.msra.mxu2 %v13636_v33  ;;  %v8728_v57 = vpop.f32.mrf.mxu3 }
 0x31e   : > { %8954 = vmatpush.bf16.msra.mxu1 %v13628_v36  ;;  %v13649_v36 = vld [vmem:[%s13804_s17 + $0x1908] sm:$0xff]  ;;  %v13694_v57 = vld [vmem:[%s13804_s17 + $0x1a70] sm:$0xff] }
 0x31f   : > { %8980 = vmatpush.bf16.msra.mxu3 %v13644_v37  ;;  %v13665_v37 = vld [vmem:[%s13804_s17 + $0x1988] sm:$0xff] }
 0x320   : > { %8942 = vmatpush.bf16.msra.mxu0 %v13619_v38  ;;  %v2136_v38 = vld [vmem:[#allocation1 + $0x24] sm:$0xff] }
 0x321   : > { %8968 = vmatpush.bf16.msra.mxu2 %v13635_v39  ;;  %v2138_v39 = vld [vmem:[#allocation1 + $0x36] sm:$0xff] }
 0x322   : > { %8955 = vmatpush.bf16.msra.mxu1 %v13627_v42 }
 0x323   : > { %8981 = vmatpush.bf16.msra.mxu3 %v13643_v43  ;;  %v196_v43 = vld [vmem:[%s14801_s0 + $0x68] sm:$0xff] }
 0x324   : > { %8943 = vmatpush.bf16.msra.mxu0 %v13618_v47  ;;  %2141 = vst [vmem:[#allocation1] ss:$9 sm:$0xff] %v196_v43  ;;  %v13648_v47 = vld [vmem:[%s13804_s17 + $0x1900] sm:$0xff]  ;;  %v13717_v43 = vld [vmem:[%s13804_s17 + $0x1b28] sm:$0xff] }
 0x325   : > { %8969 = vmatpush.bf16.msra.mxu2 %v13634_v48  ;;  %v13664_v48 = vld [vmem:[%s13804_s17 + $0x1980] sm:$0xff] }
 0x326   : > { %8956 = vmatpush.bf16.msra.mxu1 %v13626_v50  ;;  %v13703_v50 = vld [vmem:[%s13804_s17 + $0x1ab8] sm:$0xff] }
 0x327   : > { %8982 = vmatpush.bf16.msra.mxu3 %v13642_v51  ;;  %v13656_v51 = vld [vmem:[%s13804_s17 + $0x1940] sm:$0xff] }
 0x328   : > { %8944 = vmatpush.bf16.msra.mxu0 %v13617_v52  ;;  %v13672_v52 = vld [vmem:[%s13804_s17 + $0x19c0] sm:$0xff] }
 0x329   : > { %8970 = vmatpush.bf16.msra.mxu2 %v13633_v53  ;;  %v13695_v53 = vld [vmem:[%s13804_s17 + $0x1a78] sm:$0xff] }
 0x32a   : > { %8957 = vmatpush.bf16.msra.mxu1 %v13625_v55  ;;  %v13686_v55 = vld [vmem:[%s13804_s17 + $0x1a30] sm:$0xff] }
 0x32b   : > { %8983 = vmatpush.bf16.msra.mxu3 %v13641_v56  ;;  %v13702_v56 = vld [vmem:[%s13804_s17 + $0x1ab0] sm:$0xff] }
 0x32c   : > { %8945 = vmatpush.bf16.msra.mxu0 %v13616_v58  ;;  %v8739_v14 = vpop.f32.mrf.mxu0  ;;  %v13710_v58 = vld [vmem:[%s13804_s17 + $0x1af0] sm:$0xff] }
 0x32d   : > { %8971 = vmatpush.bf16.msra.mxu2 %v13632_v59  ;;  %v8740_v15 = vadd.f32 %v8739_v14, %v8727_v46  ;;  %v13685_v59 = vld [vmem:[%s13804_s17 + $0x1a28] sm:$0xff] }
 0x32e   : > { %8958 = vmatpush.bf16.msra.mxu1 %v13624_v62  ;;  %v8752_v18 = vpop.f32.mrf.mxu1  ;;  %v13709_v62 = vld [vmem:[%s13804_s17 + $0x1ae8] sm:$0xff] }
 0x32f   : > { %8984 = vmatpush.bf16.msra.mxu3 %v13640_v63  ;;  %8946 = vmatmul.bf16.vlgmr.msra.gmra.mxu0 %v2132_v1  ;;  %v8753_v19 = vadd.f32 %v8752_v18, %v8740_v15  ;;  %v13684_v1 = vld [vmem:[%s13804_s17 + $0x1a20] sm:$0xff] }
 0x330   : > { %8990 = vmatpush.bf16.msrb.mxu0 %v13655_v60  ;;  %8972 = vmatmul.bf16.vlgmr.msra.gmra.mxu2 %v2134_v2  ;;  %v13701_v60 = vld [vmem:[%s13804_s17 + $0x1aa8] sm:$0xff]  ;;  %v13700_v2 = vld [vmem:[%s13804_s17 + $0x1aa0] sm:$0xff] }
 0x331   : > { %9016 = vmatpush.bf16.msrb.mxu2 %v13671_v61  ;;  %8959 = vmatmul.bf16.vlgmr.msra.gmra.mxu1 %v2133_v4  ;;  %v13693_v61 = vld [vmem:[%s13804_s17 + $0x1a68] sm:$0xff] }
 0x332   : > { %9003 = vmatpush.bf16.msrb.mxu1 %v13663_v0  ;;  %8985 = vmatmul.bf16.vlgmr.msra.gmra.mxu3 %v2135_v5  ;;  %v13692_v5 = vld [vmem:[%s13804_s17 + $0x1a60] sm:$0xff] }
 0x333   : > { %9029 = vmatpush.bf16.msrb.mxu3 %v13679_v3  ;;  %v8765_v24 = vpop.f32.mrf.mxu2 }
 0x334   : > { %8991 = vmatpush.bf16.msrb.mxu0 %v13654_v6  ;;  %v8766_v25 = vadd.f32 %v8765_v24, %v8753_v19  ;;  %v8741_v29 = vpop.f32.mrf.mxu0  ;;  %v13708_v6 = vld [vmem:[%s13804_s17 + $0x1ae0] sm:$0xff]  ;;  %v13690_v19 = vld [vmem:[%s13804_s17 + $0x1a50] sm:$0xff]  ;;  %v13689_v24 = vld [vmem:[%s13804_s17 + $0x1a48] sm:$0xff] }
 0x335   : > { %9017 = vmatpush.bf16.msrb.mxu2 %v13670_v7  ;;  %v8778_v28 = vpop.f32.mrf.mxu3  ;;  %v13683_v7 = vld [vmem:[%s13804_s17 + $0x1a18] sm:$0xff] }
 0x336   : > { %9004 = vmatpush.bf16.msrb.mxu1 %v13662_v8  ;;  %v14701_v30 = vadd.f32 %v8778_v28, %v8766_v25  ;;  %v8754_v33 = vpop.f32.mrf.mxu1  ;;  %v13699_v8 = vld [vmem:[%s13804_s17 + $0x1a98] sm:$0xff]  ;;  %v13705_v25 = vld [vmem:[%s13804_s17 + $0x1ac8] sm:$0xff]  ;;  %v13696_v28 = vld [vmem:[%s13804_s17 + $0x1a80] sm:$0xff] }
 0x337   : > { %9030 = vmatpush.bf16.msrb.mxu3 %v13678_v9  ;;  %v13719_v29 = vld [vmem:[%s13804_s17 + $0x1b38] sm:$0xff] }
 0x338   : > { %8992 = vmatpush.bf16.msrb.mxu0 %v13653_v10  ;;  %v13727_v33 = vld [vmem:[%s13804_s17 + $0x1b78] sm:$0xff] }
 0x339   : > { %9018 = vmatpush.bf16.msrb.mxu2 %v13669_v11  ;;  %v13691_v11 = vld [vmem:[%s13804_s17 + $0x1a58] sm:$0xff] }
 0x33a   : > { %9005 = vmatpush.bf16.msrb.mxu1 %v13661_v12  ;;  %v13707_v12 = vld [vmem:[%s13804_s17 + $0x1ad8] sm:$0xff] }
 0x33b   : > { %9031 = vmatpush.bf16.msrb.mxu3 %v13677_v13  ;;  %v8767_v42 = vpop.f32.mrf.mxu2 }
 0x33c   : > { %8993 = vmatpush.bf16.msrb.mxu0 %v13652_v16  ;;  %v13682_v16 = vld [vmem:[%s13804_s17 + $0x1a10] sm:$0xff] }
 0x33d   : > { %9019 = vmatpush.bf16.msrb.mxu2 %v13668_v17  ;;  %v8780_v46 = vpop.f32.mrf.mxu3  ;;  %v13698_v17 = vld [vmem:[%s13804_s17 + $0x1a90] sm:$0xff] }
 0x33e   : > { %9006 = vmatpush.bf16.msrb.mxu1 %v13660_v20  ;;  %v13706_v20 = vld [vmem:[%s13804_s17 + $0x1ad0] sm:$0xff]  ;;  %v13741_v46 = vld [vmem:[%s13804_s17 + $0x1be8] sm:$0xff] }
 0x33f   : > { %9032 = vmatpush.bf16.msrb.mxu3 %v13676_v21  ;;  %v13681_v21 = vld [vmem:[%s13804_s17 + $0x1a08] sm:$0xff]  ;;  %v13742_v42 = vld [vmem:[%s13804_s17 + $0x1bf0] sm:$0xff] }
 0x340   : > { %8994 = vmatpush.bf16.msrb.mxu0 %v13651_v22  ;;  %v13697_v22 = vld [vmem:[%s13804_s17 + $0x1a88] sm:$0xff] }
 0x341   : > { %9020 = vmatpush.bf16.msrb.mxu2 %v13667_v23 }
 0x342   : > { %9007 = vmatpush.bf16.msrb.mxu1 %v13659_v26 }
 0x343   : > { %9033 = vmatpush.bf16.msrb.mxu3 %v13675_v27  ;;  %v13680_v27 = vld [vmem:[%s13804_s17 + $0x1a00] sm:$0xff] }
 0x344   : > { %8995 = vmatpush.bf16.msrb.mxu0 %v13650_v31  ;;  %v13688_v31 = vld [vmem:[%s13804_s17 + $0x1a40] sm:$0xff] }
 0x345   : > { %9021 = vmatpush.bf16.msrb.mxu2 %v13666_v32  ;;  %v13704_v32 = vld [vmem:[%s13804_s17 + $0x1ac0] sm:$0xff] }
 0x346   : > { %9008 = vmatpush.bf16.msrb.mxu1 %v13658_v34  ;;  %v2142_v34 = vld [vmem:[#allocation1] sm:$0xff] }
 0x347   : > { %9034 = vmatpush.bf16.msrb.mxu3 %v13674_v35  ;;  %v2144_v35 = vld [vmem:[#allocation1 + $0x12] sm:$0xff] }
 0x348   : > { %8996 = vmatpush.bf16.msrb.mxu0 %v13649_v36  ;;  %v13743_v36 = vld [vmem:[%s13804_s17 + $0x1bf8] sm:$0xff] }
 0x349   : > { %9022 = vmatpush.bf16.msrb.mxu2 %v13665_v37  ;;  %v2143_v37 = vld [vmem:[#allocation1 + $0x9] sm:$0xff] }
 0x34a   : > { %9009 = vmatpush.bf16.msrb.mxu1 %v13657_v44  ;;  %v13733_v44 = vld [vmem:[%s13804_s17 + $0x1ba8] sm:$0xff] }
 0x34b   : > { %9035 = vmatpush.bf16.msrb.mxu3 %v13673_v45  ;;  %v13725_v45 = vld [vmem:[%s13804_s17 + $0x1b68] sm:$0xff] }
 0x34c   : > { %8997 = vmatpush.bf16.msrb.mxu0 %v13648_v47  ;;  %v8791_v63 = vpop.f32.mrf.mxu0 }
 0x34d   : > { %9023 = vmatpush.bf16.msrb.mxu2 %v13664_v48  ;;  %v8792_v0 = vadd.f32 %v8791_v63, %v14701_v30  ;;  %v13735_v30 = vld [vmem:[%s13804_s17 + $0x1bb8] sm:$0xff] }
 0x34e   : > { %9010 = vmatpush.bf16.msrb.mxu1 %v13656_v51  ;;  %v8804_v3 = vpop.f32.mrf.mxu1 }
 0x34f   : > { %9036 = vmatpush.bf16.msrb.mxu3 %v13672_v52  ;;  %8998 = vmatmul.bf16.vlgmr.msrb.gmra.mxu0 %v2136_v38  ;;  %v8805_v4 = vadd.f32 %v8804_v3, %v8792_v0  ;;  %v2145_v38 = vld [vmem:[#allocation1 + $0x1b] sm:$0xff]  ;;  %v13714_v0 = vld [vmem:[%s13804_s17 + $0x1b10] sm:$0xff] }
 0x350   : > { %9042 = vmatpush.bf16.msra.mxu0 %v13687_v49  ;;  %9024 = vmatmul.bf16.vlgmr.msrb.gmra.mxu2 %v2138_v39  ;;  %v13718_v39 = vld [vmem:[%s13804_s17 + $0x1b30] sm:$0xff]  ;;  %v13716_v49 = vld [vmem:[%s13804_s17 + $0x1b20] sm:$0xff] }
 0x351   : > { %9068 = vmatpush.bf16.msra.mxu2 %v13703_v50  ;;  %9011 = vmatmul.bf16.vlgmr.msrb.gmra.mxu1 %v2137_v40  ;;  %v13734_v40 = vld [vmem:[%s13804_s17 + $0x1bb0] sm:$0xff]  ;;  %v13732_v50 = vld [vmem:[%s13804_s17 + $0x1ba0] sm:$0xff] }
 0x352   : > { %9055 = vmatpush.bf16.msra.mxu1 %v13695_v53  ;;  %9037 = vmatmul.bf16.vlgmr.msrb.gmra.mxu3 %v2139_v41  ;;  %v13726_v41 = vld [vmem:[%s13804_s17 + $0x1b70] sm:$0xff]  ;;  %v13724_v53 = vld [vmem:[%s13804_s17 + $0x1b60] sm:$0xff] }
 0x353   : > { %9081 = vmatpush.bf16.msra.mxu3 %v13711_v54  ;;  %v8817_v9 = vpop.f32.mrf.mxu2  ;;  %v13740_v54 = vld [vmem:[%s13804_s17 + $0x1be0] sm:$0xff]  ;;  %v13722_v3 = vld [vmem:[%s13804_s17 + $0x1b50] sm:$0xff] }
 0x354   : > { %9043 = vmatpush.bf16.msra.mxu0 %v13686_v55  ;;  %v8818_v10 = vadd.f32 %v8817_v9, %v8805_v4  ;;  %v8793_v14 = vpop.f32.mrf.mxu0  ;;  %v13715_v55 = vld [vmem:[%s13804_s17 + $0x1b18] sm:$0xff]  ;;  %v13738_v4 = vld [vmem:[%s13804_s17 + $0x1bd0] sm:$0xff] }
 0x355   : > { %9069 = vmatpush.bf16.msra.mxu2 %v13702_v56  ;;  %v8830_v13 = vpop.f32.mrf.mxu3  ;;  %v13731_v56 = vld [vmem:[%s13804_s17 + $0x1b98] sm:$0xff]  ;;  %v2147_v9 = vld [vmem:[#allocation1 + $0x2d] sm:$0xff] }
 0x356   : > { %9056 = vmatpush.bf16.msra.mxu1 %v13694_v57  ;;  %v8831_v15 = vadd.f32 %v8830_v13, %v8818_v10  ;;  %v8806_v18 = vpop.f32.mrf.mxu1  ;;  %v2149_v10 = vld [vmem:[#allocation1 + $0x3f] sm:$0xff]  ;;  %v13721_v13 = vld [vmem:[%s13804_s17 + $0x1b48] sm:$0xff] }
 0x357   : > { %9082 = vmatpush.bf16.msra.mxu3 %v13710_v58  ;;  %v13737_v14 = vld [vmem:[%s13804_s17 + $0x1bc8] sm:$0xff]  ;;  %v13751_v18 = vld [vmem:[%s13804_s17 + $0x1c38] sm:$0xff] }
 0x358   : > { %9044 = vmatpush.bf16.msra.mxu0 %v13685_v59  ;;  %v13723_v59 = vld [vmem:[%s13804_s17 + $0x1b58] sm:$0xff] }
 0x359   : > { %9070 = vmatpush.bf16.msra.mxu2 %v13701_v60  ;;  %v13739_v60 = vld [vmem:[%s13804_s17 + $0x1bd8] sm:$0xff] }
 0x35a   : > { %9057 = vmatpush.bf16.msra.mxu1 %v13693_v61 }
 0x35b   : > { %9083 = vmatpush.bf16.msra.mxu3 %v13709_v62  ;;  %v8819_v23 = vpop.f32.mrf.mxu2 }
 0x35c   : > { %9045 = vmatpush.bf16.msra.mxu0 %v13684_v1  ;;  %v13730_v1 = vld [vmem:[%s13804_s17 + $0x1b90] sm:$0xff] }
 0x35d   : > { %9071 = vmatpush.bf16.msra.mxu2 %v13700_v2  ;;  %v8832_v26 = vpop.f32.mrf.mxu3 }
 0x35e   : > { %9058 = vmatpush.bf16.msra.mxu1 %v13692_v5  ;;  %v13713_v5 = vld [vmem:[%s13804_s17 + $0x1b08] sm:$0xff] }
 0x35f   : > { %9084 = vmatpush.bf16.msra.mxu3 %v13708_v6  ;;  %v13729_v6 = vld [vmem:[%s13804_s17 + $0x1b88] sm:$0xff] }
 0x360   : > { %9046 = vmatpush.bf16.msra.mxu0 %v13683_v7  ;;  %v2146_v7 = vld [vmem:[#allocation1 + $0x24] sm:$0xff] }
 0x361   : > { %9072 = vmatpush.bf16.msra.mxu2 %v13699_v8  ;;  %v2148_v8 = vld [vmem:[#allocation1 + $0x36] sm:$0xff] }
 0x362   : > { %9059 = vmatpush.bf16.msra.mxu1 %v13691_v11 }
 0x363   : > { %9085 = vmatpush.bf16.msra.mxu3 %v13707_v12  ;;  %v197_v12 = vld [vmem:[%s14801_s0 + $0x70] sm:$0x1] }
 0x364   : > { %9047 = vmatpush.bf16.msra.mxu0 %v13682_v16  ;;  %2151 = vst [vmem:[#allocation1] ss:$9 sm:$0xff] %v197_v12  ;;  %v13712_v16 = vld [vmem:[%s13804_s17 + $0x1b00] sm:$0xff] }
 0x365   : > { %9073 = vmatpush.bf16.msra.mxu2 %v13698_v17  ;;  %v13728_v17 = vld [vmem:[%s13804_s17 + $0x1b80] sm:$0xff] }
 0x366   : > { %9060 = vmatpush.bf16.msra.mxu1 %v13690_v19  ;;  %v13720_v19 = vld [vmem:[%s13804_s17 + $0x1b40] sm:$0xff] }
 0x367   : > { %9086 = vmatpush.bf16.msra.mxu3 %v13706_v20  ;;  %v13736_v20 = vld [vmem:[%s13804_s17 + $0x1bc0] sm:$0xff] }
 0x368   : > { %9048 = vmatpush.bf16.msra.mxu0 %v13681_v21  ;;  %v13750_v21 = vld [vmem:[%s13804_s17 + $0x1c30] sm:$0xff] }
 0x369   : > { %9074 = vmatpush.bf16.msra.mxu2 %v13697_v22  ;;  %v13749_v22 = vld [vmem:[%s13804_s17 + $0x1c28] sm:$0xff] }
 0x36a   : > { %9061 = vmatpush.bf16.msra.mxu1 %v13689_v24 }
 0x36b   : > { %9087 = vmatpush.bf16.msra.mxu3 %v13705_v25  ;;  %v13748_v25 = vld [vmem:[%s13804_s17 + $0x1c20] sm:$0xff] }
 0x36c   : > { %9049 = vmatpush.bf16.msra.mxu0 %v13680_v27  ;;  %v8843_v47 = vpop.f32.mrf.mxu0 }
 0x36d   : > { %9075 = vmatpush.bf16.msra.mxu2 %v13696_v28  ;;  %v8844_v48 = vadd.f32 %v8843_v47, %v8831_v15  ;;  %v13747_v28 = vld [vmem:[%s13804_s17 + $0x1c18] sm:$0xff] }
 0x36e   : > { %9062 = vmatpush.bf16.msra.mxu1 %v13688_v31  ;;  %v8856_v51 = vpop.f32.mrf.mxu1 }
 0x36f   : > { %9088 = vmatpush.bf16.msra.mxu3 %v13704_v32  ;;  %9050 = vmatmul.bf16.vlgmr.msra.gmra.mxu0 %v2142_v34  ;;  %v8857_v52 = vadd.f32 %v8856_v51, %v8844_v48  ;;  %v13746_v34 = vld [vmem:[%s13804_s17 + $0x1c10] sm:$0xff] }
 0x370   : > { %9094 = vmatpush.bf16.msrb.mxu0 %v13719_v29  ;;  %9076 = vmatmul.bf16.vlgmr.msra.gmra.mxu2 %v2144_v35 }
 0x371   : > { %9120 = vmatpush.bf16.msrb.mxu2 %v13735_v30  ;;  %9063 = vmatmul.bf16.vlgmr.msra.gmra.mxu1 %v2143_v37 }
 0x372   : > { %9107 = vmatpush.bf16.msrb.mxu1 %v13727_v33  ;;  %9089 = vmatmul.bf16.vlgmr.msra.gmra.mxu3 %v2145_v38 }
 0x373   : > { %9133 = vmatpush.bf16.msrb.mxu3 %v13743_v36  ;;  %v8869_v57 = vpop.f32.mrf.mxu2  ;;  %v13745_v36 = vld [vmem:[%s13804_s17 + $0x1c08] sm:$0xff] }
 0x374   : > { %9095 = vmatpush.bf16.msrb.mxu0 %v13718_v39  ;;  %v8870_v58 = vadd.f32 %v8869_v57, %v8857_v52  ;;  %v8845_v62 = vpop.f32.mrf.mxu0  ;;  %v13744_v39 = vld [vmem:[%s13804_s17 + $0x1c00] sm:$0xff]  ;;  %s9229_s17 = sshll.u32 %s14806_s13, 1 }
 0x375   : > { %9121 = vmatpush.bf16.msrb.mxu2 %v13734_v40  ;;  %v8882_v61 = vpop.f32.mrf.mxu3  ;;  %v2152_v40 = vld [vmem:[#allocation1] sm:$0xff]  ;;  %s182_s4 = scalar_lea.vmem %s14804_s3, %s9229_s17 }
 0x376   : > { %9108 = vmatpush.bf16.msrb.mxu1 %v13726_v41  ;;  %v8883_v63 = vadd.f32 %v8882_v61, %v8870_v58  ;;  %v8858_v2 = vpop.f32.mrf.mxu1 }
 0x377   : > { %9134 = vmatpush.bf16.msrb.mxu3 %v13742_v42 }
 0x378   : > { %9096 = vmatpush.bf16.msrb.mxu0 %v13717_v43 }
 0x379   : > { %9122 = vmatpush.bf16.msrb.mxu2 %v13733_v44 }
 0x37a   : > { %9109 = vmatpush.bf16.msrb.mxu1 %v13725_v45 }
 0x37b   : > { %9135 = vmatpush.bf16.msrb.mxu3 %v13741_v46  ;;  %v8871_v11 = vpop.f32.mrf.mxu2 }
 0x37c   : > { %9097 = vmatpush.bf16.msrb.mxu0 %v13716_v49 }
 0x37d   : > { %9123 = vmatpush.bf16.msrb.mxu2 %v13732_v50  ;;  %v8884_v15 = vpop.f32.mrf.mxu3 }
 0x37e   : > { %9110 = vmatpush.bf16.msrb.mxu1 %v13724_v53 }
 0x37f   : > { %9136 = vmatpush.bf16.msrb.mxu3 %v13740_v54 }
 0x380   : > { %9098 = vmatpush.bf16.msrb.mxu0 %v13715_v55 }
 0x381   : > { %9124 = vmatpush.bf16.msrb.mxu2 %v13731_v56 }
 0x382   : > { %9111 = vmatpush.bf16.msrb.mxu1 %v13723_v59 }
 0x383   : > { %9137 = vmatpush.bf16.msrb.mxu3 %v13739_v60 }
 0x384   : > { %9099 = vmatpush.bf16.msrb.mxu0 %v13714_v0 }
 0x385   : > { %9125 = vmatpush.bf16.msrb.mxu2 %v13730_v1 }
 0x386   : > { %9112 = vmatpush.bf16.msrb.mxu1 %v13722_v3 }
 0x387   : > { %9138 = vmatpush.bf16.msrb.mxu3 %v13738_v4 }
 0x388   : > { %9100 = vmatpush.bf16.msrb.mxu0 %v13713_v5 }
 0x389   : > { %9126 = vmatpush.bf16.msrb.mxu2 %v13729_v6 }
 0x38a   : > { %9113 = vmatpush.bf16.msrb.mxu1 %v13721_v13 }
 0x38b   : > { %9139 = vmatpush.bf16.msrb.mxu3 %v13737_v14 }
 0x38c   : > { %9101 = vmatpush.bf16.msrb.mxu0 %v13712_v16  ;;  %v8895_v23 = vpop.f32.mrf.mxu0 }
 0x38d   : > { %9127 = vmatpush.bf16.msrb.mxu2 %v13728_v17  ;;  %v8896_v24 = vadd.f32 %v8895_v23, %v8883_v63 }
 0x38e   : > { %9114 = vmatpush.bf16.msrb.mxu1 %v13720_v19  ;;  %v8908_v26 = vpop.f32.mrf.mxu1 }
 0x38f   : > { %9140 = vmatpush.bf16.msrb.mxu3 %v13736_v20  ;;  %9102 = vmatmul.bf16.vlgmr.msrb.gmra.mxu0 %v2146_v7  ;;  %v8909_v27 = vadd.f32 %v8908_v26, %v8896_v24 }
 0x390   : > { %9146 = vmatpush.bf16.msra.mxu0 %v13751_v18  ;;  %9128 = vmatmul.bf16.vlgmr.msrb.gmra.mxu2 %v2148_v8 }
 0x391   : > { %9115 = vmatmul.bf16.vlgmr.msrb.gmra.mxu1 %v2147_v9 }
 0x392   : > { %9141 = vmatmul.bf16.vlgmr.msrb.gmra.mxu3 %v2149_v10 }
 0x393   : > { %v8921_v29 = vpop.f32.mrf.mxu2 }
 0x394   : > { %9147 = vmatpush.bf16.msra.mxu0 %v13750_v21  ;;  %v8922_v30 = vadd.f32 %v8921_v29, %v8909_v27  ;;  %v8897_v32 = vpop.f32.mrf.mxu0 }
 0x395   : > { %v8934_v31 = vpop.f32.mrf.mxu3 }
 0x396   : > { %v8935_v33 = vadd.f32 %v8934_v31, %v8922_v30  ;;  %v8910_v35 = vpop.f32.mrf.mxu1 }
 0x398   : > { %9148 = vmatpush.bf16.msra.mxu0 %v13749_v22 }
 0x39b   : > { %v8923_v37 = vpop.f32.mrf.mxu2 }
 0x39c   : > { %9149 = vmatpush.bf16.msra.mxu0 %v13748_v25 }
 0x39d   : > { %v8936_v38 = vpop.f32.mrf.mxu3 }
 0x3a0   : > { %9150 = vmatpush.bf16.msra.mxu0 %v13747_v28 }
 0x3a4   : > { %9151 = vmatpush.bf16.msra.mxu0 %v13746_v34 }
 0x3a8   : > { %9152 = vmatpush.bf16.msra.mxu0 %v13745_v36 }
 0x3ac   : > { %9153 = vmatpush.bf16.msra.mxu0 %v13744_v39  ;;  %v8947_v41 = vpop.f32.mrf.mxu0 }
 0x3ad   : > { %v8948_v42 = vadd.f32 %v8947_v41, %v8935_v33 }
 0x3ae   : > { %v8960_v43 = vpop.f32.mrf.mxu1 }
 0x3af   : > { %9154 = vmatmul.bf16.vlgmr.msra.gmra.mxu0 %v2152_v40  ;;  %v8961_v44 = vadd.f32 %v8960_v43, %v8948_v42 }
 0x3b3   : > { %v8973_v45 = vpop.f32.mrf.mxu2 }
 0x3b4   : > { %v8974_v46 = vadd.f32 %v8973_v45, %v8961_v44  ;;  %v8949_v48 = vpop.f32.mrf.mxu0 }
 0x3b5   : > { %v8986_v47 = vpop.f32.mrf.mxu3 }
 0x3b6   : > { %v8987_v49 = vadd.f32 %v8986_v47, %v8974_v46  ;;  %v8962_v50 = vpop.f32.mrf.mxu1 }
 0x3bb   : > { %v8975_v51 = vpop.f32.mrf.mxu2 }
 0x3bd   : > { %v8988_v52 = vpop.f32.mrf.mxu3 }
 0x3cc   : > { %v8999_v53 = vpop.f32.mrf.mxu0 }
 0x3cd   : > { %v9000_v54 = vadd.f32 %v8999_v53, %v8987_v49 }
 0x3ce   : > { %v9012_v55 = vpop.f32.mrf.mxu1 }
 0x3cf   : > { %v9013_v56 = vadd.f32 %v9012_v55, %v9000_v54 }
 0x3d3   : > { %v9025_v57 = vpop.f32.mrf.mxu2 }
 0x3d4   : > { %v9026_v58 = vadd.f32 %v9025_v57, %v9013_v56  ;;  %v9001_v60 = vpop.f32.mrf.mxu0 }
 0x3d5   : > { %v9038_v59 = vpop.f32.mrf.mxu3 }
 0x3d6   : > { %v9039_v61 = vadd.f32 %v9038_v59, %v9026_v58  ;;  %v9014_v62 = vpop.f32.mrf.mxu1 }
 0x3db   : > { %v9027_v63 = vpop.f32.mrf.mxu2 }
 0x3dd   : > { %v9040_v0 = vpop.f32.mrf.mxu3 }
 0x3ec   : > { %v9051_v1 = vpop.f32.mrf.mxu0 }
 0x3ed   : > { %v9052_v12 = vadd.f32 %v9051_v1, %v9039_v61 }
 0x3ee   : > { %v9064_v2 = vpop.f32.mrf.mxu1 }
 0x3ef   : > { %v9065_v16 = vadd.f32 %v9064_v2, %v9052_v12 }
 0x3f3   : > { %v9077_v3 = vpop.f32.mrf.mxu2 }
 0x3f4   : > { %v9053_v5 = vpop.f32.mrf.mxu0  ;;  %v9078_v17 = vadd.f32 %v9077_v3, %v9065_v16 }
 0x3f5   : > { %v9090_v4 = vpop.f32.mrf.mxu3 }
 0x3f6   : > { %v9066_v6 = vpop.f32.mrf.mxu1  ;;  %v9091_v20 = vadd.f32 %v9090_v4, %v9078_v17 }
 0x3fb   : > { %v9079_v7 = vpop.f32.mrf.mxu2 }
 0x3fd   : > { %v9092_v8 = vpop.f32.mrf.mxu3 }
 0x40c   : > { %v9103_v9 = vpop.f32.mrf.mxu0 }
 0x40d   : > { %v9104_v21 = vadd.f32 %v9103_v9, %v9091_v20 }
 0x40e   : > { %v9116_v10 = vpop.f32.mrf.mxu1 }
 0x40f   : > { %v9117_v22 = vadd.f32 %v9116_v10, %v9104_v21 }
 0x413   : > { %v9129_v11 = vpop.f32.mrf.mxu2 }
 0x414   : > { %v9105_v14 = vpop.f32.mrf.mxu0  ;;  %v9130_v23 = vadd.f32 %v9129_v11, %v9117_v22 }
 0x415   : > { %v9142_v13 = vpop.f32.mrf.mxu3 }
 0x416   : > { %v9118_v15 = vpop.f32.mrf.mxu1  ;;  %v9143_v24 = vadd.f32 %v9142_v13, %v9130_v23 }
 0x41b   : > { %v9131_v18 = vpop.f32.mrf.mxu2 }
 0x41d   : > { %v9144_v19 = vpop.f32.mrf.mxu3 }
 0x42c   : > { %v9155_v25 = vpop.f32.mrf.mxu0 }
 0x42d   : > { %v9156_v26 = vadd.f32 %v9155_v25, %v9143_v24 }
 0x42f   : > { %9160 = vst.msk [vmem:[%s182_s4] sm:$0x3] %vm9159_vm0, %v9156_v26 }
 0x434   : > { %v9157_v27 = vpop.f32.mrf.mxu0 }
 0x435 PF: > { %s13_s12 = sadd.s32 1, %s13768_s12  }
 0x436   : > { %p10_p4 = scmp.ge.s32.totalorder %s13_s12, 4  }
 0x438   :  { %12 = sbr.rel (!%p10_p4) target bundleno = 1 (0x1), region = 65 }

</bundles_post_ra>
